<compile_context>
chip_gen: v7x
topology: tpu7x:2x2x1
jax: 0.10.0
libtpu: 0.0.40
codegen_flags: <defaults>
</compile_context>

<pallas_src>
from functools import partial

import jax
import jax.numpy as jnp
from jax.experimental import pallas as pl
from jax.experimental.pallas import tpu as pltpu

NEG_SLOPE = 0.01            # nn.LeakyReLU default
BN_EPS = 1e-5               # nn.BatchNorm2d default
LANES = 128
VMEM_LIMIT = 32 * 1024 * 1024
FUSED_VMEM_BUDGET = 20 * 1024 * 1024   # gate for the single-tile fused path


def _round_up(x, m):
    return (x + m - 1) // m * m


# ----------------------------------------------------------------------------
# Kernels
# ----------------------------------------------------------------------------
def fused_conv_bn_lrelu_kernel(p_ref, w_ref, gamma_ref, beta_ref, o_ref, *, inv_m):
    """Whole layer in one shot over a VMEM-resident y.

    p_ref:     (M, K)    bf16 im2col patches (whole layer)
    w_ref:     (K, OCp)  bf16 weights (OC zero-padded to 128 lanes)
    gamma/beta:(1, OCp)  f32 BN affine params
    o_ref:     (M, OCp)  bf16/f32 lane-dense output
    inv_m:     python float, 1 / (true number of rows)
    """
    y = jnp.dot(p_ref[...], w_ref[...], preferred_element_type=jnp.float32)
    ssum = jnp.sum(y, axis=0, keepdims=True)
    ssq = jnp.sum(y * y, axis=0, keepdims=True)
    mean = ssum * inv_m
    var = jnp.maximum(ssq * inv_m - mean * mean, 0.0)   # biased var, clamp cancellation
    inv = jax.lax.rsqrt(var + BN_EPS)
    scale = gamma_ref[...] * inv
    shift = beta_ref[...] - mean * scale
    z = y * scale + shift
    o_ref[...] = jnp.where(z >= 0.0, z, NEG_SLOPE * z).astype(o_ref.dtype)


def conv_stats_kernel(p_ref, w_ref, y_ref, stat_ref):
    """Fallback phase A: y = patches @ W once, accumulate per-channel sum/sumsq.

    y_ref:    (TM, OCp) f32 tile of pre-BN activations (written out, no recompute)
    stat_ref: (2, OCp)  f32 resident accumulator; row 0 = sum, row 1 = sumsq
    """
    @pl.when(pl.program_id(0) == 0)
    def _init():
        stat_ref[...] = jnp.zeros_like(stat_ref)

    y = jnp.dot(p_ref[...], w_ref[...], preferred_element_type=jnp.float32)
    y_ref[...] = y
    stat_ref[0:1, :] += jnp.sum(y, axis=0, keepdims=True)
    stat_ref[1:2, :] += jnp.sum(y * y, axis=0, keepdims=True)


def bn_lrelu_kernel(y_ref, stat_ref, gamma_ref, beta_ref, o_ref, *, inv_m):
    """Fallback phase B: pure VPU — fold BN scale/shift in-kernel + LeakyReLU."""
    mean = stat_ref[0:1, :] * inv_m
    var = jnp.maximum(stat_ref[1:2, :] * inv_m - mean * mean, 0.0)
    inv = jax.lax.rsqrt(var + BN_EPS)
    scale = gamma_ref[...] * inv
    shift = beta_ref[...] - mean * scale
    z = y_ref[...] * scale + shift
    o_ref[...] = jnp.where(z >= 0.0, z, NEG_SLOPE * z).astype(o_ref.dtype)


# ----------------------------------------------------------------------------
# Per-layer wrapper
# ----------------------------------------------------------------------------
def conv_bn_lrelu(x_nhwc, layer, *, k=3, s=2, out_dtype=jnp.bfloat16,
                  force_tiled=False, tm_max=1024):
    """One Conv2d(k=3, s=2, pad=0, no-bias) + BN(train) + LeakyReLU layer.

    x_nhwc is bf16 NHWC (channels may be lane-padded; the weights' zero K-rows
    absorb the padding).  Returns a bf16/f32 NHWC tensor with OCp=128 channels.
    """
    w_mat, gamma, beta, _oc = layer
    N, H, W, C = x_nhwc.shape
    OH = (H - k) // s + 1
    OW = (W - k) // s + 1

    # im2col in plain JAX on the already-bf16 activation (static strided slices);
    # (kh, kw, c) ordering matches the weight reshape in init_layer.
    cols = []
    for di in range(k):
        for dj in range(k):
            cols.append(x_nhwc[:, di:di + s * (OH - 1) + 1:s,
                               dj:dj + s * (OW - 1) + 1:s, :])
    patches = jnp.stack(cols, axis=3).reshape(N * OH * OW, k * k * C)

    M, K = patches.shape
    OCp = w_mat.shape[1]
    assert K == w_mat.shape[0], (K, w_mat.shape)
    inv_m = 1.0 / float(M)
    out_bytes = jnp.dtype(out_dtype).itemsize

    # Conservative VMEM estimate for the single-tile fused path:
    # double-buffered bf16 operands + y + z f32 intermediates + output.
    fused_est = 4 * (M * K + K * OCp) + M * OCp * (4 + 4 + 2 * out_bytes)

    if (not force_tiled) and fused_est <= FUSED_VMEM_BUDGET:
        # ---- fused single-call path (stats + normalize over VMEM-resident y) ----
        out = pl.pallas_call(
            partial(fused_conv_bn_lrelu_kernel, inv_m=inv_m),
            out_shape=jax.ShapeDtypeStruct((M, OCp), out_dtype),
            grid=(1,),
            in_specs=[pl.BlockSpec((M, K), lambda i: (0, 0)),
                      pl.BlockSpec((K, OCp), lambda i: (0, 0)),
                      pl.BlockSpec((1, OCp), lambda i: (0, 0)),
                      pl.BlockSpec((1, OCp), lambda i: (0, 0))],
            out_specs=pl.BlockSpec((M, OCp), lambda i: (0, 0)),
            compiler_params=pltpu.CompilerParams(
                dimension_semantics=("arbitrary",),
                vmem_limit_bytes=VMEM_LIMIT),
        )(patches, w_mat, gamma, beta)
        return out.reshape(N, OH, OW, OCp)

    # ---- fallback: tiled over M, two passes, no matmul recompute ----
    n_tiles = pl.cdiv(M, tm_max)
    tm = _round_up(pl.cdiv(M, n_tiles), 16)       # bf16 sublane packing
    Mp = n_tiles * tm
    if Mp != M:
        patches = jnp.pad(patches, ((0, Mp - M), (0, 0)))   # zero rows: no stat shift
    grid = (n_tiles,)

    # phase A: y once + batch statistics (reduction over the M grid axis)
    y, stats = pl.pallas_call(
        conv_stats_kernel,
        out_shape=(jax.ShapeDtypeStruct((Mp, OCp), jnp.float32),
                   jax.ShapeDtypeStruct((2, OCp), jnp.float32)),
        grid=grid,
        in_specs=[pl.BlockSpec((tm, K), lambda i: (i, 0)),
                  pl.BlockSpec((K, OCp), lambda i: (0, 0))],
        out_specs=(pl.BlockSpec((tm, OCp), lambda i: (i, 0)),
                   pl.BlockSpec((2, OCp), lambda i: (0, 0))),
        compiler_params=pltpu.CompilerParams(
            dimension_semantics=("arbitrary",),
            vmem_limit_bytes=VMEM_LIMIT),
    )(patches, w_mat)

    # phase B: pure VPU affine + LeakyReLU; scale/shift computed in-kernel.
    out = pl.pallas_call(
        partial(bn_lrelu_kernel, inv_m=inv_m),
        out_shape=jax.ShapeDtypeStruct((Mp, OCp), out_dtype),
        grid=grid,
        in_specs=[pl.BlockSpec((tm, OCp), lambda i: (i, 0)),
                  pl.BlockSpec((2, OCp), lambda i: (0, 0)),
                  pl.BlockSpec((1, OCp), lambda i: (0, 0)),
                  pl.BlockSpec((1, OCp), lambda i: (0, 0))],
        out_specs=pl.BlockSpec((tm, OCp), lambda i: (i, 0)),
        compiler_params=pltpu.CompilerParams(
            dimension_semantics=("parallel",),
            vmem_limit_bytes=VMEM_LIMIT),
    )(y, stats, gamma, beta)

    return out[:M].reshape(N, OH, OW, OCp)


# ----------------------------------------------------------------------------
# Parameters
# ----------------------------------------------------------------------------
def init_layer(key, ic, oc, *, ic_pad=None, k=3):
    """Conv2d-like init (uniform +/- 1/sqrt(fan_in)) + BN params.

    Weights are laid out as an im2col matmul matrix (k*k*ic_pad, OCp):
    input-channel padding (carried lane padding of the previous layer's
    activation) is absorbed with zero rows; OC is zero-padded to 128 lanes.
    Conv bias is omitted: it cancels under training-mode BatchNorm.
    """
    ic_pad = ic if ic_pad is None else ic_pad
    fan_in = ic * k * k
    bound = 1.0 / float(fan_in) ** 0.5
    w = jax.random.uniform(key, (oc, ic, k, k), jnp.float32, -bound, bound)
    # PyTorch (OC, IC, KH, KW) -> (KH, KW, IC, OC), pad IC, -> (KH*KW*ICp, OC);
    # matches the (kh, kw, c) ordering of the im2col patches.
    w = jnp.transpose(w, (2, 3, 1, 0))
    w = jnp.pad(w, ((0, 0), (0, 0), (0, ic_pad - ic), (0, 0)))
    w_mat = w.reshape(k * k * ic_pad, oc)
    ocp = _round_up(oc, LANES)
    w_mat = jnp.pad(w_mat, ((0, 0), (0, ocp - oc))).astype(jnp.bfloat16)
    gamma = jnp.ones((1, ocp), jnp.float32)      # BN weight default
    beta = jnp.zeros((1, ocp), jnp.float32)      # BN bias default
    return (w_mat, gamma, beta, oc)


def make_params(in_channels, seed=0):
    chans = [in_channels, 32, 32, 64, 64]
    keys = jax.random.split(jax.random.PRNGKey(seed), 4)
    layers = []
    for i in range(4):
        # layers 2..4 consume the previous layer's lane-padded (128ch) activation
        ic_pad = chans[i] if i == 0 else _round_up(chans[i], LANES)
        layers.append(init_layer(keys[i], chans[i], chans[i + 1], ic_pad=ic_pad))
    return layers


# ----------------------------------------------------------------------------
# Forward pass (matches CnnEncoder.forward; BatchNorm in training mode)
# ----------------------------------------------------------------------------
def cnn_encoder_forward(params, obs_nchw, next_obs_nchw=None, *,
                        force_tiled=False, tm_max=1024):
    if next_obs_nchw is not None:
        x = jnp.concatenate([obs_nchw, next_obs_nchw], axis=1)
    else:
        x = obs_nchw
    # NCHW -> NHWC, bf16 before im2col (halves the patch intermediate).
    x = jnp.transpose(x, (0, 2, 3, 1)).astype(jnp.bfloat16)
    n_layers = len(params)
    for li, layer in enumerate(params):
        last = li == n_layers - 1
        x = conv_bn_lrelu(x, layer,
                          out_dtype=jnp.float32 if last else jnp.bfloat16,
                          force_tiled=force_tiled, tm_max=tm_max)
    # Drop the carried lane padding once, at the very end.
    x = x[..., :params[-1][3]]
    N = x.shape[0]
    # Flatten exactly like torch .view(N, -1) on an NCHW tensor.
    return jnp.transpose(x, (0, 3, 1, 2)).reshape(N, -1)


if __name__ == "__main__":
    # 4 stride-2 valid 3x3 convs: spatial 33 -> 16 -> 7 -> 3 -> 1.
    # batch=4 makes layer 1's M = 4*16*16 = 1024 (a healthy single fused tile).
    batch, in_channels, spatial = 4, 4, 33
    params = make_params(in_channels, seed=0)
    obs = jax.random.normal(jax.random.PRNGKey(0),
                            (batch, in_channels, spatial, spatial),
                            dtype=jnp.float32)

    # Default path: one fused pallas_call per layer.
    fwd = jax.jit(lambda o: cnn_encoder_forward(params, o))
    latent = jax.block_until_ready(fwd(obs))     # (4, 64)
    assert latent.shape == (batch, 64), latent.shape
    assert bool(jnp.all(jnp.isfinite(latent)))

    # Also exercise the large-M tiled fallback (multi-step stats reduction +
    # pure-VPU affine pass) and check it agrees with the fused path.
    fwd_tiled = jax.jit(lambda o: cnn_encoder_forward(params, o,
                                                      force_tiled=True, tm_max=256))
    latent_tiled = jax.block_until_ready(fwd_tiled(obs))
    assert latent_tiled.shape == (batch, 64), latent_tiled.shape
    assert bool(jnp.all(jnp.isfinite(latent_tiled)))
    assert bool(jnp.allclose(latent, latent_tiled, atol=0.1, rtol=0.1))

    print("KERNEL_OK")
</pallas_src>

<mosaic_0001>
module attributes {stable_mosaic.version = 11 : i64} {
  func.func @fused_conv_bn_lrelu_kernel(%arg0: i32, %arg1: memref<1024x36xbf16, #tpu.memory_space<vmem>>, %arg2: memref<36x128xbf16, #tpu.memory_space<vmem>>, %arg3: memref<1x128xf32, #tpu.memory_space<vmem>>, %arg4: memref<1x128xf32, #tpu.memory_space<vmem>>, %arg5: memref<1024x128xbf16, #tpu.memory_space<vmem>>) attributes {dimension_semantics = [#tpu.dimension_semantics<arbitrary>], iteration_bounds = array<i64: 1>, scalar_prefetch = 0 : i64, scratch_operands = 0 : i64, tpu.core_type = #tpu.core_type<tc>, window_params = [{pipeline_mode = #tpu.pipeline_mode<synchronous>, transform_indices = @transform_0, window_bounds = array<i64: 1024, 36>}, {pipeline_mode = #tpu.pipeline_mode<synchronous>, transform_indices = @transform_1, window_bounds = array<i64: 36, 128>}, {pipeline_mode = #tpu.pipeline_mode<synchronous>, transform_indices = @transform_2, window_bounds = array<i64: 1, 128>}, {pipeline_mode = #tpu.pipeline_mode<synchronous>, transform_indices = @transform_3, window_bounds = array<i64: 1, 128>}, {pipeline_mode = #tpu.pipeline_mode<synchronous>, transform_indices = @transform_4, window_bounds = array<i64: 1024, 128>}]} {
    %c0 = arith.constant 0 : index
    %c0_0 = arith.constant 0 : index
    %0 = vector.load %arg1[%c0, %c0_0] : memref<1024x36xbf16, #tpu.memory_space<vmem>>, vector<1024x36xbf16>
    %c0_1 = arith.constant 0 : index
    %c0_2 = arith.constant 0 : index
    %1 = vector.load %arg2[%c0_1, %c0_2] : memref<36x128xbf16, #tpu.memory_space<vmem>>, vector<36x128xbf16>
    %cst = arith.constant dense<0.000000e+00> : vector<1024x128xf32>
    %2 = tpu.matmul %0, %1, %cst {dimension_numbers = #tpu.dot_dimension_numbers<[1], [0], [0], [1], [0, 0, 1, 1], [], []>} : vector<1024x36xbf16>, vector<36x128xbf16>, vector<1024x128xf32> -> vector<1024x128xf32>
    %cst_3 = arith.constant dense<0.000000e+00> : vector<128xf32>
    %3 = vector.multi_reduction <add>, %2, %cst_3 [0] : vector<1024x128xf32> to vector<128xf32>
    %4 = vector.shape_cast %3 : vector<128xf32> to vector<1x128xf32>
    %5 = arith.mulf %2, %2 : vector<1024x128xf32>
    %cst_4 = arith.constant dense<0.000000e+00> : vector<128xf32>
    %6 = vector.multi_reduction <add>, %5, %cst_4 [0] : vector<1024x128xf32> to vector<128xf32>
    %7 = vector.shape_cast %6 : vector<128xf32> to vector<1x128xf32>
    %cst_5 = arith.constant 9.765625E-4 : f32
    %8 = vector.broadcast %cst_5 : f32 to vector<1x128xf32>
    %9 = arith.mulf %4, %8 : vector<1x128xf32>
    %cst_6 = arith.constant 9.765625E-4 : f32
    %10 = vector.broadcast %cst_6 : f32 to vector<1x128xf32>
    %11 = arith.mulf %7, %10 : vector<1x128xf32>
    %12 = arith.mulf %9, %9 : vector<1x128xf32>
    %13 = arith.subf %11, %12 : vector<1x128xf32>
    %cst_7 = arith.constant 0.000000e+00 : f32
    %14 = vector.broadcast %cst_7 : f32 to vector<1x128xf32>
    %15 = arith.maximumf %13, %14 : vector<1x128xf32>
    %cst_8 = arith.constant 9.99999974E-6 : f32
    %16 = vector.broadcast %cst_8 : f32 to vector<1x128xf32>
    %17 = arith.addf %15, %16 : vector<1x128xf32>
    %18 = math.rsqrt %17 : vector<1x128xf32>
    %c0_9 = arith.constant 0 : index
    %c0_10 = arith.constant 0 : index
    %19 = vector.load %arg3[%c0_9, %c0_10] : memref<1x128xf32, #tpu.memory_space<vmem>>, vector<1x128xf32>
    %20 = arith.mulf %19, %18 : vector<1x128xf32>
    %c0_11 = arith.constant 0 : index
    %c0_12 = arith.constant 0 : index
    %21 = vector.load %arg4[%c0_11, %c0_12] : memref<1x128xf32, #tpu.memory_space<vmem>>, vector<1x128xf32>
    %22 = arith.mulf %9, %20 : vector<1x128xf32>
    %23 = arith.subf %21, %22 : vector<1x128xf32>
    %24 = vector.broadcast %20 : vector<1x128xf32> to vector<1024x128xf32>
    %25 = arith.mulf %2, %24 : vector<1024x128xf32>
    %26 = vector.broadcast %23 : vector<1x128xf32> to vector<1024x128xf32>
    %27 = arith.addf %25, %26 : vector<1024x128xf32>
    %cst_13 = arith.constant 0.000000e+00 : f32
    %28 = vector.broadcast %cst_13 : f32 to vector<1024x128xf32>
    %29 = arith.cmpf oge, %27, %28 : vector<1024x128xf32>
    %cst_14 = arith.constant 0.00999999977 : f32
    %30 = vector.broadcast %cst_14 : f32 to vector<1024x128xf32>
    %31 = arith.mulf %30, %27 : vector<1024x128xf32>
    %32 = arith.select %29, %27, %31 : vector<1024x128xi1>, vector<1024x128xf32>
    %33 = arith.truncf %32 : vector<1024x128xf32> to vector<1024x128xbf16>
    %c0_15 = arith.constant 0 : index
    %c0_16 = arith.constant 0 : index
    %34 = vector.load %arg5[%c0_15, %c0_16] : memref<1024x128xbf16, #tpu.memory_space<vmem>>, vector<1024x128xbf16>
    tpu.vector_store %arg5[%c0_15, %c0_16], %33 {strides = array<i32>} : memref<1024x128xbf16, #tpu.memory_space<vmem>>, vector<1024x128xbf16>,
    return
  }
  func.func @transform_0(%arg0: i32) -> (i32, i32) {
    %c0_i32 = arith.constant 0 : i32
    %c0_i32_0 = arith.constant 0 : i32
    %c0_i32_1 = arith.constant 0 : i32
    return %c0_i32, %c0_i32_0 : i32, i32
  }
  func.func @transform_1(%arg0: i32) -> (i32, i32) {
    %c0_i32 = arith.constant 0 : i32
    %c0_i32_0 = arith.constant 0 : i32
    %c0_i32_1 = arith.constant 0 : i32
    return %c0_i32, %c0_i32_0 : i32, i32
  }
  func.func @transform_2(%arg0: i32) -> (i32, i32) {
    %c0_i32 = arith.constant 0 : i32
    %c0_i32_0 = arith.constant 0 : i32
    %c0_i32_1 = arith.constant 0 : i32
    return %c0_i32, %c0_i32_0 : i32, i32
  }
  func.func @transform_3(%arg0: i32) -> (i32, i32) {
    %c0_i32 = arith.constant 0 : i32
    %c0_i32_0 = arith.constant 0 : i32
    %c0_i32_1 = arith.constant 0 : i32
    return %c0_i32, %c0_i32_0 : i32, i32
  }
  func.func @transform_4(%arg0: i32) -> (i32, i32) {
    %c0_i32 = arith.constant 0 : i32
    %c0_i32_0 = arith.constant 0 : i32
    %c0_i32_1 = arith.constant 0 : i32
    return %c0_i32, %c0_i32_0 : i32, i32
  }
}

module attributes {stable_mosaic.version = 11 : i64} {
  func.func @fused_conv_bn_lrelu_kernel(%arg0: i32, %arg1: memref<196x1152xbf16, #tpu.memory_space<vmem>>, %arg2: memref<1152x128xbf16, #tpu.memory_space<vmem>>, %arg3: memref<1x128xf32, #tpu.memory_space<vmem>>, %arg4: memref<1x128xf32, #tpu.memory_space<vmem>>, %arg5: memref<196x128xbf16, #tpu.memory_space<vmem>>) attributes {dimension_semantics = [#tpu.dimension_semantics<arbitrary>], iteration_bounds = array<i64: 1>, scalar_prefetch = 0 : i64, scratch_operands = 0 : i64, tpu.core_type = #tpu.core_type<tc>, window_params = [{pipeline_mode = #tpu.pipeline_mode<synchronous>, transform_indices = @transform_0, window_bounds = array<i64: 196, 1152>}, {pipeline_mode = #tpu.pipeline_mode<synchronous>, transform_indices = @transform_1, window_bounds = array<i64: 1152, 128>}, {pipeline_mode = #tpu.pipeline_mode<synchronous>, transform_indices = @transform_2, window_bounds = array<i64: 1, 128>}, {pipeline_mode = #tpu.pipeline_mode<synchronous>, transform_indices = @transform_3, window_bounds = array<i64: 1, 128>}, {pipeline_mode = #tpu.pipeline_mode<synchronous>, transform_indices = @transform_4, window_bounds = array<i64: 196, 128>}]} {
    %c0 = arith.constant 0 : index
    %c0_0 = arith.constant 0 : index
    %0 = vector.load %arg1[%c0, %c0_0] : memref<196x1152xbf16, #tpu.memory_space<vmem>>, vector<196x1152xbf16>
    %c0_1 = arith.constant 0 : index
    %c0_2 = arith.constant 0 : index
    %1 = vector.load %arg2[%c0_1, %c0_2] : memref<1152x128xbf16, #tpu.memory_space<vmem>>, vector<1152x128xbf16>
    %cst = arith.constant dense<0.000000e+00> : vector<196x128xf32>
    %2 = tpu.matmul %0, %1, %cst {dimension_numbers = #tpu.dot_dimension_numbers<[1], [0], [0], [1], [0, 0, 1, 1], [], []>} : vector<196x1152xbf16>, vector<1152x128xbf16>, vector<196x128xf32> -> vector<196x128xf32>
    %cst_3 = arith.constant dense<0.000000e+00> : vector<128xf32>
    %3 = vector.multi_reduction <add>, %2, %cst_3 [0] : vector<196x128xf32> to vector<128xf32>
    %4 = vector.shape_cast %3 : vector<128xf32> to vector<1x128xf32>
    %5 = arith.mulf %2, %2 : vector<196x128xf32>
    %cst_4 = arith.constant dense<0.000000e+00> : vector<128xf32>
    %6 = vector.multi_reduction <add>, %5, %cst_4 [0] : vector<196x128xf32> to vector<128xf32>
    %7 = vector.shape_cast %6 : vector<128xf32> to vector<1x128xf32>
    %cst_5 = arith.constant 0.00510204071 : f32
    %8 = vector.broadcast %cst_5 : f32 to vector<1x128xf32>
    %9 = arith.mulf %4, %8 : vector<1x128xf32>
    %cst_6 = arith.constant 0.00510204071 : f32
    %10 = vector.broadcast %cst_6 : f32 to vector<1x128xf32>
    %11 = arith.mulf %7, %10 : vector<1x128xf32>
    %12 = arith.mulf %9, %9 : vector<1x128xf32>
    %13 = arith.subf %11, %12 : vector<1x128xf32>
    %cst_7 = arith.constant 0.000000e+00 : f32
    %14 = vector.broadcast %cst_7 : f32 to vector<1x128xf32>
    %15 = arith.maximumf %13, %14 : vector<1x128xf32>
    %cst_8 = arith.constant 9.99999974E-6 : f32
    %16 = vector.broadcast %cst_8 : f32 to vector<1x128xf32>
    %17 = arith.addf %15, %16 : vector<1x128xf32>
    %18 = math.rsqrt %17 : vector<1x128xf32>
    %c0_9 = arith.constant 0 : index
    %c0_10 = arith.constant 0 : index
    %19 = vector.load %arg3[%c0_9, %c0_10] : memref<1x128xf32, #tpu.memory_space<vmem>>, vector<1x128xf32>
    %20 = arith.mulf %19, %18 : vector<1x128xf32>
    %c0_11 = arith.constant 0 : index
    %c0_12 = arith.constant 0 : index
    %21 = vector.load %arg4[%c0_11, %c0_12] : memref<1x128xf32, #tpu.memory_space<vmem>>, vector<1x128xf32>
    %22 = arith.mulf %9, %20 : vector<1x128xf32>
    %23 = arith.subf %21, %22 : vector<1x128xf32>
    %24 = vector.broadcast %20 : vector<1x128xf32> to vector<196x128xf32>
    %25 = arith.mulf %2, %24 : vector<196x128xf32>
    %26 = vector.broadcast %23 : vector<1x128xf32> to vector<196x128xf32>
    %27 = arith.addf %25, %26 : vector<196x128xf32>
    %cst_13 = arith.constant 0.000000e+00 : f32
    %28 = vector.broadcast %cst_13 : f32 to vector<196x128xf32>
    %29 = arith.cmpf oge, %27, %28 : vector<196x128xf32>
    %cst_14 = arith.constant 0.00999999977 : f32
    %30 = vector.broadcast %cst_14 : f32 to vector<196x128xf32>
    %31 = arith.mulf %30, %27 : vector<196x128xf32>
    %32 = arith.select %29, %27, %31 : vector<196x128xi1>, vector<196x128xf32>
    %33 = arith.truncf %32 : vector<196x128xf32> to vector<196x128xbf16>
    %c0_15 = arith.constant 0 : index
    %c0_16 = arith.constant 0 : index
    %34 = vector.load %arg5[%c0_15, %c0_16] : memref<196x128xbf16, #tpu.memory_space<vmem>>, vector<196x128xbf16>
    tpu.vector_store %arg5[%c0_15, %c0_16], %33 {strides = array<i32>} : memref<196x128xbf16, #tpu.memory_space<vmem>>, vector<196x128xbf16>,
    return
  }
  func.func @transform_0(%arg0: i32) -> (i32, i32) {
    %c0_i32 = arith.constant 0 : i32
    %c0_i32_0 = arith.constant 0 : i32
    %c0_i32_1 = arith.constant 0 : i32
    return %c0_i32, %c0_i32_0 : i32, i32
  }
  func.func @transform_1(%arg0: i32) -> (i32, i32) {
    %c0_i32 = arith.constant 0 : i32
    %c0_i32_0 = arith.constant 0 : i32
    %c0_i32_1 = arith.constant 0 : i32
    return %c0_i32, %c0_i32_0 : i32, i32
  }
  func.func @transform_2(%arg0: i32) -> (i32, i32) {
    %c0_i32 = arith.constant 0 : i32
    %c0_i32_0 = arith.constant 0 : i32
    %c0_i32_1 = arith.constant 0 : i32
    return %c0_i32, %c0_i32_0 : i32, i32
  }
  func.func @transform_3(%arg0: i32) -> (i32, i32) {
    %c0_i32 = arith.constant 0 : i32
    %c0_i32_0 = arith.constant 0 : i32
    %c0_i32_1 = arith.constant 0 : i32
    return %c0_i32, %c0_i32_0 : i32, i32
  }
  func.func @transform_4(%arg0: i32) -> (i32, i32) {
    %c0_i32 = arith.constant 0 : i32
    %c0_i32_0 = arith.constant 0 : i32
    %c0_i32_1 = arith.constant 0 : i32
    return %c0_i32, %c0_i32_0 : i32, i32
  }
}

module attributes {stable_mosaic.version = 11 : i64} {
  func.func @fused_conv_bn_lrelu_kernel(%arg0: i32, %arg1: memref<36x1152xbf16, #tpu.memory_space<vmem>>, %arg2: memref<1152x128xbf16, #tpu.memory_space<vmem>>, %arg3: memref<1x128xf32, #tpu.memory_space<vmem>>, %arg4: memref<1x128xf32, #tpu.memory_space<vmem>>, %arg5: memref<36x128xbf16, #tpu.memory_space<vmem>>) attributes {dimension_semantics = [#tpu.dimension_semantics<arbitrary>], iteration_bounds = array<i64: 1>, scalar_prefetch = 0 : i64, scratch_operands = 0 : i64, tpu.core_type = #tpu.core_type<tc>, window_params = [{pipeline_mode = #tpu.pipeline_mode<synchronous>, transform_indices = @transform_0, window_bounds = array<i64: 36, 1152>}, {pipeline_mode = #tpu.pipeline_mode<synchronous>, transform_indices = @transform_1, window_bounds = array<i64: 1152, 128>}, {pipeline_mode = #tpu.pipeline_mode<synchronous>, transform_indices = @transform_2, window_bounds = array<i64: 1, 128>}, {pipeline_mode = #tpu.pipeline_mode<synchronous>, transform_indices = @transform_3, window_bounds = array<i64: 1, 128>}, {pipeline_mode = #tpu.pipeline_mode<synchronous>, transform_indices = @transform_4, window_bounds = array<i64: 36, 128>}]} {
    %c0 = arith.constant 0 : index
    %c0_0 = arith.constant 0 : index
    %0 = vector.load %arg1[%c0, %c0_0] : memref<36x1152xbf16, #tpu.memory_space<vmem>>, vector<36x1152xbf16>
    %c0_1 = arith.constant 0 : index
    %c0_2 = arith.constant 0 : index
    %1 = vector.load %arg2[%c0_1, %c0_2] : memref<1152x128xbf16, #tpu.memory_space<vmem>>, vector<1152x128xbf16>
    %cst = arith.constant dense<0.000000e+00> : vector<36x128xf32>
    %2 = tpu.matmul %0, %1, %cst {dimension_numbers = #tpu.dot_dimension_numbers<[1], [0], [0], [1], [0, 0, 1, 1], [], []>} : vector<36x1152xbf16>, vector<1152x128xbf16>, vector<36x128xf32> -> vector<36x128xf32>
    %cst_3 = arith.constant dense<0.000000e+00> : vector<128xf32>
    %3 = vector.multi_reduction <add>, %2, %cst_3 [0] : vector<36x128xf32> to vector<128xf32>
    %4 = vector.shape_cast %3 : vector<128xf32> to vector<1x128xf32>
    %5 = arith.mulf %2, %2 : vector<36x128xf32>
    %cst_4 = arith.constant dense<0.000000e+00> : vector<128xf32>
    %6 = vector.multi_reduction <add>, %5, %cst_4 [0] : vector<36x128xf32> to vector<128xf32>
    %7 = vector.shape_cast %6 : vector<128xf32> to vector<1x128xf32>
    %cst_5 = arith.constant 0.027777778 : f32
    %8 = vector.broadcast %cst_5 : f32 to vector<1x128xf32>
    %9 = arith.mulf %4, %8 : vector<1x128xf32>
    %cst_6 = arith.constant 0.027777778 : f32
    %10 = vector.broadcast %cst_6 : f32 to vector<1x128xf32>
    %11 = arith.mulf %7, %10 : vector<1x128xf32>
    %12 = arith.mulf %9, %9 : vector<1x128xf32>
    %13 = arith.subf %11, %12 : vector<1x128xf32>
    %cst_7 = arith.constant 0.000000e+00 : f32
    %14 = vector.broadcast %cst_7 : f32 to vector<1x128xf32>
    %15 = arith.maximumf %13, %14 : vector<1x128xf32>
    %cst_8 = arith.constant 9.99999974E-6 : f32
    %16 = vector.broadcast %cst_8 : f32 to vector<1x128xf32>
    %17 = arith.addf %15, %16 : vector<1x128xf32>
    %18 = math.rsqrt %17 : vector<1x128xf32>
    %c0_9 = arith.constant 0 : index
    %c0_10 = arith.constant 0 : index
    %19 = vector.load %arg3[%c0_9, %c0_10] : memref<1x128xf32, #tpu.memory_space<vmem>>, vector<1x128xf32>
    %20 = arith.mulf %19, %18 : vector<1x128xf32>
    %c0_11 = arith.constant 0 : index
    %c0_12 = arith.constant 0 : index
    %21 = vector.load %arg4[%c0_11, %c0_12] : memref<1x128xf32, #tpu.memory_space<vmem>>, vector<1x128xf32>
    %22 = arith.mulf %9, %20 : vector<1x128xf32>
    %23 = arith.subf %21, %22 : vector<1x128xf32>
    %24 = vector.broadcast %20 : vector<1x128xf32> to vector<36x128xf32>
    %25 = arith.mulf %2, %24 : vector<36x128xf32>
    %26 = vector.broadcast %23 : vector<1x128xf32> to vector<36x128xf32>
    %27 = arith.addf %25, %26 : vector<36x128xf32>
    %cst_13 = arith.constant 0.000000e+00 : f32
    %28 = vector.broadcast %cst_13 : f32 to vector<36x128xf32>
    %29 = arith.cmpf oge, %27, %28 : vector<36x128xf32>
    %cst_14 = arith.constant 0.00999999977 : f32
    %30 = vector.broadcast %cst_14 : f32 to vector<36x128xf32>
    %31 = arith.mulf %30, %27 : vector<36x128xf32>
    %32 = arith.select %29, %27, %31 : vector<36x128xi1>, vector<36x128xf32>
    %33 = arith.truncf %32 : vector<36x128xf32> to vector<36x128xbf16>
    %c0_15 = arith.constant 0 : index
    %c0_16 = arith.constant 0 : index
    %34 = vector.load %arg5[%c0_15, %c0_16] : memref<36x128xbf16, #tpu.memory_space<vmem>>, vector<36x128xbf16>
    tpu.vector_store %arg5[%c0_15, %c0_16], %33 {strides = array<i32>} : memref<36x128xbf16, #tpu.memory_space<vmem>>, vector<36x128xbf16>,
    return
  }
  func.func @transform_0(%arg0: i32) -> (i32, i32) {
    %c0_i32 = arith.constant 0 : i32
    %c0_i32_0 = arith.constant 0 : i32
    %c0_i32_1 = arith.constant 0 : i32
    return %c0_i32, %c0_i32_0 : i32, i32
  }
  func.func @transform_1(%arg0: i32) -> (i32, i32) {
    %c0_i32 = arith.constant 0 : i32
    %c0_i32_0 = arith.constant 0 : i32
    %c0_i32_1 = arith.constant 0 : i32
    return %c0_i32, %c0_i32_0 : i32, i32
  }
  func.func @transform_2(%arg0: i32) -> (i32, i32) {
    %c0_i32 = arith.constant 0 : i32
    %c0_i32_0 = arith.constant 0 : i32
    %c0_i32_1 = arith.constant 0 : i32
    return %c0_i32, %c0_i32_0 : i32, i32
  }
  func.func @transform_3(%arg0: i32) -> (i32, i32) {
    %c0_i32 = arith.constant 0 : i32
    %c0_i32_0 = arith.constant 0 : i32
    %c0_i32_1 = arith.constant 0 : i32
    return %c0_i32, %c0_i32_0 : i32, i32
  }
  func.func @transform_4(%arg0: i32) -> (i32, i32) {
    %c0_i32 = arith.constant 0 : i32
    %c0_i32_0 = arith.constant 0 : i32
    %c0_i32_1 = arith.constant 0 : i32
    return %c0_i32, %c0_i32_0 : i32, i32
  }
}

module attributes {stable_mosaic.version = 11 : i64} {
  func.func @fused_conv_bn_lrelu_kernel(%arg0: i32, %arg1: memref<4x1152xbf16, #tpu.memory_space<vmem>>, %arg2: memref<1152x128xbf16, #tpu.memory_space<vmem>>, %arg3: memref<1x128xf32, #tpu.memory_space<vmem>>, %arg4: memref<1x128xf32, #tpu.memory_space<vmem>>, %arg5: memref<4x128xf32, #tpu.memory_space<vmem>>) attributes {dimension_semantics = [#tpu.dimension_semantics<arbitrary>], iteration_bounds = array<i64: 1>, scalar_prefetch = 0 : i64, scratch_operands = 0 : i64, tpu.core_type = #tpu.core_type<tc>, window_params = [{pipeline_mode = #tpu.pipeline_mode<synchronous>, transform_indices = @transform_0, window_bounds = array<i64: 4, 1152>}, {pipeline_mode = #tpu.pipeline_mode<synchronous>, transform_indices = @transform_1, window_bounds = array<i64: 1152, 128>}, {pipeline_mode = #tpu.pipeline_mode<synchronous>, transform_indices = @transform_2, window_bounds = array<i64: 1, 128>}, {pipeline_mode = #tpu.pipeline_mode<synchronous>, transform_indices = @transform_3, window_bounds = array<i64: 1, 128>}, {pipeline_mode = #tpu.pipeline_mode<synchronous>, transform_indices = @transform_4, window_bounds = array<i64: 4, 128>}]} {
    %c0 = arith.constant 0 : index
    %c0_0 = arith.constant 0 : index
    %0 = vector.load %arg1[%c0, %c0_0] : memref<4x1152xbf16, #tpu.memory_space<vmem>>, vector<4x1152xbf16>
    %c0_1 = arith.constant 0 : index
    %c0_2 = arith.constant 0 : index
    %1 = vector.load %arg2[%c0_1, %c0_2] : memref<1152x128xbf16, #tpu.memory_space<vmem>>, vector<1152x128xbf16>
    %cst = arith.constant dense<0.000000e+00> : vector<4x128xf32>
    %2 = tpu.matmul %0, %1, %cst {dimension_numbers = #tpu.dot_dimension_numbers<[1], [0], [0], [1], [0, 0, 1, 1], [], []>} : vector<4x1152xbf16>, vector<1152x128xbf16>, vector<4x128xf32> -> vector<4x128xf32>
    %cst_3 = arith.constant dense<0.000000e+00> : vector<128xf32>
    %3 = vector.multi_reduction <add>, %2, %cst_3 [0] : vector<4x128xf32> to vector<128xf32>
    %4 = vector.shape_cast %3 : vector<128xf32> to vector<1x128xf32>
    %5 = arith.mulf %2, %2 : vector<4x128xf32>
    %cst_4 = arith.constant dense<0.000000e+00> : vector<128xf32>
    %6 = vector.multi_reduction <add>, %5, %cst_4 [0] : vector<4x128xf32> to vector<128xf32>
    %7 = vector.shape_cast %6 : vector<128xf32> to vector<1x128xf32>
    %cst_5 = arith.constant 2.500000e-01 : f32
    %8 = vector.broadcast %cst_5 : f32 to vector<1x128xf32>
    %9 = arith.mulf %4, %8 : vector<1x128xf32>
    %cst_6 = arith.constant 2.500000e-01 : f32
    %10 = vector.broadcast %cst_6 : f32 to vector<1x128xf32>
    %11 = arith.mulf %7, %10 : vector<1x128xf32>
    %12 = arith.mulf %9, %9 : vector<1x128xf32>
    %13 = arith.subf %11, %12 : vector<1x128xf32>
    %cst_7 = arith.constant 0.000000e+00 : f32
    %14 = vector.broadcast %cst_7 : f32 to vector<1x128xf32>
    %15 = arith.maximumf %13, %14 : vector<1x128xf32>
    %cst_8 = arith.constant 9.99999974E-6 : f32
    %16 = vector.broadcast %cst_8 : f32 to vector<1x128xf32>
    %17 = arith.addf %15, %16 : vector<1x128xf32>
    %18 = math.rsqrt %17 : vector<1x128xf32>
    %c0_9 = arith.constant 0 : index
    %c0_10 = arith.constant 0 : index
    %19 = vector.load %arg3[%c0_9, %c0_10] : memref<1x128xf32, #tpu.memory_space<vmem>>, vector<1x128xf32>
    %20 = arith.mulf %19, %18 : vector<1x128xf32>
    %c0_11 = arith.constant 0 : index
    %c0_12 = arith.constant 0 : index
    %21 = vector.load %arg4[%c0_11, %c0_12] : memref<1x128xf32, #tpu.memory_space<vmem>>, vector<1x128xf32>
    %22 = arith.mulf %9, %20 : vector<1x128xf32>
    %23 = arith.subf %21, %22 : vector<1x128xf32>
    %24 = vector.broadcast %20 : vector<1x128xf32> to vector<4x128xf32>
    %25 = arith.mulf %2, %24 : vector<4x128xf32>
    %26 = vector.broadcast %23 : vector<1x128xf32> to vector<4x128xf32>
    %27 = arith.addf %25, %26 : vector<4x128xf32>
    %cst_13 = arith.constant 0.000000e+00 : f32
    %28 = vector.broadcast %cst_13 : f32 to vector<4x128xf32>
    %29 = arith.cmpf oge, %27, %28 : vector<4x128xf32>
    %cst_14 = arith.constant 0.00999999977 : f32
    %30 = vector.broadcast %cst_14 : f32 to vector<4x128xf32>
    %31 = arith.mulf %30, %27 : vector<4x128xf32>
    %32 = arith.select %29, %27, %31 : vector<4x128xi1>, vector<4x128xf32>
    %c0_15 = arith.constant 0 : index
    %c0_16 = arith.constant 0 : index
    %33 = vector.load %arg5[%c0_15, %c0_16] : memref<4x128xf32, #tpu.memory_space<vmem>>, vector<4x128xf32>
    tpu.vector_store %arg5[%c0_15, %c0_16], %32 {strides = array<i32>} : memref<4x128xf32, #tpu.memory_space<vmem>>, vector<4x128xf32>,
    return
  }
  func.func @transform_0(%arg0: i32) -> (i32, i32) {
    %c0_i32 = arith.constant 0 : i32
    %c0_i32_0 = arith.constant 0 : i32
    %c0_i32_1 = arith.constant 0 : i32
    return %c0_i32, %c0_i32_0 : i32, i32
  }
  func.func @transform_1(%arg0: i32) -> (i32, i32) {
    %c0_i32 = arith.constant 0 : i32
    %c0_i32_0 = arith.constant 0 : i32
    %c0_i32_1 = arith.constant 0 : i32
    return %c0_i32, %c0_i32_0 : i32, i32
  }
  func.func @transform_2(%arg0: i32) -> (i32, i32) {
    %c0_i32 = arith.constant 0 : i32
    %c0_i32_0 = arith.constant 0 : i32
    %c0_i32_1 = arith.constant 0 : i32
    return %c0_i32, %c0_i32_0 : i32, i32
  }
  func.func @transform_3(%arg0: i32) -> (i32, i32) {
    %c0_i32 = arith.constant 0 : i32
    %c0_i32_0 = arith.constant 0 : i32
    %c0_i32_1 = arith.constant 0 : i32
    return %c0_i32, %c0_i32_0 : i32, i32
  }
  func.func @transform_4(%arg0: i32) -> (i32, i32) {
    %c0_i32 = arith.constant 0 : i32
    %c0_i32_0 = arith.constant 0 : i32
    %c0_i32_1 = arith.constant 0 : i32
    return %c0_i32, %c0_i32_0 : i32, i32
  }
}

</mosaic_0001>

<bundles_post_ra>
// kernel: _lambda_.4
= control target key start
LH: loop header
LB: loop body
LE: loop exit
PB: predicated region body
PF: predicated region fallthrough
CT: control target
= control target key end

     0   :  { %vm486_vm0 = vcmask 293888   ;;  %vm679_vm1 = vcmask 1041408   ;;  %s7513_s1 = inlined_call_operand.vmem [shape: bf16[36,128], index: 1, kind: input, shape index: {}]   ;;  %s7514_s0 = inlined_call_operand.vmem [shape: bf16[1024,36], index: 0, kind: input, shape index: {}]   ;;  %s7515_s2 = inlined_call_operand.vmem [shape: f32[1,128], index: 2, kind: input, shape index: {}]   ;;  %s7516_s3 = inlined_call_operand.vmem [shape: f32[1,128], index: 3, kind: input, shape index: {}]   ;;  %s7517_s4 = inlined_call_operand.vmem [shape: bf16[1024,128], index: 4, kind: output, shape index: {}]  }
   0x1   :  { %v3909_v0 = vld [vmem:[%s7513_s1] sm:$0xff]   ;;  %v3910_v1 = vld [vmem:[%s7513_s1 + $0x8] sm:$0xff]   ;;  %v3911_v2 = vld [vmem:[%s7513_s1 + $0x10] ss:$0 sps:$4 sm:$0x33]  }
   0x2   :  { %3767 = vmatprep.subr.bf16.mxu0 %v3909_v0  ;;  %v3912_v3 = vld [vmem:[%s7514_s0] sm:$0xff]   ;;  %3901 = vmatprep.subr.bf16.mxu1 %v3909_v0  ;;  %v681_v4 = vsel %vm679_vm1, %v3911_v2, 0  ;;  %v3913_v5 = vld [vmem:[%s7514_s0 + $0x8] sm:$0xff]   ;;  %v3914_v6 = vld [vmem:[%s7514_s0 + $0x10] sm:$0xff]  }
   0x3   :  { %3768 = vmatpush3.bf16.msra.mxu0 %v3909_v0  ;;  %3904 = vmatpush3.bf16.msra.mxu1 %v3909_v0  ;;  %v3915_v7 = vld [vmem:[%s7514_s0 + $0x18] sm:$0xff]   ;;  %v3916_v8 = vld [vmem:[%s7514_s0 + $0x20] sm:$0xff]   ;;  %v3917_v9 = vld [vmem:[%s7514_s0 + $0x28] sm:$0xff]  }
   0x4   :  { %3769 = vmatprep.subr.bf16.mxu0 %v3910_v1  ;;  %3773 = vmatprep.mubr.msk.bf16.mxu0 %vm486_vm0, %v3912_v3  ;;  %v3918_v10 = vld [vmem:[%s7514_s0 + $0x30] sm:$0xff]   ;;  %v3919_v11 = vld [vmem:[%s7514_s0 + $0x38] sm:$0xff]   ;;  %v3920_v12 = vld [vmem:[%s7514_s0 + $0x40] sm:$0xff]  }
   0x5   :  { %3902 = vmatprep.subr.bf16.mxu1 %v3910_v1  ;;  %v3944_v13 = vld [vmem:[%s7514_s0 + $0x100] sm:$0xff]   ;;  %v3945_v14 = vld [vmem:[%s7514_s0 + $0x108] sm:$0xff]   ;;  %v3946_v15 = vld [vmem:[%s7514_s0 + $0x110] sm:$0xff]  }
   0x6   :  { %3837 = vmatprep.mubr.msk.bf16.mxu1 %vm486_vm0, %v3944_v13  ;;  %v3921_v16 = vld [vmem:[%s7514_s0 + $0x48] sm:$0xff]   ;;  %v3922_v17 = vld [vmem:[%s7514_s0 + $0x50] sm:$0xff]   ;;  %v3947_v18 = vld [vmem:[%s7514_s0 + $0x118] sm:$0xff]  }
   0x7   :  { %3770 = vmatpush3.bf16.msra.mxu0 %v3910_v1  ;;  %3905 = vmatpush3.bf16.msra.mxu1 %v3910_v1  ;;  %v3948_v19 = vld [vmem:[%s7514_s0 + $0x120] sm:$0xff]   ;;  %v3923_v20 = vld [vmem:[%s7514_s0 + $0x58] sm:$0xff]   ;;  %v3949_v22 = vld [vmem:[%s7514_s0 + $0x128] sm:$0xff]  }
   0x8   :  { %3907 = vmatprep.subr.msk.bf16.mxu0 %vm679_vm1, %v3911_v2  ;;  %3908 = vmatprep.subr.msk.bf16.mxu1 %vm679_vm1, %v3911_v2  ;;  %v3924_v21 = vld [vmem:[%s7514_s0 + $0x60] sm:$0xff]   ;;  %v3950_v23 = vld [vmem:[%s7514_s0 + $0x130] sm:$0xff]   ;;  %v3925_v24 = vld [vmem:[%s7514_s0 + $0x68] sm:$0xff]  }
   0x9   :  { %v3951_v25 = vld [vmem:[%s7514_s0 + $0x138] sm:$0xff]   ;;  %v3926_v26 = vld [vmem:[%s7514_s0 + $0x70] sm:$0xff]   ;;  %v3952_v27 = vld [vmem:[%s7514_s0 + $0x140] sm:$0xff]  }
   0xa   :  { %v3927_v28 = vld [vmem:[%s7514_s0 + $0x78] sm:$0xff]   ;;  %v3953_v29 = vld [vmem:[%s7514_s0 + $0x148] sm:$0xff]   ;;  %v3928_v30 = vld [vmem:[%s7514_s0 + $0x80] sm:$0xff]  }
   0xb   :  { %3772 = vmatpush3.bf16.msra.mxu0 %v681_v4  ;;  %3906 = vmatpush3.bf16.msra.mxu1 %v681_v4  ;;  %v3954_v31 = vld [vmem:[%s7514_s0 + $0x150] sm:$0xff]   ;;  %v3929_v32 = vld [vmem:[%s7514_s0 + $0x88] sm:$0xff]   ;;  %v3955_v33 = vld [vmem:[%s7514_s0 + $0x158] sm:$0xff]  }
   0xc   :  { %v3930_v34 = vld [vmem:[%s7514_s0 + $0x90] sm:$0xff]   ;;  %v3956_v35 = vld [vmem:[%s7514_s0 + $0x160] sm:$0xff]   ;;  %v3931_v36 = vld [vmem:[%s7514_s0 + $0x98] sm:$0xff]  }
   0xd   :  { %v3957_v37 = vld [vmem:[%s7514_s0 + $0x168] sm:$0xff]   ;;  %v3932_v38 = vld [vmem:[%s7514_s0 + $0xa0] sm:$0xff]   ;;  %v3958_v39 = vld [vmem:[%s7514_s0 + $0x170] sm:$0xff]  }
   0xe   :  { %3774 = vmatmul.mubr.msk.bf16.vlgmr.msra.gmra.mrb[0].mxu0 %vm486_vm0, %v3913_v5  ;;  %3838 = vmatmul.mubr.msk.bf16.vlgmr.msra.gmra.mrb[0].mxu1 %vm486_vm0, %v3945_v14  ;;  %v3933_v40 = vld [vmem:[%s7514_s0 + $0xa8] sm:$0xff]   ;;  %v3959_v41 = vld [vmem:[%s7514_s0 + $0x178] sm:$0xff]   ;;  %v3934_v42 = vld [vmem:[%s7514_s0 + $0xb0] sm:$0xff]  }
   0xf   :  { %3777 = vmatprep.mubr.msk.bf16.mxu0 %vm486_vm0, %v3914_v6  ;;  %3841 = vmatprep.mubr.msk.bf16.mxu1 %vm486_vm0, %v3946_v15  ;;  %v3960_v43 = vld [vmem:[%s7514_s0 + $0x180] sm:$0xff]   ;;  %v3935_v44 = vld [vmem:[%s7514_s0 + $0xb8] sm:$0xff]   ;;  %v3961_v45 = vld [vmem:[%s7514_s0 + $0x188] sm:$0xff]  }
  0x10   :  { %v3936_v46 = vld [vmem:[%s7514_s0 + $0xc0] sm:$0xff]   ;;  %v3962_v47 = vld [vmem:[%s7514_s0 + $0x190] sm:$0xff]   ;;  %v3937_v48 = vld [vmem:[%s7514_s0 + $0xc8] sm:$0xff]  }
  0x11   :  { %v3963_v49 = vld [vmem:[%s7514_s0 + $0x198] sm:$0xff]   ;;  %v3938_v50 = vld [vmem:[%s7514_s0 + $0xd0] sm:$0xff]   ;;  %v3964_v51 = vld [vmem:[%s7514_s0 + $0x1a0] sm:$0xff]  }
  0x12   :  { %v3939_v52 = vld [vmem:[%s7514_s0 + $0xd8] sm:$0xff]   ;;  %v3965_v53 = vld [vmem:[%s7514_s0 + $0x1a8] sm:$0xff]   ;;  %v3940_v54 = vld [vmem:[%s7514_s0 + $0xe0] sm:$0xff]  }
  0x13   :  { %v3966_v55 = vld [vmem:[%s7514_s0 + $0x1b0] sm:$0xff]   ;;  %v3941_v56 = vld [vmem:[%s7514_s0 + $0xe8] sm:$0xff]   ;;  %v3967_v57 = vld [vmem:[%s7514_s0 + $0x1b8] sm:$0xff]  }
  0x14   :  { %v3942_v58 = vld [vmem:[%s7514_s0 + $0xf0] sm:$0xff]   ;;  %v3968_v59 = vld [vmem:[%s7514_s0 + $0x1c0] sm:$0xff]   ;;  %v3943_v60 = vld [vmem:[%s7514_s0 + $0xf8] sm:$0xff]  }
  0x15   :  { %v3969_v61 = vld [vmem:[%s7514_s0 + $0x1c8] sm:$0xff]   ;;  %v3970_v62 = vld [vmem:[%s7514_s0 + $0x1d0] sm:$0xff]   ;;  %v3971_v63 = vld [vmem:[%s7514_s0 + $0x1d8] sm:$0xff]  }
  0x16   :  { %3778 = vmatmul.mubr.msk.bf16.gmra.mrb[4].mxu0 %vm486_vm0, %v3915_v7  ;;  %3842 = vmatmul.mubr.msk.bf16.gmra.mrb[4].mxu1 %vm486_vm0, %v3947_v18  ;;  %v3972_v0 = vld [vmem:[%s7514_s0 + $0x1e0] sm:$0xff]   ;;  %v3973_v1 = vld [vmem:[%s7514_s0 + $0x1e8] sm:$0xff]   ;;  %v3974_v2 = vld [vmem:[%s7514_s0 + $0x1f0] sm:$0xff]  }
  0x17   :  { %3781 = vmatprep.mubr.msk.bf16.mxu0 %vm486_vm0, %v3916_v8  ;;  %3845 = vmatprep.mubr.msk.bf16.mxu1 %vm486_vm0, %v3948_v19  ;;  %v3975_v3 = vld [vmem:[%s7514_s0 + $0x1f8] sm:$0xff]  }
  0x1e   :  { %3782 = vmatmul.mubr.msk.bf16.gmra.mrb[8].mxu0 %vm486_vm0, %v3917_v9  ;;  %3846 = vmatmul.mubr.msk.bf16.gmra.mrb[8].mxu1 %vm486_vm0, %v3949_v22 }
  0x1f   :  { %3785 = vmatprep.mubr.msk.bf16.mxu0 %vm486_vm0, %v3918_v10  ;;  %3849 = vmatprep.mubr.msk.bf16.mxu1 %vm486_vm0, %v3950_v23 }
  0x26   :  { %3786 = vmatmul.mubr.msk.bf16.gmra.mrb[12].mxu0 %vm486_vm0, %v3919_v11  ;;  %3850 = vmatmul.mubr.msk.bf16.gmra.mrb[12].mxu1 %vm486_vm0, %v3951_v25 }
  0x27   :  { %3789 = vmatprep.mubr.msk.bf16.mxu0 %vm486_vm0, %v3920_v12  ;;  %3853 = vmatprep.mubr.msk.bf16.mxu1 %vm486_vm0, %v3952_v27 }
  0x2e   :  { %3790 = vmatmul.mubr.msk.bf16.gmra.mrb[16].mxu0 %vm486_vm0, %v3921_v16  ;;  %3854 = vmatmul.mubr.msk.bf16.gmra.mrb[16].mxu1 %vm486_vm0, %v3953_v29 }
  0x2f   :  { %3793 = vmatprep.mubr.msk.bf16.mxu0 %vm486_vm0, %v3922_v17  ;;  %3857 = vmatprep.mubr.msk.bf16.mxu1 %vm486_vm0, %v3954_v31 }
  0x36   :  { %3794 = vmatmul.mubr.msk.bf16.gmra.mrb[20].mxu0 %vm486_vm0, %v3923_v20  ;;  %3858 = vmatmul.mubr.msk.bf16.gmra.mrb[20].mxu1 %vm486_vm0, %v3955_v33 }
  0x37   :  { %3797 = vmatprep.mubr.msk.bf16.mxu0 %vm486_vm0, %v3924_v21  ;;  %3861 = vmatprep.mubr.msk.bf16.mxu1 %vm486_vm0, %v3956_v35 }
  0x3e   :  { %3798 = vmatmul.mubr.msk.bf16.gmra.mrb[24].mxu0 %vm486_vm0, %v3925_v24  ;;  %3862 = vmatmul.mubr.msk.bf16.gmra.mrb[24].mxu1 %vm486_vm0, %v3957_v37 }
  0x3f   :  { %3801 = vmatprep.mubr.msk.bf16.mxu0 %vm486_vm0, %v3926_v26  ;;  %3865 = vmatprep.mubr.msk.bf16.mxu1 %vm486_vm0, %v3958_v39 }
  0x46   :  { %3802 = vmatmul.mubr.msk.bf16.gmra.mrb[28].mxu0 %vm486_vm0, %v3927_v28  ;;  %3866 = vmatmul.mubr.msk.bf16.gmra.mrb[28].mxu1 %vm486_vm0, %v3959_v41 }
  0x47   :  { %3805 = vmatprep.mubr.msk.bf16.mxu0 %vm486_vm0, %v3928_v30  ;;  %3869 = vmatprep.mubr.msk.bf16.mxu1 %vm486_vm0, %v3960_v43 }
  0x4e   :  { %3806 = vmatmul.mubr.msk.bf16.gmra.mrb[32].mxu0 %vm486_vm0, %v3929_v32  ;;  %3870 = vmatmul.mubr.msk.bf16.gmra.mrb[32].mxu1 %vm486_vm0, %v3961_v45 }
  0x4f   :  { %3809 = vmatprep.mubr.msk.bf16.mxu0 %vm486_vm0, %v3930_v34  ;;  %3873 = vmatprep.mubr.msk.bf16.mxu1 %vm486_vm0, %v3962_v47 }
  0x56   :  { %3810 = vmatmul.mubr.msk.bf16.gmra.mrb[36].mxu0 %vm486_vm0, %v3931_v36  ;;  %3874 = vmatmul.mubr.msk.bf16.gmra.mrb[36].mxu1 %vm486_vm0, %v3963_v49 }
  0x57   :  { %3813 = vmatprep.mubr.msk.bf16.mxu0 %vm486_vm0, %v3932_v38  ;;  %3877 = vmatprep.mubr.msk.bf16.mxu1 %vm486_vm0, %v3964_v51 }
  0x5e   :  { %3814 = vmatmul.mubr.msk.bf16.gmra.mrb[40].mxu0 %vm486_vm0, %v3933_v40  ;;  %3878 = vmatmul.mubr.msk.bf16.gmra.mrb[40].mxu1 %vm486_vm0, %v3965_v53 }
  0x5f   :  { %3817 = vmatprep.mubr.msk.bf16.mxu0 %vm486_vm0, %v3934_v42  ;;  %3881 = vmatprep.mubr.msk.bf16.mxu1 %vm486_vm0, %v3966_v55 }
  0x66   :  { %3818 = vmatmul.mubr.msk.bf16.gmra.mrb[44].mxu0 %vm486_vm0, %v3935_v44  ;;  %3882 = vmatmul.mubr.msk.bf16.gmra.mrb[44].mxu1 %vm486_vm0, %v3967_v57 }
  0x67   :  { %3821 = vmatprep.mubr.msk.bf16.mxu0 %vm486_vm0, %v3936_v46  ;;  %3885 = vmatprep.mubr.msk.bf16.mxu1 %vm486_vm0, %v3968_v59 }
  0x6e   :  { %3822 = vmatmul.mubr.msk.bf16.gmra.mrb[48].mxu0 %vm486_vm0, %v3937_v48  ;;  %3886 = vmatmul.mubr.msk.bf16.gmra.mrb[48].mxu1 %vm486_vm0, %v3969_v61 }
  0x6f   :  { %3825 = vmatprep.mubr.msk.bf16.mxu0 %vm486_vm0, %v3938_v50  ;;  %3889 = vmatprep.mubr.msk.bf16.mxu1 %vm486_vm0, %v3970_v62 }
  0x76   :  { %3826 = vmatmul.mubr.msk.bf16.gmra.mrb[52].mxu0 %vm486_vm0, %v3939_v52  ;;  %3890 = vmatmul.mubr.msk.bf16.gmra.mrb[52].mxu1 %vm486_vm0, %v3971_v63 }
  0x77   :  { %3829 = vmatprep.mubr.msk.bf16.mxu0 %vm486_vm0, %v3940_v54  ;;  %3893 = vmatprep.mubr.msk.bf16.mxu1 %vm486_vm0, %v3972_v0 }
  0x7e   :  { %3830 = vmatmul.mubr.msk.bf16.gmra.mrb[56].mxu0 %vm486_vm0, %v3941_v56  ;;  %3894 = vmatmul.mubr.msk.bf16.gmra.mrb[56].mxu1 %vm486_vm0, %v3973_v1 }
  0x7f   :  { %3833 = vmatprep.mubr.msk.bf16.mxu0 %vm486_vm0, %v3942_v58  ;;  %3897 = vmatprep.mubr.msk.bf16.mxu1 %vm486_vm0, %v3974_v2 }
  0x86   :  { %3834 = vmatmul.mubr.msk.bf16.gmra.mrb[60].mxu0 %vm486_vm0, %v3943_v60  ;;  %3898 = vmatmul.mubr.msk.bf16.gmra.mrb[60].mxu1 %vm486_vm0, %v3975_v3 }
  0xe1   :  { %v4268_v4 = vpop.f32.mrb[0].mxu0  ;;  %v4330_v50 = vpop.f32.mrb[0].mxu1 }
  0xe2   :  { %7722 = vst [vmem:[#allocation2_spill] sm:$0xff] %v4268_v4  ;;  %v4270_v5 = vpop.f32.mrb[1].mxu0  ;;  %v1363_v11 = vmul.f32 %v4268_v4, %v4268_v4  ;;  %7735 = vst [vmem:[#allocation15_spill] sm:$0xff] %v4330_v50  ;;  %v4334_v52 = vpop.f32.mrb[1].mxu1 }
  0xe3   :  { %7723 = vst [vmem:[#allocation3_spill] sm:$0xff] %v4270_v5  ;;  %v4272_v6 = vpop.f32.mrb[2].mxu0  ;;  %v1361_v8 = vmul.f32 %v4270_v5, %v4270_v5  ;;  %7737 = vst [vmem:[#allocation17_spill] sm:$0xff] %v4334_v52  ;;  %v4341_v57 = vpop.f32.mrb[2].mxu1 }
  0xe4   :  { %7724 = vst [vmem:[#allocation4_spill] sm:$0xff] %v4272_v6  ;;  %v4274_v7 = vpop.f32.mrb[3].mxu0  ;;  %v1364_v14 = vmul.f32 %v4272_v6, %v4272_v6  ;;  %7739 = vst [vmem:[#allocation19_spill] sm:$0xff] %v4341_v57  ;;  %v4345_v59 = vpop.f32.mrb[3].mxu1 }
  0xe5   :  { %7725 = vst [vmem:[#allocation5_spill] sm:$0xff] %v4274_v7  ;;  %v1228_v9 = vadd.f32 %v4274_v7, %v4270_v5  ;;  %v1362_v10 = vmul.f32 %v4274_v7, %v4274_v7  ;;  %7741 = vst [vmem:[#allocation21_spill] sm:$0xff] %v4345_v59 }
  0xe7   :  { %v1229_v12 = vadd.f32 %v4268_v4, %v1228_v9  ;;  %v1489_v13 = vadd.f32 %v1362_v10, %v1361_v8 }
  0xe9   :  { %v1230_v15 = vadd.f32 %v4272_v6, %v1229_v12  ;;  %v1490_v16 = vadd.f32 %v1489_v13, %v1363_v11  ;;  %v4288_v17 = vpop.f32.mrb[4].mxu0  ;;  %v4358_v10 = vpop.f32.mrb[4].mxu1 }
  0xea   :  { %7726 = vst [vmem:[#allocation6_spill] sm:$0xff] %v4288_v17  ;;  %v4290_v18 = vpop.f32.mrb[5].mxu0  ;;  %v1367_v27 = vmul.f32 %v4288_v17, %v4288_v17  ;;  %7743 = vst [vmem:[#allocation23_spill] sm:$0xff] %v4358_v10  ;;  %v4362_v12 = vpop.f32.mrb[5].mxu1 }
  0xeb   :  { %7727 = vst [vmem:[#allocation7_spill] sm:$0xff] %v4290_v18  ;;  %v1491_v19 = vadd.f32 %v1490_v16, %v1364_v14  ;;  %v1231_v20 = vadd.f32 %v1230_v15, %v4290_v18  ;;  %v1365_v21 = vmul.f32 %v4290_v18, %v4290_v18  ;;  %v4295_v22 = vpop.f32.mrb[6].mxu0  ;;  %7745 = vst [vmem:[#allocation25_spill] sm:$0xff] %v4362_v12 }
  0xec   :  { %7728 = vst [vmem:[#allocation8_spill] sm:$0xff] %v4295_v22  ;;  %v4297_v23 = vpop.f32.mrb[7].mxu0  ;;  %v1368_v30 = vmul.f32 %v4295_v22, %v4295_v22 }
  0xed   :  { %7729 = vst [vmem:[#allocation9_spill] sm:$0xff] %v4297_v23  ;;  %v1492_v24 = vadd.f32 %v1491_v19, %v1365_v21  ;;  %v1232_v25 = vadd.f32 %v1231_v20, %v4297_v23  ;;  %v1366_v26 = vmul.f32 %v4297_v23, %v4297_v23  ;;  %v4369_v19 = vpop.f32.mrb[6].mxu1 }
  0xee   :  { %7747 = vst [vmem:[#allocation27_spill] sm:$0xff] %v4369_v19  ;;  %v4373_v21 = vpop.f32.mrb[7].mxu1 }
  0xef   :  { %v1233_v28 = vadd.f32 %v4288_v17, %v1232_v25  ;;  %v1493_v29 = vadd.f32 %v1492_v24, %v1366_v26  ;;  %7749 = vst [vmem:[#allocation29_spill] sm:$0xff] %v4373_v21 }
  0xf1   :  { %v1494_v31 = vadd.f32 %v1493_v29, %v1367_v27  ;;  %v4307_v32 = vpop.f32.mrb[8].mxu0  ;;  %v1234_v33 = vadd.f32 %v4295_v22, %v1233_v28 }
  0xf2   :  { %7730 = vst [vmem:[#allocation10_spill] sm:$0xff] %v4307_v32  ;;  %v4310_v34 = vpop.f32.mrb[9].mxu0  ;;  %v1371_v43 = vmul.f32 %v4307_v32, %v4307_v32 }
  0xf3   :  { %7731 = vst [vmem:[#allocation11_spill] sm:$0xff] %v4310_v34  ;;  %v1235_v35 = vadd.f32 %v1234_v33, %v4310_v34  ;;  %v1369_v36 = vmul.f32 %v4310_v34, %v4310_v34  ;;  %v1495_v37 = vadd.f32 %v1494_v31, %v1368_v30  ;;  %v4315_v38 = vpop.f32.mrb[10].mxu0 }
  0xf4   :  { %7732 = vst [vmem:[#allocation12_spill] sm:$0xff] %v4315_v38  ;;  %v4317_v39 = vpop.f32.mrb[11].mxu0  ;;  %v1372_v46 = vmul.f32 %v4315_v38, %v4315_v38 }
  0xf5   :  { %7733 = vst [vmem:[#allocation13_spill] sm:$0xff] %v4317_v39  ;;  %v1496_v40 = vadd.f32 %v1495_v37, %v1369_v36  ;;  %v1236_v41 = vadd.f32 %v1235_v35, %v4317_v39  ;;  %v1370_v42 = vmul.f32 %v4317_v39, %v4317_v39  ;;  %v4386_v36 = vpop.f32.mrb[8].mxu1 }
  0xf7   :  { %v1237_v44 = vadd.f32 %v4307_v32, %v1236_v41  ;;  %v1497_v45 = vadd.f32 %v1496_v40, %v1370_v42  ;;  %v4390_v40 = vpop.f32.mrb[9].mxu1 }
  0xf8   :  { %7752 = vst [vmem:[#allocation32_spill] sm:$0xff] %v4390_v40 }
  0xf9   :  { %v1498_v47 = vadd.f32 %v1497_v45, %v1371_v43  ;;  %v4327_v48 = vpop.f32.mrb[12].mxu0  ;;  %v1238_v49 = vadd.f32 %v4315_v38, %v1237_v44  ;;  %v4397_v45 = vpop.f32.mrb[10].mxu1 }
  0xfa   :  { %7734 = vst [vmem:[#allocation14_spill] sm:$0xff] %v4327_v48  ;;  %v4332_v51 = vpop.f32.mrb[13].mxu0  ;;  %v1375_v63 = vmul.f32 %v4327_v48, %v4327_v48 }
  0xfb   :  { %7736 = vst [vmem:[#allocation16_spill] sm:$0xff] %v4332_v51  ;;  %v1239_v53 = vadd.f32 %v1238_v49, %v4332_v51  ;;  %v1373_v54 = vmul.f32 %v4332_v51, %v4332_v51  ;;  %v1499_v55 = vadd.f32 %v1498_v47, %v1372_v46  ;;  %v4339_v56 = vpop.f32.mrb[14].mxu0  ;;  %v4401_v47 = vpop.f32.mrb[11].mxu1 }
  0xfc   :  { %7738 = vst [vmem:[#allocation18_spill] sm:$0xff] %v4339_v56  ;;  %v4343_v58 = vpop.f32.mrb[15].mxu0  ;;  %v1376_v2 = vmul.f32 %v4339_v56, %v4339_v56  ;;  %7755 = vst [vmem:[#allocation35_spill] sm:$0xff] %v4401_v47 }
  0xfd   :  { %7740 = vst [vmem:[#allocation20_spill] sm:$0xff] %v4343_v58  ;;  %v1500_v60 = vadd.f32 %v1499_v55, %v1373_v54  ;;  %v1240_v61 = vadd.f32 %v1239_v53, %v4343_v58  ;;  %v1374_v62 = vmul.f32 %v4343_v58, %v4343_v58 }
  0xff   :  { %v1241_v0 = vadd.f32 %v4327_v48, %v1240_v61  ;;  %v1501_v1 = vadd.f32 %v1500_v60, %v1374_v62 }
 0x101   :  { %v1502_v3 = vadd.f32 %v1501_v1, %v1375_v63  ;;  %v4355_v8 = vpop.f32.mrb[16].mxu0  ;;  %v1242_v9 = vadd.f32 %v4339_v56, %v1241_v0 }
 0x102   :  { %7742 = vst [vmem:[#allocation22_spill] sm:$0xff] %v4355_v8  ;;  %v4360_v11 = vpop.f32.mrb[17].mxu0  ;;  %v1379_v27 = vmul.f32 %v4355_v8, %v4355_v8 }
 0x103   :  { %7744 = vst [vmem:[#allocation24_spill] sm:$0xff] %v4360_v11  ;;  %v1243_v13 = vadd.f32 %v1242_v9, %v4360_v11  ;;  %v1377_v14 = vmul.f32 %v4360_v11, %v4360_v11  ;;  %v1503_v15 = vadd.f32 %v1502_v3, %v1376_v2  ;;  %v4367_v16 = vpop.f32.mrb[18].mxu0  ;;  %v4414_v2 = vpop.f32.mrb[12].mxu1 }
 0x104   :  { %7746 = vst [vmem:[#allocation26_spill] sm:$0xff] %v4367_v16  ;;  %v4371_v20 = vpop.f32.mrb[19].mxu0  ;;  %v1380_v30 = vmul.f32 %v4367_v16, %v4367_v16  ;;  %v4418_v9 = vpop.f32.mrb[13].mxu1 }
 0x105   :  { %7748 = vst [vmem:[#allocation28_spill] sm:$0xff] %v4371_v20  ;;  %v1504_v24 = vadd.f32 %v1503_v15, %v1377_v14  ;;  %v1244_v25 = vadd.f32 %v1243_v13, %v4371_v20  ;;  %v1378_v26 = vmul.f32 %v4371_v20, %v4371_v20 }
 0x107   :  { %v1245_v28 = vadd.f32 %v4355_v8, %v1244_v25  ;;  %v1505_v29 = vadd.f32 %v1504_v24, %v1378_v26  ;;  %v4425_v25 = vpop.f32.mrb[14].mxu1 }
 0x109   :  { %v1506_v31 = vadd.f32 %v1505_v29, %v1379_v27  ;;  %v4383_v33 = vpop.f32.mrb[20].mxu0  ;;  %v1246_v35 = vadd.f32 %v4367_v16, %v1245_v28  ;;  %v4429_v27 = vpop.f32.mrb[15].mxu1 }
 0x10a   :  { %7750 = vst [vmem:[#allocation30_spill] sm:$0xff] %v4383_v33  ;;  %v4388_v37 = vpop.f32.mrb[21].mxu0  ;;  %v1383_v55 = vmul.f32 %v4383_v33, %v4383_v33 }
 0x10b   :  { %7751 = vst [vmem:[#allocation31_spill] sm:$0xff] %v4388_v37  ;;  %v1247_v41 = vadd.f32 %v1246_v35, %v4388_v37  ;;  %v1381_v42 = vmul.f32 %v4388_v37, %v4388_v37  ;;  %v1507_v43 = vadd.f32 %v1506_v31, %v1380_v30  ;;  %v4395_v44 = vpop.f32.mrb[22].mxu0 }
 0x10c   :  { %7753 = vst [vmem:[#allocation33_spill] sm:$0xff] %v4395_v44  ;;  %v4399_v46 = vpop.f32.mrb[23].mxu0  ;;  %v1384_v62 = vmul.f32 %v4395_v44, %v4395_v44 }
 0x10d   :  { %7754 = vst [vmem:[#allocation34_spill] sm:$0xff] %v4399_v46  ;;  %v1508_v49 = vadd.f32 %v1507_v43, %v1381_v42  ;;  %v1248_v53 = vadd.f32 %v1247_v41, %v4399_v46  ;;  %v1382_v54 = vmul.f32 %v4399_v46, %v4399_v46 }
 0x10f   :  { %v1249_v60 = vadd.f32 %v4383_v33, %v1248_v53  ;;  %v1509_v61 = vadd.f32 %v1508_v49, %v1382_v54  ;;  %v4442_v54 = vpop.f32.mrb[16].mxu1 }
 0x111   :  { %v1510_v63 = vadd.f32 %v1509_v61, %v1383_v55  ;;  %v4411_v0 = vpop.f32.mrb[24].mxu0  ;;  %v1250_v1 = vadd.f32 %v4395_v44, %v1249_v60  ;;  %v4446_v60 = vpop.f32.mrb[17].mxu1 }
 0x112   :  { %7756 = vst [vmem:[#allocation36_spill] sm:$0xff] %v4411_v0  ;;  %v4416_v3 = vpop.f32.mrb[25].mxu0  ;;  %v1387_v31 = vmul.f32 %v4411_v0, %v4411_v0 }
 0x113   :  { %7757 = vst [vmem:[#allocation37_spill] sm:$0xff] %v4416_v3  ;;  %v1251_v13 = vadd.f32 %v1250_v1, %v4416_v3  ;;  %v1385_v14 = vmul.f32 %v4416_v3, %v4416_v3  ;;  %v1511_v15 = vadd.f32 %v1510_v63, %v1384_v62  ;;  %v4423_v24 = vpop.f32.mrb[26].mxu0 }
 0x114   :  { %7758 = vst [vmem:[#allocation38_spill] sm:$0xff] %v4423_v24  ;;  %v4427_v26 = vpop.f32.mrb[27].mxu0  ;;  %v1388_v42 = vmul.f32 %v4423_v24, %v4423_v24 }
 0x115   :  { %7759 = vst [vmem:[#allocation39_spill] sm:$0xff] %v4427_v26  ;;  %v1512_v28 = vadd.f32 %v1511_v15, %v1385_v14  ;;  %v1252_v29 = vadd.f32 %v1251_v13, %v4427_v26  ;;  %v1386_v30 = vmul.f32 %v4427_v26, %v4427_v26  ;;  %v4453_v13 = vpop.f32.mrb[18].mxu1 }
 0x116   :  { %v4457_v15 = vpop.f32.mrb[19].mxu1 }
 0x117   :  { %v1253_v35 = vadd.f32 %v4411_v0, %v1252_v29  ;;  %v1513_v41 = vadd.f32 %v1512_v28, %v1386_v30 }
 0x119   :  { %v1514_v43 = vadd.f32 %v1513_v41, %v1387_v31  ;;  %v4439_v49 = vpop.f32.mrb[28].mxu0  ;;  %v1254_v53 = vadd.f32 %v4423_v24, %v1253_v35 }
 0x11a   :  { %7760 = vst [vmem:[#allocation40_spill] sm:$0xff] %v4439_v49  ;;  %v4444_v55 = vpop.f32.mrb[29].mxu0  ;;  %v1391_v31 = vmul.f32 %v4439_v49, %v4439_v49 }
 0x11b   :  { %7761 = vst [vmem:[#allocation41_spill] sm:$0xff] %v4444_v55  ;;  %v1255_v61 = vadd.f32 %v1254_v53, %v4444_v55  ;;  %v1389_v62 = vmul.f32 %v4444_v55, %v4444_v55  ;;  %v1515_v63 = vadd.f32 %v1514_v43, %v1388_v42  ;;  %v4451_v1 = vpop.f32.mrb[30].mxu0 }
 0x11c   :  { %7762 = vst [vmem:[#allocation42_spill] sm:$0xff] %v4451_v1  ;;  %v4455_v14 = vpop.f32.mrb[31].mxu0  ;;  %v1392_v42 = vmul.f32 %v4451_v1, %v4451_v1 }
 0x11d   :  { %7763 = vst [vmem:[#allocation43_spill] sm:$0xff] %v4455_v14  ;;  %v1516_v28 = vadd.f32 %v1515_v63, %v1389_v62  ;;  %v1256_v29 = vadd.f32 %v1255_v61, %v4455_v14  ;;  %v1390_v30 = vmul.f32 %v4455_v14, %v4455_v14  ;;  %v4470_v62 = vpop.f32.mrb[20].mxu1 }
 0x11e   :  { %v4474_v63 = vpop.f32.mrb[21].mxu1 }
 0x11f   :  { %v1257_v35 = vadd.f32 %v4439_v49, %v1256_v29  ;;  %v1517_v41 = vadd.f32 %v1516_v28, %v1390_v30  ;;  %v4481_v49 = vpop.f32.mrb[22].mxu1 }
 0x121   :  { %v1518_v43 = vadd.f32 %v1517_v41, %v1391_v31  ;;  %v4467_v53 = vpop.f32.mrb[32].mxu0  ;;  %v1258_v55 = vadd.f32 %v4451_v1, %v1257_v35  ;;  %v4485_v41 = vpop.f32.mrb[23].mxu1 }
 0x122   :  { %7764 = vst [vmem:[#allocation44_spill] sm:$0xff] %v4467_v53  ;;  %v4472_v61 = vpop.f32.mrb[33].mxu0 }
 0x123   :  { %7765 = vst [vmem:[#allocation45_spill] sm:$0xff] %v4472_v61  ;;  %v1259_v14 = vadd.f32 %v1258_v55, %v4472_v61  ;;  %v1393_v29 = vmul.f32 %v4472_v61, %v4472_v61  ;;  %v1519_v28 = vadd.f32 %v1518_v43, %v1392_v42  ;;  %v4479_v30 = vpop.f32.mrb[34].mxu0  ;;  %v1395_v55 = vmul.f32 %v4467_v53, %v4467_v53 }
 0x124   :  { %7766 = vst [vmem:[#allocation46_spill] sm:$0xff] %v4479_v30  ;;  %v4483_v31 = vpop.f32.mrb[35].mxu0  ;;  %v1396_v43 = vmul.f32 %v4479_v30, %v4479_v30 }
 0x125   :  { %7767 = vst [vmem:[#allocation47_spill] sm:$0xff] %v4483_v31  ;;  %v1520_v35 = vadd.f32 %v1519_v28, %v1393_v29  ;;  %v1260_v1 = vadd.f32 %v1259_v14, %v4483_v31  ;;  %v1394_v24 = vmul.f32 %v4483_v31, %v4483_v31  ;;  %v4498_v29 = vpop.f32.mrb[24].mxu1 }
 0x126   :  { %v4502_v28 = vpop.f32.mrb[25].mxu1 }
 0x127   :  { %v1261_v61 = vadd.f32 %v4467_v53, %v1260_v1  ;;  %v1521_v42 = vadd.f32 %v1520_v35, %v1394_v24  ;;  %v4509_v53 = vpop.f32.mrb[26].mxu1 }
 0x129   :  { %v1522_v0 = vadd.f32 %v1521_v42, %v1395_v55  ;;  %v4495_v26 = vpop.f32.mrb[36].mxu0  ;;  %v1262_v3 = vadd.f32 %v4479_v30, %v1261_v61  ;;  %v4513_v42 = vpop.f32.mrb[27].mxu1 }
 0x12a   :  { %7768 = vst [vmem:[#allocation48_spill] sm:$0xff] %v4495_v26  ;;  %v4500_v14 = vpop.f32.mrb[37].mxu0 }
 0x12b   :  { %7769 = vst [vmem:[#allocation49_spill] sm:$0xff] %v4500_v14  ;;  %v1263_v31 = vadd.f32 %v1262_v3, %v4500_v14  ;;  %v1397_v1 = vmul.f32 %v4500_v14, %v4500_v14  ;;  %v1523_v24 = vadd.f32 %v1522_v0, %v1396_v43  ;;  %v4507_v35 = vpop.f32.mrb[38].mxu0  ;;  %v1399_v3 = vmul.f32 %v4495_v26, %v4495_v26 }
 0x12c   :  { %7770 = vst [vmem:[#allocation50_spill] sm:$0xff] %v4507_v35  ;;  %v4511_v55 = vpop.f32.mrb[39].mxu0  ;;  %v1400_v43 = vmul.f32 %v4507_v35, %v4507_v35 }
 0x12d   :  { %7771 = vst [vmem:[#allocation51_spill] sm:$0xff] %v4511_v55  ;;  %v1524_v61 = vadd.f32 %v1523_v24, %v1397_v1  ;;  %v1264_v30 = vadd.f32 %v1263_v31, %v4511_v55  ;;  %v1398_v44 = vmul.f32 %v4511_v55, %v4511_v55  ;;  %v4526_v1 = vpop.f32.mrb[28].mxu1 }
 0x12e   :  { %v4530_v24 = vpop.f32.mrb[29].mxu1 }
 0x12f   :  { %v1265_v14 = vadd.f32 %v4495_v26, %v1264_v30  ;;  %v1525_v0 = vadd.f32 %v1524_v61, %v1398_v44  ;;  %v4537_v26 = vpop.f32.mrb[30].mxu1 }
 0x131   :  { %v1526_v33 = vadd.f32 %v1525_v0, %v1399_v3  ;;  %v4523_v46 = vpop.f32.mrb[40].mxu0  ;;  %v1266_v37 = vadd.f32 %v4507_v35, %v1265_v14  ;;  %v4541_v0 = vpop.f32.mrb[31].mxu1 }
 0x132   :  { %7772 = vst [vmem:[#allocation52_spill] sm:$0xff] %v4523_v46  ;;  %v4528_v31 = vpop.f32.mrb[41].mxu0 }
 0x133   :  { %7773 = vst [vmem:[#allocation53_spill] sm:$0xff] %v4528_v31  ;;  %v1267_v55 = vadd.f32 %v1266_v37, %v4528_v31  ;;  %v1401_v30 = vmul.f32 %v4528_v31, %v4528_v31  ;;  %v1527_v44 = vadd.f32 %v1526_v33, %v1400_v43  ;;  %v4535_v61 = vpop.f32.mrb[42].mxu0  ;;  %v1403_v37 = vmul.f32 %v4523_v46, %v4523_v46 }
 0x134   :  { %7774 = vst [vmem:[#allocation54_spill] sm:$0xff] %v4535_v61  ;;  %v4539_v3 = vpop.f32.mrb[43].mxu0  ;;  %v1404_v43 = vmul.f32 %v4535_v61, %v4535_v61 }
 0x135   :  { %7775 = vst [vmem:[#allocation55_spill] sm:$0xff] %v4539_v3  ;;  %v1528_v14 = vadd.f32 %v1527_v44, %v1401_v30  ;;  %v1268_v35 = vadd.f32 %v1267_v55, %v4539_v3  ;;  %v1402_v16 = vmul.f32 %v4539_v3, %v4539_v3  ;;  %v4554_v30 = vpop.f32.mrb[32].mxu1 }
 0x136   :  { %v4558_v44 = vpop.f32.mrb[33].mxu1 }
 0x137   :  { %v1269_v31 = vadd.f32 %v4523_v46, %v1268_v35  ;;  %v1529_v33 = vadd.f32 %v1528_v14, %v1402_v16  ;;  %v4565_v46 = vpop.f32.mrb[34].mxu1 }
 0x139   :  { %v1530_v8 = vadd.f32 %v1529_v33, %v1403_v37  ;;  %v4551_v20 = vpop.f32.mrb[44].mxu0  ;;  %v1270_v11 = vadd.f32 %v4535_v61, %v1269_v31  ;;  %v4569_v33 = vpop.f32.mrb[35].mxu1 }
 0x13a   :  { %7776 = vst [vmem:[#allocation56_spill] sm:$0xff] %v4551_v20  ;;  %v4556_v55 = vpop.f32.mrb[45].mxu0 }
 0x13b   :  { %7777 = vst [vmem:[#allocation57_spill] sm:$0xff] %v4556_v55  ;;  %v1271_v3 = vadd.f32 %v1270_v11, %v4556_v55  ;;  %v1405_v35 = vmul.f32 %v4556_v55, %v4556_v55  ;;  %v1531_v16 = vadd.f32 %v1530_v8, %v1404_v43  ;;  %v4563_v14 = vpop.f32.mrb[46].mxu0  ;;  %v1407_v11 = vmul.f32 %v4551_v20, %v4551_v20 }
 0x13c   :  { %7778 = vst [vmem:[#allocation58_spill] sm:$0xff] %v4563_v14  ;;  %v4567_v37 = vpop.f32.mrb[47].mxu0  ;;  %v1408_v43 = vmul.f32 %v4563_v14, %v4563_v14 }
 0x13d   :  { %7779 = vst [vmem:[#allocation59_spill] sm:$0xff] %v4567_v37  ;;  %v1532_v31 = vadd.f32 %v1531_v16, %v1405_v35  ;;  %v1272_v61 = vadd.f32 %v1271_v3, %v4567_v37  ;;  %v1406_v56 = vmul.f32 %v4567_v37, %v4567_v37  ;;  %v4582_v35 = vpop.f32.mrb[36].mxu1 }
 0x13e   :  { %v4586_v16 = vpop.f32.mrb[37].mxu1 }
 0x13f   :  { %v1273_v55 = vadd.f32 %v4551_v20, %v1272_v61  ;;  %v1533_v8 = vadd.f32 %v1532_v31, %v1406_v56  ;;  %v4593_v20 = vpop.f32.mrb[38].mxu1 }
 0x141   :  { %v1534_v48 = vadd.f32 %v1533_v8, %v1407_v11  ;;  %v4579_v58 = vpop.f32.mrb[48].mxu0  ;;  %v1274_v51 = vadd.f32 %v4563_v14, %v1273_v55  ;;  %v4597_v8 = vpop.f32.mrb[39].mxu1 }
 0x142   :  { %7780 = vst [vmem:[#allocation60_spill] sm:$0xff] %v4579_v58  ;;  %v4584_v3 = vpop.f32.mrb[49].mxu0 }
 0x143   :  { %7781 = vst [vmem:[#allocation61_spill] sm:$0xff] %v4584_v3  ;;  %v1275_v37 = vadd.f32 %v1274_v51, %v4584_v3  ;;  %v1409_v61 = vmul.f32 %v4584_v3, %v4584_v3  ;;  %v1535_v56 = vadd.f32 %v1534_v48, %v1408_v43  ;;  %v4591_v31 = vpop.f32.mrb[50].mxu0  ;;  %v1411_v51 = vmul.f32 %v4579_v58, %v4579_v58 }
 0x144   :  { %7782 = vst [vmem:[#allocation62_spill] sm:$0xff] %v4591_v31  ;;  %v4595_v11 = vpop.f32.mrb[51].mxu0  ;;  %v1412_v43 = vmul.f32 %v4591_v31, %v4591_v31 }
 0x145   :  { %7783 = vst [vmem:[#allocation63_spill] sm:$0xff] %v4595_v11  ;;  %v1536_v55 = vadd.f32 %v1535_v56, %v1409_v61  ;;  %v1276_v14 = vadd.f32 %v1275_v37, %v4595_v11  ;;  %v1410_v38 = vmul.f32 %v4595_v11, %v4595_v11  ;;  %v4610_v61 = vpop.f32.mrb[40].mxu1 }
 0x146   :  { %v4614_v56 = vpop.f32.mrb[41].mxu1 }
 0x147   :  { %v1277_v3 = vadd.f32 %v4579_v58, %v1276_v14  ;;  %v1537_v48 = vadd.f32 %v1536_v55, %v1410_v38  ;;  %v4621_v58 = vpop.f32.mrb[42].mxu1 }
 0x148   :  { %7787 = vst [vmem:[#allocation67_spill] sm:$0xff] %v4621_v58 }
 0x149   :  { %v1538_v32 = vadd.f32 %v1537_v48, %v1411_v51  ;;  %v4607_v39 = vpop.f32.mrb[52].mxu0  ;;  %v1278_v34 = vadd.f32 %v4591_v31, %v1277_v3  ;;  %v4625_v48 = vpop.f32.mrb[43].mxu1 }
 0x14a   :  { %7784 = vst [vmem:[#allocation64_spill] sm:$0xff] %v4607_v39  ;;  %v4612_v37 = vpop.f32.mrb[53].mxu0 }
 0x14b   :  { %7785 = vst [vmem:[#allocation65_spill] sm:$0xff] %v4612_v37  ;;  %v1279_v11 = vadd.f32 %v1278_v34, %v4612_v37  ;;  %v1413_v14 = vmul.f32 %v4612_v37, %v4612_v37  ;;  %v1539_v38 = vadd.f32 %v1538_v32, %v1412_v43  ;;  %v4619_v55 = vpop.f32.mrb[54].mxu0  ;;  %v1415_v34 = vmul.f32 %v4607_v39, %v4607_v39 }
 0x14c   :  { %7786 = vst [vmem:[#allocation66_spill] sm:$0xff] %v4619_v55  ;;  %v4623_v51 = vpop.f32.mrb[55].mxu0  ;;  %v1416_v43 = vmul.f32 %v4619_v55, %v4619_v55 }
 0x14d   :  { %7788 = vst [vmem:[#allocation68_spill] sm:$0xff] %v4623_v51  ;;  %v1540_v3 = vadd.f32 %v1539_v38, %v1413_v14  ;;  %v1280_v31 = vadd.f32 %v1279_v11, %v4623_v51  ;;  %v1414_v22 = vmul.f32 %v4623_v51, %v4623_v51  ;;  %v4638_v14 = vpop.f32.mrb[44].mxu1 }
 0x14e   :  { %7790 = vst [vmem:[#allocation70_spill] sm:$0xff] %v4638_v14  ;;  %v4642_v38 = vpop.f32.mrb[45].mxu1 }
 0x14f   :  { %v1281_v37 = vadd.f32 %v4607_v39, %v1280_v31  ;;  %v1541_v32 = vadd.f32 %v1540_v3, %v1414_v22  ;;  %7792 = vst [vmem:[#allocation72_spill] sm:$0xff] %v4642_v38  ;;  %v4649_v39 = vpop.f32.mrb[46].mxu1 }
 0x150   :  { %7794 = vst [vmem:[#allocation74_spill] sm:$0xff] %v4649_v39 }
 0x151   :  { %v1542_v17 = vadd.f32 %v1541_v32, %v1415_v34  ;;  %v4635_v23 = vpop.f32.mrb[56].mxu0  ;;  %v1282_v18 = vadd.f32 %v4619_v55, %v1281_v37  ;;  %v4653_v32 = vpop.f32.mrb[47].mxu1 }
 0x152   :  { %7789 = vst [vmem:[#allocation69_spill] sm:$0xff] %v4635_v23  ;;  %v4640_v11 = vpop.f32.mrb[57].mxu0  ;;  %7796 = vst [vmem:[#allocation76_spill] sm:$0xff] %v4653_v32 }
 0x153   :  { %7791 = vst [vmem:[#allocation71_spill] sm:$0xff] %v4640_v11  ;;  %v1283_v51 = vadd.f32 %v1282_v18, %v4640_v11  ;;  %v1417_v31 = vmul.f32 %v4640_v11, %v4640_v11  ;;  %v1543_v22 = vadd.f32 %v1542_v17, %v1416_v43  ;;  %v4647_v3 = vpop.f32.mrb[58].mxu0  ;;  %v1419_v18 = vmul.f32 %v4635_v23, %v4635_v23 }
 0x154   :  { %7793 = vst [vmem:[#allocation73_spill] sm:$0xff] %v4647_v3  ;;  %v4651_v34 = vpop.f32.mrb[59].mxu0  ;;  %v1420_v43 = vmul.f32 %v4647_v3, %v4647_v3 }
 0x155   :  { %7795 = vst [vmem:[#allocation75_spill] sm:$0xff] %v4651_v34  ;;  %v1544_v37 = vadd.f32 %v1543_v22, %v1417_v31  ;;  %v1284_v55 = vadd.f32 %v1283_v51, %v4651_v34  ;;  %v1418_v6 = vmul.f32 %v4651_v34, %v4651_v34  ;;  %v4666_v31 = vpop.f32.mrb[48].mxu1 }
 0x156   :  { %7798 = vst [vmem:[#allocation78_spill] sm:$0xff] %v4666_v31  ;;  %v4670_v22 = vpop.f32.mrb[49].mxu1 }
 0x157   :  { %v1285_v11 = vadd.f32 %v4635_v23, %v1284_v55  ;;  %v1545_v17 = vadd.f32 %v1544_v37, %v1418_v6  ;;  %7800 = vst [vmem:[#allocation80_spill] sm:$0xff] %v4670_v22  ;;  %v4677_v23 = vpop.f32.mrb[50].mxu1 }
 0x158   :  { %7802 = vst [vmem:[#allocation82_spill] sm:$0xff] %v4677_v23 }
 0x159   :  { %v1546_v4 = vadd.f32 %v1545_v17, %v1419_v18  ;;  %v4663_v7 = vpop.f32.mrb[60].mxu0  ;;  %v1286_v5 = vadd.f32 %v4647_v3, %v1285_v11  ;;  %v4681_v17 = vpop.f32.mrb[51].mxu1 }
 0x15a   :  { %7797 = vst [vmem:[#allocation77_spill] sm:$0xff] %v4663_v7  ;;  %v4668_v51 = vpop.f32.mrb[61].mxu0  ;;  %7804 = vst [vmem:[#allocation84_spill] sm:$0xff] %v4681_v17 }
 0x15b   :  { %7799 = vst [vmem:[#allocation79_spill] sm:$0xff] %v4668_v51  ;;  %v1287_v34 = vadd.f32 %v1286_v5, %v4668_v51  ;;  %v1421_v55 = vmul.f32 %v4668_v51, %v4668_v51  ;;  %v1547_v6 = vadd.f32 %v1546_v4, %v1420_v43  ;;  %v4675_v37 = vpop.f32.mrb[62].mxu0  ;;  %v1423_v5 = vmul.f32 %v4663_v7, %v4663_v7 }
 0x15c   :  { %7801 = vst [vmem:[#allocation81_spill] sm:$0xff] %v4675_v37  ;;  %v4679_v18 = vpop.f32.mrb[63].mxu0  ;;  %v1424_v43 = vmul.f32 %v4675_v37, %v4675_v37 }
 0x15d   :  { %7803 = vst [vmem:[#allocation83_spill] sm:$0xff] %v4679_v18  ;;  %v1548_v11 = vadd.f32 %v1547_v6, %v1421_v55  ;;  %v1288_v3 = vadd.f32 %v1287_v34, %v4679_v18  ;;  %v1422_v31 = vmul.f32 %v4679_v18, %v4679_v18  ;;  %v1425_v55 = vmul.f32 %v4334_v52, %v4334_v52  ;;  %v4694_v6 = vpop.f32.mrb[52].mxu1 }
 0x15e   :  { %7805 = vst [vmem:[#allocation85_spill] sm:$0xff] %v4694_v6  ;;  %v4696_v34 = vpop.f32.mrb[53].mxu1 }
 0x15f   :  { %v1289_v51 = vadd.f32 %v4663_v7, %v1288_v3  ;;  %v1549_v4 = vadd.f32 %v1548_v11, %v1422_v31  ;;  %v4699_v39 = vpop.f32.mrb[54].mxu1 }
 0x160   :  { %7806 = vst [vmem:[#allocation86_spill] sm:$0xff] %v4699_v39  ;;  %v4701_v3 = vpop.f32.mrb[55].mxu1 }
 0x161   :  { %v1290_v23 = vadd.f32 %v4675_v37, %v1289_v51  ;;  %v1550_v22 = vadd.f32 %v1549_v4, %v1423_v5  ;;  %v1426_v51 = vmul.f32 %v4345_v59, %v4345_v59  ;;  %v1427_v5 = vmul.f32 %v4330_v50, %v4330_v50 }
 0x163   :  { %v1551_v18 = vadd.f32 %v1550_v22, %v1424_v43  ;;  %v1291_v17 = vadd.f32 %v1290_v23, %v4334_v52  ;;  %v1428_v22 = vmul.f32 %v4341_v57, %v4341_v57 }
 0x165   :  { %v1552_v31 = vadd.f32 %v1551_v18, %v1425_v55  ;;  %v1292_v11 = vadd.f32 %v1291_v17, %v4345_v59  ;;  %v1429_v18 = vmul.f32 %v4362_v12, %v4362_v12  ;;  %v4714_v55 = vpop.f32.mrb[56].mxu1 }
 0x166   :  { %7807 = vst [vmem:[#allocation87_spill] sm:$0xff] %v4714_v55  ;;  %v4716_v17 = vpop.f32.mrb[57].mxu1 }
 0x167   :  { %v1293_v4 = vadd.f32 %v4330_v50, %v1292_v11  ;;  %v1553_v37 = vadd.f32 %v1552_v31, %v1426_v51  ;;  %7808 = vst [vmem:[#allocation88_spill] sm:$0xff] %v4716_v17  ;;  %v4719_v7 = vpop.f32.mrb[58].mxu1 }
 0x168   :  { %7809 = vst [vmem:[#allocation89_spill] sm:$0xff] %v4719_v7  ;;  %v4721_v11 = vpop.f32.mrb[59].mxu1 }
 0x169   :  { %v1554_v23 = vadd.f32 %v1553_v37, %v1427_v5  ;;  %v1294_v43 = vadd.f32 %v4341_v57, %v1293_v4  ;;  %7810 = vst [vmem:[#allocation90_spill] sm:$0xff] %v4721_v11  ;;  %v1430_v37 = vmul.f32 %v4373_v21, %v4373_v21  ;;  %v1431_v5 = vmul.f32 %v4358_v10, %v4358_v10 }
 0x16b   :  { %v1295_v59 = vadd.f32 %v1294_v43, %v4362_v12  ;;  %v1555_v52 = vadd.f32 %v1554_v23, %v1428_v22  ;;  %v1432_v43 = vmul.f32 %v4369_v19, %v4369_v19 }
 0x16d   :  { %v1556_v31 = vadd.f32 %v1555_v52, %v1429_v18  ;;  %v1296_v51 = vadd.f32 %v1295_v59, %v4373_v21  ;;  %v1433_v52 = vmul.f32 %v4390_v40, %v4390_v40  ;;  %v4734_v18 = vpop.f32.mrb[60].mxu1 }
 0x16e   :  { %7811 = vst [vmem:[#allocation91_spill] sm:$0xff] %v4734_v18  ;;  %v4736_v59 = vpop.f32.mrb[61].mxu1 }
 0x16f   :  { %v1297_v4 = vadd.f32 %v4358_v10, %v1296_v51  ;;  %v1557_v57 = vadd.f32 %v1556_v31, %v1430_v37  ;;  %7812 = vst [vmem:[#allocation92_spill] sm:$0xff] %v4736_v59  ;;  %v4739_v50 = vpop.f32.mrb[62].mxu1  ;;  %v1438_v10 = vmul.f32 %v4429_v27, %v4429_v27 }
 0x170   :  { %v4741_v51 = vpop.f32.mrb[63].mxu1 }
 0x171   :  { %v1558_v22 = vadd.f32 %v1557_v57, %v1431_v5  ;;  %v1298_v23 = vadd.f32 %v4369_v19, %v1297_v4  ;;  %7813 = vst [vmem:[#allocation93_spill] sm:$0xff] %v4741_v51  ;;  %v1434_v57 = vmul.f32 %v4401_v47, %v4401_v47  ;;  %v1435_v5 = vmul.f32 %v4386_v36, %v4386_v36 }
 0x173   :  { %v1299_v21 = vadd.f32 %v1298_v23, %v4390_v40  ;;  %v1559_v12 = vadd.f32 %v1558_v22, %v1432_v43  ;;  %v1436_v23 = vmul.f32 %v4397_v45, %v4397_v45 }
 0x175   :  { %v1560_v31 = vadd.f32 %v1559_v12, %v1433_v52  ;;  %v1300_v37 = vadd.f32 %v1299_v21, %v4401_v47  ;;  %v1437_v12 = vmul.f32 %v4418_v9, %v4418_v9 }
 0x177   :  { %v1301_v4 = vadd.f32 %v4386_v36, %v1300_v37  ;;  %v1561_v19 = vadd.f32 %v1560_v31, %v1434_v57  ;;  %v1439_v31 = vmul.f32 %v4414_v2, %v4414_v2  ;;  %v1440_v57 = vmul.f32 %v4425_v25, %v4425_v25 }
 0x179   :  { %v1562_v43 = vadd.f32 %v1561_v19, %v1435_v5  ;;  %v1302_v22 = vadd.f32 %v4397_v45, %v1301_v4 }
 0x17b   :  { %v1303_v21 = vadd.f32 %v1302_v22, %v4418_v9  ;;  %v1563_v52 = vadd.f32 %v1562_v43, %v1436_v23  ;;  %v1441_v23 = vmul.f32 %v4446_v60, %v4446_v60 }
 0x17d   :  { %v1564_v40 = vadd.f32 %v1563_v52, %v1437_v12  ;;  %v1304_v47 = vadd.f32 %v1303_v21, %v4429_v27  ;;  %v1442_v52 = vmul.f32 %v4457_v15, %v4457_v15 }
 0x17f   :  { %v1305_v37 = vadd.f32 %v4414_v2, %v1304_v47  ;;  %v1565_v19 = vadd.f32 %v1564_v40, %v1438_v10  ;;  %v1443_v10 = vmul.f32 %v4442_v54, %v4442_v54 }
 0x181   :  { %v1566_v5 = vadd.f32 %v1565_v19, %v1439_v31  ;;  %v1306_v4 = vadd.f32 %v4425_v25, %v1305_v37  ;;  %v1444_v31 = vmul.f32 %v4453_v13, %v4453_v13 }
 0x183   :  { %v1307_v43 = vadd.f32 %v1306_v4, %v4446_v60  ;;  %v1567_v22 = vadd.f32 %v1566_v5, %v1440_v57  ;;  %v1445_v57 = vmul.f32 %v4474_v63, %v4474_v63 }
 0x185   :  { %v1568_v12 = vadd.f32 %v1567_v22, %v1441_v23  ;;  %v1308_v21 = vadd.f32 %v1307_v43, %v4457_v15  ;;  %v1446_v22 = vmul.f32 %v4485_v41, %v4485_v41 }
 0x187   :  { %v1309_v40 = vadd.f32 %v4442_v54, %v1308_v21  ;;  %v1569_v47 = vadd.f32 %v1568_v12, %v1442_v52  ;;  %v1447_v12 = vmul.f32 %v4470_v62, %v4470_v62 }
 0x189   :  { %v1570_v37 = vadd.f32 %v1569_v47, %v1443_v10  ;;  %v1310_v19 = vadd.f32 %v4453_v13, %v1309_v40  ;;  %v1448_v10 = vmul.f32 %v4481_v49, %v4481_v49 }
 0x18b   :  { %v1311_v5 = vadd.f32 %v1310_v19, %v4474_v63  ;;  %v1571_v4 = vadd.f32 %v1570_v37, %v1444_v31  ;;  %v1449_v31 = vmul.f32 %v4502_v28, %v4502_v28 }
 0x18d   :  { %v1572_v23 = vadd.f32 %v1571_v4, %v1445_v57  ;;  %v1312_v43 = vadd.f32 %v1311_v5, %v4485_v41  ;;  %v1450_v4 = vmul.f32 %v4513_v42, %v4513_v42 }
 0x18f   :  { %v1313_v21 = vadd.f32 %v4470_v62, %v1312_v43  ;;  %v1573_v52 = vadd.f32 %v1572_v23, %v1446_v22  ;;  %v1451_v23 = vmul.f32 %v4498_v29, %v4498_v29 }
 0x191   :  { %v1574_v40 = vadd.f32 %v1573_v52, %v1447_v12  ;;  %v1314_v47 = vadd.f32 %v4481_v49, %v1313_v21  ;;  %v1452_v12 = vmul.f32 %v4509_v53, %v4509_v53 }
 0x193   :  { %v1315_v37 = vadd.f32 %v1314_v47, %v4502_v28  ;;  %v1575_v19 = vadd.f32 %v1574_v40, %v1448_v10  ;;  %v1453_v10 = vmul.f32 %v4530_v24, %v4530_v24 }
 0x195   :  { %v1576_v57 = vadd.f32 %v1575_v19, %v1449_v31  ;;  %v1316_v5 = vadd.f32 %v1315_v37, %v4513_v42  ;;  %v1454_v19 = vmul.f32 %v4541_v0, %v4541_v0 }
 0x197   :  { %v1317_v43 = vadd.f32 %v4498_v29, %v1316_v5  ;;  %v1577_v22 = vadd.f32 %v1576_v57, %v1450_v4  ;;  %v1455_v57 = vmul.f32 %v4526_v1, %v4526_v1 }
 0x199   :  { %v1578_v21 = vadd.f32 %v1577_v22, %v1451_v23  ;;  %v1318_v52 = vadd.f32 %v4509_v53, %v1317_v43  ;;  %v1456_v23 = vmul.f32 %v4537_v26, %v4537_v26 }
 0x19b   :  { %v1319_v40 = vadd.f32 %v1318_v52, %v4530_v24  ;;  %v1579_v47 = vadd.f32 %v1578_v21, %v1452_v12  ;;  %v1457_v12 = vmul.f32 %v4558_v44, %v4558_v44 }
 0x19d   :  { %v1580_v31 = vadd.f32 %v1579_v47, %v1453_v10  ;;  %v1320_v37 = vadd.f32 %v1319_v40, %v4541_v0  ;;  %v1458_v47 = vmul.f32 %v4569_v33, %v4569_v33 }
 0x19f   :  { %v1321_v5 = vadd.f32 %v4526_v1, %v1320_v37  ;;  %v1581_v4 = vadd.f32 %v1580_v31, %v1454_v19  ;;  %v1459_v31 = vmul.f32 %v4554_v30, %v4554_v30 }
 0x1a1   :  { %v1582_v43 = vadd.f32 %v1581_v4, %v1455_v57  ;;  %v1322_v22 = vadd.f32 %v4537_v26, %v1321_v5  ;;  %v1460_v57 = vmul.f32 %v4565_v46, %v4565_v46 }
 0x1a3   :  { %v1323_v21 = vadd.f32 %v1322_v22, %v4558_v44  ;;  %v1583_v52 = vadd.f32 %v1582_v43, %v1456_v23  ;;  %v1461_v23 = vmul.f32 %v4586_v16, %v4586_v16 }
 0x1a5   :  { %v1584_v10 = vadd.f32 %v1583_v52, %v1457_v12  ;;  %v1324_v40 = vadd.f32 %v1323_v21, %v4569_v33  ;;  %v1462_v52 = vmul.f32 %v4597_v8, %v4597_v8 }
 0x1a7   :  { %v1325_v37 = vadd.f32 %v4554_v30, %v1324_v40  ;;  %v1585_v19 = vadd.f32 %v1584_v10, %v1458_v47  ;;  %v1463_v10 = vmul.f32 %v4582_v35, %v4582_v35 }
 0x1a9   :  { %v1586_v5 = vadd.f32 %v1585_v19, %v1459_v31  ;;  %v1326_v4 = vadd.f32 %v4565_v46, %v1325_v37  ;;  %v1464_v31 = vmul.f32 %v4593_v20, %v4593_v20 }
 0x1ab   :  { %v1327_v43 = vadd.f32 %v1326_v4, %v4586_v16  ;;  %v1587_v22 = vadd.f32 %v1586_v5, %v1460_v57  ;;  %v1465_v57 = vmul.f32 %v4614_v56, %v4614_v56 }
 0x1ad   :  { %v1588_v12 = vadd.f32 %v1587_v22, %v1461_v23  ;;  %v1328_v21 = vadd.f32 %v1327_v43, %v4597_v8  ;;  %v1466_v22 = vmul.f32 %v4625_v48, %v4625_v48 }
 0x1af   :  { %v1329_v40 = vadd.f32 %v4582_v35, %v1328_v21  ;;  %v1589_v47 = vadd.f32 %v1588_v12, %v1462_v52  ;;  %v1467_v12 = vmul.f32 %v4610_v61, %v4610_v61 }
 0x1b1   :  { %v1590_v37 = vadd.f32 %v1589_v47, %v1463_v10  ;;  %v1330_v19 = vadd.f32 %v4593_v20, %v1329_v40  ;;  %v1468_v10 = vmul.f32 %v4621_v58, %v4621_v58 }
 0x1b3   :  { %v1331_v5 = vadd.f32 %v1330_v19, %v4614_v56  ;;  %v1591_v4 = vadd.f32 %v1590_v37, %v1464_v31  ;;  %v1469_v31 = vmul.f32 %v4642_v38, %v4642_v38 }
 0x1b5   :  { %v1592_v23 = vadd.f32 %v1591_v4, %v1465_v57  ;;  %v1332_v43 = vadd.f32 %v1331_v5, %v4625_v48  ;;  %v1470_v4 = vmul.f32 %v4653_v32, %v4653_v32 }
 0x1b7   :  { %v1333_v21 = vadd.f32 %v4610_v61, %v1332_v43  ;;  %v1593_v52 = vadd.f32 %v1592_v23, %v1466_v22  ;;  %v1471_v23 = vmul.f32 %v4638_v14, %v4638_v14 }
 0x1b9   :  { %v1594_v40 = vadd.f32 %v1593_v52, %v1467_v12  ;;  %v1334_v47 = vadd.f32 %v4621_v58, %v1333_v21  ;;  %v7814_v12 = vld [vmem:[#allocation74_spill] sm:$0xff] }
 0x1ba   :  { %v1472_v21 = vmul.f32 %v7814_v12, %v7814_v12 }
 0x1bb   :  { %v1335_v37 = vadd.f32 %v1334_v47, %v4642_v38  ;;  %v1595_v19 = vadd.f32 %v1594_v40, %v1468_v10  ;;  %v7815_v47 = vld [vmem:[#allocation80_spill] sm:$0xff] }
 0x1bc   :  { %v1473_v10 = vmul.f32 %v7815_v47, %v7815_v47 }
 0x1bd   :  { %v1596_v57 = vadd.f32 %v1595_v19, %v1469_v31  ;;  %v1336_v5 = vadd.f32 %v1335_v37, %v4653_v32  ;;  %v7816_v19 = vld [vmem:[#allocation84_spill] sm:$0xff] }
 0x1be   :  { %v1474_v38 = vmul.f32 %v7816_v19, %v7816_v19 }
 0x1bf   :  { %v1337_v43 = vadd.f32 %v4638_v14, %v1336_v5  ;;  %v1597_v22 = vadd.f32 %v1596_v57, %v1470_v4  ;;  %v7817_v5 = vld [vmem:[#allocation78_spill] sm:$0xff] }
 0x1c0   :  { %v1475_v57 = vmul.f32 %v7817_v5, %v7817_v5 }
 0x1c1   :  { %v1598_v52 = vadd.f32 %v1597_v22, %v1471_v23  ;;  %v1338_v58 = vadd.f32 %v7814_v12, %v1337_v43  ;;  %v7818_v22 = vld [vmem:[#allocation82_spill] sm:$0xff] }
 0x1c2   :  { %v1476_v43 = vmul.f32 %v7818_v22, %v7818_v22 }
 0x1c3   :  { %v1339_v40 = vadd.f32 %v1338_v58, %v7815_v47  ;;  %v1599_v31 = vadd.f32 %v1598_v52, %v1472_v21  ;;  %v1477_v58 = vmul.f32 %v4696_v34, %v4696_v34 }
 0x1c5   :  { %v1600_v37 = vadd.f32 %v1599_v31, %v1473_v10  ;;  %v1340_v32 = vadd.f32 %v1339_v40, %v7816_v19  ;;  %v1478_v31 = vmul.f32 %v4701_v3, %v4701_v3 }
 0x1c7   :  { %v1341_v4 = vadd.f32 %v7817_v5, %v1340_v32  ;;  %v1601_v23 = vadd.f32 %v1600_v37, %v1474_v38  ;;  %v1479_v38 = vmul.f32 %v4694_v6, %v4694_v6 }
 0x1c9   :  { %v1602_v12 = vadd.f32 %v1601_v23, %v1475_v57  ;;  %v1342_v14 = vadd.f32 %v7818_v22, %v1341_v4  ;;  %v1480_v57 = vmul.f32 %v4699_v39, %v4699_v39 }
 0x1cb   :  { %v1343_v21 = vadd.f32 %v1342_v14, %v4696_v34  ;;  %v1603_v52 = vadd.f32 %v1602_v12, %v1476_v43  ;;  %v1481_v14 = vmul.f32 %v4716_v17, %v4716_v17 }
 0x1cd   :  { %v1604_v10 = vadd.f32 %v1603_v52, %v1477_v58  ;;  %v1344_v40 = vadd.f32 %v1343_v21, %v4701_v3  ;;  %v1482_v52 = vmul.f32 %v4721_v11, %v4721_v11 }
 0x1cf   :  { %v1345_v32 = vadd.f32 %v4694_v6, %v1344_v40  ;;  %v1605_v37 = vadd.f32 %v1604_v10, %v1478_v31  ;;  %v1483_v10 = vmul.f32 %v4714_v55, %v4714_v55 }
 0x1d1   :  { %v1606_v4 = vadd.f32 %v1605_v37, %v1479_v38  ;;  %v1346_v23 = vadd.f32 %v4699_v39, %v1345_v32  ;;  %v1484_v38 = vmul.f32 %v4719_v7, %v4719_v7 }
 0x1d3   :  { %v1347_v12 = vadd.f32 %v1346_v23, %v4716_v17  ;;  %v1607_v43 = vadd.f32 %v1606_v4, %v1480_v57  ;;  %v1485_v57 = vmul.f32 %v4736_v59, %v4736_v59 }
 0x1d5   :  { %v1608_v58 = vadd.f32 %v1607_v43, %v1481_v14  ;;  %v1348_v21 = vadd.f32 %v1347_v12, %v4721_v11  ;;  %v1486_v43 = vmul.f32 %v4741_v51, %v4741_v51 }
 0x1d7   :  { %v1349_v40 = vadd.f32 %v4714_v55, %v1348_v21  ;;  %v1609_v31 = vadd.f32 %v1608_v58, %v1482_v52  ;;  %v1487_v58 = vmul.f32 %v4734_v18, %v4734_v18 }
 0x1d9   :  { %v1610_v32 = vadd.f32 %v1609_v31, %v1483_v10  ;;  %v1350_v37 = vadd.f32 %v4719_v7, %v1349_v40  ;;  %v1488_v10 = vmul.f32 %v4739_v50, %v4739_v50 }
 0x1db   :  { %v1351_v4 = vadd.f32 %v1350_v37, %v4736_v59  ;;  %v1611_v23 = vadd.f32 %v1610_v32, %v1484_v38 }
 0x1dd   :  { %v1612_v14 = vadd.f32 %v1611_v23, %v1485_v57  ;;  %v1352_v12 = vadd.f32 %v1351_v4, %v4741_v51 }
 0x1df   :  { %v1353_v21 = vadd.f32 %v4734_v18, %v1352_v12  ;;  %v1613_v52 = vadd.f32 %v1612_v14, %v1486_v43 }
 0x1e1   :  { %v1354_v40 = vadd.f32 %v4739_v50, %v1353_v21  ;;  %v1614_v31 = vadd.f32 %v1613_v52, %v1487_v58  ;;  %v1635_v58 = vlaneseq }
 0x1e3   :  { %v1355_v37 = vrot.slane %v1354_v40, 4  ;;  %v1615_v38 = vadd.f32 %v1614_v31, %v1488_v10  ;;  %v4908_v52 = vshrl.u32 %v1635_v58, 7  ;;  %v1629_v10 = vld [vmem:[%s7515_s2] sm:$0x1]  ;;  %v7826_v58 = vld [vmem:[#allocation8_spill] sm:$0xff] }
 0x1e5   :  { %v1356_v32 = vadd.f32 %v1355_v37, %v1354_v40  ;;  %v1616_v57 = vrot.slane %v1615_v38, 4  ;;  %v7611_v40 = vsub.s32 0, %v4908_v52  ;;  %v7821_v37 = vld [vmem:[#allocation2_spill] sm:$0xff] }
 0x1e7   :  { %v1357_v4 = vrot.slane %v1356_v32, 2  ;;  %v1617_v23 = vadd.f32 %v1616_v57, %v1615_v38 }
 0x1e9   :  { %v1358_v59 = vadd.f32 %v1357_v4, %v1356_v32  ;;  %v1618_v51 = vrot.slane %v1617_v23, 2  ;;  %v7822_v32 = vld [vmem:[#allocation4_spill] sm:$0xff]  ;;  %v7823_v4 = vld [vmem:[#allocation7_spill] sm:$0xff] }
 0x1eb   :  { %v1359_v7 = vrot.slane %v1358_v59, 1  ;;  %v1619_v55 = vadd.f32 %v1618_v51, %v1617_v23 }
 0x1ed   :  { %v1360_v11 = vadd.f32 %v1359_v7, %v1358_v59  ;;  %v1620_v17 = vrot.slane %v1619_v55, 1  ;;  %v7820_v59 = vld [vmem:[#allocation5_spill] sm:$0xff] }
 0x1ef   :  { %v1621_v12 = vadd.f32 %v1620_v17, %v1619_v55  ;;  %v1622_v14 = vmul.f32 0.0009765625, %v1360_v11  ;;  %v4917_v55 = vld [vmem:[%s7516_s3] sm:$0x1]  ;;  %v7819_v11 = vld [vmem:[#allocation3_spill] sm:$0xff] }
 0x1f1   :  { %v1623_v43 = vmul.f32 0.0009765625, %v1621_v12  ;;  %v1624_v18 = vmul.f32 %v1622_v14, %v1622_v14  ;;  %v7824_v12 = vld [vmem:[#allocation9_spill] sm:$0xff] }
 0x1f3   :  { %v1625_v39 = vsub.f32 %v1623_v43, %v1624_v18  ;;  %v7825_v43 = vld [vmem:[#allocation6_spill] sm:$0xff] }
 0x1f5   :  { %v1626_v6 = vmax.f32 %v1625_v39, 0.0 }
 0x1f7   :  { %v1627_v21 = vadd.f32 1e-05, %v1626_v6  ;;  %v7836_v6 = vld [vmem:[#allocation20_spill] sm:$0xff] }
 0x1f9   :  { %3976 = vrsqrt.f32 %v1627_v21 }
 0x203   :  { %v3977_v51 = vpop.eup %3976 }
 0x204   :  { %v1630_v7 = vmul.f32 %v3977_v51, %v1629_v10  ;;  %v7827_v51 = vld [vmem:[#allocation11_spill] sm:$0xff] }
 0x206   :  { %v4919_v17 = vmul.f32 %v1630_v7, %v1622_v14  ;;  %v4923_v39 = vrot.slane %v1630_v7, %v7611_v40  ;;  %v7838_v40 = vld [vmem:[#allocation14_spill] sm:$0xff] }
 0x208   :  { %v4929_v18 = vmul.f32 %v4923_v39, %v7819_v11  ;;  %v4933_v31 = vmul.f32 %v4923_v39, %v7820_v59  ;;  %v4937_v38 = vmul.f32 %v7821_v37, %v4923_v39  ;;  %v4941_v57 = vmul.f32 %v7822_v32, %v4923_v39  ;;  %v7828_v11 = vld [vmem:[#allocation13_spill] sm:$0xff]  ;;  %v7830_v37 = vld [vmem:[#allocation10_spill] sm:$0xff] }
 0x209   :  { %v4945_v23 = vmul.f32 %v4923_v39, %v7823_v4  ;;  %v4949_v14 = vmul.f32 %v4923_v39, %v7824_v12  ;;  %v4953_v21 = vmul.f32 %v7825_v43, %v4923_v39  ;;  %v4957_v10 = vmul.f32 %v7826_v58, %v4923_v39  ;;  %v7832_v4 = vld [vmem:[#allocation12_spill] sm:$0xff] }
 0x20a   :  { %v4961_v7 = vmul.f32 %v4923_v39, %v7827_v51  ;;  %v4965_v59 = vmul.f32 %v4923_v39, %v7828_v11  ;;  %v4969_v32 = vmul.f32 %v7830_v37, %v4923_v39  ;;  %v4973_v12 = vmul.f32 %v7832_v4, %v4923_v39  ;;  %v7834_v43 = vld [vmem:[#allocation16_spill] sm:$0xff] }
 0x20b   :  { %v4977_v58 = vmul.f32 %v4923_v39, %v7834_v43  ;;  %v4981_v51 = vmul.f32 %v4923_v39, %v7836_v6  ;;  %v4985_v11 = vmul.f32 %v7838_v40, %v4923_v39 }
 0x20c   :  { %7829 = vst [vmem:[#allocation80_spill] sm:$0xff] %v4965_v59  ;;  %7831 = vst [vmem:[#allocation84_spill] sm:$0xff] %v4969_v32  ;;  %v7840_v59 = vld [vmem:[#allocation18_spill] sm:$0xff]  ;;  %v7842_v32 = vld [vmem:[#allocation24_spill] sm:$0xff] }
 0x20d   :  { %7833 = vst [vmem:[#allocation78_spill] sm:$0xff] %v4973_v12  ;;  %7835 = vst [vmem:[#allocation82_spill] sm:$0xff] %v4977_v58  ;;  %v4989_v37 = vmul.f32 %v7840_v59, %v4923_v39  ;;  %v4993_v4 = vmul.f32 %v4923_v39, %v7842_v32  ;;  %v7844_v12 = vld [vmem:[#allocation28_spill] sm:$0xff]  ;;  %v7846_v58 = vld [vmem:[#allocation22_spill] sm:$0xff] }
 0x20e   :  { %7837 = vst [vmem:[#allocation3_spill] sm:$0xff] %v4981_v51  ;;  %7839 = vst [vmem:[#allocation5_spill] sm:$0xff] %v4985_v11  ;;  %v4997_v43 = vmul.f32 %v4923_v39, %v7844_v12  ;;  %v5001_v6 = vmul.f32 %v7846_v58, %v4923_v39  ;;  %v7848_v51 = vld [vmem:[#allocation26_spill] sm:$0xff]  ;;  %v7850_v11 = vld [vmem:[#allocation31_spill] sm:$0xff] }
 0x20f   :  { %7841 = vst [vmem:[#allocation2_spill] sm:$0xff] %v4989_v37  ;;  %7843 = vst [vmem:[#allocation4_spill] sm:$0xff] %v4993_v4  ;;  %v5005_v40 = vmul.f32 %v7848_v51, %v4923_v39  ;;  %v5009_v59 = vmul.f32 %v4923_v39, %v7850_v11  ;;  %v7852_v37 = vld [vmem:[#allocation34_spill] sm:$0xff] }
 0x210   :  { %7845 = vst [vmem:[#allocation7_spill] sm:$0xff] %v4997_v43  ;;  %7847 = vst [vmem:[#allocation9_spill] sm:$0xff] %v5001_v6  ;;  %v5013_v32 = vmul.f32 %v4923_v39, %v7852_v37  ;;  %v7854_v4 = vld [vmem:[#allocation30_spill] sm:$0xff]  ;;  %v7856_v43 = vld [vmem:[#allocation33_spill] sm:$0xff] }
 0x211   :  { %7849 = vst [vmem:[#allocation6_spill] sm:$0xff] %v5005_v40  ;;  %7851 = vst [vmem:[#allocation8_spill] sm:$0xff] %v5009_v59  ;;  %v5017_v12 = vmul.f32 %v7854_v4, %v4923_v39  ;;  %v5021_v58 = vmul.f32 %v7856_v43, %v4923_v39  ;;  %v7858_v6 = vld [vmem:[#allocation37_spill] sm:$0xff]  ;;  %v7860_v40 = vld [vmem:[#allocation39_spill] sm:$0xff] }
 0x212   :  { %7853 = vst [vmem:[#allocation11_spill] sm:$0xff] %v5013_v32  ;;  %v5025_v51 = vmul.f32 %v4923_v39, %v7858_v6  ;;  %v5029_v11 = vmul.f32 %v4923_v39, %v7860_v40  ;;  %v7862_v59 = vld [vmem:[#allocation36_spill] sm:$0xff]  ;;  %v7864_v32 = vld [vmem:[#allocation38_spill] sm:$0xff] }
 0x213   :  { %7855 = vst [vmem:[#allocation13_spill] sm:$0xff] %v5017_v12  ;;  %7857 = vst [vmem:[#allocation10_spill] sm:$0xff] %v5021_v58  ;;  %v5033_v37 = vmul.f32 %v7862_v59, %v4923_v39  ;;  %v5037_v4 = vmul.f32 %v7864_v32, %v4923_v39  ;;  %v7866_v12 = vld [vmem:[#allocation41_spill] sm:$0xff]  ;;  %v7868_v58 = vld [vmem:[#allocation43_spill] sm:$0xff] }
 0x214   :  { %7859 = vst [vmem:[#allocation12_spill] sm:$0xff] %v5025_v51  ;;  %7861 = vst [vmem:[#allocation16_spill] sm:$0xff] %v5029_v11  ;;  %v5041_v43 = vmul.f32 %v4923_v39, %v7866_v12  ;;  %v5045_v6 = vmul.f32 %v4923_v39, %v7868_v58  ;;  %v7870_v51 = vld [vmem:[#allocation40_spill] sm:$0xff]  ;;  %v7872_v11 = vld [vmem:[#allocation42_spill] sm:$0xff] }
 0x215   :  { %7863 = vst [vmem:[#allocation20_spill] sm:$0xff] %v5033_v37  ;;  %7865 = vst [vmem:[#allocation14_spill] sm:$0xff] %v5037_v4  ;;  %v5049_v40 = vmul.f32 %v7870_v51, %v4923_v39  ;;  %v5053_v59 = vmul.f32 %v7872_v11, %v4923_v39  ;;  %v7874_v37 = vld [vmem:[#allocation45_spill] sm:$0xff]  ;;  %v7876_v4 = vld [vmem:[#allocation47_spill] sm:$0xff] }
 0x216   :  { %7867 = vst [vmem:[#allocation18_spill] sm:$0xff] %v5041_v43  ;;  %7869 = vst [vmem:[#allocation24_spill] sm:$0xff] %v5045_v6  ;;  %v5057_v32 = vmul.f32 %v4923_v39, %v7874_v37  ;;  %v5061_v12 = vmul.f32 %v4923_v39, %v7876_v4  ;;  %v7878_v43 = vld [vmem:[#allocation44_spill] sm:$0xff]  ;;  %v7880_v6 = vld [vmem:[#allocation46_spill] sm:$0xff] }
 0x217   :  { %7871 = vst [vmem:[#allocation28_spill] sm:$0xff] %v5049_v40  ;;  %7873 = vst [vmem:[#allocation22_spill] sm:$0xff] %v5053_v59  ;;  %v5065_v58 = vmul.f32 %v7878_v43, %v4923_v39  ;;  %v5069_v51 = vmul.f32 %v7880_v6, %v4923_v39  ;;  %v7882_v40 = vld [vmem:[#allocation49_spill] sm:$0xff]  ;;  %v7884_v59 = vld [vmem:[#allocation51_spill] sm:$0xff] }
 0x218   :  { %7875 = vst [vmem:[#allocation26_spill] sm:$0xff] %v5057_v32  ;;  %7877 = vst [vmem:[#allocation31_spill] sm:$0xff] %v5061_v12  ;;  %v5073_v11 = vmul.f32 %v4923_v39, %v7882_v40  ;;  %v5077_v37 = vmul.f32 %v4923_v39, %v7884_v59  ;;  %v7886_v32 = vld [vmem:[#allocation48_spill] sm:$0xff]  ;;  %v7888_v12 = vld [vmem:[#allocation50_spill] sm:$0xff] }
 0x219   :  { %7879 = vst [vmem:[#allocation34_spill] sm:$0xff] %v5065_v58  ;;  %7881 = vst [vmem:[#allocation30_spill] sm:$0xff] %v5069_v51  ;;  %v5081_v4 = vmul.f32 %v7886_v32, %v4923_v39  ;;  %v5085_v43 = vmul.f32 %v7888_v12, %v4923_v39  ;;  %v7890_v58 = vld [vmem:[#allocation53_spill] sm:$0xff]  ;;  %v7892_v51 = vld [vmem:[#allocation55_spill] sm:$0xff] }
 0x21a   :  { %7883 = vst [vmem:[#allocation33_spill] sm:$0xff] %v5073_v11  ;;  %7885 = vst [vmem:[#allocation37_spill] sm:$0xff] %v5077_v37  ;;  %v5089_v6 = vmul.f32 %v4923_v39, %v7890_v58  ;;  %v5093_v40 = vmul.f32 %v4923_v39, %v7892_v51  ;;  %v7894_v11 = vld [vmem:[#allocation52_spill] sm:$0xff]  ;;  %v7896_v37 = vld [vmem:[#allocation54_spill] sm:$0xff] }
 0x21b   :  { %7887 = vst [vmem:[#allocation39_spill] sm:$0xff] %v5081_v4  ;;  %7889 = vst [vmem:[#allocation36_spill] sm:$0xff] %v5085_v43  ;;  %v5097_v59 = vmul.f32 %v7894_v11, %v4923_v39  ;;  %v5101_v32 = vmul.f32 %v7896_v37, %v4923_v39  ;;  %v7898_v4 = vld [vmem:[#allocation57_spill] sm:$0xff]  ;;  %v7900_v43 = vld [vmem:[#allocation59_spill] sm:$0xff] }
 0x21c   :  { %7891 = vst [vmem:[#allocation38_spill] sm:$0xff] %v5089_v6  ;;  %7893 = vst [vmem:[#allocation41_spill] sm:$0xff] %v5093_v40  ;;  %v5105_v12 = vmul.f32 %v4923_v39, %v7898_v4  ;;  %v5109_v58 = vmul.f32 %v4923_v39, %v7900_v43  ;;  %v7902_v6 = vld [vmem:[#allocation56_spill] sm:$0xff]  ;;  %v7904_v40 = vld [vmem:[#allocation58_spill] sm:$0xff] }
 0x21d   :  { %7895 = vst [vmem:[#allocation43_spill] sm:$0xff] %v5097_v59  ;;  %7897 = vst [vmem:[#allocation40_spill] sm:$0xff] %v5101_v32  ;;  %v5113_v51 = vmul.f32 %v7902_v6, %v4923_v39  ;;  %v5117_v11 = vmul.f32 %v7904_v40, %v4923_v39  ;;  %v7906_v59 = vld [vmem:[#allocation61_spill] sm:$0xff]  ;;  %v7908_v32 = vld [vmem:[#allocation63_spill] sm:$0xff] }
 0x21e   :  { %7899 = vst [vmem:[#allocation42_spill] sm:$0xff] %v5105_v12  ;;  %7901 = vst [vmem:[#allocation45_spill] sm:$0xff] %v5109_v58  ;;  %v5121_v37 = vmul.f32 %v4923_v39, %v7906_v59  ;;  %v5125_v4 = vmul.f32 %v4923_v39, %v7908_v32  ;;  %v7910_v12 = vld [vmem:[#allocation60_spill] sm:$0xff]  ;;  %v7912_v58 = vld [vmem:[#allocation62_spill] sm:$0xff] }
 0x21f   :  { %7903 = vst [vmem:[#allocation47_spill] sm:$0xff] %v5113_v51  ;;  %7905 = vst [vmem:[#allocation44_spill] sm:$0xff] %v5117_v11  ;;  %v5129_v43 = vmul.f32 %v7910_v12, %v4923_v39  ;;  %v5133_v6 = vmul.f32 %v7912_v58, %v4923_v39  ;;  %v7914_v51 = vld [vmem:[#allocation65_spill] sm:$0xff]  ;;  %v7916_v11 = vld [vmem:[#allocation68_spill] sm:$0xff] }
 0x220   :  { %7907 = vst [vmem:[#allocation46_spill] sm:$0xff] %v5121_v37  ;;  %7909 = vst [vmem:[#allocation49_spill] sm:$0xff] %v5125_v4  ;;  %v5137_v40 = vmul.f32 %v4923_v39, %v7914_v51  ;;  %v5141_v59 = vmul.f32 %v4923_v39, %v7916_v11  ;;  %v7918_v37 = vld [vmem:[#allocation64_spill] sm:$0xff]  ;;  %v7920_v4 = vld [vmem:[#allocation66_spill] sm:$0xff] }
 0x221   :  { %7911 = vst [vmem:[#allocation51_spill] sm:$0xff] %v5129_v43  ;;  %7913 = vst [vmem:[#allocation48_spill] sm:$0xff] %v5133_v6  ;;  %v5145_v32 = vmul.f32 %v7918_v37, %v4923_v39  ;;  %v5149_v12 = vmul.f32 %v7920_v4, %v4923_v39  ;;  %v7922_v43 = vld [vmem:[#allocation71_spill] sm:$0xff] }
 0x222   :  { %7915 = vst [vmem:[#allocation50_spill] sm:$0xff] %v5137_v40  ;;  %7917 = vst [vmem:[#allocation53_spill] sm:$0xff] %v5141_v59  ;;  %v5153_v58 = vmul.f32 %v4923_v39, %v7922_v43  ;;  %v7924_v6 = vld [vmem:[#allocation75_spill] sm:$0xff]  ;;  %v7926_v40 = vld [vmem:[#allocation69_spill] sm:$0xff] }
 0x223   :  { %7919 = vst [vmem:[#allocation55_spill] sm:$0xff] %v5145_v32  ;;  %7921 = vst [vmem:[#allocation52_spill] sm:$0xff] %v5149_v12  ;;  %v5157_v51 = vmul.f32 %v4923_v39, %v7924_v6  ;;  %v5161_v11 = vmul.f32 %v7926_v40, %v4923_v39  ;;  %v7928_v59 = vld [vmem:[#allocation73_spill] sm:$0xff]  ;;  %v7930_v32 = vld [vmem:[#allocation79_spill] sm:$0xff] }
 0x224   :  { %7923 = vst [vmem:[#allocation54_spill] sm:$0xff] %v5153_v58  ;;  %v5165_v37 = vmul.f32 %v7928_v59, %v4923_v39  ;;  %v5169_v4 = vmul.f32 %v4923_v39, %v7930_v32  ;;  %v7932_v12 = vld [vmem:[#allocation83_spill] sm:$0xff]  ;;  %v7934_v58 = vld [vmem:[#allocation77_spill] sm:$0xff] }
 0x225   :  { %7925 = vst [vmem:[#allocation57_spill] sm:$0xff] %v5157_v51  ;;  %7927 = vst [vmem:[#allocation59_spill] sm:$0xff] %v5161_v11  ;;  %v5173_v43 = vmul.f32 %v4923_v39, %v7932_v12  ;;  %v5177_v6 = vmul.f32 %v7934_v58, %v4923_v39  ;;  %v7936_v51 = vld [vmem:[#allocation81_spill] sm:$0xff] }
 0x226   :  { %7929 = vst [vmem:[#allocation56_spill] sm:$0xff] %v5165_v37  ;;  %7931 = vst [vmem:[#allocation58_spill] sm:$0xff] %v5169_v4  ;;  %v5181_v40 = vmul.f32 %v7936_v51, %v4923_v39  ;;  %v7938_v11 = vld [vmem:[#allocation17_spill] sm:$0xff]  ;;  %v7942_v4 = vld [vmem:[#allocation15_spill] sm:$0xff] }
 0x227   :  { %7933 = vst [vmem:[#allocation61_spill] sm:$0xff] %v5173_v43  ;;  %7935 = vst [vmem:[#allocation63_spill] sm:$0xff] %v5177_v6  ;;  %v5185_v59 = vmul.f32 %v4923_v39, %v7938_v11  ;;  %v7940_v37 = vld [vmem:[#allocation21_spill] sm:$0xff]  ;;  %v5193_v12 = vmul.f32 %v7942_v4, %v4923_v39  ;;  %v7944_v43 = vld [vmem:[#allocation19_spill] sm:$0xff] }
 0x228   :  { %7937 = vst [vmem:[#allocation60_spill] sm:$0xff] %v5181_v40  ;;  %v5189_v32 = vmul.f32 %v4923_v39, %v7940_v37  ;;  %v5197_v58 = vmul.f32 %v7944_v43, %v4923_v39  ;;  %v7946_v6 = vld [vmem:[#allocation25_spill] sm:$0xff] }
 0x229   :  { %7939 = vst [vmem:[#allocation62_spill] sm:$0xff] %v5185_v59  ;;  %7943 = vst [vmem:[#allocation68_spill] sm:$0xff] %v5193_v12  ;;  %v5201_v51 = vmul.f32 %v4923_v39, %v7946_v6  ;;  %v7947_v40 = vld [vmem:[#allocation29_spill] sm:$0xff]  ;;  %v7948_v59 = vld [vmem:[#allocation23_spill] sm:$0xff] }
 0x22a   :  { %7941 = vst [vmem:[#allocation65_spill] sm:$0xff] %v5189_v32  ;;  %7945 = vst [vmem:[#allocation64_spill] sm:$0xff] %v5197_v58  ;;  %v5205_v11 = vmul.f32 %v4923_v39, %v7947_v40  ;;  %v5209_v37 = vmul.f32 %v7948_v59, %v4923_v39  ;;  %v7949_v32 = vld [vmem:[#allocation27_spill] sm:$0xff]  ;;  %v7950_v12 = vld [vmem:[#allocation32_spill] sm:$0xff]  ;;  %v5225_v40 = vmul.f32 %v4386_v36, %v4923_v39 }
 0x22b   :  { %v5213_v4 = vmul.f32 %v7949_v32, %v4923_v39  ;;  %v5217_v43 = vmul.f32 %v4923_v39, %v7950_v12  ;;  %v7951_v58 = vld [vmem:[#allocation35_spill] sm:$0xff]  ;;  %v5229_v59 = vmul.f32 %v4397_v45, %v4923_v39  ;;  %v5233_v32 = vmul.f32 %v4923_v39, %v4418_v9 }
 0x22c   :  { %v5221_v6 = vmul.f32 %v4923_v39, %v7951_v58  ;;  %v5237_v12 = vmul.f32 %v4923_v39, %v4429_v27  ;;  %v5241_v58 = vmul.f32 %v4414_v2, %v4923_v39  ;;  %v5245_v36 = vmul.f32 %v4425_v25, %v4923_v39 }
 0x22d   :  { %v5249_v45 = vmul.f32 %v4923_v39, %v4446_v60  ;;  %v5253_v9 = vmul.f32 %v4923_v39, %v4457_v15  ;;  %v5257_v27 = vmul.f32 %v4442_v54, %v4923_v39  ;;  %v5261_v2 = vmul.f32 %v4453_v13, %v4923_v39 }
 0x22e   :  { %v5265_v25 = vmul.f32 %v4923_v39, %v4474_v63  ;;  %v5269_v60 = vmul.f32 %v4923_v39, %v4485_v41  ;;  %v5273_v15 = vmul.f32 %v4470_v62, %v4923_v39  ;;  %v5277_v54 = vmul.f32 %v4481_v49, %v4923_v39 }
 0x22f   :  { %v5281_v13 = vmul.f32 %v4923_v39, %v4502_v28  ;;  %v5285_v63 = vmul.f32 %v4923_v39, %v4513_v42  ;;  %v5289_v41 = vmul.f32 %v4498_v29, %v4923_v39  ;;  %v5293_v62 = vmul.f32 %v4509_v53, %v4923_v39 }
 0x230   :  { %v5297_v49 = vmul.f32 %v4923_v39, %v4530_v24  ;;  %v5301_v28 = vmul.f32 %v4923_v39, %v4541_v0  ;;  %v5305_v42 = vmul.f32 %v4526_v1, %v4923_v39  ;;  %v5309_v29 = vmul.f32 %v4537_v26, %v4923_v39 }
 0x231   :  { %v5313_v53 = vmul.f32 %v4923_v39, %v4558_v44  ;;  %v5317_v24 = vmul.f32 %v4923_v39, %v4569_v33  ;;  %v5321_v0 = vmul.f32 %v4554_v30, %v4923_v39  ;;  %v5325_v1 = vmul.f32 %v4565_v46, %v4923_v39 }
 0x232   :  { %v5329_v26 = vmul.f32 %v4923_v39, %v4586_v16  ;;  %v5333_v44 = vmul.f32 %v4923_v39, %v4597_v8  ;;  %v5337_v33 = vmul.f32 %v4582_v35, %v4923_v39  ;;  %v5341_v30 = vmul.f32 %v4593_v20, %v4923_v39 }
 0x233   :  { %v5345_v46 = vmul.f32 %v4923_v39, %v4614_v56  ;;  %v5349_v16 = vmul.f32 %v4923_v39, %v4625_v48  ;;  %v5353_v8 = vmul.f32 %v4610_v61, %v4923_v39 }
 0x234   :  { %7952 = vst [vmem:[#allocation66_spill] sm:$0xff] %v5333_v44  ;;  %7953 = vst [vmem:[#allocation71_spill] sm:$0xff] %v5337_v33  ;;  %v7957_v44 = vld [vmem:[#allocation67_spill] sm:$0xff]  ;;  %v7958_v33 = vld [vmem:[#allocation72_spill] sm:$0xff] }
 0x235   :  { %7954 = vst [vmem:[#allocation75_spill] sm:$0xff] %v5341_v30  ;;  %7955 = vst [vmem:[#allocation69_spill] sm:$0xff] %v5345_v46  ;;  %v5357_v35 = vmul.f32 %v7957_v44, %v4923_v39  ;;  %v5361_v20 = vmul.f32 %v4923_v39, %v7958_v33  ;;  %v7959_v30 = vld [vmem:[#allocation76_spill] sm:$0xff]  ;;  %v7960_v46 = vld [vmem:[#allocation70_spill] sm:$0xff]  ;;  %v5377_v44 = vmul.f32 %v4923_v39, %v7815_v47 }
 0x236   :  { %7956 = vst [vmem:[#allocation73_spill] sm:$0xff] %v5349_v16  ;;  %v5365_v56 = vmul.f32 %v4923_v39, %v7959_v30  ;;  %v5369_v48 = vmul.f32 %v7960_v46, %v4923_v39  ;;  %v7961_v16 = vld [vmem:[#allocation74_spill] sm:$0xff]  ;;  %v5381_v33 = vmul.f32 %v4923_v39, %v7816_v19  ;;  %v5385_v30 = vmul.f32 %v7817_v5, %v4923_v39 }
 0x237   :  { %v5373_v61 = vmul.f32 %v7961_v16, %v4923_v39  ;;  %7962 = vst [vmem:[#allocation79_spill] sm:$0xff] %v5377_v44  ;;  %v5389_v46 = vmul.f32 %v7818_v22, %v4923_v39  ;;  %v5393_v16 = vmul.f32 %v4923_v39, %v4696_v34  ;;  %v5397_v47 = vmul.f32 %v4923_v39, %v4701_v3  ;;  %v7968_v44 = vld [vmem:[#allocation85_spill] sm:$0xff] }
 0x238   :  { %7963 = vst [vmem:[#allocation83_spill] sm:$0xff] %v5381_v33  ;;  %7964 = vst [vmem:[#allocation77_spill] sm:$0xff] %v5385_v30  ;;  %v5401_v19 = vmul.f32 %v7968_v44, %v4923_v39  ;;  %v7970_v33 = vld [vmem:[#allocation86_spill] sm:$0xff]  ;;  %v7972_v30 = vld [vmem:[#allocation88_spill] sm:$0xff] }
 0x239   :  { %7965 = vst [vmem:[#allocation81_spill] sm:$0xff] %v5389_v46  ;;  %7966 = vst [vmem:[#allocation17_spill] sm:$0xff] %v5393_v16  ;;  %v5405_v5 = vmul.f32 %v7970_v33, %v4923_v39  ;;  %v5409_v22 = vmul.f32 %v4923_v39, %v7972_v30  ;;  %v7974_v46 = vld [vmem:[#allocation90_spill] sm:$0xff]  ;;  %v7975_v16 = vld [vmem:[#allocation87_spill] sm:$0xff] }
 0x23a   :  { %7967 = vst [vmem:[#allocation21_spill] sm:$0xff] %v5397_v47  ;;  %7969 = vst [vmem:[#allocation15_spill] sm:$0xff] %v5401_v19  ;;  %v5413_v34 = vmul.f32 %v4923_v39, %v7974_v46  ;;  %v5417_v3 = vmul.f32 %v7975_v16, %v4923_v39  ;;  %v7977_v47 = vld [vmem:[#allocation89_spill] sm:$0xff]  ;;  %v7979_v19 = vld [vmem:[#allocation92_spill] sm:$0xff]  ;;  %v5437_v16 = vmul.f32 %v4739_v50, %v4923_v39 }
 0x23b   :  { %7971 = vst [vmem:[#allocation19_spill] sm:$0xff] %v5405_v5  ;;  %7973 = vst [vmem:[#allocation25_spill] sm:$0xff] %v5409_v22  ;;  %v5421_v44 = vmul.f32 %v7977_v47, %v4923_v39  ;;  %v5425_v33 = vmul.f32 %v4923_v39, %v7979_v19  ;;  %v7980_v5 = vld [vmem:[#allocation93_spill] sm:$0xff]  ;;  %v7981_v22 = vld [vmem:[#allocation91_spill] sm:$0xff]  ;;  %v7983_v47 = vsub.f32 %v4917_v55, %v4919_v17 }
 0x23c   :  { %7976 = vst [vmem:[#allocation29_spill] sm:$0xff] %v5417_v3  ;;  %v5429_v30 = vmul.f32 %v4923_v39, %v7980_v5  ;;  %v5433_v46 = vmul.f32 %v7981_v22, %v4923_v39  ;;  %v7982_v3 = vsub.s32 0, %v4908_v52 }
 0x23d   :  { %7978 = vst [vmem:[#allocation23_spill] sm:$0xff] %v5421_v44 }
 0x23e   :  { %v5444_v44 = vrot.slane %v7983_v47, %v7982_v3  ;;  %v7991_v3 = vld [vmem:[#allocation82_spill] sm:$0xff]  ;;  %v7993_v47 = vld [vmem:[#allocation3_spill] sm:$0xff] }
 0x240   :  { %v5448_v19 = vadd.f32 %v5444_v44, %v4929_v18  ;;  %v5452_v5 = vadd.f32 %v5444_v44, %v4933_v31  ;;  %v5456_v22 = vadd.f32 %v5444_v44, %v4937_v38  ;;  %v5460_v50 = vadd.f32 %v5444_v44, %v4941_v57  ;;  %v7985_v31 = vld [vmem:[#allocation80_spill] sm:$0xff] }
 0x241   :  { %v5464_v52 = vadd.f32 %v5444_v44, %v4945_v23  ;;  %v5468_v55 = vadd.f32 %v5444_v44, %v4949_v14  ;;  %v5472_v17 = vadd.f32 %v5444_v44, %v4953_v21  ;;  %v5476_v39 = vadd.f32 %v5444_v44, %v4957_v10  ;;  %v7987_v57 = vld [vmem:[#allocation84_spill] sm:$0xff]  ;;  %v7989_v14 = vld [vmem:[#allocation78_spill] sm:$0xff] }
 0x242   :  { %v5480_v18 = vadd.f32 %v5444_v44, %v4961_v7  ;;  %v5484_v38 = vadd.f32 %v5444_v44, %v7985_v31  ;;  %v5488_v23 = vadd.f32 %v5444_v44, %v7987_v57  ;;  %v5492_v21 = vadd.f32 %v5444_v44, %v7989_v14 }
 0x243   :  { %v5496_v10 = vadd.f32 %v5444_v44, %v7991_v3  ;;  %v5500_v7 = vadd.f32 %v5444_v44, %v7993_v47  ;;  %vm1902_vm2 = vcmp.ge.f32.partialorder %v5448_v19, 0.0  ;;  %vm1903_vm3 = vcmp.ge.f32.partialorder %v5452_v5, 0.0 }
 0x244   :  { %7984 = vst [vmem:[#allocation27_spill] sm:$0xff] %v5480_v18  ;;  %7986 = vst [vmem:[#allocation32_spill] sm:$0xff] %v5484_v38  ;;  %v7995_v18 = vld [vmem:[#allocation5_spill] sm:$0xff]  ;;  %v7997_v38 = vld [vmem:[#allocation2_spill] sm:$0xff]  ;;  %vm1904_vm4 = vcmp.ge.f32.partialorder %v5456_v22, 0.0  ;;  %vm1905_vm5 = vcmp.ge.f32.partialorder %v5460_v50, 0.0 }
 0x245   :  { %7988 = vst [vmem:[#allocation35_spill] sm:$0xff] %v5488_v23  ;;  %7990 = vst [vmem:[#allocation67_spill] sm:$0xff] %v5492_v21  ;;  %v5504_v31 = vadd.f32 %v5444_v44, %v7995_v18  ;;  %v5508_v57 = vadd.f32 %v5444_v44, %v7997_v38  ;;  %v7999_v23 = vld [vmem:[#allocation4_spill] sm:$0xff]  ;;  %v8001_v21 = vld [vmem:[#allocation7_spill] sm:$0xff]  ;;  %vm1906_vm6 = vcmp.ge.f32.partialorder %v5464_v52, 0.0  ;;  %vm1907_vm7 = vcmp.ge.f32.partialorder %v5468_v55, 0.0 }
 0x246   :  { %7992 = vst [vmem:[#allocation72_spill] sm:$0xff] %v5496_v10  ;;  %7994 = vst [vmem:[#allocation76_spill] sm:$0xff] %v5500_v7  ;;  %v5512_v14 = vadd.f32 %v5444_v44, %v7999_v23  ;;  %v5516_v3 = vadd.f32 %v5444_v44, %v8001_v21  ;;  %v8003_v10 = vld [vmem:[#allocation9_spill] sm:$0xff]  ;;  %v8005_v7 = vld [vmem:[#allocation6_spill] sm:$0xff]  ;;  %vm1908_vm8 = vcmp.ge.f32.partialorder %v5472_v17, 0.0  ;;  %vm1909_vm9 = vcmp.ge.f32.partialorder %v5476_v39, 0.0 }
 0x247   :  { %7996 = vst [vmem:[#allocation70_spill] sm:$0xff] %v5504_v31  ;;  %7998 = vst [vmem:[#allocation74_spill] sm:$0xff] %v5508_v57  ;;  %v5520_v47 = vadd.f32 %v5444_v44, %v8003_v10  ;;  %v5524_v18 = vadd.f32 %v5444_v44, %v8005_v7  ;;  %v8007_v31 = vld [vmem:[#allocation8_spill] sm:$0xff]  ;;  %v8009_v57 = vld [vmem:[#allocation11_spill] sm:$0xff] }
 0x248   :  { %8000 = vst [vmem:[#allocation85_spill] sm:$0xff] %v5512_v14  ;;  %8002 = vst [vmem:[#allocation86_spill] sm:$0xff] %v5516_v3  ;;  %v5528_v38 = vadd.f32 %v5444_v44, %v8007_v31  ;;  %v5532_v23 = vadd.f32 %v5444_v44, %v8009_v57  ;;  %v8011_v14 = vld [vmem:[#allocation13_spill] sm:$0xff]  ;;  %v8013_v3 = vld [vmem:[#allocation10_spill] sm:$0xff] }
 0x249   :  { %8004 = vst [vmem:[#allocation88_spill] sm:$0xff] %v5520_v47  ;;  %8006 = vst [vmem:[#allocation90_spill] sm:$0xff] %v5524_v18  ;;  %v5536_v21 = vadd.f32 %v5444_v44, %v8011_v14  ;;  %v5540_v10 = vadd.f32 %v5444_v44, %v8013_v3  ;;  %v8015_v47 = vld [vmem:[#allocation12_spill] sm:$0xff] }
 0x24a   :  { %8008 = vst [vmem:[#allocation87_spill] sm:$0xff] %v5528_v38  ;;  %8010 = vst [vmem:[#allocation89_spill] sm:$0xff] %v5532_v23  ;;  %v5544_v7 = vadd.f32 %v5444_v44, %v8015_v47  ;;  %v8017_v18 = vld [vmem:[#allocation16_spill] sm:$0xff]  ;;  %v8021_v23 = vld [vmem:[#allocation14_spill] sm:$0xff] }
 0x24b   :  { %8012 = vst [vmem:[#allocation92_spill] sm:$0xff] %v5536_v21  ;;  %8014 = vst [vmem:[#allocation93_spill] sm:$0xff] %v5540_v10  ;;  %v5548_v31 = vadd.f32 %v5444_v44, %v8017_v18  ;;  %v8019_v38 = vld [vmem:[#allocation20_spill] sm:$0xff]  ;;  %v5556_v14 = vadd.f32 %v5444_v44, %v8021_v23  ;;  %v8023_v21 = vld [vmem:[#allocation18_spill] sm:$0xff] }
 0x24c   :  { %8016 = vst [vmem:[#allocation91_spill] sm:$0xff] %v5544_v7  ;;  %v5552_v57 = vadd.f32 %v5444_v44, %v8019_v38  ;;  %v5560_v3 = vadd.f32 %v5444_v44, %v8023_v21  ;;  %v8025_v10 = vld [vmem:[#allocation24_spill] sm:$0xff] }
 0x24d   :  { %8018 = vst [vmem:[#allocation80_spill] sm:$0xff] %v5548_v31  ;;  %8022 = vst [vmem:[#allocation78_spill] sm:$0xff] %v5556_v14  ;;  %v5564_v47 = vadd.f32 %v5444_v44, %v8025_v10  ;;  %v8027_v7 = vld [vmem:[#allocation28_spill] sm:$0xff]  ;;  %v8029_v31 = vld [vmem:[#allocation22_spill] sm:$0xff] }
 0x24e   :  { %8020 = vst [vmem:[#allocation84_spill] sm:$0xff] %v5552_v57  ;;  %8024 = vst [vmem:[#allocation82_spill] sm:$0xff] %v5560_v3  ;;  %v5568_v18 = vadd.f32 %v5444_v44, %v8027_v7  ;;  %v5572_v38 = vadd.f32 %v5444_v44, %v8029_v31  ;;  %v8031_v57 = vld [vmem:[#allocation26_spill] sm:$0xff]  ;;  %v8033_v14 = vld [vmem:[#allocation31_spill] sm:$0xff] }
 0x24f   :  { %8026 = vst [vmem:[#allocation3_spill] sm:$0xff] %v5564_v47  ;;  %v5576_v23 = vadd.f32 %v5444_v44, %v8031_v57  ;;  %v5580_v21 = vadd.f32 %v5444_v44, %v8033_v14  ;;  %v8035_v3 = vld [vmem:[#allocation34_spill] sm:$0xff] }
 0x250   :  { %8028 = vst [vmem:[#allocation5_spill] sm:$0xff] %v5568_v18  ;;  %8030 = vst [vmem:[#allocation2_spill] sm:$0xff] %v5572_v38  ;;  %v5584_v10 = vadd.f32 %v5444_v44, %v8035_v3  ;;  %v8037_v47 = vld [vmem:[#allocation30_spill] sm:$0xff]  ;;  %v8039_v18 = vld [vmem:[#allocation33_spill] sm:$0xff] }
 0x251   :  { %8032 = vst [vmem:[#allocation4_spill] sm:$0xff] %v5576_v23  ;;  %8034 = vst [vmem:[#allocation7_spill] sm:$0xff] %v5580_v21  ;;  %v5588_v7 = vadd.f32 %v5444_v44, %v8037_v47  ;;  %v5592_v31 = vadd.f32 %v5444_v44, %v8039_v18  ;;  %v8041_v38 = vld [vmem:[#allocation37_spill] sm:$0xff]  ;;  %v8043_v23 = vld [vmem:[#allocation39_spill] sm:$0xff] }
 0x252   :  { %8036 = vst [vmem:[#allocation9_spill] sm:$0xff] %v5584_v10  ;;  %v5596_v57 = vadd.f32 %v5444_v44, %v8041_v38  ;;  %v5600_v14 = vadd.f32 %v5444_v44, %v8043_v23  ;;  %v8045_v21 = vld [vmem:[#allocation36_spill] sm:$0xff]  ;;  %v8047_v10 = vld [vmem:[#allocation38_spill] sm:$0xff] }
 0x253   :  { %8038 = vst [vmem:[#allocation6_spill] sm:$0xff] %v5588_v7  ;;  %8040 = vst [vmem:[#allocation8_spill] sm:$0xff] %v5592_v31  ;;  %v5604_v3 = vadd.f32 %v5444_v44, %v8045_v21  ;;  %v5608_v47 = vadd.f32 %v5444_v44, %v8047_v10  ;;  %v8049_v7 = vld [vmem:[#allocation41_spill] sm:$0xff]  ;;  %v8051_v31 = vld [vmem:[#allocation43_spill] sm:$0xff] }
 0x254   :  { %8042 = vst [vmem:[#allocation11_spill] sm:$0xff] %v5596_v57  ;;  %8044 = vst [vmem:[#allocation13_spill] sm:$0xff] %v5600_v14  ;;  %v5612_v18 = vadd.f32 %v5444_v44, %v8049_v7  ;;  %v5616_v38 = vadd.f32 %v5444_v44, %v8051_v31  ;;  %v8053_v57 = vld [vmem:[#allocation40_spill] sm:$0xff]  ;;  %v8055_v14 = vld [vmem:[#allocation42_spill] sm:$0xff] }
 0x255   :  { %8046 = vst [vmem:[#allocation10_spill] sm:$0xff] %v5604_v3  ;;  %8048 = vst [vmem:[#allocation12_spill] sm:$0xff] %v5608_v47  ;;  %v5620_v23 = vadd.f32 %v5444_v44, %v8053_v57  ;;  %v5624_v21 = vadd.f32 %v5444_v44, %v8055_v14  ;;  %v8057_v3 = vld [vmem:[#allocation45_spill] sm:$0xff]  ;;  %v8059_v47 = vld [vmem:[#allocation47_spill] sm:$0xff] }
 0x256   :  { %8050 = vst [vmem:[#allocation16_spill] sm:$0xff] %v5612_v18  ;;  %8052 = vst [vmem:[#allocation20_spill] sm:$0xff] %v5616_v38  ;;  %v5628_v10 = vadd.f32 %v5444_v44, %v8057_v3  ;;  %v5632_v7 = vadd.f32 %v5444_v44, %v8059_v47  ;;  %v8061_v18 = vld [vmem:[#allocation44_spill] sm:$0xff]  ;;  %v8063_v38 = vld [vmem:[#allocation46_spill] sm:$0xff] }
 0x257   :  { %8054 = vst [vmem:[#allocation14_spill] sm:$0xff] %v5620_v23  ;;  %8056 = vst [vmem:[#allocation18_spill] sm:$0xff] %v5624_v21  ;;  %v5636_v31 = vadd.f32 %v5444_v44, %v8061_v18  ;;  %v5640_v57 = vadd.f32 %v5444_v44, %v8063_v38  ;;  %v8065_v23 = vld [vmem:[#allocation49_spill] sm:$0xff]  ;;  %v8067_v21 = vld [vmem:[#allocation51_spill] sm:$0xff] }
 0x258   :  { %8058 = vst [vmem:[#allocation24_spill] sm:$0xff] %v5628_v10  ;;  %8060 = vst [vmem:[#allocation28_spill] sm:$0xff] %v5632_v7  ;;  %v5644_v14 = vadd.f32 %v5444_v44, %v8065_v23  ;;  %v5648_v3 = vadd.f32 %v5444_v44, %v8067_v21  ;;  %v8069_v10 = vld [vmem:[#allocation48_spill] sm:$0xff]  ;;  %v8071_v7 = vld [vmem:[#allocation50_spill] sm:$0xff] }
 0x259   :  { %8062 = vst [vmem:[#allocation22_spill] sm:$0xff] %v5636_v31  ;;  %8064 = vst [vmem:[#allocation26_spill] sm:$0xff] %v5640_v57  ;;  %v5652_v47 = vadd.f32 %v5444_v44, %v8069_v10  ;;  %v5656_v18 = vadd.f32 %v5444_v44, %v8071_v7  ;;  %v8073_v31 = vld [vmem:[#allocation53_spill] sm:$0xff]  ;;  %v8075_v57 = vld [vmem:[#allocation55_spill] sm:$0xff] }
 0x25a   :  { %8066 = vst [vmem:[#allocation31_spill] sm:$0xff] %v5644_v14  ;;  %8068 = vst [vmem:[#allocation34_spill] sm:$0xff] %v5648_v3  ;;  %v5660_v38 = vadd.f32 %v5444_v44, %v8073_v31  ;;  %v5664_v23 = vadd.f32 %v5444_v44, %v8075_v57  ;;  %v8077_v14 = vld [vmem:[#allocation52_spill] sm:$0xff]  ;;  %v8079_v3 = vld [vmem:[#allocation54_spill] sm:$0xff] }
 0x25b   :  { %8070 = vst [vmem:[#allocation30_spill] sm:$0xff] %v5652_v47  ;;  %8072 = vst [vmem:[#allocation33_spill] sm:$0xff] %v5656_v18  ;;  %v5668_v21 = vadd.f32 %v5444_v44, %v8077_v14  ;;  %v5672_v10 = vadd.f32 %v5444_v44, %v8079_v3  ;;  %v8081_v47 = vld [vmem:[#allocation57_spill] sm:$0xff]  ;;  %v8083_v18 = vld [vmem:[#allocation59_spill] sm:$0xff] }
 0x25c   :  { %8074 = vst [vmem:[#allocation37_spill] sm:$0xff] %v5660_v38  ;;  %8076 = vst [vmem:[#allocation39_spill] sm:$0xff] %v5664_v23  ;;  %v5676_v7 = vadd.f32 %v5444_v44, %v8081_v47  ;;  %v5680_v31 = vadd.f32 %v5444_v44, %v8083_v18  ;;  %v8085_v38 = vld [vmem:[#allocation56_spill] sm:$0xff]  ;;  %v8087_v23 = vld [vmem:[#allocation58_spill] sm:$0xff] }
 0x25d   :  { %8078 = vst [vmem:[#allocation36_spill] sm:$0xff] %v5668_v21  ;;  %8080 = vst [vmem:[#allocation38_spill] sm:$0xff] %v5672_v10  ;;  %v5684_v57 = vadd.f32 %v5444_v44, %v8085_v38  ;;  %v5688_v14 = vadd.f32 %v5444_v44, %v8087_v23  ;;  %v8089_v21 = vld [vmem:[#allocation61_spill] sm:$0xff]  ;;  %v8091_v10 = vld [vmem:[#allocation63_spill] sm:$0xff] }
 0x25e   :  { %8082 = vst [vmem:[#allocation41_spill] sm:$0xff] %v5676_v7  ;;  %8084 = vst [vmem:[#allocation43_spill] sm:$0xff] %v5680_v31  ;;  %v5692_v3 = vadd.f32 %v5444_v44, %v8089_v21  ;;  %v5696_v47 = vadd.f32 %v5444_v44, %v8091_v10  ;;  %v8092_v7 = vld [vmem:[#allocation60_spill] sm:$0xff]  ;;  %v8093_v31 = vld [vmem:[#allocation62_spill] sm:$0xff] }
 0x25f   :  { %8086 = vst [vmem:[#allocation40_spill] sm:$0xff] %v5684_v57  ;;  %8088 = vst [vmem:[#allocation42_spill] sm:$0xff] %v5688_v14  ;;  %v5700_v18 = vadd.f32 %v5444_v44, %v8092_v7  ;;  %v5704_v38 = vadd.f32 %v5444_v44, %v8093_v31  ;;  %v8094_v57 = vld [vmem:[#allocation65_spill] sm:$0xff]  ;;  %v8095_v14 = vld [vmem:[#allocation68_spill] sm:$0xff]  ;;  %v5720_v7 = vadd.f32 %v5444_v44, %v5201_v51 }
 0x260   :  { %8090 = vst [vmem:[#allocation45_spill] sm:$0xff] %v5692_v3  ;;  %v5708_v23 = vadd.f32 %v5444_v44, %v8094_v57  ;;  %v5712_v21 = vadd.f32 %v5444_v44, %v8095_v14  ;;  %v8096_v3 = vld [vmem:[#allocation64_spill] sm:$0xff]  ;;  %v5724_v31 = vadd.f32 %v5444_v44, %v5205_v11  ;;  %v5728_v57 = vadd.f32 %v5444_v44, %v5209_v37 }
 0x261   :  { %v5716_v10 = vadd.f32 %v5444_v44, %v8096_v3  ;;  %v5732_v14 = vadd.f32 %v5444_v44, %v5213_v4  ;;  %v5736_v3 = vadd.f32 %v5444_v44, %v5217_v43  ;;  %v5740_v51 = vadd.f32 %v5444_v44, %v5221_v6 }
 0x262   :  { %v5744_v11 = vadd.f32 %v5444_v44, %v5225_v40  ;;  %v5748_v37 = vadd.f32 %v5444_v44, %v5229_v59  ;;  %v5752_v4 = vadd.f32 %v5444_v44, %v5233_v32  ;;  %v5756_v43 = vadd.f32 %v5444_v44, %v5237_v12 }
 0x263   :  { %v5760_v6 = vadd.f32 %v5444_v44, %v5241_v58  ;;  %v5764_v40 = vadd.f32 %v5444_v44, %v5245_v36  ;;  %v5768_v59 = vadd.f32 %v5444_v44, %v5249_v45  ;;  %v5772_v32 = vadd.f32 %v5444_v44, %v5253_v9 }
 0x264   :  { %8097 = vst [vmem:[#allocation47_spill] sm:$0xff] %v5752_v4  ;;  %8098 = vst [vmem:[#allocation44_spill] sm:$0xff] %v5756_v43  ;;  %v5776_v12 = vadd.f32 %v5444_v44, %v5257_v27  ;;  %v5780_v58 = vadd.f32 %v5444_v44, %v5261_v2  ;;  %v5784_v36 = vadd.f32 %v5444_v44, %v5265_v25 }
 0x265   :  { %8099 = vst [vmem:[#allocation46_spill] sm:$0xff] %v5760_v6  ;;  %8100 = vst [vmem:[#allocation49_spill] sm:$0xff] %v5764_v40  ;;  %v5788_v45 = vadd.f32 %v5444_v44, %v5269_v60  ;;  %v5792_v9 = vadd.f32 %v5444_v44, %v5273_v15  ;;  %v5796_v27 = vadd.f32 %v5444_v44, %v5277_v54 }
 0x266   :  { %8101 = vst [vmem:[#allocation51_spill] sm:$0xff] %v5768_v59  ;;  %8102 = vst [vmem:[#allocation48_spill] sm:$0xff] %v5772_v32  ;;  %v5800_v2 = vadd.f32 %v5444_v44, %v5281_v13  ;;  %v5804_v25 = vadd.f32 %v5444_v44, %v5285_v63  ;;  %v5808_v60 = vadd.f32 %v5444_v44, %v5289_v41 }
 0x267   :  { %8103 = vst [vmem:[#allocation50_spill] sm:$0xff] %v5776_v12  ;;  %8104 = vst [vmem:[#allocation53_spill] sm:$0xff] %v5780_v58  ;;  %v5812_v15 = vadd.f32 %v5444_v44, %v5293_v62  ;;  %v5816_v54 = vadd.f32 %v5444_v44, %v5297_v49  ;;  %v5820_v13 = vadd.f32 %v5444_v44, %v5301_v28  ;;  %v8192_v12 = vld [vmem:[#allocation84_spill] sm:$0xff] }
 0x268   :  { %8105 = vst [vmem:[#allocation55_spill] sm:$0xff] %v5784_v36  ;;  %8106 = vst [vmem:[#allocation52_spill] sm:$0xff] %v5788_v45  ;;  %v5824_v63 = vadd.f32 %v5444_v44, %v5305_v42  ;;  %v5828_v41 = vadd.f32 %v5444_v44, %v5309_v29  ;;  %v5832_v62 = vadd.f32 %v5444_v44, %v5313_v53  ;;  %v6055_v32 = vmul.f32 0.01, %v8192_v12 }
 0x269   :  { %8107 = vst [vmem:[#allocation54_spill] sm:$0xff] %v5792_v9  ;;  %8108 = vst [vmem:[#allocation57_spill] sm:$0xff] %v5796_v27  ;;  %v5836_v49 = vadd.f32 %v5444_v44, %v5317_v24  ;;  %v5840_v28 = vadd.f32 %v5444_v44, %v5321_v0  ;;  %v5844_v42 = vadd.f32 %v5444_v44, %v5325_v1  ;;  %v8185_v9 = vld [vmem:[#allocation93_spill] sm:$0xff] }
 0x26a   :  { %8109 = vst [vmem:[#allocation59_spill] sm:$0xff] %v5800_v2  ;;  %8110 = vst [vmem:[#allocation56_spill] sm:$0xff] %v5804_v25  ;;  %v5848_v29 = vadd.f32 %v5444_v44, %v5329_v26  ;;  %v6040_v45 = vmul.f32 0.01, %v8185_v9 }
 0x26b   :  { %8111 = vst [vmem:[#allocation58_spill] sm:$0xff] %v5808_v60  ;;  %8112 = vst [vmem:[#allocation61_spill] sm:$0xff] %v5812_v15  ;;  %v8181_v60 = vld [vmem:[#allocation87_spill] sm:$0xff] }
 0x26c   :  { %8113 = vst [vmem:[#allocation63_spill] sm:$0xff] %v5816_v54  ;;  %8114 = vst [vmem:[#allocation60_spill] sm:$0xff] %v5820_v13  ;;  %v6025_v25 = vmul.f32 0.01, %v8181_v60 }
 0x26d   :  { %8115 = vst [vmem:[#allocation62_spill] sm:$0xff] %v5824_v63  ;;  %8116 = vst [vmem:[#allocation65_spill] sm:$0xff] %v5828_v41  ;;  %v8122_v41 = vld [vmem:[#allocation66_spill] sm:$0xff] }
 0x26e   :  { %8117 = vst [vmem:[#allocation68_spill] sm:$0xff] %v5832_v62  ;;  %8118 = vst [vmem:[#allocation64_spill] sm:$0xff] %v5836_v49  ;;  %v5852_v53 = vadd.f32 %v5444_v44, %v8122_v41  ;;  %v8124_v62 = vld [vmem:[#allocation71_spill] sm:$0xff]  ;;  %v5872_v41 = vadd.f32 %v5444_v44, %v5353_v8  ;;  %v5892_v8 = vadd.f32 %v5444_v44, %v5373_v61 }
 0x26f   :  { %8119 = vst [vmem:[#allocation94_spill] sm:$0xff] %v5840_v28  ;;  %8120 = vst [vmem:[#allocation95_spill] sm:$0xff] %v5844_v42  ;;  %v5856_v24 = vadd.f32 %v5444_v44, %v8124_v62  ;;  %v8126_v49 = vld [vmem:[#allocation75_spill] sm:$0xff]  ;;  %v8128_v28 = vld [vmem:[#allocation69_spill] sm:$0xff]  ;;  %v5876_v62 = vadd.f32 %v5444_v44, %v5357_v35 }
 0x270   :  { %8121 = vst [vmem:[#allocation96_spill] sm:$0xff] %v5848_v29  ;;  %8123 = vst [vmem:[#allocation66_spill] sm:$0xff] %v5852_v53  ;;  %v5860_v0 = vadd.f32 %v5444_v44, %v8126_v49  ;;  %v5864_v1 = vadd.f32 %v5444_v44, %v8128_v28  ;;  %v8130_v42 = vld [vmem:[#allocation73_spill] sm:$0xff]  ;;  %v5880_v49 = vadd.f32 %v5444_v44, %v5361_v20  ;;  %v8175_v29 = vld [vmem:[#allocation74_spill] sm:$0xff] }
 0x271   :  { %8125 = vst [vmem:[#allocation71_spill] sm:$0xff] %v5856_v24  ;;  %v5868_v26 = vadd.f32 %v5444_v44, %v8130_v42  ;;  %8132 = vst [vmem:[#allocation97_spill] sm:$0xff] %v5872_v41  ;;  %v5884_v28 = vadd.f32 %v5444_v44, %v5365_v56  ;;  %v5888_v42 = vadd.f32 %v5444_v44, %v5369_v48  ;;  %v8138_v41 = vld [vmem:[#allocation79_spill] sm:$0xff]  ;;  %v6004_v63 = vmul.f32 0.01, %v8175_v29 }
 0x272   :  { %8127 = vst [vmem:[#allocation75_spill] sm:$0xff] %v5860_v0  ;;  %8129 = vst [vmem:[#allocation69_spill] sm:$0xff] %v5864_v1  ;;  %v5896_v35 = vadd.f32 %v5444_v44, %v8138_v41  ;;  %v8172_v0 = vld [vmem:[#allocation76_spill] sm:$0xff]  ;;  %vm1917_vm1 = vcmp.ge.f32.partialorder %v8175_v29, 0.0 }
 0x273   :  { %8131 = vst [vmem:[#allocation73_spill] sm:$0xff] %v5868_v26  ;;  %8133 = vst [vmem:[#allocation98_spill] sm:$0xff] %v5876_v62  ;;  %v8140_v62 = vld [vmem:[#allocation83_spill] sm:$0xff]  ;;  %vm1915_vm15 = vcmp.ge.f32.partialorder %v8172_v0, 0.0 }
 0x274   :  { %8134 = vst [vmem:[#allocation99_spill] sm:$0xff] %v5880_v49  ;;  %8135 = vst [vmem:[#allocation100_spill] sm:$0xff] %v5884_v28  ;;  %v5900_v20 = vadd.f32 %v5444_v44, %v8140_v62  ;;  %v8142_v49 = vld [vmem:[#allocation77_spill] sm:$0xff] }
 0x275   :  { %8136 = vst [vmem:[#allocation101_spill] sm:$0xff] %v5888_v42  ;;  %8137 = vst [vmem:[#allocation102_spill] sm:$0xff] %v5892_v8  ;;  %v5904_v56 = vadd.f32 %v5444_v44, %v8142_v49  ;;  %v8144_v28 = vld [vmem:[#allocation81_spill] sm:$0xff] }
 0x276   :  { %8139 = vst [vmem:[#allocation79_spill] sm:$0xff] %v5896_v35  ;;  %8141 = vst [vmem:[#allocation83_spill] sm:$0xff] %v5900_v20  ;;  %v5908_v48 = vadd.f32 %v5444_v44, %v8144_v28  ;;  %v8146_v42 = vld [vmem:[#allocation17_spill] sm:$0xff]  ;;  %v8150_v35 = vld [vmem:[#allocation15_spill] sm:$0xff] }
 0x277   :  { %8143 = vst [vmem:[#allocation77_spill] sm:$0xff] %v5904_v56  ;;  %v5912_v61 = vadd.f32 %v5444_v44, %v8146_v42  ;;  %v8148_v8 = vld [vmem:[#allocation21_spill] sm:$0xff]  ;;  %v5920_v62 = vadd.f32 %v5444_v44, %v8150_v35  ;;  %v8152_v20 = vld [vmem:[#allocation19_spill] sm:$0xff]  ;;  %v5932_v42 = vadd.f32 %v5444_v44, %v5413_v34  ;;  %v5952_v34 = vadd.f32 %v5444_v44, %v5433_v46 }
 0x278   :  { %8145 = vst [vmem:[#allocation81_spill] sm:$0xff] %v5908_v48  ;;  %v5916_v41 = vadd.f32 %v5444_v44, %v8148_v8  ;;  %v5924_v49 = vadd.f32 %v5444_v44, %v8152_v20  ;;  %v8154_v56 = vld [vmem:[#allocation25_spill] sm:$0xff]  ;;  %v5944_v20 = vadd.f32 %v5444_v44, %v5425_v33  ;;  %v8165_v33 = vld [vmem:[#allocation27_spill] sm:$0xff]  ;;  %v2031_v46 = vmul.f32 0.01, %v5452_v5  ;;  %8186 = vst [vmem:[#allocation76_spill] sm:$0xff] %v6040_v45 }
 0x279   :  { %8147 = vst [vmem:[#allocation17_spill] sm:$0xff] %v5912_v61  ;;  %8151 = vst [vmem:[#allocation15_spill] sm:$0xff] %v5920_v62  ;;  %v5928_v28 = vadd.f32 %v5444_v44, %v8154_v56  ;;  %v8157_v61 = vld [vmem:[#allocation29_spill] sm:$0xff]  ;;  %v5948_v56 = vadd.f32 %v5444_v44, %v5429_v30  ;;  %vm1910_vm10 = vcmp.ge.f32.partialorder %v8165_v33, 0.0  ;;  %v2030_v30 = vmul.f32 0.01, %v5448_v19 }
 0x27a   :  { %8149 = vst [vmem:[#allocation21_spill] sm:$0xff] %v5916_v41  ;;  %8153 = vst [vmem:[#allocation19_spill] sm:$0xff] %v5924_v49  ;;  %v5936_v8 = vadd.f32 %v5444_v44, %v8157_v61  ;;  %v8159_v41 = vld [vmem:[#allocation23_spill] sm:$0xff]  ;;  %v5956_v61 = vadd.f32 %v5444_v44, %v5437_v16  ;;  %v2032_v16 = vmul.f32 0.01, %v5456_v22  ;;  %v8170_v49 = vld [vmem:[#allocation72_spill] sm:$0xff]  ;;  %v5991_v1 = vsel %vm1903_vm3, %v5452_v5, %v2031_v46 }
 0x27b   :  { %8155 = vst [vmem:[#allocation25_spill] sm:$0xff] %v5928_v28  ;;  %8156 = vst [vmem:[#allocation103_spill] sm:$0xff] %v5932_v42  ;;  %v5940_v35 = vadd.f32 %v5444_v44, %v8159_v41  ;;  %v8166_v44 = vld [vmem:[#allocation32_spill] sm:$0xff]  ;;  %v8167_v41 = vld [vmem:[#allocation35_spill] sm:$0xff]  ;;  %v2038_v42 = vmul.f32 0.01, %v8165_v33  ;;  %v5982_v28 = vsel %vm1902_vm2, %v5448_v19, %v2030_v30 }
 0x27c   :  { %8158 = vst [vmem:[#allocation29_spill] sm:$0xff] %v5936_v8  ;;  %8161 = vst [vmem:[#allocation104_spill] sm:$0xff] %v5944_v20  ;;  %vm1911_vm11 = vcmp.ge.f32.partialorder %v8166_v44, 0.0  ;;  %vm1912_vm12 = vcmp.ge.f32.partialorder %v8167_v41, 0.0  ;;  %v8168_v20 = vld [vmem:[#allocation67_spill] sm:$0xff]  ;;  %vm1914_vm14 = vcmp.ge.f32.partialorder %v8170_v49, 0.0  ;;  %v6000_v53 = vsel %vm1904_vm4, %v5456_v22, %v2032_v16 }
 0x27d   :  { %8160 = vst [vmem:[#allocation23_spill] sm:$0xff] %v5940_v35  ;;  %8162 = vst [vmem:[#allocation105_spill] sm:$0xff] %v5948_v56  ;;  %v2035_v56 = vmul.f32 0.01, %v5468_v55  ;;  %vm1913_vm13 = vcmp.ge.f32.partialorder %v8168_v20, 0.0  ;;  %v8173_v30 = vld [vmem:[#allocation70_spill] sm:$0xff] }
 0x27e   :  { %8163 = vst [vmem:[#allocation106_spill] sm:$0xff] %v5952_v34  ;;  %8164 = vst [vmem:[#allocation107_spill] sm:$0xff] %v5956_v61  ;;  %v2033_v61 = vmul.f32 0.01, %v5460_v50  ;;  %v2034_v34 = vmul.f32 0.01, %v5464_v52 }
 0x27f   :  { %v2036_v35 = vmul.f32 0.01, %v5472_v17  ;;  %v2037_v8 = vmul.f32 0.01, %v5476_v39  ;;  %8169 = vst [vmem:[#allocation27_spill] sm:$0xff] %v5982_v28  ;;  %8171 = vst [vmem:[#allocation32_spill] sm:$0xff] %v5991_v1  ;;  %v6045_v36 = vsel %vm1907_vm7, %v5468_v55, %v2035_v56 }
 0x280   :  { %v2039_v62 = vmul.f32 0.01, %v8166_v44  ;;  %v2040_v48 = vmul.f32 0.01, %v8167_v41  ;;  %v2041_v26 = vmul.f32 0.01, %v8168_v20  ;;  %v6015_v54 = vsel %vm1905_vm5, %v5460_v50, %v2033_v61 }
 0x281   :  { %v2042_v24 = vmul.f32 0.01, %v8170_v49  ;;  %v2043_v19 = vmul.f32 0.01, %v8172_v0  ;;  %v2044_v28 = vmul.f32 0.01, %v8173_v30  ;;  %v6030_v2 = vsel %vm1906_vm6, %v5464_v52, %v2034_v34 }
 0x282   :  { %8174 = vst [vmem:[#allocation35_spill] sm:$0xff] %v6000_v53  ;;  %vm1916_vm0 = vcmp.ge.f32.partialorder %v8173_v30, 0.0  ;;  %v8176_v5 = vld [vmem:[#allocation85_spill] sm:$0xff]  ;;  %v8177_v1 = vld [vmem:[#allocation86_spill] sm:$0xff]  ;;  %8178 = vst [vmem:[#allocation67_spill] sm:$0xff] %v6015_v54  ;;  %v6060_v59 = vsel %vm1908_vm8, %v5472_v17, %v2036_v35  ;;  %vm1922_vm6 = vcmp.ge.f32.partialorder %v8181_v60, 0.0 }
 0x283   :  { %v6007_v46 = vmul.f32 0.01, %v8176_v5  ;;  %v6010_v13 = vmul.f32 0.01, %v8177_v1  ;;  %v8179_v22 = vld [vmem:[#allocation88_spill] sm:$0xff]  ;;  %v8180_v53 = vld [vmem:[#allocation90_spill] sm:$0xff] }
 0x284   :  { %v6019_v16 = vmul.f32 0.01, %v8179_v22  ;;  %v6022_v15 = vmul.f32 0.01, %v8180_v53  ;;  %8182 = vst [vmem:[#allocation72_spill] sm:$0xff] %v6030_v2  ;;  %vm1918_vm2 = vcmp.ge.f32.partialorder %v8176_v5, 0.0 }
 0x285   :  { %v8183_v50 = vld [vmem:[#allocation89_spill] sm:$0xff]  ;;  %v8184_v54 = vld [vmem:[#allocation92_spill] sm:$0xff]  ;;  %8187 = vst [vmem:[#allocation70_spill] sm:$0xff] %v6045_v36  ;;  %vm1919_vm3 = vcmp.ge.f32.partialorder %v8177_v1, 0.0  ;;  %v8188_v52 = vld [vmem:[#allocation91_spill] sm:$0xff]  ;;  %vm1920_vm4 = vcmp.ge.f32.partialorder %v8179_v22, 0.0 }
 0x286   :  { %v6034_v61 = vmul.f32 0.01, %v8183_v50  ;;  %v6037_v27 = vmul.f32 0.01, %v8184_v54  ;;  %v6049_v34 = vmul.f32 0.01, %v8188_v52 }
 0x287   :  { %v8190_v2 = vld [vmem:[#allocation80_spill] sm:$0xff]  ;;  %8193 = vst [vmem:[#allocation86_spill] sm:$0xff] %v6055_v32  ;;  %8194 = vst [vmem:[#allocation88_spill] sm:$0xff] %v6060_v59  ;;  %v8195_v55 = vld [vmem:[#allocation78_spill] sm:$0xff]  ;;  %v6075_v32 = vsel %vm1909_vm9, %v5476_v39, %v2037_v8  ;;  %vm1921_vm5 = vcmp.ge.f32.partialorder %v8180_v53, 0.0  ;;  %vm1923_vm7 = vcmp.ge.f32.partialorder %v8183_v50, 0.0 }
 0x288   :  { %8189 = vst [vmem:[#allocation74_spill] sm:$0xff] %v6049_v34  ;;  %v6052_v58 = vmul.f32 0.01, %v8190_v2  ;;  %v6064_v56 = vmul.f32 0.01, %v8195_v55  ;;  %v8197_v36 = vld [vmem:[#allocation82_spill] sm:$0xff] }
 0x289   :  { %v6067_v40 = vmul.f32 0.01, %v8197_v36  ;;  %v8199_v34 = vld [vmem:[#allocation3_spill] sm:$0xff]  ;;  %8201 = vst [vmem:[#allocation92_spill] sm:$0xff] %v6075_v32  ;;  %v8202_v17 = vld [vmem:[#allocation5_spill] sm:$0xff]  ;;  %v8204_v59 = vld [vmem:[#allocation2_spill] sm:$0xff] }
 0x28a   :  { %8191 = vst [vmem:[#allocation85_spill] sm:$0xff] %v6052_v58  ;;  %8196 = vst [vmem:[#allocation90_spill] sm:$0xff] %v6064_v56  ;;  %v6070_v6 = vmul.f32 0.01, %v8199_v34  ;;  %v6079_v35 = vmul.f32 0.01, %v8202_v17 }
 0x28b   :  { %8198 = vst [vmem:[#allocation87_spill] sm:$0xff] %v6067_v40  ;;  %v6082_v58 = vmul.f32 0.01, %v8204_v59  ;;  %v8206_v56 = vld [vmem:[#allocation4_spill] sm:$0xff]  ;;  %v8209_v39 = vld [vmem:[#allocation7_spill] sm:$0xff]  ;;  %v8211_v32 = vld [vmem:[#allocation9_spill] sm:$0xff] }
 0x28c   :  { %8200 = vst [vmem:[#allocation89_spill] sm:$0xff] %v6070_v6  ;;  %8203 = vst [vmem:[#allocation93_spill] sm:$0xff] %v6079_v35  ;;  %v6085_v45 = vmul.f32 0.01, %v8206_v56  ;;  %v6090_v6 = vsel %vm1910_vm10, %v8165_v33, %v2038_v42  ;;  %v6094_v8 = vmul.f32 0.01, %v8209_v39 }
 0x28d   :  { %8205 = vst [vmem:[#allocation91_spill] sm:$0xff] %v6082_v58  ;;  %8208 = vst [vmem:[#allocation84_spill] sm:$0xff] %v6090_v6  ;;  %v6097_v40 = vmul.f32 0.01, %v8211_v32  ;;  %v8213_v35 = vld [vmem:[#allocation6_spill] sm:$0xff]  ;;  %v8216_v42 = vld [vmem:[#allocation8_spill] sm:$0xff] }
 0x28e   :  { %8207 = vst [vmem:[#allocation80_spill] sm:$0xff] %v6085_v45  ;;  %8210 = vst [vmem:[#allocation78_spill] sm:$0xff] %v6094_v8  ;;  %v6100_v43 = vmul.f32 0.01, %v8213_v35  ;;  %v6105_v45 = vsel %vm1911_vm11, %v8166_v44, %v2039_v62  ;;  %v6109_v33 = vmul.f32 0.01, %v8216_v42 }
 0x28f   :  { %8212 = vst [vmem:[#allocation82_spill] sm:$0xff] %v6097_v40  ;;  %8215 = vst [vmem:[#allocation5_spill] sm:$0xff] %v6105_v45  ;;  %v8218_v6 = vld [vmem:[#allocation11_spill] sm:$0xff]  ;;  %v8220_v8 = vld [vmem:[#allocation13_spill] sm:$0xff]  ;;  %vm1924_vm8 = vcmp.ge.f32.partialorder %v8184_v54, 0.0  ;;  %vm1925_vm9 = vcmp.ge.f32.partialorder %v8185_v9, 0.0 }
 0x290   :  { %8214 = vst [vmem:[#allocation3_spill] sm:$0xff] %v6100_v43  ;;  %8217 = vst [vmem:[#allocation2_spill] sm:$0xff] %v6109_v33  ;;  %v6112_v58 = vmul.f32 0.01, %v8218_v6  ;;  %v6115_v4 = vmul.f32 0.01, %v8220_v8  ;;  %v6120_v43 = vsel %vm1912_vm12, %v8167_v41, %v2040_v48 }
 0x291   :  { %8222 = vst [vmem:[#allocation9_spill] sm:$0xff] %v6120_v43  ;;  %v8223_v62 = vld [vmem:[#allocation10_spill] sm:$0xff]  ;;  %v8225_v45 = vld [vmem:[#allocation12_spill] sm:$0xff]  ;;  %vm1926_vm10 = vcmp.ge.f32.partialorder %v8188_v52, 0.0  ;;  %vm1927_vm11 = vcmp.ge.f32.partialorder %v8190_v2, 0.0  ;;  %vm1928_vm12 = vcmp.ge.f32.partialorder %v8192_v12, 0.0 }
 0x292   :  { %8219 = vst [vmem:[#allocation4_spill] sm:$0xff] %v6112_v58  ;;  %8221 = vst [vmem:[#allocation7_spill] sm:$0xff] %v6115_v4  ;;  %v6124_v44 = vmul.f32 0.01, %v8223_v62  ;;  %v6127_v40 = vmul.f32 0.01, %v8225_v45  ;;  %v6135_v4 = vsel %vm1913_vm13, %v8168_v20, %v2041_v26 }
 0x293   :  { %v8227_v33 = vld [vmem:[#allocation16_spill] sm:$0xff]  ;;  %8229 = vst [vmem:[#allocation12_spill] sm:$0xff] %v6135_v4  ;;  %v8232_v43 = vld [vmem:[#allocation14_spill] sm:$0xff]  ;;  %vm1929_vm13 = vcmp.ge.f32.partialorder %v8195_v55, 0.0 }
 0x294   :  { %8224 = vst [vmem:[#allocation6_spill] sm:$0xff] %v6124_v44  ;;  %8226 = vst [vmem:[#allocation11_spill] sm:$0xff] %v6127_v40  ;;  %v6130_v42 = vmul.f32 0.01, %v8227_v33  ;;  %v8230_v48 = vld [vmem:[#allocation20_spill] sm:$0xff]  ;;  %v8234_v44 = vld [vmem:[#allocation18_spill] sm:$0xff] }
 0x295   :  { %v6139_v41 = vmul.f32 0.01, %v8230_v48  ;;  %v6142_v58 = vmul.f32 0.01, %v8232_v43  ;;  %v6145_v62 = vmul.f32 0.01, %v8234_v44 }
 0x296   :  { %8228 = vst [vmem:[#allocation13_spill] sm:$0xff] %v6130_v42  ;;  %v6150_v42 = vsel %vm1914_vm14, %v8170_v49, %v2042_v24  ;;  %v8237_v26 = vld [vmem:[#allocation24_spill] sm:$0xff]  ;;  %v8244_v24 = vld [vmem:[#allocation26_spill] sm:$0xff]  ;;  %vm1930_vm14 = vcmp.ge.f32.partialorder %v8197_v36, 0.0 }
 0x297   :  { %8231 = vst [vmem:[#allocation16_spill] sm:$0xff] %v6139_v41  ;;  %8233 = vst [vmem:[#allocation14_spill] sm:$0xff] %v6142_v58  ;;  %v6154_v20 = vmul.f32 0.01, %v8237_v26  ;;  %v8239_v4 = vld [vmem:[#allocation28_spill] sm:$0xff]  ;;  %v8241_v41 = vld [vmem:[#allocation22_spill] sm:$0xff] }
 0x298   :  { %8235 = vst [vmem:[#allocation18_spill] sm:$0xff] %v6145_v62  ;;  %8236 = vst [vmem:[#allocation108_spill] sm:$0xff] %v6150_v42  ;;  %v6157_v40 = vmul.f32 0.01, %v8239_v4  ;;  %v6160_v48 = vmul.f32 0.01, %v8241_v41  ;;  %v6165_v62 = vsel %vm1915_vm15, %v8172_v0, %v2043_v19 }
 0x299   :  { %8238 = vst [vmem:[#allocation109_spill] sm:$0xff] %v6154_v20  ;;  %8243 = vst [vmem:[#allocation110_spill] sm:$0xff] %v6165_v62  ;;  %v6169_v49 = vmul.f32 0.01, %v8244_v24  ;;  %v8246_v42 = vld [vmem:[#allocation31_spill] sm:$0xff]  ;;  %v8248_v20 = vld [vmem:[#allocation34_spill] sm:$0xff] }
 0x29a   :  { %8240 = vst [vmem:[#allocation28_spill] sm:$0xff] %v6157_v40  ;;  %8242 = vst [vmem:[#allocation22_spill] sm:$0xff] %v6160_v48  ;;  %v6172_v58 = vmul.f32 0.01, %v8246_v42  ;;  %v6175_v26 = vmul.f32 0.01, %v8248_v20  ;;  %v6180_v48 = vsel %vm1916_vm0, %v8173_v30, %v2044_v28 }
 0x29b   :  { %8245 = vst [vmem:[#allocation111_spill] sm:$0xff] %v6169_v49  ;;  %8250 = vst [vmem:[#allocation112_spill] sm:$0xff] %v6180_v48  ;;  %v8251_v0 = vld [vmem:[#allocation30_spill] sm:$0xff]  ;;  %v8253_v62 = vld [vmem:[#allocation33_spill] sm:$0xff]  ;;  %vm1931_vm15 = vcmp.ge.f32.partialorder %v8199_v34, 0.0  ;;  %vm1932_vm0 = vcmp.ge.f32.partialorder %v8202_v17, 0.0 }
 0x29c   :  { %8247 = vst [vmem:[#allocation31_spill] sm:$0xff] %v6172_v58  ;;  %8249 = vst [vmem:[#allocation34_spill] sm:$0xff] %v6175_v26  ;;  %v6184_v19 = vmul.f32 0.01, %v8251_v0  ;;  %v6187_v40 = vmul.f32 0.01, %v8253_v62  ;;  %v6196_v26 = vsel %vm1917_vm1, %v8175_v29, %v6004_v63 }
 0x29d   :  { %v8255_v49 = vld [vmem:[#allocation37_spill] sm:$0xff]  ;;  %8257 = vst [vmem:[#allocation114_spill] sm:$0xff] %v6196_v26  ;;  %v8258_v28 = vld [vmem:[#allocation39_spill] sm:$0xff]  ;;  %v8260_v48 = vld [vmem:[#allocation36_spill] sm:$0xff]  ;;  %vm1933_vm1 = vcmp.ge.f32.partialorder %v8204_v59, 0.0 }
 0x29e   :  { %8252 = vst [vmem:[#allocation30_spill] sm:$0xff] %v6184_v19  ;;  %8254 = vst [vmem:[#allocation113_spill] sm:$0xff] %v6187_v40  ;;  %v6190_v24 = vmul.f32 0.01, %v8255_v49  ;;  %v6200_v30 = vmul.f32 0.01, %v8258_v28 }
 0x29f   :  { %v6203_v58 = vmul.f32 0.01, %v8260_v48  ;;  %v8262_v19 = vld [vmem:[#allocation38_spill] sm:$0xff]  ;;  %v8265_v63 = vld [vmem:[#allocation41_spill] sm:$0xff]  ;;  %v8267_v26 = vld [vmem:[#allocation43_spill] sm:$0xff] }
 0x2a0   :  { %8256 = vst [vmem:[#allocation37_spill] sm:$0xff] %v6190_v24  ;;  %8259 = vst [vmem:[#allocation39_spill] sm:$0xff] %v6200_v30  ;;  %v6206_v62 = vmul.f32 0.01, %v8262_v19  ;;  %v6212_v24 = vsel %vm1918_vm2, %v8176_v5, %v6007_v46  ;;  %v6216_v29 = vmul.f32 0.01, %v8265_v63 }
 0x2a1   :  { %8261 = vst [vmem:[#allocation115_spill] sm:$0xff] %v6203_v58  ;;  %8264 = vst [vmem:[#allocation116_spill] sm:$0xff] %v6212_v24  ;;  %v6219_v40 = vmul.f32 0.01, %v8267_v26  ;;  %v8269_v30 = vld [vmem:[#allocation40_spill] sm:$0xff]  ;;  %v8272_v5 = vld [vmem:[#allocation42_spill] sm:$0xff] }
 0x2a2   :  { %8263 = vst [vmem:[#allocation38_spill] sm:$0xff] %v6206_v62  ;;  %8266 = vst [vmem:[#allocation41_spill] sm:$0xff] %v6216_v29  ;;  %v6222_v48 = vmul.f32 0.01, %v8269_v30  ;;  %v6228_v62 = vsel %vm1919_vm3, %v8177_v1, %v6010_v13  ;;  %v6232_v46 = vmul.f32 0.01, %v8272_v5 }
 0x2a3   :  { %8268 = vst [vmem:[#allocation43_spill] sm:$0xff] %v6219_v40  ;;  %8271 = vst [vmem:[#allocation117_spill] sm:$0xff] %v6228_v62  ;;  %v8274_v24 = vld [vmem:[#allocation45_spill] sm:$0xff]  ;;  %v6238_v29 = vmul.f32 0.01, %v5696_v47  ;;  %vm1934_vm2 = vcmp.ge.f32.partialorder %v8206_v56, 0.0 }
 0x2a4   :  { %8270 = vst [vmem:[#allocation40_spill] sm:$0xff] %v6222_v48  ;;  %8273 = vst [vmem:[#allocation42_spill] sm:$0xff] %v6232_v46  ;;  %v6235_v58 = vmul.f32 0.01, %v8274_v24  ;;  %v6244_v48 = vsel %vm1920_vm4, %v8179_v22, %v6019_v16  ;;  %v6248_v13 = vmul.f32 0.01, %v5700_v18 }
 0x2a5   :  { %8276 = vst [vmem:[#allocation118_spill] sm:$0xff] %v6238_v29  ;;  %8277 = vst [vmem:[#allocation119_spill] sm:$0xff] %v6244_v48  ;;  %v6251_v1 = vmul.f32 0.01, %v5704_v38  ;;  %v6254_v62 = vmul.f32 0.01, %v5708_v23  ;;  %v6260_v29 = vsel %vm1921_vm5, %v8180_v53, %v6022_v15 }
 0x2a6   :  { %8275 = vst [vmem:[#allocation45_spill] sm:$0xff] %v6235_v58  ;;  %8278 = vst [vmem:[#allocation120_spill] sm:$0xff] %v6248_v13  ;;  %v6264_v22 = vmul.f32 0.01, %v5712_v21  ;;  %v6267_v16 = vmul.f32 0.01, %v5716_v10 }
 0x2a7   :  { %8279 = vst [vmem:[#allocation121_spill] sm:$0xff] %v6251_v1  ;;  %8280 = vst [vmem:[#allocation122_spill] sm:$0xff] %v6254_v62  ;;  %v6270_v48 = vmul.f32 0.01, %v5720_v7  ;;  %v6276_v62 = vsel %vm1922_vm6, %v8181_v60, %v6025_v25  ;;  %v6280_v15 = vmul.f32 0.01, %v5724_v31 }
 0x2a8   :  { %8281 = vst [vmem:[#allocation123_spill] sm:$0xff] %v6260_v29  ;;  %8282 = vst [vmem:[#allocation124_spill] sm:$0xff] %v6264_v22  ;;  %v6283_v53 = vmul.f32 0.01, %v5728_v57  ;;  %v6286_v29 = vmul.f32 0.01, %v5732_v14 }
 0x2a9   :  { %8283 = vst [vmem:[#allocation125_spill] sm:$0xff] %v6267_v16  ;;  %8284 = vst [vmem:[#allocation126_spill] sm:$0xff] %v6270_v48  ;;  %v6292_v48 = vsel %vm1923_vm7, %v8183_v50, %v6034_v61  ;;  %vm1935_vm3 = vcmp.ge.f32.partialorder %v8209_v39, 0.0  ;;  %v6296_v25 = vmul.f32 0.01, %v5736_v3  ;;  %vm1936_vm4 = vcmp.ge.f32.partialorder %v8211_v32, 0.0 }
 0x2aa   :  { %8285 = vst [vmem:[#allocation127_spill] sm:$0xff] %v6276_v62  ;;  %8286 = vst [vmem:[#allocation128_spill] sm:$0xff] %v6280_v15  ;;  %v6299_v60 = vmul.f32 0.01, %v5740_v51  ;;  %v6302_v62 = vmul.f32 0.01, %v5744_v11 }
 0x2ab   :  { %8287 = vst [vmem:[#allocation129_spill] sm:$0xff] %v6283_v53  ;;  %8288 = vst [vmem:[#allocation130_spill] sm:$0xff] %v6286_v29  ;;  %v6308_v29 = vsel %vm1924_vm8, %v8184_v54, %v6037_v27  ;;  %v6312_v50 = vmul.f32 0.01, %v5748_v37  ;;  %v8295_v61 = vld [vmem:[#allocation47_spill] sm:$0xff]  ;;  %vm1937_vm5 = vcmp.ge.f32.partialorder %v8213_v35, 0.0 }
 0x2ac   :  { %8289 = vst [vmem:[#allocation131_spill] sm:$0xff] %v6292_v48  ;;  %8290 = vst [vmem:[#allocation132_spill] sm:$0xff] %v6296_v25  ;;  %v6315_v48 = vmul.f32 0.01, %v8295_v61  ;;  %v8297_v25 = vld [vmem:[#allocation44_spill] sm:$0xff]  ;;  %v8301_v27 = vld [vmem:[#allocation46_spill] sm:$0xff] }
 0x2ad   :  { %8291 = vst [vmem:[#allocation133_spill] sm:$0xff] %v6299_v60  ;;  %8292 = vst [vmem:[#allocation134_spill] sm:$0xff] %v6302_v62  ;;  %v6318_v53 = vmul.f32 0.01, %v8297_v25  ;;  %v8299_v60 = vld [vmem:[#allocation76_spill] sm:$0xff]  ;;  %vm1939_vm7 = vcmp.ge.f32.partialorder %v8218_v6, 0.0 }
 0x2ae   :  { %8293 = vst [vmem:[#allocation135_spill] sm:$0xff] %v6308_v29  ;;  %8294 = vst [vmem:[#allocation136_spill] sm:$0xff] %v6312_v50  ;;  %v6324_v62 = vsel %vm1925_vm9, %v8185_v9, %v8299_v60  ;;  %v6328_v54 = vmul.f32 0.01, %v8301_v27  ;;  %v8303_v29 = vld [vmem:[#allocation49_spill] sm:$0xff]  ;;  %v8305_v50 = vld [vmem:[#allocation51_spill] sm:$0xff] }
 0x2af   :  { %8296 = vst [vmem:[#allocation47_spill] sm:$0xff] %v6315_v48  ;;  %8298 = vst [vmem:[#allocation137_spill] sm:$0xff] %v6318_v53  ;;  %v6331_v15 = vmul.f32 0.01, %v8303_v29  ;;  %v6334_v16 = vmul.f32 0.01, %v8305_v50 }
 0x2b0   :  { %8300 = vst [vmem:[#allocation76_spill] sm:$0xff] %v6324_v62  ;;  %8302 = vst [vmem:[#allocation46_spill] sm:$0xff] %v6328_v54  ;;  %v8307_v48 = vld [vmem:[#allocation74_spill] sm:$0xff]  ;;  %v8309_v22 = vld [vmem:[#allocation8_spill] sm:$0xff]  ;;  %vm1940_vm8 = vcmp.ge.f32.partialorder %v8220_v8, 0.0 }
 0x2b1   :  { %8304 = vst [vmem:[#allocation49_spill] sm:$0xff] %v6331_v15  ;;  %8306 = vst [vmem:[#allocation51_spill] sm:$0xff] %v6334_v16  ;;  %v6340_v53 = vsel %vm1926_vm10, %v8188_v52, %v8307_v48  ;;  %vm1938_vm6 = vcmp.ge.f32.partialorder %v8309_v22, 0.0  ;;  %v8310_v9 = vld [vmem:[#allocation48_spill] sm:$0xff]  ;;  %v8312_v62 = vld [vmem:[#allocation50_spill] sm:$0xff]  ;;  %vm1942_vm10 = vcmp.ge.f32.partialorder %v8225_v45, 0.0 }
 0x2b2   :  { %8308 = vst [vmem:[#allocation74_spill] sm:$0xff] %v6340_v53  ;;  %v6344_v60 = vmul.f32 0.01, %v8310_v9  ;;  %v6347_v1 = vmul.f32 0.01, %v8312_v62  ;;  %v8314_v54 = vld [vmem:[#allocation53_spill] sm:$0xff] }
 0x2b3   :  { %v6350_v13 = vmul.f32 0.01, %v8314_v54  ;;  %v8316_v15 = vld [vmem:[#allocation85_spill] sm:$0xff]  ;;  %v8318_v52 = vld [vmem:[#allocation55_spill] sm:$0xff]  ;;  %v8320_v53 = vld [vmem:[#allocation52_spill] sm:$0xff] }
 0x2b4   :  { %8311 = vst [vmem:[#allocation8_spill] sm:$0xff] %v6344_v60  ;;  %8313 = vst [vmem:[#allocation50_spill] sm:$0xff] %v6347_v1  ;;  %v6356_v16 = vsel %vm1927_vm11, %v8190_v2, %v8316_v15  ;;  %v6360_v48 = vmul.f32 0.01, %v8318_v52  ;;  %v6363_v58 = vmul.f32 0.01, %v8320_v53 }
 0x2b5   :  { %8315 = vst [vmem:[#allocation53_spill] sm:$0xff] %v6350_v13  ;;  %8317 = vst [vmem:[#allocation85_spill] sm:$0xff] %v6356_v16  ;;  %v8322_v60 = vld [vmem:[#allocation54_spill] sm:$0xff]  ;;  %v8326_v2 = vld [vmem:[#allocation57_spill] sm:$0xff] }
 0x2b6   :  { %8319 = vst [vmem:[#allocation138_spill] sm:$0xff] %v6360_v48  ;;  %8321 = vst [vmem:[#allocation139_spill] sm:$0xff] %v6363_v58  ;;  %v6366_v46 = vmul.f32 0.01, %v8322_v60  ;;  %v8324_v1 = vld [vmem:[#allocation86_spill] sm:$0xff]  ;;  %v8328_v16 = vld [vmem:[#allocation59_spill] sm:$0xff] }
 0x2b7   :  { %v6372_v13 = vsel %vm1928_vm12, %v8192_v12, %v8324_v1  ;;  %v6376_v15 = vmul.f32 0.01, %v8326_v2  ;;  %v6379_v40 = vmul.f32 0.01, %v8328_v16  ;;  %v8330_v48 = vld [vmem:[#allocation56_spill] sm:$0xff]  ;;  %v8332_v58 = vld [vmem:[#allocation90_spill] sm:$0xff] }
 0x2b8   :  { %8323 = vst [vmem:[#allocation140_spill] sm:$0xff] %v6366_v46  ;;  %8325 = vst [vmem:[#allocation86_spill] sm:$0xff] %v6372_v13  ;;  %v6382_v53 = vmul.f32 0.01, %v8330_v48  ;;  %v6388_v46 = vsel %vm1929_vm13, %v8195_v55, %v8332_v58  ;;  %v8334_v60 = vld [vmem:[#allocation10_spill] sm:$0xff]  ;;  %v8337_v13 = vld [vmem:[#allocation61_spill] sm:$0xff] }
 0x2b9   :  { %8327 = vst [vmem:[#allocation141_spill] sm:$0xff] %v6376_v15  ;;  %8329 = vst [vmem:[#allocation142_spill] sm:$0xff] %v6379_v40  ;;  %vm1941_vm9 = vcmp.ge.f32.partialorder %v8334_v60, 0.0  ;;  %v8335_v12 = vld [vmem:[#allocation58_spill] sm:$0xff]  ;;  %v6395_v2 = vmul.f32 0.01, %v8337_v13 }
 0x2ba   :  { %8331 = vst [vmem:[#allocation143_spill] sm:$0xff] %v6382_v53  ;;  %8333 = vst [vmem:[#allocation90_spill] sm:$0xff] %v6388_v46  ;;  %v6392_v1 = vmul.f32 0.01, %v8335_v12  ;;  %v8339_v15 = vld [vmem:[#allocation63_spill] sm:$0xff]  ;;  %v8343_v58 = vld [vmem:[#allocation60_spill] sm:$0xff] }
 0x2bb   :  { %8338 = vst [vmem:[#allocation58_spill] sm:$0xff] %v6395_v2  ;;  %v6398_v16 = vmul.f32 0.01, %v8339_v15  ;;  %v8341_v40 = vld [vmem:[#allocation87_spill] sm:$0xff]  ;;  %v6409_v55 = vmul.f32 0.01, %v8343_v58 }
 0x2bc   :  { %8336 = vst [vmem:[#allocation10_spill] sm:$0xff] %v6392_v1  ;;  %v6404_v53 = vsel %vm1930_vm14, %v8197_v36, %v8341_v40  ;;  %v8345_v46 = vld [vmem:[#allocation62_spill] sm:$0xff]  ;;  %v8347_v2 = vld [vmem:[#allocation65_spill] sm:$0xff]  ;;  %v8351_v40 = vld [vmem:[#allocation20_spill] sm:$0xff] }
 0x2bd   :  { %8340 = vst [vmem:[#allocation144_spill] sm:$0xff] %v6398_v16  ;;  %8342 = vst [vmem:[#allocation87_spill] sm:$0xff] %v6404_v53  ;;  %v6412_v1 = vmul.f32 0.01, %v8345_v46  ;;  %v6415_v13 = vmul.f32 0.01, %v8347_v2 }
 0x2be   :  { %8344 = vst [vmem:[#allocation145_spill] sm:$0xff] %v6409_v55  ;;  %v8349_v16 = vld [vmem:[#allocation89_spill] sm:$0xff]  ;;  %vm1944_vm12 = vcmp.ge.f32.partialorder %v8351_v40, 0.0  ;;  %v8352_v36 = vld [vmem:[#allocation24_spill] sm:$0xff]  ;;  %v8434_v25 = vld [vmem:[#allocation6_spill] sm:$0xff] }
 0x2bf   :  { %8346 = vst [vmem:[#allocation146_spill] sm:$0xff] %v6412_v1  ;;  %8348 = vst [vmem:[#allocation147_spill] sm:$0xff] %v6415_v13  ;;  %v6421_v15 = vsel %vm1931_vm15, %v8199_v34, %v8349_v16  ;;  %v8353_v53 = vld [vmem:[#allocation68_spill] sm:$0xff]  ;;  %v8357_v13 = vld [vmem:[#allocation94_spill] sm:$0xff]  ;;  %vm1948_vm15 = vcmp.ge.f32.partialorder %v8239_v4, 0.0 }
 0x2c0   :  { %8350 = vst [vmem:[#allocation89_spill] sm:$0xff] %v6421_v15  ;;  %v6428_v55 = vmul.f32 0.01, %v8353_v53  ;;  %v8355_v1 = vld [vmem:[#allocation64_spill] sm:$0xff]  ;;  %v6434_v46 = vmul.f32 0.01, %v8357_v13 }
 0x2c1   :  { %v6431_v2 = vmul.f32 0.01, %v8355_v1  ;;  %v8359_v58 = vld [vmem:[#allocation93_spill] sm:$0xff]  ;;  %v8361_v16 = vld [vmem:[#allocation26_spill] sm:$0xff]  ;;  %v8362_v15 = vld [vmem:[#allocation95_spill] sm:$0xff] }
 0x2c2   :  { %8354 = vst [vmem:[#allocation20_spill] sm:$0xff] %v6428_v55  ;;  %8358 = vst [vmem:[#allocation148_spill] sm:$0xff] %v6434_v46  ;;  %v6440_v34 = vsel %vm1932_vm0, %v8202_v17, %v8359_v58  ;;  %v6447_v55 = vmul.f32 0.01, %v8362_v15  ;;  %v8366_v46 = vld [vmem:[#allocation66_spill] sm:$0xff]  ;;  %v8368_v53 = vld [vmem:[#allocation91_spill] sm:$0xff] }
 0x2c3   :  { %8356 = vst [vmem:[#allocation24_spill] sm:$0xff] %v6431_v2  ;;  %8360 = vst [vmem:[#allocation93_spill] sm:$0xff] %v6440_v34  ;;  %v8364_v2 = vld [vmem:[#allocation96_spill] sm:$0xff]  ;;  %v6453_v1 = vmul.f32 0.01, %v8366_v46  ;;  %v6459_v17 = vsel %vm1933_vm1, %v8204_v59, %v8368_v53  ;;  %vm1952_vm0 = vcmp.ge.f32.partialorder %v8248_v20, 0.0 }
 0x2c4   :  { %8363 = vst [vmem:[#allocation26_spill] sm:$0xff] %v6447_v55  ;;  %v6450_v13 = vmul.f32 0.01, %v8364_v2  ;;  %8369 = vst [vmem:[#allocation91_spill] sm:$0xff] %v6459_v17  ;;  %v8370_v58 = vld [vmem:[#allocation33_spill] sm:$0xff]  ;;  %v8371_v34 = vld [vmem:[#allocation71_spill] sm:$0xff] }
 0x2c5   :  { %8367 = vst [vmem:[#allocation150_spill] sm:$0xff] %v6453_v1  ;;  %v6466_v55 = vmul.f32 0.01, %v8371_v34  ;;  %v8375_v1 = vld [vmem:[#allocation69_spill] sm:$0xff]  ;;  %v8377_v15 = vld [vmem:[#allocation80_spill] sm:$0xff]  ;;  %vm1956_vm1 = vcmp.ge.f32.partialorder %v8258_v28, 0.0 }
 0x2c6   :  { %8365 = vst [vmem:[#allocation149_spill] sm:$0xff] %v6450_v13  ;;  %v8373_v13 = vld [vmem:[#allocation75_spill] sm:$0xff]  ;;  %v6472_v2 = vmul.f32 0.01, %v8375_v1  ;;  %v6478_v59 = vsel %vm1934_vm2, %v8206_v56, %v8377_v15  ;;  %v8379_v53 = vld [vmem:[#allocation36_spill] sm:$0xff]  ;;  %v8380_v17 = vld [vmem:[#allocation73_spill] sm:$0xff] }
 0x2c7   :  { %8372 = vst [vmem:[#allocation33_spill] sm:$0xff] %v6466_v55  ;;  %v6469_v46 = vmul.f32 0.01, %v8373_v13  ;;  %8378 = vst [vmem:[#allocation80_spill] sm:$0xff] %v6478_v59  ;;  %v6485_v55 = vmul.f32 0.01, %v8380_v17 }
 0x2c8   :  { %8376 = vst [vmem:[#allocation152_spill] sm:$0xff] %v6472_v2  ;;  %v8384_v2 = vld [vmem:[#allocation98_spill] sm:$0xff]  ;;  %vm1960_vm2 = vcmp.ge.f32.partialorder %v8267_v26, 0.0  ;;  %v8388_v15 = vld [vmem:[#allocation99_spill] sm:$0xff] }
 0x2c9   :  { %8374 = vst [vmem:[#allocation151_spill] sm:$0xff] %v6469_v46  ;;  %8381 = vst [vmem:[#allocation36_spill] sm:$0xff] %v6485_v55  ;;  %v8382_v46 = vld [vmem:[#allocation97_spill] sm:$0xff]  ;;  %v6491_v13 = vmul.f32 0.01, %v8384_v2  ;;  %v8386_v34 = vld [vmem:[#allocation78_spill] sm:$0xff] }
 0x2ca   :  { %v6488_v1 = vmul.f32 0.01, %v8382_v46  ;;  %v6497_v56 = vsel %vm1935_vm3, %v8209_v39, %v8386_v34  ;;  %v6504_v59 = vmul.f32 0.01, %v8388_v15  ;;  %v8394_v46 = vld [vmem:[#allocation82_spill] sm:$0xff]  ;;  %vm1964_vm3 = vcmp.ge.f32.partialorder %v5696_v47, 0.0 }
 0x2cb   :  { %8385 = vst [vmem:[#allocation153_spill] sm:$0xff] %v6491_v13  ;;  %8387 = vst [vmem:[#allocation78_spill] sm:$0xff] %v6497_v56  ;;  %v8392_v13 = vld [vmem:[#allocation101_spill] sm:$0xff]  ;;  %v6516_v39 = vsel %vm1936_vm4, %v8211_v32, %v8394_v46  ;;  %v8396_v34 = vld [vmem:[#allocation102_spill] sm:$0xff]  ;;  %vm1968_vm4 = vcmp.ge.f32.partialorder %v5712_v21, 0.0 }
 0x2cc   :  { %8383 = vst [vmem:[#allocation73_spill] sm:$0xff] %v6488_v1  ;;  %8389 = vst [vmem:[#allocation99_spill] sm:$0xff] %v6504_v59  ;;  %v8390_v1 = vld [vmem:[#allocation100_spill] sm:$0xff]  ;;  %v6510_v2 = vmul.f32 0.01, %v8392_v13  ;;  %v8404_v46 = vld [vmem:[#allocation77_spill] sm:$0xff] }
 0x2cd   :  { %v6507_v55 = vmul.f32 0.01, %v8390_v1  ;;  %8395 = vst [vmem:[#allocation82_spill] sm:$0xff] %v6516_v39  ;;  %v6523_v56 = vmul.f32 0.01, %v8396_v34  ;;  %v8402_v1 = vld [vmem:[#allocation3_spill] sm:$0xff] }
 0x2ce   :  { %8393 = vst [vmem:[#allocation155_spill] sm:$0xff] %v6510_v2  ;;  %v8400_v2 = vld [vmem:[#allocation83_spill] sm:$0xff]  ;;  %v6535_v32 = vsel %vm1937_vm5, %v8213_v35, %v8402_v1  ;;  %v6542_v39 = vmul.f32 0.01, %v8404_v46  ;;  %vm1972_vm5 = vcmp.ge.f32.partialorder %v5728_v57, 0.0  ;;  %v8412_v1 = vld [vmem:[#allocation21_spill] sm:$0xff] }
 0x2cf   :  { %8391 = vst [vmem:[#allocation154_spill] sm:$0xff] %v6507_v55  ;;  %8397 = vst [vmem:[#allocation102_spill] sm:$0xff] %v6523_v56  ;;  %v8398_v55 = vld [vmem:[#allocation79_spill] sm:$0xff]  ;;  %v6529_v13 = vmul.f32 0.01, %v8400_v2  ;;  %v8446_v52 = vld [vmem:[#allocation54_spill] sm:$0xff] }
 0x2d0   :  { %v6526_v59 = vmul.f32 0.01, %v8398_v55  ;;  %8403 = vst [vmem:[#allocation3_spill] sm:$0xff] %v6535_v32  ;;  %8405 = vst [vmem:[#allocation77_spill] sm:$0xff] %v6542_v39  ;;  %v8410_v55 = vld [vmem:[#allocation2_spill] sm:$0xff]  ;;  %vm1988_vm13 = vcmp.ge.f32.partialorder %v8446_v52, 0.0 }
 0x2d1   :  { %8401 = vst [vmem:[#allocation157_spill] sm:$0xff] %v6529_v13  ;;  %v8408_v13 = vld [vmem:[#allocation17_spill] sm:$0xff]  ;;  %v6554_v35 = vsel %vm1938_vm6, %v8309_v22, %v8410_v55  ;;  %v6561_v32 = vmul.f32 0.01, %v8412_v1  ;;  %vm1976_vm6 = vcmp.ge.f32.partialorder %v5744_v11, 0.0 }
 0x2d2   :  { %8399 = vst [vmem:[#allocation156_spill] sm:$0xff] %v6526_v59  ;;  %v8406_v59 = vld [vmem:[#allocation81_spill] sm:$0xff]  ;;  %v6548_v2 = vmul.f32 0.01, %v8408_v13  ;;  %8411 = vst [vmem:[#allocation2_spill] sm:$0xff] %v6554_v35 }
 0x2d3   :  { %v6545_v56 = vmul.f32 0.01, %v8406_v59  ;;  %8413 = vst [vmem:[#allocation21_spill] sm:$0xff] %v6561_v32  ;;  %v8418_v59 = vld [vmem:[#allocation4_spill] sm:$0xff]  ;;  %v8420_v55 = vld [vmem:[#allocation25_spill] sm:$0xff] }
 0x2d4   :  { %8409 = vst [vmem:[#allocation159_spill] sm:$0xff] %v6548_v2  ;;  %v8416_v2 = vld [vmem:[#allocation19_spill] sm:$0xff]  ;;  %v6573_v22 = vsel %vm1939_vm7, %v8218_v6, %v8418_v59  ;;  %v6580_v35 = vmul.f32 0.01, %v8420_v55  ;;  %vm1980_vm7 = vcmp.ge.f32.partialorder %v8301_v27, 0.0 }
 0x2d5   :  { %8407 = vst [vmem:[#allocation158_spill] sm:$0xff] %v6545_v56  ;;  %v8414_v56 = vld [vmem:[#allocation15_spill] sm:$0xff]  ;;  %v6567_v13 = vmul.f32 0.01, %v8416_v2  ;;  %8419 = vst [vmem:[#allocation4_spill] sm:$0xff] %v6573_v22 }
 0x2d6   :  { %v6564_v39 = vmul.f32 0.01, %v8414_v56  ;;  %8421 = vst [vmem:[#allocation25_spill] sm:$0xff] %v6580_v35  ;;  %v8426_v56 = vld [vmem:[#allocation7_spill] sm:$0xff] }
 0x2d7   :  { %8417 = vst [vmem:[#allocation161_spill] sm:$0xff] %v6567_v13  ;;  %v8424_v13 = vld [vmem:[#allocation29_spill] sm:$0xff]  ;;  %v6592_v6 = vsel %vm1940_vm8, %v8220_v8, %v8426_v56  ;;  %v8428_v59 = vld [vmem:[#allocation23_spill] sm:$0xff]  ;;  %v6611_v8 = vsel %vm1941_vm9, %v8334_v60, %v8434_v25  ;;  %vm8444_vm9 = vcmp.ge.f32.partialorder %v8227_v33, 0.0  ;;  %vm8457_vm8 = vcmp.ge.f32.partialorder %v8352_v36, 0.0 }
 0x2d8   :  { %8415 = vst [vmem:[#allocation160_spill] sm:$0xff] %v6564_v39  ;;  %v8422_v39 = vld [vmem:[#allocation103_spill] sm:$0xff]  ;;  %v6586_v2 = vmul.f32 0.01, %v8424_v13  ;;  %8427 = vst [vmem:[#allocation7_spill] sm:$0xff] %v6592_v6  ;;  %v8437_v6 = vld [vmem:[#allocation106_spill] sm:$0xff] }
 0x2d9   :  { %v6583_v32 = vmul.f32 0.01, %v8422_v39  ;;  %v6599_v22 = vmul.f32 0.01, %v8428_v59  ;;  %8435 = vst [vmem:[#allocation6_spill] sm:$0xff] %v6611_v8  ;;  %v8443_v60 = vld [vmem:[#allocation13_spill] sm:$0xff] }
 0x2da   :  { %8425 = vst [vmem:[#allocation162_spill] sm:$0xff] %v6586_v2  ;;  %v8432_v2 = vld [vmem:[#allocation105_spill] sm:$0xff]  ;;  %v6633_v8 = vsel %vm8444_vm9, %v8227_v33, %v8443_v60  ;;  %v8453_v60 = vld [vmem:[#allocation18_spill] sm:$0xff]  ;;  %vm8454_vm9 = vcmp.ge.f32.partialorder %v8234_v44, 0.0  ;;  %vm2025_vm14 = vcmp.ge.f32.partialorder %v8428_v59, 0.0 }
 0x2db   :  { %8423 = vst [vmem:[#allocation103_spill] sm:$0xff] %v6583_v32  ;;  %8429 = vst [vmem:[#allocation23_spill] sm:$0xff] %v6599_v22  ;;  %v8430_v32 = vld [vmem:[#allocation104_spill] sm:$0xff]  ;;  %v6605_v13 = vmul.f32 0.01, %v8432_v2  ;;  %v8447_v56 = vld [vmem:[#allocation57_spill] sm:$0xff] }
 0x2dc   :  { %v6602_v35 = vmul.f32 0.01, %v8430_v32  ;;  %v6618_v22 = vmul.f32 0.01, %v8437_v6  ;;  %8445 = vst [vmem:[#allocation13_spill] sm:$0xff] %v6633_v8  ;;  %v6655_v8 = vsel %vm8454_vm9, %v8234_v44, %v8453_v60  ;;  %v8464_v60 = vld [vmem:[#allocation22_spill] sm:$0xff] }
 0x2dd   :  { %8433 = vst [vmem:[#allocation105_spill] sm:$0xff] %v6605_v13  ;;  %v8441_v13 = vld [vmem:[#allocation11_spill] sm:$0xff]  ;;  %8455 = vst [vmem:[#allocation57_spill] sm:$0xff] %v6655_v8  ;;  %vm8465_vm9 = vcmp.ge.f32.partialorder %v8241_v41, 0.0 }
 0x2de   :  { %8431 = vst [vmem:[#allocation104_spill] sm:$0xff] %v6602_v35  ;;  %8438 = vst [vmem:[#allocation106_spill] sm:$0xff] %v6618_v22  ;;  %v8439_v35 = vld [vmem:[#allocation107_spill] sm:$0xff]  ;;  %v6627_v25 = vsel %vm1942_vm10, %v8225_v45, %v8441_v13  ;;  %v8450_v13 = vld [vmem:[#allocation14_spill] sm:$0xff]  ;;  %vm8451_vm10 = vcmp.ge.f32.partialorder %v8232_v43, 0.0 }
 0x2df   :  { %v6621_v9 = vmul.f32 0.01, %v8439_v35  ;;  %8442 = vst [vmem:[#allocation11_spill] sm:$0xff] %v6627_v25  ;;  %v8448_v22 = vld [vmem:[#allocation59_spill] sm:$0xff]  ;;  %v6649_v33 = vsel %vm8451_vm10, %v8232_v43, %v8450_v13  ;;  %v8456_v25 = vld [vmem:[#allocation109_spill] sm:$0xff]  ;;  %v8461_v43 = vld [vmem:[#allocation60_spill] sm:$0xff] }
 0x2e0   :  { %8452 = vst [vmem:[#allocation54_spill] sm:$0xff] %v6649_v33  ;;  %v6661_v48 = vsel %vm8457_vm8, %v8352_v36, %v8456_v25  ;;  %v8462_v13 = vld [vmem:[#allocation28_spill] sm:$0xff]  ;;  %v6677_v36 = vsel %vm8465_vm9, %v8241_v41, %v8464_v60  ;;  %v8467_v25 = vld [vmem:[#allocation111_spill] sm:$0xff]  ;;  %vm8468_vm8 = vcmp.ge.f32.partialorder %v8361_v16, 0.0  ;;  %vm8471_vm10 = vcmp.ge.f32.partialorder %v8246_v42, 0.0  ;;  %v8477_v60 = vld [vmem:[#allocation34_spill] sm:$0xff] }
 0x2e1   :  { %8440 = vst [vmem:[#allocation107_spill] sm:$0xff] %v6621_v9  ;;  %v8449_v9 = vld [vmem:[#allocation16_spill] sm:$0xff]  ;;  %8458 = vst [vmem:[#allocation59_spill] sm:$0xff] %v6661_v48  ;;  %v6671_v44 = vsel %vm1948_vm15, %v8239_v4, %v8462_v13  ;;  %v6683_v48 = vsel %vm8468_vm8, %v8361_v16, %v8467_v25  ;;  %v8470_v8 = vld [vmem:[#allocation31_spill] sm:$0xff]  ;;  %v6699_v16 = vsel %vm1952_vm0, %v8248_v20, %v8477_v60  ;;  %vm8480_vm8 = vcmp.ge.f32.partialorder %v8251_v0, 0.0 }
 0x2e2   :  { %v6643_v45 = vsel %vm1944_vm12, %v8351_v40, %v8449_v9  ;;  %vm1992_vm12 = vcmp.ge.f32.partialorder %v8335_v12, 0.0  ;;  %v8459_v9 = vld [vmem:[#allocation61_spill] sm:$0xff]  ;;  %v8460_v40 = vld [vmem:[#allocation63_spill] sm:$0xff]  ;;  %8463 = vst [vmem:[#allocation16_spill] sm:$0xff] %v6671_v44  ;;  %8466 = vst [vmem:[#allocation14_spill] sm:$0xff] %v6677_v36  ;;  %v6689_v33 = vsel %vm8471_vm10, %v8246_v42, %v8470_v8  ;;  %vm8483_vm10 = vcmp.ge.f32.partialorder %v8370_v58, 0.0 }
 0x2e3   :  { %8469 = vst [vmem:[#allocation18_spill] sm:$0xff] %v6683_v48  ;;  %8472 = vst [vmem:[#allocation109_spill] sm:$0xff] %v6689_v33  ;;  %v8473_v4 = vld [vmem:[#allocation62_spill] sm:$0xff]  ;;  %v8474_v13 = vld [vmem:[#allocation65_spill] sm:$0xff]  ;;  %vm8486_vm9 = vcmp.ge.f32.partialorder %v8255_v49, 0.0 }
 0x2e4   :  { %vm1996_vm15 = vcmp.ge.f32.partialorder %v8473_v4, 0.0  ;;  %v8475_v44 = vld [vmem:[#allocation68_spill] sm:$0xff]  ;;  %8478 = vst [vmem:[#allocation61_spill] sm:$0xff] %v6699_v16  ;;  %v8479_v25 = vld [vmem:[#allocation30_spill] sm:$0xff]  ;;  %v8482_v8 = vld [vmem:[#allocation113_spill] sm:$0xff] }
 0x2e5   :  { %v8476_v41 = vld [vmem:[#allocation64_spill] sm:$0xff]  ;;  %v6705_v42 = vsel %vm8480_vm8, %v8251_v0, %v8479_v25  ;;  %v6711_v33 = vsel %vm8483_vm10, %v8370_v58, %v8482_v8  ;;  %v8485_v48 = vld [vmem:[#allocation37_spill] sm:$0xff]  ;;  %v8488_v20 = vld [vmem:[#allocation94_spill] sm:$0xff]  ;;  %vm8495_vm10 = vcmp.ge.f32.partialorder %v8379_v53, 0.0  ;;  %vm8500_vm8 = vcmp.ge.f32.partialorder %v8265_v63, 0.0 }
 0x2e6   :  { %8481 = vst [vmem:[#allocation63_spill] sm:$0xff] %v6705_v42  ;;  %8484 = vst [vmem:[#allocation60_spill] sm:$0xff] %v6711_v33  ;;  %v6717_v36 = vsel %vm8486_vm9, %v8255_v49, %v8485_v48  ;;  %vm2000_vm0 = vcmp.ge.f32.partialorder %v8488_v20, 0.0  ;;  %v8489_v60 = vld [vmem:[#allocation95_spill] sm:$0xff]  ;;  %v8490_v16 = vld [vmem:[#allocation96_spill] sm:$0xff]  ;;  %vm8497_vm9 = vcmp.ge.f32.partialorder %v8262_v19, 0.0 }
 0x2e7   :  { %8487 = vst [vmem:[#allocation28_spill] sm:$0xff] %v6717_v36  ;;  %v8491_v0 = vld [vmem:[#allocation66_spill] sm:$0xff]  ;;  %v8492_v25 = vld [vmem:[#allocation39_spill] sm:$0xff]  ;;  %v8499_v33 = vld [vmem:[#allocation41_spill] sm:$0xff] }
 0x2e8   :  { %v6727_v58 = vsel %vm1956_vm1, %v8258_v28, %v8492_v25  ;;  %v8494_v8 = vld [vmem:[#allocation115_spill] sm:$0xff]  ;;  %v8496_v48 = vld [vmem:[#allocation38_spill] sm:$0xff]  ;;  %v6745_v42 = vsel %vm8500_vm8, %v8265_v63, %v8499_v33  ;;  %vm8510_vm8 = vcmp.ge.f32.partialorder %v8272_v5, 0.0 }
 0x2e9   :  { %8493 = vst [vmem:[#allocation22_spill] sm:$0xff] %v6727_v58  ;;  %v6733_v49 = vsel %vm8495_vm10, %v8379_v53, %v8494_v8  ;;  %v6739_v36 = vsel %vm8497_vm9, %v8262_v19, %v8496_v48  ;;  %8501 = vst [vmem:[#allocation31_spill] sm:$0xff] %v6745_v42  ;;  %v8502_v28 = vld [vmem:[#allocation71_spill] sm:$0xff]  ;;  %v8504_v58 = vld [vmem:[#allocation69_spill] sm:$0xff]  ;;  %vm8507_vm9 = vcmp.ge.f32.partialorder %v8269_v30, 0.0  ;;  %vm8513_vm10 = vcmp.ge.f32.partialorder %v8274_v24, 0.0 }
 0x2ea   :  { %8498 = vst [vmem:[#allocation111_spill] sm:$0xff] %v6739_v36  ;;  %vm2004_vm1 = vcmp.ge.f32.partialorder %v8502_v28, 0.0  ;;  %v8503_v25 = vld [vmem:[#allocation75_spill] sm:$0xff]  ;;  %v8506_v8 = vld [vmem:[#allocation40_spill] sm:$0xff]  ;;  %v8509_v33 = vld [vmem:[#allocation42_spill] sm:$0xff] }
 0x2eb   :  { %v8505_v53 = vld [vmem:[#allocation43_spill] sm:$0xff]  ;;  %v6761_v63 = vsel %vm8507_vm9, %v8269_v30, %v8506_v8  ;;  %v6767_v48 = vsel %vm8510_vm8, %v8272_v5, %v8509_v33  ;;  %v8512_v42 = vld [vmem:[#allocation45_spill] sm:$0xff]  ;;  %v8517_v30 = vld [vmem:[#allocation100_spill] sm:$0xff]  ;;  %vm8520_vm8 = vcmp.ge.f32.partialorder %v5700_v18, 0.0  ;;  %vm8526_vm9 = vcmp.ge.f32.partialorder %v5708_v23, 0.0 }
 0x2ec   :  { %v6755_v19 = vsel %vm1960_vm2, %v8267_v26, %v8505_v53  ;;  %8508 = vst [vmem:[#allocation62_spill] sm:$0xff] %v6761_v63  ;;  %8511 = vst [vmem:[#allocation65_spill] sm:$0xff] %v6767_v48  ;;  %v6773_v36 = vsel %vm8513_vm10, %v8274_v24, %v8512_v42  ;;  %v8515_v26 = vld [vmem:[#allocation97_spill] sm:$0xff]  ;;  %v8516_v53 = vld [vmem:[#allocation98_spill] sm:$0xff]  ;;  %vm8523_vm10 = vcmp.ge.f32.partialorder %v5704_v38, 0.0 }
 0x2ed   :  { %8514 = vst [vmem:[#allocation68_spill] sm:$0xff] %v6773_v36  ;;  %vm2008_vm2 = vcmp.ge.f32.partialorder %v8515_v26, 0.0  ;;  %v8518_v8 = vld [vmem:[#allocation118_spill] sm:$0xff]  ;;  %v8519_v33 = vld [vmem:[#allocation120_spill] sm:$0xff]  ;;  %v8522_v42 = vld [vmem:[#allocation121_spill] sm:$0xff] }
 0x2ee   :  { %v6783_v5 = vsel %vm1964_vm3, %v5696_v47, %v8518_v8  ;;  %v6789_v24 = vsel %vm8520_vm8, %v5700_v18, %v8519_v33  ;;  %v6795_v36 = vsel %vm8523_vm10, %v5704_v38, %v8522_v42  ;;  %v8525_v48 = vld [vmem:[#allocation122_spill] sm:$0xff]  ;;  %v8528_v47 = vld [vmem:[#allocation101_spill] sm:$0xff]  ;;  %v8529_v8 = vld [vmem:[#allocation79_spill] sm:$0xff]  ;;  %vm8533_vm10 = vcmp.ge.f32.partialorder %v5716_v10, 0.0 }
 0x2ef   :  { %8521 = vst [vmem:[#allocation64_spill] sm:$0xff] %v6789_v24  ;;  %8524 = vst [vmem:[#allocation34_spill] sm:$0xff] %v6795_v36  ;;  %v6801_v63 = vsel %vm8526_vm9, %v5708_v23, %v8525_v48  ;;  %vm2012_vm3 = vcmp.ge.f32.partialorder %v8528_v47, 0.0  ;;  %v8530_v18 = vld [vmem:[#allocation83_spill] sm:$0xff]  ;;  %v8531_v33 = vld [vmem:[#allocation124_spill] sm:$0xff]  ;;  %vm8535_vm9 = vcmp.ge.f32.partialorder %v5720_v7, 0.0 }
 0x2f0   :  { %8527 = vst [vmem:[#allocation30_spill] sm:$0xff] %v6801_v63  ;;  %v6811_v38 = vsel %vm1968_vm4, %v5712_v21, %v8531_v33  ;;  %v8532_v42 = vld [vmem:[#allocation125_spill] sm:$0xff]  ;;  %v8534_v48 = vld [vmem:[#allocation126_spill] sm:$0xff]  ;;  %v8537_v36 = vld [vmem:[#allocation128_spill] sm:$0xff]  ;;  %vm8538_vm8 = vcmp.ge.f32.partialorder %v5724_v31, 0.0  ;;  %vm2016_vm4 = vcmp.ge.f32.partialorder %v8404_v46, 0.0 }
 0x2f1   :  { %v6817_v23 = vsel %vm8533_vm10, %v5716_v10, %v8532_v42  ;;  %v6823_v63 = vsel %vm8535_vm9, %v5720_v7, %v8534_v48  ;;  %v6829_v24 = vsel %vm8538_vm8, %v5724_v31, %v8537_v36  ;;  %v8540_v21 = vld [vmem:[#allocation81_spill] sm:$0xff]  ;;  %v8543_v42 = vld [vmem:[#allocation130_spill] sm:$0xff]  ;;  %vm8544_vm9 = vcmp.ge.f32.partialorder %v5732_v14, 0.0  ;;  %v8546_v36 = vld [vmem:[#allocation132_spill] sm:$0xff] }
 0x2f2   :  { %8536 = vst [vmem:[#allocation113_spill] sm:$0xff] %v6823_v63  ;;  %8539 = vst [vmem:[#allocation37_spill] sm:$0xff] %v6829_v24  ;;  %v8541_v33 = vld [vmem:[#allocation17_spill] sm:$0xff]  ;;  %v6845_v31 = vsel %vm8544_vm9, %v5732_v14, %v8543_v42  ;;  %vm8547_vm8 = vcmp.ge.f32.partialorder %v5736_v3, 0.0  ;;  %vm8550_vm10 = vcmp.ge.f32.partialorder %v5740_v51, 0.0  ;;  %v8554_v14 = vld [vmem:[#allocation134_spill] sm:$0xff] }
 0x2f3   :  { %v8542_v10 = vld [vmem:[#allocation129_spill] sm:$0xff]  ;;  %8545 = vst [vmem:[#allocation94_spill] sm:$0xff] %v6845_v31  ;;  %v6851_v48 = vsel %vm8547_vm8, %v5736_v3, %v8546_v36  ;;  %v6867_v3 = vsel %vm1976_vm6, %v5744_v11, %v8554_v14  ;;  %v8555_v42 = vld [vmem:[#allocation136_spill] sm:$0xff]  ;;  %vm8556_vm8 = vcmp.ge.f32.partialorder %v5748_v37, 0.0 }
 0x2f4   :  { %v6839_v7 = vsel %vm1972_vm5, %v5728_v57, %v8542_v10  ;;  %8548 = vst [vmem:[#allocation95_spill] sm:$0xff] %v6851_v48  ;;  %v8549_v24 = vld [vmem:[#allocation133_spill] sm:$0xff]  ;;  %v8552_v57 = vld [vmem:[#allocation15_spill] sm:$0xff]  ;;  %v8561_v48 = vld [vmem:[#allocation44_spill] sm:$0xff] }
 0x2f5   :  { %v6857_v63 = vsel %vm8550_vm10, %v5740_v51, %v8549_v24  ;;  %vm2020_vm5 = vcmp.ge.f32.partialorder %v8552_v57, 0.0  ;;  %v8553_v10 = vld [vmem:[#allocation19_spill] sm:$0xff]  ;;  %v6873_v51 = vsel %vm8556_vm8, %v5748_v37, %v8555_v42  ;;  %vm8558_vm10 = vcmp.ge.f32.partialorder %v8295_v61, 0.0  ;;  %v8564_v11 = vld [vmem:[#allocation29_spill] sm:$0xff]  ;;  %v8565_v37 = vld [vmem:[#allocation46_spill] sm:$0xff] }
 0x2f6   :  { %8551 = vst [vmem:[#allocation96_spill] sm:$0xff] %v6857_v63  ;;  %v8557_v24 = vld [vmem:[#allocation47_spill] sm:$0xff]  ;;  %v8560_v63 = vld [vmem:[#allocation137_spill] sm:$0xff]  ;;  %vm8562_vm9 = vcmp.ge.f32.partialorder %v8561_v48, 0.0  ;;  %vm2024_vm6 = vcmp.ge.f32.partialorder %v8564_v11, 0.0 }
 0x2f7   :  { %v6879_v36 = vsel %vm8558_vm10, %v8295_v61, %v8557_v24  ;;  %v6885_v31 = vsel %vm8562_vm9, %v8561_v48, %v8560_v63  ;;  %v6895_v61 = vsel %vm1980_vm7, %v8301_v27, %v8565_v37  ;;  %v8566_v14 = vld [vmem:[#allocation49_spill] sm:$0xff]  ;;  %vm8567_vm10 = vcmp.ge.f32.partialorder %v8303_v29, 0.0  ;;  %v8568_v48 = vld [vmem:[#allocation51_spill] sm:$0xff]  ;;  %v8571_v24 = vld [vmem:[#allocation8_spill] sm:$0xff] }
 0x2f8   :  { %8559 = vst [vmem:[#allocation66_spill] sm:$0xff] %v6879_v36  ;;  %8563 = vst [vmem:[#allocation39_spill] sm:$0xff] %v6885_v31  ;;  %v6901_v63 = vsel %vm8567_vm10, %v8303_v29, %v8566_v14  ;;  %vm8569_vm9 = vcmp.ge.f32.partialorder %v8305_v50, 0.0  ;;  %v8572_v31 = vld [vmem:[#allocation48_spill] sm:$0xff]  ;;  %vm2028_vm7 = vcmp.ge.f32.partialorder %v8437_v6, 0.0  ;;  %v8575_v27 = vld [vmem:[#allocation50_spill] sm:$0xff] }
 0x2f9   :  { %v6907_v42 = vsel %vm8569_vm9, %v8305_v50, %v8568_v48  ;;  %vm8573_vm8 = vcmp.ge.f32.partialorder %v8572_v31, 0.0  ;;  %vm8576_vm10 = vcmp.ge.f32.partialorder %v8312_v62, 0.0  ;;  %v8577_v37 = vld [vmem:[#allocation53_spill] sm:$0xff]  ;;  %vm8578_vm9 = vcmp.ge.f32.partialorder %v8314_v54, 0.0  ;;  %v8579_v14 = vld [vmem:[#allocation138_spill] sm:$0xff]  ;;  %v8580_v48 = vld [vmem:[#allocation55_spill] sm:$0xff] }
 0x2fa   :  { %8570 = vst [vmem:[#allocation115_spill] sm:$0xff] %v6907_v42  ;;  %v6913_v36 = vsel %vm8573_vm8, %v8572_v31, %v8571_v24  ;;  %v6921_v29 = vsel %vm8576_vm10, %v8312_v62, %v8575_v27  ;;  %v6927_v50 = vsel %vm8578_vm9, %v8314_v54, %v8577_v37  ;;  %vm8581_vm8 = vcmp.ge.f32.partialorder %v8580_v48, 0.0  ;;  %v8582_v24 = vld [vmem:[#allocation139_spill] sm:$0xff]  ;;  %v8586_v62 = vld [vmem:[#allocation140_spill] sm:$0xff]  ;;  %v8587_v54 = vld [vmem:[#allocation141_spill] sm:$0xff] }
 0x2fb   :  { %8574 = vst [vmem:[#allocation38_spill] sm:$0xff] %v6913_v36  ;;  %v6933_v31 = vsel %vm8581_vm8, %v8580_v48, %v8579_v14  ;;  %v8583_v36 = vld [vmem:[#allocation52_spill] sm:$0xff]  ;;  %v6945_v27 = vsel %vm1988_vm13, %v8446_v52, %v8586_v62  ;;  %vm8588_vm10 = vcmp.ge.f32.partialorder %v8447_v56, 0.0  ;;  %v8589_v14 = vld [vmem:[#allocation142_spill] sm:$0xff]  ;;  %vm8590_vm9 = vcmp.ge.f32.partialorder %v8448_v22, 0.0 }
 0x2fc   :  { %vm8584_vm11 = vcmp.ge.f32.partialorder %v8583_v36, 0.0  ;;  %v6951_v37 = vsel %vm8588_vm10, %v8447_v56, %v8587_v54  ;;  %v6957_v48 = vsel %vm8590_vm9, %v8448_v22, %v8589_v14  ;;  %v8594_v52 = vld [vmem:[#allocation10_spill] sm:$0xff]  ;;  %vm8596_vm13 = vcmp.ge.f32.partialorder %v8459_v9, 0.0  ;;  %v8597_v22 = vld [vmem:[#allocation144_spill] sm:$0xff] }
 0x2fd   :  { %v6939_v42 = vsel %vm8584_vm11, %v8583_v36, %v8582_v24  ;;  %v8591_v36 = vld [vmem:[#allocation143_spill] sm:$0xff]  ;;  %v8592_v24 = vld [vmem:[#allocation56_spill] sm:$0xff]  ;;  %v6969_v62 = vsel %vm1992_vm12, %v8335_v12, %v8594_v52  ;;  %v8595_v56 = vld [vmem:[#allocation58_spill] sm:$0xff]  ;;  %vm8598_vm8 = vcmp.ge.f32.partialorder %v8460_v40, 0.0  ;;  %vm8600_vm10 = vcmp.ge.f32.partialorder %v8461_v43, 0.0 }
 0x2fe   :  { %8585 = vst [vmem:[#allocation41_spill] sm:$0xff] %v6939_v42  ;;  %vm8593_vm11 = vcmp.ge.f32.partialorder %v8592_v24, 0.0  ;;  %v6975_v54 = vsel %vm8596_vm13, %v8459_v9, %v8595_v56  ;;  %v6981_v14 = vsel %vm8598_vm8, %v8460_v40, %v8597_v22  ;;  %v8601_v12 = vld [vmem:[#allocation146_spill] sm:$0xff]  ;;  %v8602_v9 = vld [vmem:[#allocation147_spill] sm:$0xff]  ;;  %vm8603_vm12 = vcmp.ge.f32.partialorder %v8474_v13, 0.0  ;;  %v8604_v40 = vld [vmem:[#allocation20_spill] sm:$0xff] }
 0x2ff   :  { %v6963_v42 = vsel %vm8593_vm11, %v8592_v24, %v8591_v36  ;;  %v8599_v36 = vld [vmem:[#allocation145_spill] sm:$0xff]  ;;  %v6993_v52 = vsel %vm1996_vm15, %v8473_v4, %v8601_v12  ;;  %v6999_v56 = vsel %vm8603_vm12, %v8474_v13, %v8602_v9  ;;  %vm8605_vm9 = vcmp.ge.f32.partialorder %v8475_v44, 0.0  ;;  %v8608_v4 = vld [vmem:[#allocation148_spill] sm:$0xff]  ;;  %v8609_v13 = vld [vmem:[#allocation26_spill] sm:$0xff] }
 0x300   :  { %v6987_v24 = vsel %vm8600_vm10, %v8461_v43, %v8599_v36  ;;  %v7005_v22 = vsel %vm8605_vm9, %v8475_v44, %v8604_v40  ;;  %v8606_v43 = vld [vmem:[#allocation24_spill] sm:$0xff]  ;;  %vm8607_vm11 = vcmp.ge.f32.partialorder %v8476_v41, 0.0  ;;  %v7017_v12 = vsel %vm2000_vm0, %v8488_v20, %v8608_v4  ;;  %v8611_v44 = vld [vmem:[#allocation149_spill] sm:$0xff] }
 0x301   :  { %v7011_v36 = vsel %vm8607_vm11, %v8476_v41, %v8606_v43  ;;  %vm8610_vm15 = vcmp.ge.f32.partialorder %v8489_v60, 0.0  ;;  %vm8612_vm13 = vcmp.ge.f32.partialorder %v8490_v16, 0.0  ;;  %v8613_v41 = vld [vmem:[#allocation150_spill] sm:$0xff]  ;;  %vm8614_vm8 = vcmp.ge.f32.partialorder %v8491_v0, 0.0  ;;  %v8615_v20 = vld [vmem:[#allocation33_spill] sm:$0xff] }
 0x302   :  { %v7023_v9 = vsel %vm8610_vm15, %v8489_v60, %v8609_v13  ;;  %v7029_v40 = vsel %vm8612_vm13, %v8490_v16, %v8611_v44  ;;  %v7035_v43 = vsel %vm8614_vm8, %v8491_v0, %v8613_v41  ;;  %v7041_v4 = vsel %vm2004_vm1, %v8502_v28, %v8615_v20  ;;  %v8616_v60 = vld [vmem:[#allocation151_spill] sm:$0xff]  ;;  %v8618_v16 = vld [vmem:[#allocation152_spill] sm:$0xff]  ;;  %v8622_v28 = vld [vmem:[#allocation73_spill] sm:$0xff] }
 0x303   :  { %vm8617_vm0 = vcmp.ge.f32.partialorder %v8503_v25, 0.0  ;;  %vm8619_vm10 = vcmp.ge.f32.partialorder %v8504_v58, 0.0  ;;  %v8620_v0 = vld [vmem:[#allocation36_spill] sm:$0xff]  ;;  %vm8621_vm12 = vcmp.ge.f32.partialorder %v8380_v17, 0.0  ;;  %v7065_v20 = vsel %vm2008_vm2, %v8515_v26, %v8622_v28  ;;  %v8629_v26 = vld [vmem:[#allocation155_spill] sm:$0xff] }
 0x304   :  { %v7047_v13 = vsel %vm8617_vm0, %v8503_v25, %v8616_v60  ;;  %v7053_v44 = vsel %vm8619_vm10, %v8504_v58, %v8618_v16  ;;  %v7059_v41 = vsel %vm8621_vm12, %v8380_v17, %v8620_v0  ;;  %v8623_v25 = vld [vmem:[#allocation153_spill] sm:$0xff]  ;;  %vm8624_vm1 = vcmp.ge.f32.partialorder %v8516_v53, 0.0  ;;  %v8625_v58 = vld [vmem:[#allocation99_spill] sm:$0xff]  ;;  %v8627_v17 = vld [vmem:[#allocation154_spill] sm:$0xff] }
 0x305   :  { %v7071_v60 = vsel %vm8624_vm1, %v8516_v53, %v8623_v25  ;;  %vm8626_vm9 = vcmp.ge.f32.partialorder %v8388_v15, 0.0  ;;  %vm8628_vm11 = vcmp.ge.f32.partialorder %v8517_v30, 0.0  ;;  %v7089_v28 = vsel %vm2012_vm3, %v8528_v47, %v8629_v26  ;;  %v8630_v53 = vld [vmem:[#allocation102_spill] sm:$0xff]  ;;  %v8636_v47 = vld [vmem:[#allocation77_spill] sm:$0xff] }
 0x306   :  { %v7077_v16 = vsel %vm8626_vm9, %v8388_v15, %v8625_v58  ;;  %v7083_v0 = vsel %vm8628_vm11, %v8517_v30, %v8627_v17  ;;  %vm8631_vm2 = vcmp.ge.f32.partialorder %v8396_v34, 0.0  ;;  %v8632_v15 = vld [vmem:[#allocation156_spill] sm:$0xff]  ;;  %vm8633_vm15 = vcmp.ge.f32.partialorder %v8529_v8, 0.0  ;;  %v8634_v30 = vld [vmem:[#allocation157_spill] sm:$0xff] }
 0x307   :  { %v7095_v25 = vsel %vm8631_vm2, %v8396_v34, %v8630_v53  ;;  %v7101_v58 = vsel %vm8633_vm15, %v8529_v8, %v8632_v15  ;;  %vm8635_vm13 = vcmp.ge.f32.partialorder %v8530_v18, 0.0  ;;  %v7113_v26 = vsel %vm2016_vm4, %v8404_v46, %v8636_v47  ;;  %v8637_v34 = vld [vmem:[#allocation158_spill] sm:$0xff]  ;;  %v8640_v8 = vld [vmem:[#allocation159_spill] sm:$0xff]  ;;  %v8646_v46 = vld [vmem:[#allocation160_spill] sm:$0xff] }
 0x308   :  { %v7107_v17 = vsel %vm8635_vm13, %v8530_v18, %v8634_v30  ;;  %vm8638_vm3 = vcmp.ge.f32.partialorder %v8540_v21, 0.0  ;;  %vm8641_vm8 = vcmp.ge.f32.partialorder %v8541_v33, 0.0  ;;  %v8643_v18 = vld [vmem:[#allocation21_spill] sm:$0xff]  ;;  %vm8644_vm0 = vcmp.ge.f32.partialorder %v8412_v1, 0.0 }
 0x309   :  { %v7119_v53 = vsel %vm8638_vm3, %v8540_v21, %v8637_v34  ;;  %v7125_v15 = vsel %vm8641_vm8, %v8541_v33, %v8640_v8  ;;  %v7131_v30 = vsel %vm8644_vm0, %v8412_v1, %v8643_v18  ;;  %v7137_v47 = vsel %vm2020_vm5, %v8552_v57, %v8646_v46  ;;  %v8648_v21 = vld [vmem:[#allocation161_spill] sm:$0xff]  ;;  %v8654_v1 = vld [vmem:[#allocation103_spill] sm:$0xff]  ;;  %v8657_v57 = vld [vmem:[#allocation162_spill] sm:$0xff] }
 0x30a   :  { %8639 = vst [vmem:[#allocation71_spill] sm:$0xff] %v7119_v53  ;;  %8642 = vst [vmem:[#allocation75_spill] sm:$0xff] %v7125_v15  ;;  %vm8649_vm4 = vcmp.ge.f32.partialorder %v8553_v10, 0.0  ;;  %v8651_v33 = vld [vmem:[#allocation25_spill] sm:$0xff]  ;;  %vm8652_vm10 = vcmp.ge.f32.partialorder %v8420_v55, 0.0  ;;  %vm8655_vm12 = vcmp.ge.f32.partialorder %v8422_v39, 0.0  ;;  %v7161_v46 = vsel %vm2024_vm6, %v8564_v11, %v8657_v57 }
 0x30b   :  { %8645 = vst [vmem:[#allocation69_spill] sm:$0xff] %v7131_v30  ;;  %8647 = vst [vmem:[#allocation43_spill] sm:$0xff] %v7137_v47  ;;  %v7143_v34 = vsel %vm8649_vm4, %v8553_v10, %v8648_v21  ;;  %v7149_v8 = vsel %vm8652_vm10, %v8420_v55, %v8651_v33  ;;  %v7155_v18 = vsel %vm8655_vm12, %v8422_v39, %v8654_v1  ;;  %v8659_v10 = vld [vmem:[#allocation23_spill] sm:$0xff]  ;;  %v8661_v55 = vld [vmem:[#allocation104_spill] sm:$0xff]  ;;  %vm8662_vm5 = vcmp.ge.f32.partialorder %v8430_v32, 0.0 }
 0x30c   :  { %8650 = vst [vmem:[#allocation40_spill] sm:$0xff] %v7143_v34  ;;  %8653 = vst [vmem:[#allocation42_spill] sm:$0xff] %v7149_v8  ;;  %v7167_v21 = vsel %vm2025_vm14, %v8428_v59, %v8659_v10  ;;  %v7173_v33 = vsel %vm8662_vm5, %v8430_v32, %v8661_v55  ;;  %v8664_v39 = vld [vmem:[#allocation105_spill] sm:$0xff]  ;;  %vm8665_vm1 = vcmp.ge.f32.partialorder %v8432_v2, 0.0  ;;  %v8667_v11 = vld [vmem:[#allocation106_spill] sm:$0xff]  ;;  %vm8670_vm14 = vcmp.ge.f32.partialorder %v8439_v35, 0.0 }
 0x30d   :  { %8656 = vst [vmem:[#allocation45_spill] sm:$0xff] %v7155_v18  ;;  %8658 = vst [vmem:[#allocation97_spill] sm:$0xff] %v7161_v46  ;;  %v7179_v1 = vsel %vm8665_vm1, %v8432_v2, %v8664_v39  ;;  %v7185_v57 = vsel %vm2028_vm7, %v8437_v6, %v8667_v11  ;;  %v8669_v59 = vld [vmem:[#allocation107_spill] sm:$0xff]  ;;  %v8672_v55 = vld [vmem:[#allocation32_spill] sm:$0xff] }
 0x30e   :  { %8660 = vst [vmem:[#allocation98_spill] sm:$0xff] %v7167_v21  ;;  %8663 = vst [vmem:[#allocation100_spill] sm:$0xff] %v7173_v33  ;;  %v7191_v10 = vsel %vm8670_vm14, %v8439_v35, %v8669_v59  ;;  %v8671_v32 = vld [vmem:[#allocation27_spill] sm:$0xff]  ;;  %v8675_v2 = vld [vmem:[#allocation72_spill] sm:$0xff] }
 0x30f   :  { %8666 = vst [vmem:[#allocation118_spill] sm:$0xff] %v7179_v1  ;;  %8668 = vst [vmem:[#allocation120_spill] sm:$0xff] %v7185_v57  ;;  %v3320_v33 = vpack.c.bf16 %v8672_v55, %v8671_v32  ;;  %v8673_v21 = vld [vmem:[#allocation35_spill] sm:$0xff]  ;;  %v8676_v39 = vld [vmem:[#allocation70_spill] sm:$0xff] }
 0x310   :  { %v8674_v46 = vld [vmem:[#allocation67_spill] sm:$0xff]  ;;  %v3330_v1 = vpack.c.bf16 %v8676_v39, %v8675_v2  ;;  %v8677_v8 = vld [vmem:[#allocation88_spill] sm:$0xff]  ;;  %v8680_v11 = vld [vmem:[#allocation5_spill] sm:$0xff] }
 0x311   :  { %v3325_v18 = vpack.c.bf16 %v8674_v46, %v8673_v21  ;;  %v8678_v34 = vld [vmem:[#allocation92_spill] sm:$0xff]  ;;  %v8681_v30 = vld [vmem:[#allocation9_spill] sm:$0xff]  ;;  %3321 = vst [vmem:[%s7517_s4] sm:$0xff] %v3320_v33   ;;  %v8684_v46 = vld [vmem:[#allocation110_spill] sm:$0xff] }
 0x312   :  { %v3335_v47 = vpack.c.bf16 %v8678_v34, %v8677_v8  ;;  %v8679_v6 = vld [vmem:[#allocation84_spill] sm:$0xff]  ;;  %v8686_v32 = vld [vmem:[#allocation114_spill] sm:$0xff]  ;;  %v8688_v55 = vld [vmem:[#allocation117_spill] sm:$0xff]  ;;  %3638 = vst [vmem:[%s7517_s4 + $0x10] sm:$0xff] %v3330_v1  }
 0x313   :  { %v3340_v57 = vpack.c.bf16 %v8680_v11, %v8679_v6  ;;  %v8682_v15 = vld [vmem:[#allocation12_spill] sm:$0xff]  ;;  %3637 = vst [vmem:[%s7517_s4 + $0x8] sm:$0xff] %v3325_v18   ;;  %v8689_v39 = vld [vmem:[#allocation119_spill] sm:$0xff]  ;;  %v8696_v1 = vld [vmem:[#allocation85_spill] sm:$0xff] }
 0x314   :  { %v3345_v53 = vpack.c.bf16 %v8682_v15, %v8681_v30  ;;  %v8683_v35 = vld [vmem:[#allocation108_spill] sm:$0xff]  ;;  %v8690_v6 = vld [vmem:[#allocation123_spill] sm:$0xff]  ;;  %3639 = vst [vmem:[%s7517_s4 + $0x18] sm:$0xff] %v3335_v47  }
 0x315   :  { %v3350_v21 = vpack.c.bf16 %v8684_v46, %v8683_v35  ;;  %v8685_v59 = vld [vmem:[#allocation112_spill] sm:$0xff]  ;;  %v3365_v15 = vpack.c.bf16 %v8690_v6, %v8689_v39  ;;  %3640 = vst [vmem:[%s7517_s4 + $0x20] sm:$0xff] %v3340_v57   ;;  %v8691_v30 = vld [vmem:[#allocation127_spill] sm:$0xff]  ;;  %v8700_v57 = vld [vmem:[#allocation89_spill] sm:$0xff] }
 0x316   :  { %v3355_v34 = vpack.c.bf16 %v8686_v32, %v8685_v59  ;;  %v8687_v8 = vld [vmem:[#allocation116_spill] sm:$0xff]  ;;  %3641 = vst [vmem:[%s7517_s4 + $0x28] sm:$0xff] %v3345_v53   ;;  %v8692_v18 = vld [vmem:[#allocation131_spill] sm:$0xff]  ;;  %v8695_v59 = vld [vmem:[#allocation74_spill] sm:$0xff] }
 0x317   :  { %v3360_v2 = vpack.c.bf16 %v8688_v55, %v8687_v8  ;;  %v3370_v33 = vpack.c.bf16 %v8692_v18, %v8691_v30  ;;  %v8693_v11 = vld [vmem:[#allocation135_spill] sm:$0xff]  ;;  %v8694_v35 = vld [vmem:[#allocation76_spill] sm:$0xff]  ;;  %v3380_v32 = vpack.c.bf16 %v8696_v1, %v8695_v59  ;;  %v8697_v8 = vld [vmem:[#allocation86_spill] sm:$0xff]  ;;  %3642 = vst [vmem:[%s7517_s4 + $0x30] sm:$0xff] %v3350_v21  }
 0x318   :  { %v3375_v46 = vpack.c.bf16 %v8694_v35, %v8693_v11  ;;  %v8698_v55 = vld [vmem:[#allocation90_spill] sm:$0xff]  ;;  %3643 = vst [vmem:[%s7517_s4 + $0x38] sm:$0xff] %v3355_v34   ;;  %3645 = vst [vmem:[%s7517_s4 + $0x48] sm:$0xff] %v3365_v15   ;;  %v8699_v53 = vld [vmem:[#allocation87_spill] sm:$0xff] }
 0x319   :  { %v3385_v47 = vpack.c.bf16 %v8698_v55, %v8697_v8  ;;  %3644 = vst [vmem:[%s7517_s4 + $0x40] sm:$0xff] %v3360_v2   ;;  %v3390_v39 = vpack.c.bf16 %v8700_v57, %v8699_v53  ;;  %v8701_v6 = vld [vmem:[#allocation93_spill] sm:$0xff]  ;;  %v8702_v30 = vld [vmem:[#allocation91_spill] sm:$0xff]  ;;  %v8703_v11 = vld [vmem:[#allocation80_spill] sm:$0xff] }
 0x31a   :  { %v3395_v18 = vpack.c.bf16 %v8702_v30, %v8701_v6  ;;  %v8704_v21 = vld [vmem:[#allocation78_spill] sm:$0xff]  ;;  %v8706_v1 = vld [vmem:[#allocation3_spill] sm:$0xff]  ;;  %3646 = vst [vmem:[%s7517_s4 + $0x50] sm:$0xff] %v3370_v33   ;;  %3647 = vst [vmem:[%s7517_s4 + $0x58] sm:$0xff] %v3375_v46  }
 0x31b   :  { %v3400_v35 = vpack.c.bf16 %v8704_v21, %v8703_v11  ;;  %v8705_v59 = vld [vmem:[#allocation82_spill] sm:$0xff]  ;;  %3648 = vst [vmem:[%s7517_s4 + $0x60] sm:$0xff] %v3380_v32   ;;  %3649 = vst [vmem:[%s7517_s4 + $0x68] sm:$0xff] %v3385_v47   ;;  %v8708_v15 = vld [vmem:[#allocation4_spill] sm:$0xff] }
 0x31c   :  { %v3405_v34 = vpack.c.bf16 %v8706_v1, %v8705_v59  ;;  %v8707_v2 = vld [vmem:[#allocation2_spill] sm:$0xff]  ;;  %v8709_v55 = vld [vmem:[#allocation7_spill] sm:$0xff]  ;;  %v8712_v33 = vld [vmem:[#allocation13_spill] sm:$0xff]  ;;  %3650 = vst [vmem:[%s7517_s4 + $0x70] sm:$0xff] %v3390_v39  }
 0x31d   :  { %v3410_v8 = vpack.c.bf16 %v8708_v15, %v8707_v2  ;;  %v8710_v53 = vld [vmem:[#allocation6_spill] sm:$0xff]  ;;  %v8711_v6 = vld [vmem:[#allocation11_spill] sm:$0xff]  ;;  %3651 = vst [vmem:[%s7517_s4 + $0x78] sm:$0xff] %v3395_v18   ;;  %3652 = vst [vmem:[%s7517_s4 + $0x80] sm:$0xff] %v3400_v35  }
 0x31e   :  { %v3415_v57 = vpack.c.bf16 %v8710_v53, %v8709_v55  ;;  %v3420_v30 = vpack.c.bf16 %v8712_v33, %v8711_v6  ;;  %v8713_v11 = vld [vmem:[#allocation54_spill] sm:$0xff]  ;;  %3653 = vst [vmem:[%s7517_s4 + $0x88] sm:$0xff] %v3405_v34   ;;  %v8714_v32 = vld [vmem:[#allocation57_spill] sm:$0xff]  ;;  %v8715_v47 = vld [vmem:[#allocation59_spill] sm:$0xff] }
 0x31f   :  { %v3425_v46 = vpack.c.bf16 %v8713_v11, %v6643_v45  ;;  %v3430_v21 = vpack.c.bf16 %v8715_v47, %v8714_v32  ;;  %v8716_v45 = vld [vmem:[#allocation16_spill] sm:$0xff]  ;;  %v8717_v59 = vld [vmem:[#allocation14_spill] sm:$0xff]  ;;  %v8719_v39 = vld [vmem:[#allocation109_spill] sm:$0xff]  ;;  %3654 = vst [vmem:[%s7517_s4 + $0x90] sm:$0xff] %v3410_v8  }
 0x320   :  { %v3435_v1 = vpack.c.bf16 %v8717_v59, %v8716_v45  ;;  %v8718_v2 = vld [vmem:[#allocation18_spill] sm:$0xff]  ;;  %v8720_v55 = vld [vmem:[#allocation61_spill] sm:$0xff]  ;;  %v8721_v53 = vld [vmem:[#allocation63_spill] sm:$0xff]  ;;  %3655 = vst [vmem:[%s7517_s4 + $0x98] sm:$0xff] %v3415_v57  }
 0x321   :  { %v3440_v15 = vpack.c.bf16 %v8719_v39, %v8718_v2  ;;  %v3445_v18 = vpack.c.bf16 %v8721_v53, %v8720_v55  ;;  %3656 = vst [vmem:[%s7517_s4 + $0xa0] sm:$0xff] %v3420_v30   ;;  %3657 = vst [vmem:[%s7517_s4 + $0xa8] sm:$0xff] %v3425_v46   ;;  %v8722_v35 = vld [vmem:[#allocation60_spill] sm:$0xff]  ;;  %v8724_v33 = vld [vmem:[#allocation22_spill] sm:$0xff] }
 0x322   :  { %v8723_v34 = vld [vmem:[#allocation28_spill] sm:$0xff]  ;;  %v3455_v11 = vpack.c.bf16 %v6733_v49, %v8724_v33  ;;  %v8725_v32 = vld [vmem:[#allocation111_spill] sm:$0xff]  ;;  %v8727_v45 = vld [vmem:[#allocation62_spill] sm:$0xff]  ;;  %3658 = vst [vmem:[%s7517_s4 + $0xb0] sm:$0xff] %v3430_v21  }
 0x323   :  { %v3450_v6 = vpack.c.bf16 %v8723_v34, %v8722_v35  ;;  %v8726_v8 = vld [vmem:[#allocation31_spill] sm:$0xff]  ;;  %v3465_v57 = vpack.c.bf16 %v8727_v45, %v6755_v19  ;;  %3659 = vst [vmem:[%s7517_s4 + $0xb8] sm:$0xff] %v3435_v1   ;;  %3660 = vst [vmem:[%s7517_s4 + $0xc0] sm:$0xff] %v3440_v15   ;;  %v8728_v49 = vld [vmem:[#allocation65_spill] sm:$0xff]  ;;  %v3485_v1 = vpack.c.bf16 %v6817_v23, %v6811_v38 }
 0x324   :  { %v3460_v47 = vpack.c.bf16 %v8726_v8, %v8725_v32  ;;  %3661 = vst [vmem:[%s7517_s4 + $0xc8] sm:$0xff] %v3445_v18   ;;  %v8729_v30 = vld [vmem:[#allocation68_spill] sm:$0xff]  ;;  %v8731_v2 = vld [vmem:[#allocation34_spill] sm:$0xff]  ;;  %3663 = vst [vmem:[%s7517_s4 + $0xd8] sm:$0xff] %v3455_v11   ;;  %v3505_v34 = vpack.c.bf16 %v6873_v51, %v6867_v3  ;;  %v3515_v3 = vpack.c.bf16 %v6901_v63, %v6895_v61 }
 0x325   :  { %v3470_v46 = vpack.c.bf16 %v8729_v30, %v8728_v49  ;;  %v8730_v19 = vld [vmem:[#allocation64_spill] sm:$0xff]  ;;  %v8732_v21 = vld [vmem:[#allocation30_spill] sm:$0xff]  ;;  %3662 = vst [vmem:[%s7517_s4 + $0xd0] sm:$0xff] %v3450_v6   ;;  %3665 = vst [vmem:[%s7517_s4 + $0xe8] sm:$0xff] %v3465_v57   ;;  %v3525_v8 = vpack.c.bf16 %v6927_v50, %v6921_v29  ;;  %v3535_v29 = vpack.c.bf16 %v6951_v37, %v6945_v27 }
 0x326   :  { %v3475_v59 = vpack.c.bf16 %v8730_v19, %v6783_v5  ;;  %v3480_v39 = vpack.c.bf16 %v8732_v21, %v8731_v2  ;;  %3664 = vst [vmem:[%s7517_s4 + $0xe0] sm:$0xff] %v3460_v47   ;;  %v8733_v5 = vld [vmem:[#allocation113_spill] sm:$0xff]  ;;  %v8735_v38 = vld [vmem:[#allocation94_spill] sm:$0xff]  ;;  %v8736_v53 = vld [vmem:[#allocation95_spill] sm:$0xff]  ;;  %v3540_v50 = vpack.c.bf16 %v6963_v42, %v6957_v48  ;;  %v3545_v47 = vpack.c.bf16 %v6975_v54, %v6969_v62 }
 0x327   :  { %v8734_v15 = vld [vmem:[#allocation37_spill] sm:$0xff]  ;;  %v3495_v23 = vpack.c.bf16 %v8735_v38, %v6839_v7  ;;  %v8737_v18 = vld [vmem:[#allocation96_spill] sm:$0xff]  ;;  %3666 = vst [vmem:[%s7517_s4 + $0xf0] sm:$0xff] %v3470_v46   ;;  %3669 = vst [vmem:[%s7517_s4 + $0x108] sm:$0xff] %v3485_v1   ;;  %v3550_v42 = vpack.c.bf16 %v6987_v24, %v6981_v14  ;;  %v3560_v27 = vpack.c.bf16 %v7011_v36, %v7005_v22 }
 0x328   :  { %v3490_v55 = vpack.c.bf16 %v8734_v15, %v8733_v5  ;;  %v3500_v35 = vpack.c.bf16 %v8737_v18, %v8736_v53  ;;  %3667 = vst [vmem:[%s7517_s4 + $0xf8] sm:$0xff] %v3475_v59   ;;  %3668 = vst [vmem:[%s7517_s4 + $0x100] sm:$0xff] %v3480_v39   ;;  %v8738_v7 = vld [vmem:[#allocation66_spill] sm:$0xff]  ;;  %v8739_v6 = vld [vmem:[#allocation39_spill] sm:$0xff]  ;;  %v3565_v37 = vpack.c.bf16 %v7023_v9, %v7017_v12 }
 0x329   :  { %v3510_v33 = vpack.c.bf16 %v8739_v6, %v8738_v7  ;;  %v8740_v51 = vld [vmem:[#allocation115_spill] sm:$0xff]  ;;  %v8741_v11 = vld [vmem:[#allocation38_spill] sm:$0xff]  ;;  %3671 = vst [vmem:[%s7517_s4 + $0x118] sm:$0xff] %v3495_v23   ;;  %3673 = vst [vmem:[%s7517_s4 + $0x128] sm:$0xff] %v3505_v34   ;;  %v3570_v48 = vpack.c.bf16 %v7035_v43, %v7029_v40  ;;  %v3575_v62 = vpack.c.bf16 %v7047_v13, %v7041_v4 }
 0x32a   :  { %v3520_v32 = vpack.c.bf16 %v8741_v11, %v8740_v51  ;;  %3670 = vst [vmem:[%s7517_s4 + $0x110] sm:$0xff] %v3490_v55   ;;  %3672 = vst [vmem:[%s7517_s4 + $0x120] sm:$0xff] %v3500_v35   ;;  %v8742_v61 = vld [vmem:[#allocation41_spill] sm:$0xff]  ;;  %v3580_v54 = vpack.c.bf16 %v7059_v41, %v7053_v44  ;;  %v3585_v14 = vpack.c.bf16 %v7071_v60, %v7065_v20  ;;  %v8743_v22 = vld [vmem:[#allocation71_spill] sm:$0xff] }
 0x32b   :  { %v3530_v63 = vpack.c.bf16 %v8742_v61, %v6933_v31  ;;  %3674 = vst [vmem:[%s7517_s4 + $0x130] sm:$0xff] %v3510_v33   ;;  %3675 = vst [vmem:[%s7517_s4 + $0x138] sm:$0xff] %v3515_v3   ;;  %v3555_v31 = vpack.c.bf16 %v6999_v56, %v6993_v52  ;;  %v3590_v24 = vpack.c.bf16 %v7083_v0, %v7077_v16  ;;  %v8744_v12 = vld [vmem:[#allocation75_spill] sm:$0xff]  ;;  %v8745_v9 = vld [vmem:[#allocation69_spill] sm:$0xff] }
 0x32c   :  { %3676 = vst [vmem:[%s7517_s4 + $0x140] sm:$0xff] %v3520_v32   ;;  %3677 = vst [vmem:[%s7517_s4 + $0x148] sm:$0xff] %v3525_v8   ;;  %v3595_v52 = vpack.c.bf16 %v7095_v25, %v7089_v28  ;;  %v3600_v56 = vpack.c.bf16 %v7107_v17, %v7101_v58  ;;  %v3605_v36 = vpack.c.bf16 %v8743_v22, %v7113_v26  ;;  %v8746_v43 = vld [vmem:[#allocation43_spill] sm:$0xff]  ;;  %v8747_v4 = vld [vmem:[#allocation40_spill] sm:$0xff] }
 0x32d   :  { %3678 = vst [vmem:[%s7517_s4 + $0x150] sm:$0xff] %v3530_v63   ;;  %3679 = vst [vmem:[%s7517_s4 + $0x158] sm:$0xff] %v3535_v29   ;;  %v3610_v40 = vpack.c.bf16 %v8745_v9, %v8744_v12  ;;  %v3615_v13 = vpack.c.bf16 %v8747_v4, %v8746_v43  ;;  %v8748_v44 = vld [vmem:[#allocation42_spill] sm:$0xff]  ;;  %v8749_v41 = vld [vmem:[#allocation45_spill] sm:$0xff] }
 0x32e   :  { %3680 = vst [vmem:[%s7517_s4 + $0x160] sm:$0xff] %v3540_v50   ;;  %3681 = vst [vmem:[%s7517_s4 + $0x168] sm:$0xff] %v3545_v47   ;;  %v3620_v20 = vpack.c.bf16 %v8749_v41, %v8748_v44  ;;  %v8750_v60 = vld [vmem:[#allocation97_spill] sm:$0xff]  ;;  %v8751_v16 = vld [vmem:[#allocation98_spill] sm:$0xff] }
 0x32f   :  { %3682 = vst [vmem:[%s7517_s4 + $0x170] sm:$0xff] %v3550_v42   ;;  %3683 = vst [vmem:[%s7517_s4 + $0x178] sm:$0xff] %v3555_v31   ;;  %v3625_v0 = vpack.c.bf16 %v8751_v16, %v8750_v60  ;;  %v8752_v28 = vld [vmem:[#allocation100_spill] sm:$0xff]  ;;  %v8753_v25 = vld [vmem:[#allocation118_spill] sm:$0xff] }
 0x330   :  { %3684 = vst [vmem:[%s7517_s4 + $0x180] sm:$0xff] %v3560_v27   ;;  %3685 = vst [vmem:[%s7517_s4 + $0x188] sm:$0xff] %v3565_v37   ;;  %v3630_v58 = vpack.c.bf16 %v8753_v25, %v8752_v28  ;;  %v8754_v17 = vld [vmem:[#allocation120_spill] sm:$0xff] }
 0x331   :  { %3686 = vst [vmem:[%s7517_s4 + $0x190] sm:$0xff] %v3570_v48   ;;  %3687 = vst [vmem:[%s7517_s4 + $0x198] sm:$0xff] %v3575_v62   ;;  %v3635_v26 = vpack.c.bf16 %v7191_v10, %v8754_v17 }
 0x332   :  { %3688 = vst [vmem:[%s7517_s4 + $0x1a0] sm:$0xff] %v3580_v54   ;;  %3689 = vst [vmem:[%s7517_s4 + $0x1a8] sm:$0xff] %v3585_v14  }
 0x333   :  { %3690 = vst [vmem:[%s7517_s4 + $0x1b0] sm:$0xff] %v3590_v24   ;;  %3691 = vst [vmem:[%s7517_s4 + $0x1b8] sm:$0xff] %v3595_v52  }
 0x334   :  { %3692 = vst [vmem:[%s7517_s4 + $0x1c0] sm:$0xff] %v3600_v56   ;;  %3693 = vst [vmem:[%s7517_s4 + $0x1c8] sm:$0xff] %v3605_v36  }
 0x335   :  { %3694 = vst [vmem:[%s7517_s4 + $0x1d0] sm:$0xff] %v3610_v40   ;;  %3695 = vst [vmem:[%s7517_s4 + $0x1d8] sm:$0xff] %v3615_v13  }
 0x336   :  { %3696 = vst [vmem:[%s7517_s4 + $0x1e0] sm:$0xff] %v3620_v20   ;;  %3697 = vst [vmem:[%s7517_s4 + $0x1e8] sm:$0xff] %v3625_v0  }
 0x337   :  { %3698 = vst [vmem:[%s7517_s4 + $0x1f0] sm:$0xff] %v3630_v58   ;;  %3699 = vst [vmem:[%s7517_s4 + $0x1f8] sm:$0xff] %v3635_v26  }

// kernel: _lambda_.5
= control target key start
LH: loop header
LB: loop body
LE: loop exit
PB: predicated region body
PF: predicated region fallthrough
CT: control target
= control target key end

     0   :  { %vm3383_vm0 = vmmov 0   ;;  %vm2006_vm1 = vcmask 1043456   ;;  %s4500_s1 = inlined_call_operand.vmem [shape: bf16[1152,128], index: 1, kind: input, shape index: {}]   ;;  %s4501_s0 = inlined_call_operand.vmem [shape: bf16[196,1152], index: 0, kind: input, shape index: {}]   ;;  %s4502_s2 = inlined_call_operand.vmem [shape: f32[1,128], index: 2, kind: input, shape index: {}]   ;;  %s4503_s3 = inlined_call_operand.vmem [shape: f32[1,128], index: 3, kind: input, shape index: {}]   ;;  %s4504_s4 = inlined_call_operand.vmem [shape: bf16[196,128], index: 4, kind: output, shape index: {}]  }
   0x1   :  { %v3143_v0 = vld [vmem:[%s4500_s1 + $0x40] sm:$0xff]   ;;  %v3145_v2 = vld [vmem:[%s4500_s1 + $0x48] sm:$0xff]   ;;  %v3147_v4 = vld [vmem:[%s4500_s1 + $0x50] sm:$0xff]  }
   0x2   :  { %v3144_v1 = vld [vmem:[%s4500_s1] sm:$0xff]   ;;  %2660 = vmatprep.subr.bf16.mxu0 %v3143_v0  ;;  %3125 = vmatprep.subr.bf16.mxu1 %v3143_v0  ;;  %v3146_v3 = vld [vmem:[%s4500_s1 + $0x8] sm:$0xff]   ;;  %v3148_v5 = vld [vmem:[%s4500_s1 + $0x10] sm:$0xff]  }
   0x3   :  { %2661 = vmatpush3.bf16.msra.mxu0 %v3144_v1  ;;  %3133 = vmatpush3.bf16.msra.mxu1 %v3144_v1  ;;  %v3149_v6 = vld [vmem:[%s4500_s1 + $0x58] sm:$0xff]   ;;  %v3151_v8 = vld [vmem:[%s4500_s1 + $0x60] sm:$0xff]   ;;  %v3153_v10 = vld [vmem:[%s4500_s1 + $0x68] sm:$0xff]  }
   0x4   :  { %2662 = vmatprep.subr.bf16.mxu0 %v3145_v2  ;;  %3126 = vmatprep.subr.bf16.mxu1 %v3145_v2  ;;  %v3150_v7 = vld [vmem:[%s4500_s1 + $0x18] sm:$0xff]   ;;  %v3152_v9 = vld [vmem:[%s4500_s1 + $0x20] sm:$0xff]   ;;  %v3154_v13 = vld [vmem:[%s4500_s1 + $0x28] sm:$0xff]  }
   0x5   :  { %v3161_v11 = vld [vmem:[%s4501_s0 + $0x4] ss:$36 sps:$4 sm:$0xff]   ;;  %v3164_v12 = vld [vmem:[%s4501_s0 + $0x1fc] ss:$36 sps:$4 sm:$0xff]   ;;  %v3155_v14 = vld [vmem:[%s4500_s1 + $0x70] sm:$0xff]  }
   0x6   :  { %1335 = vmatprep.mubr.bf16.mxu0 %v3161_v11  ;;  %1391 = vmatprep.mubr.bf16.mxu1 %v3164_v12  ;;  %v3156_v15 = vld [vmem:[%s4500_s1 + $0x30] sm:$0xff]   ;;  %v3157_v16 = vld [vmem:[%s4500_s1 + $0x78] sm:$0xff]   ;;  %v3165_v18 = vld [vmem:[%s4500_s1 + $0x140] sm:$0xff]   ;;  %v3382_v11 = vmov 0.0  }
   0x7   :  { %2663 = vmatpush3.bf16.msra.mxu0 %v3146_v3  ;;  %3134 = vmatpush3.bf16.msra.mxu1 %v3146_v3  ;;  %v3158_v17 = vld [vmem:[%s4500_s1 + $0x38] sm:$0xff]   ;;  %v3159_v19 = vld [vmem:[%s4501_s0] ss:$36 sps:$4 sm:$0xff]   ;;  %v3169_v24 = vld [vmem:[%s4501_s0 + $0x4c] ss:$36 sps:$4 sm:$0xff]  }
   0x8   :  { %2664 = vmatprep.subr.bf16.mxu0 %v3147_v4  ;;  %3127 = vmatprep.subr.bf16.mxu1 %v3147_v4  ;;  %v3162_v20 = vld [vmem:[%s4501_s0 + $0x1f8] ss:$36 sps:$4 sm:$0xff]   ;;  %v3167_v21 = vld [vmem:[%s4500_s1 + $0xc0] sm:$0xff]   ;;  %v3173_v26 = vld [vmem:[%s4500_s1 + $0x148] sm:$0xff]  }
   0x9   :  { %v3166_v22 = vld [vmem:[%s4500_s1 + $0x100] sm:$0xff]   ;;  %v3177_v27 = vld [vmem:[%s4500_s1 + $0xc8] sm:$0xff]   ;;  %v3179_v30 = vld [vmem:[%s4500_s1 + $0x150] sm:$0xff]  }
   0xa   :  { %v3168_v23 = vld [vmem:[%s4500_s1 + $0x80] sm:$0xff]   ;;  %v3176_v28 = vld [vmem:[%s4500_s1 + $0x108] sm:$0xff]   ;;  %v3184_v33 = vld [vmem:[%s4500_s1 + $0xd0] sm:$0xff]  }
   0xb   :  { %2665 = vmatpush3.bf16.msra.mxu0 %v3148_v5  ;;  %3135 = vmatpush3.bf16.msra.mxu1 %v3148_v5  ;;  %v3171_v25 = vld [vmem:[%s4501_s0 + $0x244] ss:$36 sps:$4 sm:$0xff]   ;;  %v3180_v34 = vld [vmem:[%s4501_s0 + $0x94] ss:$36 sps:$4 sm:$0xff]   ;;  %v3182_v35 = vld [vmem:[%s4501_s0 + $0x28c] ss:$36 sps:$4 sm:$0xff]  }
   0xc   :  { %2666 = vmatprep.subr.bf16.mxu0 %v3149_v6  ;;  %3128 = vmatprep.subr.bf16.mxu1 %v3149_v6  ;;  %v3178_v29 = vld [vmem:[%s4500_s1 + $0x88] sm:$0xff]   ;;  %v3175_v32 = vld [vmem:[%s4501_s0 + $0x240] ss:$36 sps:$4 sm:$0xff]   ;;  %v3185_v36 = vld [vmem:[%s4500_s1 + $0x110] sm:$0xff]  }
   0xd   :  { %v3174_v31 = vld [vmem:[%s4501_s0 + $0x48] ss:$36 sps:$4 sm:$0xff]   ;;  %v3188_v37 = vld [vmem:[%s4500_s1 + $0x90] sm:$0xff]   ;;  %v3189_v38 = vld [vmem:[%s4500_s1 + $0xd8] sm:$0xff]  }
   0xe   :  { %v3190_v39 = vld [vmem:[%s4500_s1 + $0x158] sm:$0xff]   ;;  %v3186_v42 = vld [vmem:[%s4501_s0 + $0x90] ss:$36 sps:$4 sm:$0xff]   ;;  %v3187_v43 = vld [vmem:[%s4501_s0 + $0x288] ss:$36 sps:$4 sm:$0xff]  }
   0xf   :  { %2667 = vmatpush3.bf16.msra.mxu0 %v3150_v7  ;;  %3136 = vmatpush3.bf16.msra.mxu1 %v3150_v7  ;;  %v3191_v40 = vld [vmem:[%s4500_s1 + $0x98] sm:$0xff]   ;;  %v3199_v44 = vld [vmem:[%s4500_s1 + $0xe0] sm:$0xff]   ;;  %v3209_v50 = vld [vmem:[%s4500_s1 + $0xe8] sm:$0xff]  }
  0x10   :  { %2668 = vmatprep.subr.bf16.mxu0 %v3151_v8  ;;  %3129 = vmatprep.subr.bf16.mxu1 %v3151_v8  ;;  %v3192_v41 = vld [vmem:[%s4500_s1 + $0x118] sm:$0xff]   ;;  %v3201_v45 = vld [vmem:[%s4500_s1 + $0x160] sm:$0xff]   ;;  %v3210_v51 = vld [vmem:[%s4500_s1 + $0xa8] sm:$0xff]  }
  0x11   :  { %v3193_v46 = vld [vmem:[%s4501_s0 + $0xdc] ss:$36 sps:$4 sm:$0xff]   ;;  %v3195_v47 = vld [vmem:[%s4501_s0 + $0x2d4] ss:$36 sps:$4 sm:$0xff]   ;;  %v3211_v53 = vld [vmem:[%s4500_s1 + $0x168] sm:$0xff]  }
  0x12   :  { %v3200_v48 = vld [vmem:[%s4500_s1 + $0xa0] sm:$0xff]   ;;  %v3197_v52 = vld [vmem:[%s4501_s0 + $0xd8] ss:$36 sps:$4 sm:$0xff]   ;;  %v3212_v54 = vld [vmem:[%s4500_s1 + $0x128] sm:$0xff]  }
  0x13   :  { %2669 = vmatpush3.bf16.msra.mxu0 %v3152_v9  ;;  %3137 = vmatpush3.bf16.msra.mxu1 %v3152_v9  ;;  %v3202_v49 = vld [vmem:[%s4500_s1 + $0x120] sm:$0xff]   ;;  %v3198_v55 = vld [vmem:[%s4501_s0 + $0x2d0] ss:$36 sps:$4 sm:$0xff]   ;;  %v3222_v63 = vld [vmem:[%s4500_s1 + $0xf8] sm:$0xff]  }
  0x14   :  { %2670 = vmatprep.subr.bf16.mxu0 %v3153_v10  ;;  %3130 = vmatprep.subr.bf16.mxu1 %v3153_v10  ;;  %v3203_v56 = vld [vmem:[%s4501_s0 + $0x124] ss:$36 sps:$4 sm:$0xff]   ;;  %v3205_v57 = vld [vmem:[%s4501_s0 + $0x31c] ss:$36 sps:$4 sm:$0xff]   ;;  %v3216_v58 = vld [vmem:[%s4500_s1 + $0xf0] sm:$0xff]  }
  0x15   :  { %v3219_v59 = vld [vmem:[%s4500_s1 + $0xb0] sm:$0xff]   ;;  %v138_v61 = vld [vmem:[%s4501_s0 + $0x360] sm:$0x33]  ;;  %v3223_v0 = vld [vmem:[%s4500_s1 + $0xb8] sm:$0xff]  }
  0x16   :  { %v3220_v60 = vld [vmem:[%s4500_s1 + $0x170] sm:$0xff]   ;;  %v3207_v1 = vld [vmem:[%s4501_s0 + $0x120] ss:$36 sps:$4 sm:$0xff]   ;;  %v3208_v2 = vld [vmem:[%s4501_s0 + $0x318] ss:$36 sps:$4 sm:$0xff]   ;;  %v2459_v4 = vcombine.high %v138_v61, %v138_v61  ;;  %v2458_v9 = vcombine.low %v138_v61, %v138_v61 }
  0x17   :  { %2671 = vmatpush3.bf16.msra.mxu0 %v3154_v13  ;;  %3138 = vmatpush3.bf16.msra.mxu1 %v3154_v13  ;;  %v3221_v62 = vld [vmem:[%s4500_s1 + $0x130] sm:$0xff]   ;;  %v3230_v5 = vld [vmem:[%s4500_s1 + $0x178] sm:$0xff]   ;;  %v3232_v7 = vld [vmem:[%s4500_s1 + $0x1c0] sm:$0xff]  }
  0x18   :  { %2672 = vmatprep.subr.bf16.mxu0 %v3155_v14  ;;  %3131 = vmatprep.subr.bf16.mxu1 %v3155_v14  ;;  %v3213_v3 = vld [vmem:[%s4501_s0 + $0x16c] ss:$36 sps:$4 sm:$0xff]   ;;  %v3231_v6 = vld [vmem:[%s4500_s1 + $0x138] sm:$0xff]  }
  0x19   :  { %v3217_v8 = vld [vmem:[%s4501_s0 + $0x168] ss:$36 sps:$4 sm:$0xff]   ;;  %v3224_v10 = vld [vmem:[%s4501_s0 + $0x1b4] ss:$36 sps:$4 sm:$0xff]  }
  0x1a   :  { %v3228_v12 = vld [vmem:[%s4501_s0 + $0xc] ss:$36 sps:$4 sm:$0xff]   ;;  %v3278_v61 = vld [vmem:[%s4501_s0 + $0x178] ss:$36 sps:$4 sm:$0xff]  }
  0x1b   :  { %2673 = vmatpush3.bf16.msra.mxu0 %v3156_v15  ;;  %3139 = vmatpush3.bf16.msra.mxu1 %v3156_v15  ;;  %v3226_v13 = vld [vmem:[%s4501_s0 + $0x8] ss:$36 sps:$4 sm:$0xff]   ;;  %v3229_v14 = vld [vmem:[%s4501_s0 + $0x1b0] ss:$36 sps:$4 sm:$0xff]   ;;  %v3233_v15 = vld [vmem:[%s4500_s1 + $0x180] sm:$0xff]  }
  0x1c   :  { %2674 = vmatprep.subr.bf16.mxu0 %v3157_v16  ;;  %3132 = vmatprep.subr.bf16.mxu1 %v3157_v16  ;;  %v3234_v16 = vld [vmem:[%s4501_s0 + $0x54] ss:$36 sps:$4 sm:$0xff]  }
  0x1f   :  { %2675 = vmatpush3.bf16.msra.mxu0 %v3158_v17  ;;  %3140 = vmatpush3.bf16.msra.mxu1 %v3158_v17  ;;  %v3238_v17 = vld [vmem:[%s4501_s0 + $0x14] ss:$36 sps:$4 sm:$0xff]  }
  0x20   :  { %2848 = vmatprep.subr.bf16.mxu0 %v3165_v18  ;;  %2754 = vmatprep.subr.bf16.mxu1 %v3167_v21  ;;  %v3247_v18 = vld [vmem:[%s4500_s1 + $0x1c8] sm:$0xff]   ;;  %v3236_v21 = vld [vmem:[%s4501_s0 + $0x10] ss:$36 sps:$4 sm:$0xff]  }
  0x22   :  { %1336 = vmatmul.mubr.bf16.vlgmr.msra.gmra.mrb[0].mxu0 %v3159_v19  ;;  %1392 = vmatmul.mubr.bf16.vlgmr.msra.gmra.mrb[0].mxu1 %v3162_v20  ;;  %v3248_v19 = vld [vmem:[%s4500_s1 + $0x188] sm:$0xff]   ;;  %v3256_v20 = vld [vmem:[%s4500_s1 + $0x1d0] sm:$0xff]  }
  0x23   :  { %2849 = vmatpush3.bf16.msra.mxu0 %v3166_v22  ;;  %2755 = vmatpush3.bf16.msra.mxu1 %v3168_v23  ;;  %v3239_v22 = vld [vmem:[%s4501_s0 + $0x50] ss:$36 sps:$4 sm:$0xff]   ;;  %v3240_v23 = vld [vmem:[%s4500_s1 + $0x200] sm:$0xff]  }
  0x24   :  { %1343 = vmatprep.mubr.bf16.mxu0 %v3169_v24  ;;  %1399 = vmatprep.mubr.bf16.mxu1 %v3171_v25  ;;  %v3241_v24 = vld [vmem:[%s4501_s0 + $0x9c] ss:$36 sps:$4 sm:$0xff]  }
  0x25   :  { %2850 = vmatprep.subr.bf16.mxu0 %v3173_v26  ;;  %2756 = vmatprep.subr.bf16.mxu1 %v3177_v27  ;;  %v3243_v25 = vld [vmem:[%s4501_s0 + $0x5c] ss:$36 sps:$4 sm:$0xff]   ;;  %v3257_v26 = vld [vmem:[%s4500_s1 + $0x190] sm:$0xff]  }
  0x26   :  { %v3271_v27 = vld [vmem:[%s4500_s1 + $0x1d8] sm:$0xff]  }
  0x27   :  { %2851 = vmatpush3.bf16.msra.mxu0 %v3176_v28  ;;  %2757 = vmatpush3.bf16.msra.mxu1 %v3178_v29  ;;  %v3249_v28 = vld [vmem:[%s4500_s1 + $0x208] sm:$0xff]   ;;  %v3245_v29 = vld [vmem:[%s4501_s0 + $0x98] ss:$36 sps:$4 sm:$0xff]  }
  0x28   :  { %2852 = vmatprep.subr.bf16.mxu0 %v3179_v30  ;;  %2758 = vmatprep.subr.bf16.mxu1 %v3184_v33  ;;  %v3246_v30 = vld [vmem:[%s4501_s0 + $0x58] ss:$36 sps:$4 sm:$0xff]   ;;  %v3252_v33 = vld [vmem:[%s4501_s0 + $0xa4] ss:$36 sps:$4 sm:$0xff]  }
  0x2a   :  { %1344 = vmatmul.mubr.bf16.gmra.mrb[4].mxu0 %v3174_v31  ;;  %1400 = vmatmul.mubr.bf16.gmra.mrb[4].mxu1 %v3175_v32  ;;  %v3272_v31 = vld [vmem:[%s4500_s1 + $0x198] sm:$0xff]   ;;  %v3250_v32 = vld [vmem:[%s4501_s0 + $0xe4] ss:$36 sps:$4 sm:$0xff]  }
  0x2b   :  { %1351 = vmatprep.mubr.bf16.mxu0 %v3180_v34  ;;  %1407 = vmatprep.mubr.bf16.mxu1 %v3182_v35  ;;  %v3264_v34 = vld [vmem:[%s4500_s1 + $0x210] sm:$0xff]   ;;  %v3284_v35 = vld [vmem:[%s4500_s1 + $0x1e0] sm:$0xff]  }
  0x2c   :  { %2853 = vmatpush3.bf16.msra.mxu0 %v3185_v36  ;;  %2759 = vmatpush3.bf16.msra.mxu1 %v3188_v37  ;;  %v3287_v36 = vld [vmem:[%s4500_s1 + $0x1a0] sm:$0xff]  }
  0x2d   :  { %2760 = vmatprep.subr.bf16.mxu1 %v3189_v38  ;;  %2854 = vmatprep.subr.bf16.mxu0 %v3190_v39  ;;  %v3254_v37 = vld [vmem:[%s4501_s0 + $0xe0] ss:$36 sps:$4 sm:$0xff]   ;;  %v3279_v38 = vld [vmem:[%s4500_s1 + $0x218] sm:$0xff]  }
  0x2e   :  { %v3255_v39 = vld [vmem:[%s4501_s0 + $0xa0] ss:$36 sps:$4 sm:$0xff]  }
  0x30   :  { %2761 = vmatpush3.bf16.msra.mxu1 %v3191_v40  ;;  %2855 = vmatpush3.bf16.msra.mxu0 %v3192_v41  ;;  %v3258_v40 = vld [vmem:[%s4501_s0 + $0x12c] ss:$36 sps:$4 sm:$0xff]  }
  0x31   :  { %2762 = vmatprep.subr.bf16.mxu1 %v3199_v44  ;;  %2856 = vmatprep.subr.bf16.mxu0 %v3201_v45  ;;  %v3260_v41 = vld [vmem:[%s4501_s0 + $0xec] ss:$36 sps:$4 sm:$0xff]   ;;  %v3288_v44 = vld [vmem:[%s4500_s1 + $0x220] sm:$0xff]  }
  0x32   :  { %1352 = vmatmul.mubr.bf16.gmra.mrb[8].mxu0 %v3186_v42  ;;  %1408 = vmatmul.mubr.bf16.gmra.mrb[8].mxu1 %v3187_v43  ;;  %v3295_v42 = vld [vmem:[%s4500_s1 + $0x1e8] sm:$0xff]  }
  0x33   :  { %1359 = vmatprep.mubr.bf16.mxu0 %v3193_v46  ;;  %1415 = vmatprep.mubr.bf16.mxu1 %v3195_v47  ;;  %v3296_v43 = vld [vmem:[%s4500_s1 + $0x1a8] sm:$0xff]  }
  0x34   :  { %2763 = vmatpush3.bf16.msra.mxu1 %v3200_v48  ;;  %2857 = vmatpush3.bf16.msra.mxu0 %v3202_v49  ;;  %v3262_v45 = vld [vmem:[%s4501_s0 + $0x128] ss:$36 sps:$4 sm:$0xff]   ;;  %v3265_v48 = vld [vmem:[%s4501_s0 + $0x174] ss:$36 sps:$4 sm:$0xff]  }
  0x35   :  { %2764 = vmatprep.subr.bf16.mxu1 %v3209_v50  ;;  %2858 = vmatprep.subr.bf16.mxu0 %v3211_v53  ;;  %v3303_v46 = vld [vmem:[%s4500_s1 + $0x228] sm:$0xff]   ;;  %v3267_v49 = vld [vmem:[%s4501_s0 + $0x134] ss:$36 sps:$4 sm:$0xff]  }
  0x36   :  { %v3263_v47 = vld [vmem:[%s4501_s0 + $0xe8] ss:$36 sps:$4 sm:$0xff]   ;;  %v3310_v50 = vld [vmem:[%s4500_s1 + $0x1f0] sm:$0xff]  }
  0x37   :  { %v3269_v53 = vld [vmem:[%s4501_s0 + $0x170] ss:$36 sps:$4 sm:$0xff]  }
  0x38   :  { %2765 = vmatpush3.bf16.msra.mxu1 %v3210_v51  ;;  %2859 = vmatpush3.bf16.msra.mxu0 %v3212_v54  ;;  %v3311_v51 = vld [vmem:[%s4500_s1 + $0x1b0] sm:$0xff]   ;;  %v3319_v54 = vld [vmem:[%s4500_s1 + $0x1f8] sm:$0xff]  }
  0x39   :  { %2766 = vmatprep.subr.bf16.mxu1 %v3216_v58  ;;  %2860 = vmatprep.subr.bf16.mxu0 %v3220_v60  ;;  %v3323_v58 = vld [vmem:[%s4500_s1 + $0x1b8] sm:$0xff]  }
  0x3a   :  { %1360 = vmatmul.mubr.bf16.gmra.mrb[12].mxu0 %v3197_v52  ;;  %1416 = vmatmul.mubr.bf16.gmra.mrb[12].mxu1 %v3198_v55  ;;  %v3316_v52 = vld [vmem:[%s4500_s1 + $0x230] sm:$0xff]   ;;  %v3277_v60 = vld [vmem:[%s4501_s0 + $0x1b8] ss:$36 sps:$4 sm:$0xff]  }
  0x3b   :  { %1367 = vmatprep.mubr.bf16.mxu0 %v3203_v56  ;;  %1423 = vmatprep.mubr.bf16.mxu1 %v3205_v57  ;;  %v3270_v55 = vld [vmem:[%s4501_s0 + $0x130] ss:$36 sps:$4 sm:$0xff]   ;;  %v3273_v56 = vld [vmem:[%s4501_s0 + $0x1bc] ss:$36 sps:$4 sm:$0xff]  }
  0x3c   :  { %2767 = vmatpush3.bf16.msra.mxu1 %v3219_v59  ;;  %2861 = vmatpush3.bf16.msra.mxu0 %v3221_v62  ;;  %v3275_v57 = vld [vmem:[%s4501_s0 + $0x17c] ss:$36 sps:$4 sm:$0xff]   ;;  %v3280_v62 = vld [vmem:[%s4501_s0 + $0x204] ss:$36 sps:$4 sm:$0xff]  }
  0x3d   :  { %2768 = vmatprep.subr.bf16.mxu1 %v3222_v63  ;;  %2862 = vmatprep.subr.bf16.mxu0 %v3230_v5  ;;  %v3326_v59 = vld [vmem:[%s4500_s1 + $0x238] sm:$0xff]   ;;  %v3282_v63 = vld [vmem:[%s4501_s0 + $0x1c4] ss:$36 sps:$4 sm:$0xff]  }
  0x3e   :  { %v3294_v5 = vld [vmem:[%s4501_s0 + $0x208] ss:$36 sps:$4 sm:$0xff]  }
  0x40   :  { %2769 = vmatpush3.bf16.msra.mxu1 %v3223_v0  ;;  %2863 = vmatpush3.bf16.msra.mxu0 %v3231_v6  ;;  %v3285_v0 = vld [vmem:[%s4501_s0 + $0x200] ss:$36 sps:$4 sm:$0xff]   ;;  %v3297_v6 = vld [vmem:[%s4501_s0 + $0x294] ss:$36 sps:$4 sm:$0xff]  }
  0x41   :  { %2942 = vmatprep.subr.bf16.mxu1 %v3232_v7  ;;  %3057 = vmatprep.subr.bf16.mxu0 %v3382_v11  ;;  %v3299_v7 = vld [vmem:[%s4501_s0 + $0x254] ss:$36 sps:$4 sm:$0xff]  }
  0x42   :  { %1368 = vmatmul.mubr.bf16.gmra.mrb[16].mxu0 %v3207_v1  ;;  %1424 = vmatmul.mubr.bf16.gmra.mrb[16].mxu1 %v3208_v2  ;;  %v3286_v1 = vld [vmem:[%s4501_s0 + $0x1c0] ss:$36 sps:$4 sm:$0xff]   ;;  %v3289_v2 = vld [vmem:[%s4501_s0 + $0x24c] ss:$36 sps:$4 sm:$0xff]  }
  0x43   :  { %1375 = vmatprep.mubr.bf16.mxu0 %v3213_v3  ;;  %1431 = vmatprep.mubr.bf16.mxu1 %v2459_v4  ;;  %v3291_v3 = vld [vmem:[%s4501_s0 + $0x20c] ss:$36 sps:$4 sm:$0xff]  }
  0x44   :  { %v3293_v4 = vld [vmem:[%s4501_s0 + $0x248] ss:$36 sps:$4 sm:$0xff]  }
  0x4a   :  { %1376 = vmatmul.mubr.bf16.gmra.mrb[20].mxu0 %v3217_v8  ;;  %1432 = vmatmul.mubr.bf16.gmra.mrb[20].mxu1 %v2458_v9  ;;  %v3301_v8 = vld [vmem:[%s4501_s0 + $0x290] ss:$36 sps:$4 sm:$0xff]  }
  0x4b   :  { %1383 = vmatprep.mubr.bf16.mxu0 %v3224_v10  ;;  %1471 = vmatprep.mubr.bf16.mxu1 %v3228_v12  ;;  %v3302_v9 = vld [vmem:[%s4501_s0 + $0x250] ss:$36 sps:$4 sm:$0xff]   ;;  %v3304_v10 = vld [vmem:[%s4501_s0 + $0x2dc] ss:$36 sps:$4 sm:$0xff]  }
  0x4c   :  { %v3306_v12 = vld [vmem:[%s4501_s0 + $0x29c] ss:$36 sps:$4 sm:$0xff]  }
  0x52   :  { %1384 = vmatmul.mubr.bf16.gmra.mrb[24].mxu0 %v3229_v14  ;;  %1472 = vmatmul.mubr.bf16.vlgmr.msra.gmra.mrb[24].mxu1 %v3226_v13  ;;  %v3308_v13 = vld [vmem:[%s4501_s0 + $0x2d8] ss:$36 sps:$4 sm:$0xff]  }
  0x53   :  { %2943 = vmatpush3.bf16.msra.mxu1 %v3233_v15  ;;  %1479 = vmatprep.mubr.bf16.mxu1 %v3234_v16  ;;  %v3309_v14 = vld [vmem:[%s4501_s0 + $0x298] ss:$36 sps:$4 sm:$0xff]   ;;  %v3312_v15 = vld [vmem:[%s4501_s0 + $0x324] ss:$36 sps:$4 sm:$0xff]  }
  0x54   :  { %1607 = vmatprep.mubr.bf16.mxu0 %v3238_v17  ;;  %2944 = vmatprep.subr.bf16.mxu1 %v3247_v18  ;;  %v3314_v16 = vld [vmem:[%s4501_s0 + $0x2e4] ss:$36 sps:$4 sm:$0xff]  }
  0x55   :  { %v139_v17 = vld [vmem:[%s4501_s0 + $0x368] sm:$0x33]  ;;  %v3317_v18 = vld [vmem:[%s4501_s0 + $0x320] ss:$36 sps:$4 sm:$0xff]  }
  0x57   :  { %2945 = vmatpush3.bf16.msra.mxu1 %v3248_v19  ;;  %v3318_v19 = vld [vmem:[%s4501_s0 + $0x2e0] ss:$36 sps:$4 sm:$0xff]  }
  0x58   :  { %2946 = vmatprep.subr.bf16.mxu1 %v3256_v20  ;;  %v2461_v20 = vcombine.high %v139_v17, %v139_v17 }
  0x5a   :  { %1480 = vmatmul.mubr.bf16.gmra.mrb[28].mxu1 %v3239_v22  ;;  %1608 = vmatmul.mubr.bf16.vlgmr.msra.gmra.mrb[28].mxu0 %v3236_v21  ;;  %v3321_v21 = vld [vmem:[%s4501_s0 + $0x32c] ss:$36 sps:$4 sm:$0xff]  }
  0x5b   :  { %3058 = vmatpush3.bf16.msra.mxu0 %v3240_v23  ;;  %1487 = vmatprep.mubr.bf16.mxu1 %v3241_v24  ;;  %v140_v22 = vld [vmem:[%s4501_s0 + $0x370] sm:$0x33]  ;;  %v2460_v23 = vcombine.low %v139_v17, %v139_v17  ;;  %v3325_v24 = vld [vmem:[%s4501_s0 + $0x328] ss:$36 sps:$4 sm:$0xff]  }
  0x5c   :  { %1615 = vmatprep.mubr.bf16.mxu0 %v3243_v25  ;;  %3059 = vmatprep.subr.bf16.mxu0 %v3382_v11  ;;  %v2463_v25 = vcombine.high %v140_v22, %v140_v22 }
  0x5d   :  { %2947 = vmatpush3.bf16.msra.mxu1 %v3257_v26  ;;  %v3330_v26 = vld [vmem:[%s4501_s0 + $0x1c] ss:$36 sps:$4 sm:$0xff]  }
  0x5e   :  { %2948 = vmatprep.subr.bf16.mxu1 %v3271_v27  ;;  %v3328_v27 = vld [vmem:[%s4501_s0 + $0x18] ss:$36 sps:$4 sm:$0xff]  }
  0x5f   :  { %3060 = vmatpush3.bf16.msra.mxu0 %v3249_v28  ;;  %v2462_v28 = vcombine.low %v140_v22, %v140_v22  ;;  %v3370_v22 = vld [vmem:[%s4501_s0 + $0x2e8] ss:$36 sps:$4 sm:$0xff]  }
  0x60   :  { %3061 = vmatprep.subr.bf16.mxu0 %v3382_v11 }
  0x61   :  { %2949 = vmatpush3.bf16.msra.mxu1 %v3272_v31  ;;  %v3335_v31 = vld [vmem:[%s4501_s0 + $0x20] ss:$36 sps:$4 sm:$0xff]  }
  0x62   :  { %1488 = vmatmul.mubr.bf16.gmra.mrb[32].mxu1 %v3245_v29  ;;  %1616 = vmatmul.mubr.bf16.gmra.mrb[32].mxu0 %v3246_v30  ;;  %v3332_v29 = vld [vmem:[%s4501_s0 + $0x64] ss:$36 sps:$4 sm:$0xff]  }
  0x63   :  { %1495 = vmatprep.mubr.bf16.mxu1 %v3250_v32  ;;  %1623 = vmatprep.mubr.bf16.mxu0 %v3252_v33  ;;  %v3334_v30 = vld [vmem:[%s4501_s0 + $0x60] ss:$36 sps:$4 sm:$0xff]   ;;  %v3336_v32 = vld [vmem:[%s4501_s0 + $0xac] ss:$36 sps:$4 sm:$0xff]  }
  0x64   :  { %3062 = vmatpush3.bf16.msra.mxu0 %v3264_v34  ;;  %2950 = vmatprep.subr.bf16.mxu1 %v3284_v35  ;;  %v3338_v33 = vld [vmem:[%s4501_s0 + $0xa8] ss:$36 sps:$4 sm:$0xff]   ;;  %v3340_v35 = vld [vmem:[%s4501_s0 + $0xf4] ss:$36 sps:$4 sm:$0xff]  }
  0x65   :  { %3063 = vmatprep.subr.bf16.mxu0 %v3382_v11  ;;  %2951 = vmatpush3.bf16.msra.mxu1 %v3287_v36  ;;  %v3339_v34 = vld [vmem:[%s4501_s0 + $0x68] ss:$36 sps:$4 sm:$0xff]   ;;  %v3342_v36 = vld [vmem:[%s4501_s0 + $0xf0] ss:$36 sps:$4 sm:$0xff]  }
  0x66   :  { %2952 = vmatprep.subr.bf16.mxu1 %v3295_v42  ;;  %v3350_v42 = vld [vmem:[%s4501_s0 + $0x180] ss:$36 sps:$4 sm:$0xff]  }
  0x68   :  { %3064 = vmatpush3.bf16.msra.mxu0 %v3279_v38  ;;  %v3344_v38 = vld [vmem:[%s4501_s0 + $0x13c] ss:$36 sps:$4 sm:$0xff]  }
  0x69   :  { %3065 = vmatprep.subr.bf16.mxu0 %v3382_v11  ;;  %2953 = vmatpush3.bf16.msra.mxu1 %v3296_v43  ;;  %v3351_v43 = vld [vmem:[%s4501_s0 + $0x140] ss:$36 sps:$4 sm:$0xff]  }
  0x6a   :  { %1496 = vmatmul.mubr.bf16.gmra.mrb[36].mxu1 %v3254_v37  ;;  %1624 = vmatmul.mubr.bf16.gmra.mrb[36].mxu0 %v3255_v39  ;;  %v3343_v37 = vld [vmem:[%s4501_s0 + $0xb0] ss:$36 sps:$4 sm:$0xff]   ;;  %v3346_v39 = vld [vmem:[%s4501_s0 + $0x138] ss:$36 sps:$4 sm:$0xff]  }
  0x6b   :  { %1503 = vmatprep.mubr.bf16.mxu1 %v3258_v40  ;;  %1631 = vmatprep.mubr.bf16.mxu0 %v3260_v41  ;;  %v3347_v40 = vld [vmem:[%s4501_s0 + $0xf8] ss:$36 sps:$4 sm:$0xff]   ;;  %v3348_v41 = vld [vmem:[%s4501_s0 + $0x184] ss:$36 sps:$4 sm:$0xff]  }
  0x6c   :  { %3066 = vmatpush3.bf16.msra.mxu0 %v3288_v44  ;;  %2954 = vmatprep.subr.bf16.mxu1 %v3310_v50  ;;  %v3352_v44 = vld [vmem:[%s4501_s0 + $0x1cc] ss:$36 sps:$4 sm:$0xff]   ;;  %v3360_v50 = vld [vmem:[%s4501_s0 + $0x25c] ss:$36 sps:$4 sm:$0xff]  }
  0x6d   :  { %3067 = vmatprep.subr.bf16.mxu0 %v3382_v11  ;;  %2955 = vmatpush3.bf16.msra.mxu1 %v3311_v51 }
  0x6e   :  { %2956 = vmatprep.subr.bf16.mxu1 %v3319_v54 }
  0x70   :  { %3068 = vmatpush3.bf16.msra.mxu0 %v3303_v46  ;;  %v3355_v46 = vld [vmem:[%s4501_s0 + $0x188] ss:$36 sps:$4 sm:$0xff]  }
  0x71   :  { %3069 = vmatprep.subr.bf16.mxu0 %v3382_v11  ;;  %2957 = vmatpush3.bf16.msra.mxu1 %v3323_v58 }
  0x72   :  { %1504 = vmatmul.mubr.bf16.gmra.mrb[40].mxu1 %v3262_v45  ;;  %1632 = vmatmul.mubr.bf16.gmra.mrb[40].mxu0 %v3263_v47  ;;  %v3354_v45 = vld [vmem:[%s4501_s0 + $0x1c8] ss:$36 sps:$4 sm:$0xff]   ;;  %v3356_v47 = vld [vmem:[%s4501_s0 + $0x214] ss:$36 sps:$4 sm:$0xff]  }
  0x73   :  { %1511 = vmatprep.mubr.bf16.mxu1 %v3265_v48  ;;  %1639 = vmatprep.mubr.bf16.mxu0 %v3267_v49  ;;  %v3358_v48 = vld [vmem:[%s4501_s0 + $0x210] ss:$36 sps:$4 sm:$0xff]  }
  0x74   :  { %3070 = vmatpush3.bf16.msra.mxu0 %v3316_v52  ;;  %v3359_v49 = vld [vmem:[%s4501_s0 + $0x1d0] ss:$36 sps:$4 sm:$0xff]  }
  0x75   :  { %3071 = vmatprep.subr.bf16.mxu0 %v3382_v11 }
  0x78   :  { %3072 = vmatpush3.bf16.msra.mxu0 %v3326_v59 }
  0x7a   :  { %1512 = vmatmul.mubr.bf16.gmra.mrb[44].mxu1 %v3269_v53  ;;  %1640 = vmatmul.mubr.bf16.gmra.mrb[44].mxu0 %v3270_v55  ;;  %v3362_v55 = vld [vmem:[%s4501_s0 + $0x258] ss:$36 sps:$4 sm:$0xff]  }
  0x7b   :  { %1519 = vmatprep.mubr.bf16.mxu1 %v3273_v56  ;;  %1647 = vmatprep.mubr.bf16.mxu0 %v3275_v57  ;;  %v3363_v56 = vld [vmem:[%s4501_s0 + $0x218] ss:$36 sps:$4 sm:$0xff]  }
  0x82   :  { %1520 = vmatmul.mubr.bf16.gmra.mrb[48].mxu1 %v3277_v60  ;;  %1648 = vmatmul.mubr.bf16.gmra.mrb[48].mxu0 %v3278_v61  ;;  %v3364_v61 = vld [vmem:[%s4501_s0 + $0x2a4] ss:$36 sps:$4 sm:$0xff]  }
  0x83   :  { %1527 = vmatprep.mubr.bf16.mxu1 %v3280_v62  ;;  %1655 = vmatprep.mubr.bf16.mxu0 %v3282_v63 }
  0x8a   :  { %1528 = vmatmul.mubr.bf16.gmra.mrb[52].mxu1 %v3285_v0  ;;  %1656 = vmatmul.mubr.bf16.gmra.mrb[52].mxu0 %v3286_v1 }
  0x8b   :  { %1535 = vmatprep.mubr.bf16.mxu1 %v3289_v2  ;;  %1663 = vmatprep.mubr.bf16.mxu0 %v3291_v3 }
  0x92   :  { %1536 = vmatmul.mubr.bf16.gmra.mrb[56].mxu1 %v3293_v4  ;;  %1664 = vmatmul.mubr.bf16.gmra.mrb[56].mxu0 %v3294_v5 }
  0x93   :  { %1543 = vmatprep.mubr.bf16.mxu1 %v3297_v6  ;;  %1671 = vmatprep.mubr.bf16.mxu0 %v3299_v7  ;;  %v3366_v6 = vld [vmem:[%s4501_s0 + $0x2a0] ss:$36 sps:$4 sm:$0xff]  }
  0x94   :  { %v3367_v7 = vld [vmem:[%s4501_s0 + $0x260] ss:$36 sps:$4 sm:$0xff]  }
  0x9a   :  { %1544 = vmatmul.mubr.bf16.gmra.mrb[60].mxu1 %v3301_v8  ;;  %1672 = vmatmul.mubr.bf16.gmra.mrb[60].mxu0 %v3302_v9 }
  0x9b   :  { %1551 = vmatprep.mubr.bf16.mxu1 %v3304_v10  ;;  %1679 = vmatprep.mubr.bf16.mxu0 %v3306_v12 }
  0xa2   :  { %1552 = vmatmul.mubr.bf16.gmra.mrb[64].mxu1 %v3308_v13  ;;  %1680 = vmatmul.mubr.bf16.gmra.mrb[64].mxu0 %v3309_v14  ;;  %v3368_v13 = vld [vmem:[%s4501_s0 + $0x2ec] ss:$36 sps:$4 sm:$0xff]  }
  0xa3   :  { %1559 = vmatprep.mubr.bf16.mxu1 %v3312_v15  ;;  %1687 = vmatprep.mubr.bf16.mxu0 %v3314_v16 }
  0xaa   :  { %1560 = vmatmul.mubr.bf16.gmra.mrb[68].mxu1 %v3317_v18  ;;  %1688 = vmatmul.mubr.bf16.gmra.mrb[68].mxu0 %v3318_v19 }
  0xab   :  { %1567 = vmatprep.mubr.bf16.mxu1 %v2461_v20  ;;  %1695 = vmatprep.mubr.bf16.mxu0 %v3321_v21 }
  0xb2   :  { %1568 = vmatmul.mubr.bf16.gmra.mrb[72].mxu1 %v2460_v23  ;;  %1696 = vmatmul.mubr.bf16.gmra.mrb[72].mxu0 %v3325_v24  ;;  %v3371_v23 = vld [vmem:[%s4501_s0 + $0x2a8] ss:$36 sps:$4 sm:$0xff]  }
  0xb3   :  { %1703 = vmatprep.mubr.bf16.mxu0 %v2463_v25  ;;  %1743 = vmatprep.mubr.bf16.mxu1 %v3330_v26 }
  0xba   :  { %1704 = vmatmul.mubr.bf16.gmra.mrb[76].mxu0 %v2462_v28  ;;  %1744 = vmatmul.mubr.bf16.vlgmr.msra.gmra.mrb[76].mxu1 %v3328_v27  ;;  %v3372_v28 = vld [vmem:[%s4501_s0 + $0x334] ss:$36 sps:$4 sm:$0xff]  }
  0xbb   :  { %1751 = vmatprep.mubr.bf16.mxu1 %v3332_v29  ;;  %3073 = vmatprep.mubr.msk.bf16.mxu0 %vm3383_vm0, %v3382_v11 }
  0xc2   :  { %1752 = vmatmul.mubr.bf16.gmra.mrb[80].mxu1 %v3334_v30  ;;  %3074 = vmatmul.mubr.bf16.vlgmr.msra.gmra.mrb[80].mxu0 %v3335_v31 }
  0xc3   :  { %1759 = vmatprep.mubr.bf16.mxu1 %v3336_v32  ;;  %3077 = vmatprep.mubr.msk.bf16.mxu0 %vm3383_vm0, %v3382_v11 }
  0xca   :  { %1760 = vmatmul.mubr.bf16.gmra.mrb[84].mxu1 %v3338_v33  ;;  %3078 = vmatmul.mubr.bf16.gmra.mrb[84].mxu0 %v3339_v34  ;;  %v141_v33 = vld [vmem:[%s4501_s0 + $0x378] sm:$0x33] }
  0xcb   :  { %1767 = vmatprep.mubr.bf16.mxu1 %v3340_v35  ;;  %3081 = vmatprep.mubr.msk.bf16.mxu0 %vm3383_vm0, %v3382_v11 }
  0xd2   :  { %1768 = vmatmul.mubr.bf16.gmra.mrb[88].mxu1 %v3342_v36  ;;  %3082 = vmatmul.mubr.bf16.gmra.mrb[88].mxu0 %v3343_v37 }
  0xd3   :  { %1775 = vmatprep.mubr.bf16.mxu1 %v3344_v38  ;;  %3085 = vmatprep.mubr.msk.bf16.mxu0 %vm3383_vm0, %v3382_v11  ;;  %v3374_v38 = vld [vmem:[%s4501_s0 + $0x330] ss:$36 sps:$4 sm:$0xff]  }
  0xda   :  { %1776 = vmatmul.mubr.bf16.gmra.mrb[92].mxu1 %v3346_v39  ;;  %3086 = vmatmul.mubr.bf16.gmra.mrb[92].mxu0 %v3347_v40  ;;  %v3375_v39 = vld [vmem:[%s4501_s0 + $0x2f0] ss:$36 sps:$4 sm:$0xff]  }
  0xdb   :  { %1783 = vmatprep.mubr.bf16.mxu1 %v3348_v41  ;;  %3089 = vmatprep.mubr.msk.bf16.mxu0 %vm3383_vm0, %v3382_v11 }
  0xe2   :  { %1784 = vmatmul.mubr.bf16.gmra.mrb[96].mxu1 %v3350_v42  ;;  %3090 = vmatmul.mubr.bf16.gmra.mrb[96].mxu0 %v3351_v43 }
  0xe3   :  { %1791 = vmatprep.mubr.bf16.mxu1 %v3352_v44  ;;  %3093 = vmatprep.mubr.msk.bf16.mxu0 %vm3383_vm0, %v3382_v11  ;;  %v2465_v44 = vcombine.high %v141_v33, %v141_v33 }
  0xea   :  { %1792 = vmatmul.mubr.bf16.gmra.mrb[100].mxu1 %v3354_v45  ;;  %3094 = vmatmul.mubr.bf16.gmra.mrb[100].mxu0 %v3355_v46 }
  0xeb   :  { %1799 = vmatprep.mubr.bf16.mxu1 %v3356_v47  ;;  %3097 = vmatprep.mubr.msk.bf16.mxu0 %vm3383_vm0, %v3382_v11 }
  0xf2   :  { %1800 = vmatmul.mubr.bf16.gmra.mrb[104].mxu1 %v3358_v48  ;;  %3098 = vmatmul.mubr.bf16.gmra.mrb[104].mxu0 %v3359_v49 }
  0xf3   :  { %1807 = vmatprep.mubr.bf16.mxu1 %v3360_v50  ;;  %3101 = vmatprep.mubr.msk.bf16.mxu0 %vm3383_vm0, %v3382_v11 }
  0xf5   :  { %v2676_v51 = vpop.f32.mrb[0].mxu0  ;;  %v2718_v52 = vpop.f32.mrb[0].mxu1 }
  0xf6   :  { %v2677_v53 = vpop.f32.mrb[1].mxu0  ;;  %v2719_v54 = vpop.f32.mrb[1].mxu1 }
  0xf7   :  { %v3952_v57 = vadd.f32 %v2677_v53, %v2676_v51  ;;  %v2679_v58 = vpop.f32.mrb[2].mxu0  ;;  %v3954_v59 = vadd.f32 %v2719_v54, %v2718_v52  ;;  %v2721_v60 = vpop.f32.mrb[2].mxu1  ;;  %v2464_v53 = vcombine.low %v141_v33, %v141_v33  ;;  %v3378_v54 = vld [vmem:[%s4501_s0 + $0x338] ss:$36 sps:$4 sm:$0xff]  }
  0xf8   :  { %v2680_v62 = vpop.f32.mrb[3].mxu0  ;;  %v2722_v63 = vpop.f32.mrb[3].mxu1 }
  0xf9   :  { %v3959_v0 = vadd.f32 %v2680_v62, %v2679_v58  ;;  %v3961_v1 = vadd.f32 %v2722_v63, %v2721_v60 }
  0xfa   :  { %1808 = vmatmul.mubr.bf16.gmra.mrb[108].mxu1 %v3362_v55  ;;  %3102 = vmatmul.mubr.bf16.gmra.mrb[108].mxu0 %v3363_v56 }
  0xfb   :  { %1815 = vmatprep.mubr.bf16.mxu1 %v3364_v61  ;;  %3105 = vmatprep.mubr.msk.bf16.mxu0 %vm3383_vm0, %v3382_v11 }
  0xfd   :  { %v2682_v2 = vpop.f32.mrb[4].mxu0  ;;  %v2724_v3 = vpop.f32.mrb[4].mxu1 }
  0xfe   :  { %v2683_v4 = vpop.f32.mrb[5].mxu0  ;;  %v2725_v5 = vpop.f32.mrb[5].mxu1 }
  0xff   :  { %v3971_v8 = vadd.f32 %v2683_v4, %v2682_v2  ;;  %v2685_v9 = vpop.f32.mrb[6].mxu0  ;;  %v3973_v10 = vadd.f32 %v2725_v5, %v2724_v3  ;;  %v2727_v12 = vpop.f32.mrb[6].mxu1 }
 0x100   :  { %v2686_v14 = vpop.f32.mrb[7].mxu0  ;;  %v2728_v15 = vpop.f32.mrb[7].mxu1 }
 0x101   :  { %v3978_v16 = vadd.f32 %v2686_v14, %v2685_v9  ;;  %v3980_v17 = vadd.f32 %v2728_v15, %v2727_v12 }
 0x102   :  { %1816 = vmatmul.mubr.bf16.gmra.mrb[112].mxu1 %v3366_v6  ;;  %3106 = vmatmul.mubr.bf16.gmra.mrb[112].mxu0 %v3367_v7  ;;  %v3379_v7 = vld [vmem:[%s4501_s0 + $0x380] ss:$0 sps:$4 sm:$0x33]  }
 0x103   :  { %1823 = vmatprep.mubr.bf16.mxu1 %v3368_v13  ;;  %3109 = vmatprep.mubr.msk.bf16.mxu0 %vm3383_vm0, %v3382_v11 }
 0x105   :  { %v2688_v18 = vpop.f32.mrb[8].mxu0  ;;  %v2730_v19 = vpop.f32.mrb[8].mxu1 }
 0x106   :  { %v2689_v20 = vpop.f32.mrb[9].mxu0  ;;  %v2731_v21 = vpop.f32.mrb[9].mxu1 }
 0x107   :  { %v3990_v24 = vadd.f32 %v2689_v20, %v2688_v18  ;;  %v2691_v25 = vpop.f32.mrb[10].mxu0  ;;  %v3992_v26 = vadd.f32 %v2731_v21, %v2730_v19  ;;  %v2733_v27 = vpop.f32.mrb[10].mxu1 }
 0x108   :  { %v2692_v29 = vpop.f32.mrb[11].mxu0  ;;  %v2734_v30 = vpop.f32.mrb[11].mxu1 }
 0x109   :  { %v3997_v31 = vadd.f32 %v2692_v29, %v2691_v25  ;;  %v3999_v32 = vadd.f32 %v2734_v30, %v2733_v27 }
 0x10a   :  { %1824 = vmatmul.mubr.bf16.gmra.mrb[116].mxu1 %v3370_v22  ;;  %3110 = vmatmul.mubr.bf16.gmra.mrb[116].mxu0 %v3371_v23 }
 0x10b   :  { %1831 = vmatprep.mubr.bf16.mxu1 %v3372_v28  ;;  %3113 = vmatprep.mubr.msk.bf16.mxu0 %vm3383_vm0, %v3382_v11 }
 0x10d   :  { %v2694_v34 = vpop.f32.mrb[12].mxu0  ;;  %v2736_v35 = vpop.f32.mrb[12].mxu1 }
 0x10e   :  { %v2695_v36 = vpop.f32.mrb[13].mxu0  ;;  %v2737_v37 = vpop.f32.mrb[13].mxu1 }
 0x10f   :  { %v4012_v40 = vadd.f32 %v2695_v36, %v2694_v34  ;;  %v2697_v41 = vpop.f32.mrb[14].mxu0  ;;  %v4014_v42 = vadd.f32 %v2737_v37, %v2736_v35  ;;  %v2739_v43 = vpop.f32.mrb[14].mxu1 }
 0x110   :  { %v2698_v45 = vpop.f32.mrb[15].mxu0  ;;  %v2740_v46 = vpop.f32.mrb[15].mxu1 }
 0x111   :  { %v4016_v47 = vadd.f32 %v2698_v45, %v2697_v41  ;;  %v4018_v48 = vadd.f32 %v2740_v46, %v2739_v43 }
 0x112   :  { %1832 = vmatmul.mubr.bf16.gmra.mrb[120].mxu1 %v3374_v38  ;;  %3114 = vmatmul.mubr.bf16.gmra.mrb[120].mxu0 %v3375_v39 }
 0x113   :  { %1839 = vmatprep.mubr.bf16.mxu1 %v2465_v44  ;;  %3117 = vmatprep.mubr.msk.bf16.mxu0 %vm3383_vm0, %v3382_v11 }
 0x115   :  { %v2700_v49 = vpop.f32.mrb[16].mxu0  ;;  %v2742_v50 = vpop.f32.mrb[16].mxu1 }
 0x116   :  { %v2701_v51 = vpop.f32.mrb[17].mxu0  ;;  %v2743_v52 = vpop.f32.mrb[17].mxu1 }
 0x117   :  { %v4025_v55 = vadd.f32 %v2701_v51, %v2700_v49  ;;  %v2703_v56 = vpop.f32.mrb[18].mxu0  ;;  %v4027_v58 = vadd.f32 %v2743_v52, %v2742_v50  ;;  %v2745_v60 = vpop.f32.mrb[18].mxu1 }
 0x118   :  { %v2704_v61 = vpop.f32.mrb[19].mxu0  ;;  %v2746_v62 = vpop.f32.mrb[19].mxu1 }
 0x119   :  { %v4029_v63 = vadd.f32 %v2704_v61, %v2703_v56  ;;  %v4031_v2 = vadd.f32 %v2746_v62, %v2745_v60 }
 0x11a   :  { %1840 = vmatmul.mubr.bf16.gmra.mrb[124].mxu1 %v2464_v53  ;;  %3118 = vmatmul.mubr.bf16.gmra.mrb[124].mxu0 %v3378_v54 }
 0x11b   :  { %3121 = vmatprep.mubr.msk.bf16.mxu0 %vm3383_vm0, %v3382_v11 }
 0x11d   :  { %v2706_v3 = vpop.f32.mrb[20].mxu0  ;;  %v2748_v4 = vpop.f32.mrb[20].mxu1 }
 0x11e   :  { %v2707_v5 = vpop.f32.mrb[21].mxu0  ;;  %v2749_v6 = vpop.f32.mrb[21].mxu1 }
 0x11f   :  { %v4038_v9 = vadd.f32 %v2707_v5, %v2706_v3  ;;  %v2709_v12 = vpop.f32.mrb[22].mxu0  ;;  %v4040_v13 = vadd.f32 %v2749_v6, %v2748_v4  ;;  %v2751_v14 = vpop.f32.mrb[22].mxu1 }
 0x120   :  { %v2710_v15 = vpop.f32.mrb[23].mxu0  ;;  %v2752_v18 = vpop.f32.mrb[23].mxu1 }
 0x121   :  { %v4042_v19 = vadd.f32 %v2710_v15, %v2709_v12 }
 0x122   :  { %3122 = vmatmul.mubr.bf16.gmra.mrb[128].mxu0 %v3379_v7 }
 0x125   :  { %v2712_v11 = vpop.f32.mrb[24].mxu0  ;;  %v2770_v20 = vpop.f32.mrb[24].mxu1 }
 0x126   :  { %v2713_v21 = vpop.f32.mrb[25].mxu0  ;;  %v2771_v22 = vpop.f32.mrb[25].mxu1 }
 0x127   :  { %v4044_v23 = vadd.f32 %v2713_v21, %v2712_v11  ;;  %v2772_v25 = vadd.f32 %v2771_v22, %v2770_v20  ;;  %v2715_v27 = vpop.f32.mrb[26].mxu0  ;;  %v2773_v28 = vpop.f32.mrb[26].mxu1 }
 0x128   :  { %v2716_v29 = vpop.f32.mrb[27].mxu0  ;;  %v2774_v30 = vpop.f32.mrb[27].mxu1 }
 0x129   :  { %v1474_v33 = vadd.f32 %v2772_v25, %v3952_v57  ;;  %v4047_v34 = vadd.f32 %v2716_v29, %v2715_v27  ;;  %v2775_v35 = vadd.f32 %v2774_v30, %v2773_v28 }
 0x12b   :  { %v1477_v36 = vadd.f32 %v2775_v35, %v3959_v0 }
 0x12d   :  { %v2776_v37 = vpop.f32.mrb[28].mxu1  ;;  %v2864_v38 = vpop.f32.mrb[28].mxu0 }
 0x12e   :  { %v2777_v39 = vpop.f32.mrb[29].mxu1  ;;  %v2865_v41 = vpop.f32.mrb[29].mxu0 }
 0x12f   :  { %v2778_v43 = vadd.f32 %v2777_v39, %v2776_v37  ;;  %v2866_v44 = vadd.f32 %v2865_v41, %v2864_v38  ;;  %v2779_v45 = vpop.f32.mrb[30].mxu1  ;;  %v2867_v46 = vpop.f32.mrb[30].mxu0 }
 0x130   :  { %v2780_v49 = vpop.f32.mrb[31].mxu1  ;;  %v2868_v50 = vpop.f32.mrb[31].mxu0 }
 0x131   :  { %v1482_v51 = vadd.f32 %v2778_v43, %v3971_v8  ;;  %v4051_v52 = vadd.f32 %v2866_v44, %v1474_v33  ;;  %v2781_v57 = vadd.f32 %v2780_v49, %v2779_v45  ;;  %v2869_v53 = vadd.f32 %v2868_v50, %v2867_v46 }
 0x133   :  { %v1485_v54 = vadd.f32 %v2781_v57, %v3978_v16  ;;  %v4054_v56 = vadd.f32 %v2869_v53, %v1477_v36 }
 0x135   :  { %v2782_v0 = vpop.f32.mrb[32].mxu1  ;;  %v2870_v60 = vpop.f32.mrb[32].mxu0 }
 0x136   :  { %v2783_v61 = vpop.f32.mrb[33].mxu1  ;;  %v2871_v62 = vpop.f32.mrb[33].mxu0 }
 0x137   :  { %v2784_v3 = vadd.f32 %v2783_v61, %v2782_v0  ;;  %v2872_v4 = vadd.f32 %v2871_v62, %v2870_v60  ;;  %v2785_v5 = vpop.f32.mrb[34].mxu1  ;;  %v2873_v6 = vpop.f32.mrb[34].mxu0 }
 0x138   :  { %v2786_v7 = vpop.f32.mrb[35].mxu1  ;;  %v2874_v12 = vpop.f32.mrb[35].mxu0 }
 0x139   :  { %v1490_v8 = vadd.f32 %v2784_v3, %v3990_v24  ;;  %v4057_v14 = vadd.f32 %v2872_v4, %v1482_v51  ;;  %v2787_v15 = vadd.f32 %v2786_v7, %v2785_v5  ;;  %v2875_v18 = vadd.f32 %v2874_v12, %v2873_v6 }
 0x13b   :  { %v1493_v16 = vadd.f32 %v2787_v15, %v3997_v31  ;;  %v4060_v11 = vadd.f32 %v2875_v18, %v1485_v54 }
 0x13d   :  { %v2788_v20 = vpop.f32.mrb[36].mxu1  ;;  %v2876_v21 = vpop.f32.mrb[36].mxu0 }
 0x13e   :  { %v2789_v22 = vpop.f32.mrb[37].mxu1  ;;  %v2877_v25 = vpop.f32.mrb[37].mxu0 }
 0x13f   :  { %v2790_v27 = vadd.f32 %v2789_v22, %v2788_v20  ;;  %v2878_v28 = vadd.f32 %v2877_v25, %v2876_v21  ;;  %v2791_v29 = vpop.f32.mrb[38].mxu1  ;;  %v2879_v30 = vpop.f32.mrb[38].mxu0 }
 0x140   :  { %v2792_v33 = vpop.f32.mrb[39].mxu1  ;;  %v2880_v35 = vpop.f32.mrb[39].mxu0 }
 0x141   :  { %v1498_v24 = vadd.f32 %v2790_v27, %v4012_v40  ;;  %v4063_v36 = vadd.f32 %v2878_v28, %v1490_v8  ;;  %v2793_v37 = vadd.f32 %v2792_v33, %v2791_v29  ;;  %v2881_v38 = vadd.f32 %v2880_v35, %v2879_v30 }
 0x143   :  { %v1501_v31 = vadd.f32 %v2793_v37, %v4016_v47  ;;  %v4066_v39 = vadd.f32 %v2881_v38, %v1493_v16 }
 0x145   :  { %v2794_v41 = vpop.f32.mrb[40].mxu1  ;;  %v2882_v43 = vpop.f32.mrb[40].mxu0 }
 0x146   :  { %v2795_v44 = vpop.f32.mrb[41].mxu1  ;;  %v2883_v45 = vpop.f32.mrb[41].mxu0 }
 0x147   :  { %v2796_v46 = vadd.f32 %v2795_v44, %v2794_v41  ;;  %v2884_v49 = vadd.f32 %v2883_v45, %v2882_v43  ;;  %v2797_v50 = vpop.f32.mrb[42].mxu1  ;;  %v2885_v51 = vpop.f32.mrb[42].mxu0 }
 0x148   :  { %v2798_v57 = vpop.f32.mrb[43].mxu1  ;;  %v2886_v53 = vpop.f32.mrb[43].mxu0 }
 0x149   :  { %v1506_v40 = vadd.f32 %v2796_v46, %v4025_v55  ;;  %v4069_v54 = vadd.f32 %v2884_v49, %v1498_v24  ;;  %v2799_v0 = vadd.f32 %v2798_v57, %v2797_v50  ;;  %v2887_v60 = vadd.f32 %v2886_v53, %v2885_v51 }
 0x14b   :  { %v1509_v47 = vadd.f32 %v2799_v0, %v4029_v63  ;;  %v4072_v61 = vadd.f32 %v2887_v60, %v1501_v31 }
 0x14d   :  { %v2800_v62 = vpop.f32.mrb[44].mxu1  ;;  %v2888_v3 = vpop.f32.mrb[44].mxu0 }
 0x14e   :  { %v2801_v4 = vpop.f32.mrb[45].mxu1  ;;  %v2889_v5 = vpop.f32.mrb[45].mxu0 }
 0x14f   :  { %v2802_v6 = vadd.f32 %v2801_v4, %v2800_v62  ;;  %v2890_v7 = vadd.f32 %v2889_v5, %v2888_v3  ;;  %v2803_v12 = vpop.f32.mrb[46].mxu1  ;;  %v2891_v8 = vpop.f32.mrb[46].mxu0 }
 0x150   :  { %v2804_v15 = vpop.f32.mrb[47].mxu1  ;;  %v2892_v18 = vpop.f32.mrb[47].mxu0 }
 0x151   :  { %v1514_v55 = vadd.f32 %v2802_v6, %v4038_v9  ;;  %v4075_v16 = vadd.f32 %v2890_v7, %v1506_v40  ;;  %v2805_v20 = vadd.f32 %v2804_v15, %v2803_v12  ;;  %v2893_v21 = vadd.f32 %v2892_v18, %v2891_v8 }
 0x153   :  { %v1517_v63 = vadd.f32 %v2805_v20, %v4042_v19  ;;  %v4078_v22 = vadd.f32 %v2893_v21, %v1509_v47 }
 0x155   :  { %v2806_v25 = vpop.f32.mrb[48].mxu1  ;;  %v2894_v27 = vpop.f32.mrb[48].mxu0 }
 0x156   :  { %v2807_v28 = vpop.f32.mrb[49].mxu1  ;;  %v2895_v29 = vpop.f32.mrb[49].mxu0 }
 0x157   :  { %v2808_v30 = vadd.f32 %v2807_v28, %v2806_v25  ;;  %v2896_v33 = vadd.f32 %v2895_v29, %v2894_v27  ;;  %v2809_v35 = vpop.f32.mrb[50].mxu1  ;;  %v2897_v24 = vpop.f32.mrb[50].mxu0 }
 0x158   :  { %v2810_v37 = vpop.f32.mrb[51].mxu1  ;;  %v2898_v38 = vpop.f32.mrb[51].mxu0 }
 0x159   :  { %v1522_v9 = vadd.f32 %v2808_v30, %v4044_v23  ;;  %v4081_v31 = vadd.f32 %v2896_v33, %v1514_v55  ;;  %v2811_v41 = vadd.f32 %v2810_v37, %v2809_v35  ;;  %v2899_v43 = vadd.f32 %v2898_v38, %v2897_v24 }
 0x15b   :  { %v1525_v19 = vadd.f32 %v2811_v41, %v4047_v34  ;;  %v4084_v44 = vadd.f32 %v2899_v43, %v1517_v63 }
 0x15d   :  { %v2812_v45 = vpop.f32.mrb[52].mxu1  ;;  %v2900_v46 = vpop.f32.mrb[52].mxu0 }
 0x15e   :  { %v2813_v49 = vpop.f32.mrb[53].mxu1  ;;  %v2901_v50 = vpop.f32.mrb[53].mxu0 }
 0x15f   :  { %v2814_v51 = vadd.f32 %v2813_v49, %v2812_v45  ;;  %v2902_v57 = vadd.f32 %v2901_v50, %v2900_v46  ;;  %v2815_v53 = vpop.f32.mrb[54].mxu1  ;;  %v2903_v40 = vpop.f32.mrb[54].mxu0 }
 0x160   :  { %v2816_v0 = vpop.f32.mrb[55].mxu1  ;;  %v2904_v60 = vpop.f32.mrb[55].mxu0 }
 0x161   :  { %v1530_v23 = vadd.f32 %v2814_v51, %v3954_v59  ;;  %v4087_v47 = vadd.f32 %v2902_v57, %v1522_v9  ;;  %v2817_v62 = vadd.f32 %v2816_v0, %v2815_v53  ;;  %v2905_v3 = vadd.f32 %v2904_v60, %v2903_v40 }
 0x163   :  { %v1533_v34 = vadd.f32 %v2817_v62, %v3961_v1  ;;  %v4090_v4 = vadd.f32 %v2905_v3, %v1525_v19 }
 0x165   :  { %v2818_v5 = vpop.f32.mrb[56].mxu1  ;;  %v2906_v6 = vpop.f32.mrb[56].mxu0 }
 0x166   :  { %v2819_v7 = vpop.f32.mrb[57].mxu1  ;;  %v2907_v12 = vpop.f32.mrb[57].mxu0 }
 0x167   :  { %v2820_v8 = vadd.f32 %v2819_v7, %v2818_v5  ;;  %v2908_v15 = vadd.f32 %v2907_v12, %v2906_v6  ;;  %v2821_v18 = vpop.f32.mrb[58].mxu1  ;;  %v2909_v55 = vpop.f32.mrb[58].mxu0 }
 0x168   :  { %v2822_v20 = vpop.f32.mrb[59].mxu1  ;;  %v2910_v21 = vpop.f32.mrb[59].mxu0 }
 0x169   :  { %v1538_v59 = vadd.f32 %v2820_v8, %v3973_v10  ;;  %v4093_v63 = vadd.f32 %v2908_v15, %v1530_v23  ;;  %v2823_v25 = vadd.f32 %v2822_v20, %v2821_v18  ;;  %v2911_v27 = vadd.f32 %v2910_v21, %v2909_v55 }
 0x16b   :  { %v1541_v1 = vadd.f32 %v2823_v25, %v3980_v17  ;;  %v4096_v28 = vadd.f32 %v2911_v27, %v1533_v34 }
 0x16d   :  { %v2824_v29 = vpop.f32.mrb[60].mxu1  ;;  %v2912_v30 = vpop.f32.mrb[60].mxu0 }
 0x16e   :  { %v2825_v33 = vpop.f32.mrb[61].mxu1  ;;  %v2913_v35 = vpop.f32.mrb[61].mxu0 }
 0x16f   :  { %v2826_v24 = vadd.f32 %v2825_v33, %v2824_v29  ;;  %v2914_v37 = vadd.f32 %v2913_v35, %v2912_v30  ;;  %v2827_v38 = vpop.f32.mrb[62].mxu1  ;;  %v2915_v9 = vpop.f32.mrb[62].mxu0 }
 0x170   :  { %v2828_v41 = vpop.f32.mrb[63].mxu1  ;;  %v2916_v43 = vpop.f32.mrb[63].mxu0 }
 0x171   :  { %v1546_v10 = vadd.f32 %v2826_v24, %v3992_v26  ;;  %v4099_v19 = vadd.f32 %v2914_v37, %v1538_v59  ;;  %v2829_v45 = vadd.f32 %v2828_v41, %v2827_v38  ;;  %v2917_v46 = vadd.f32 %v2916_v43, %v2915_v9 }
 0x173   :  { %v1549_v17 = vadd.f32 %v2829_v45, %v3999_v32  ;;  %v4102_v49 = vadd.f32 %v2917_v46, %v1541_v1 }
 0x175   :  { %v2830_v50 = vpop.f32.mrb[64].mxu1  ;;  %v2918_v51 = vpop.f32.mrb[64].mxu0 }
 0x176   :  { %v2831_v57 = vpop.f32.mrb[65].mxu1  ;;  %v2919_v53 = vpop.f32.mrb[65].mxu0 }
 0x177   :  { %v2832_v40 = vadd.f32 %v2831_v57, %v2830_v50  ;;  %v2920_v0 = vadd.f32 %v2919_v53, %v2918_v51  ;;  %v2833_v60 = vpop.f32.mrb[66].mxu1  ;;  %v2921_v23 = vpop.f32.mrb[66].mxu0 }
 0x178   :  { %v2834_v62 = vpop.f32.mrb[67].mxu1  ;;  %v2922_v3 = vpop.f32.mrb[67].mxu0 }
 0x179   :  { %v1554_v26 = vadd.f32 %v2832_v40, %v4014_v42  ;;  %v4105_v34 = vadd.f32 %v2920_v0, %v1546_v10  ;;  %v2835_v5 = vadd.f32 %v2834_v62, %v2833_v60  ;;  %v2923_v6 = vadd.f32 %v2922_v3, %v2921_v23 }
 0x17b   :  { %v1557_v32 = vadd.f32 %v2835_v5, %v4018_v48  ;;  %v4108_v7 = vadd.f32 %v2923_v6, %v1549_v17 }
 0x17d   :  { %v2836_v12 = vpop.f32.mrb[68].mxu1  ;;  %v2924_v8 = vpop.f32.mrb[68].mxu0 }
 0x17e   :  { %v2837_v15 = vpop.f32.mrb[69].mxu1  ;;  %v2925_v18 = vpop.f32.mrb[69].mxu0 }
 0x17f   :  { %v2838_v55 = vadd.f32 %v2837_v15, %v2836_v12  ;;  %v2926_v20 = vadd.f32 %v2925_v18, %v2924_v8  ;;  %v2839_v21 = vpop.f32.mrb[70].mxu1  ;;  %v2927_v59 = vpop.f32.mrb[70].mxu0 }
 0x180   :  { %v2840_v25 = vpop.f32.mrb[71].mxu1  ;;  %v2928_v27 = vpop.f32.mrb[71].mxu0 }
 0x181   :  { %v1562_v42 = vadd.f32 %v2838_v55, %v4027_v58  ;;  %v4111_v1 = vadd.f32 %v2926_v20, %v1554_v26  ;;  %v2841_v29 = vadd.f32 %v2840_v25, %v2839_v21  ;;  %v2929_v30 = vadd.f32 %v2928_v27, %v2927_v59 }
 0x183   :  { %v1565_v48 = vadd.f32 %v2841_v29, %v4031_v2  ;;  %v4114_v33 = vadd.f32 %v2929_v30, %v1557_v32 }
 0x185   :  { %v2842_v35 = vpop.f32.mrb[72].mxu1  ;;  %v2930_v24 = vpop.f32.mrb[72].mxu0 }
 0x186   :  { %v2843_v37 = vpop.f32.mrb[73].mxu1  ;;  %v2931_v38 = vpop.f32.mrb[73].mxu0 }
 0x187   :  { %v2844_v9 = vadd.f32 %v2843_v37, %v2842_v35  ;;  %v2932_v41 = vadd.f32 %v2931_v38, %v2930_v24  ;;  %v2933_v43 = vpop.f32.mrb[74].mxu0  ;;  %v2845_v10 = vpop.f32.mrb[74].mxu1 }
 0x188   :  { %v2934_v45 = vpop.f32.mrb[75].mxu0  ;;  %v2846_v46 = vpop.f32.mrb[75].mxu1 }
 0x189   :  { %v1570_v58 = vadd.f32 %v2844_v9, %v4040_v13  ;;  %v4117_v17 = vadd.f32 %v2932_v41, %v1562_v42  ;;  %v2935_v50 = vadd.f32 %v2934_v45, %v2933_v43 }
 0x18b   :  { %v4119_v51 = vadd.f32 %v2935_v50, %v1565_v48 }
 0x18d   :  { %v2936_v2 = vpop.f32.mrb[76].mxu0  ;;  %v2958_v57 = vpop.f32.mrb[76].mxu1 }
 0x18e   :  { %v2937_v53 = vpop.f32.mrb[77].mxu0  ;;  %v2959_v40 = vpop.f32.mrb[77].mxu1 }
 0x18f   :  { %v2938_v0 = vadd.f32 %v2937_v53, %v2936_v2  ;;  %v2960_v60 = vadd.f32 %v2959_v40, %v2958_v57  ;;  %v2939_v23 = vpop.f32.mrb[78].mxu0  ;;  %v2961_v62 = vpop.f32.mrb[78].mxu1 }
 0x190   :  { %v2940_v3 = vpop.f32.mrb[79].mxu0  ;;  %v2962_v26 = vpop.f32.mrb[79].mxu1 }
 0x191   :  { %v4121_v5 = vadd.f32 %v2938_v0, %v1570_v58  ;;  %v2963_v6 = vadd.f32 %v2962_v26, %v2961_v62  ;;  %v1746_v13 = vadd.f32 %v2960_v60, %v4051_v52 }
 0x193   :  { %v1749_v32 = vadd.f32 %v2963_v6, %v4054_v56 }
 0x195   :  { %v2964_v12 = vpop.f32.mrb[80].mxu1  ;;  %v1881_v8 = vpop.f32.mrb[80].mxu0 }
 0x196   :  { %v4125_v15 = vadd.f32 %v1881_v8, %v1746_v13  ;;  %v2965_v18 = vpop.f32.mrb[81].mxu1  ;;  %v3075_v55 = vpop.f32.mrb[81].mxu0 }
 0x197   :  { %v2966_v20 = vadd.f32 %v2965_v18, %v2964_v12  ;;  %v2967_v21 = vpop.f32.mrb[82].mxu1  ;;  %v1884_v59 = vpop.f32.mrb[82].mxu0 }
 0x198   :  { %v4127_v25 = vadd.f32 %v1884_v59, %v1749_v32  ;;  %v2968_v27 = vpop.f32.mrb[83].mxu1  ;;  %v3076_v42 = vpop.f32.mrb[83].mxu0 }
 0x199   :  { %v2969_v29 = vadd.f32 %v2968_v27, %v2967_v21  ;;  %v1754_v30 = vadd.f32 %v2966_v20, %v4057_v14 }
 0x19a   :  { %v2016_v23 = vmul.f32 %v4127_v25, %v4127_v25  ;;  %v1983_v13 = vadd.f32 %v4127_v25, %v4125_v15 }
 0x19b   :  { %v1757_v52 = vadd.f32 %v2969_v29, %v4060_v11 }
 0x19d   :  { %v2970_v48 = vpop.f32.mrb[84].mxu1  ;;  %v1889_v56 = vpop.f32.mrb[84].mxu0 }
 0x19e   :  { %v4131_v35 = vadd.f32 %v1889_v56, %v1754_v30  ;;  %v2971_v24 = vpop.f32.mrb[85].mxu1  ;;  %v3079_v37 = vpop.f32.mrb[85].mxu0 }
 0x19f   :  { %v2972_v38 = vadd.f32 %v2971_v24, %v2970_v48  ;;  %v2973_v9 = vpop.f32.mrb[86].mxu1  ;;  %v1892_v41 = vpop.f32.mrb[86].mxu0 }
 0x1a0   :  { %v4133_v43 = vadd.f32 %v1892_v41, %v1757_v52  ;;  %v2974_v10 = vpop.f32.mrb[87].mxu1  ;;  %v3080_v45 = vpop.f32.mrb[87].mxu0  ;;  %v2017_v32 = vmul.f32 %v4131_v35, %v4131_v35  ;;  %v1984_v18 = vadd.f32 %v1983_v13, %v4131_v35 }
 0x1a1   :  { %v2975_v46 = vadd.f32 %v2974_v10, %v2973_v9  ;;  %v1762_v58 = vadd.f32 %v2972_v38, %v4063_v36 }
 0x1a2   :  { %v1985_v48 = vadd.f32 %v1984_v18, %v4133_v43 }
 0x1a3   :  { %v1765_v14 = vadd.f32 %v2975_v46, %v4066_v39  ;;  %v2015_v39 = vmul.f32 %v4125_v15, %v4125_v15 }
 0x1a5   :  { %v2976_v50 = vpop.f32.mrb[88].mxu1  ;;  %v1897_v11 = vpop.f32.mrb[88].mxu0  ;;  %v2040_v8 = vadd.f32 %v2016_v23, %v2015_v39 }
 0x1a6   :  { %v4137_v2 = vadd.f32 %v1897_v11, %v1762_v58  ;;  %v2977_v57 = vpop.f32.mrb[89].mxu1  ;;  %v3083_v53 = vpop.f32.mrb[89].mxu0 }
 0x1a7   :  { %v2978_v40 = vadd.f32 %v2977_v57, %v2976_v50  ;;  %v2979_v0 = vpop.f32.mrb[90].mxu1  ;;  %v1900_v60 = vpop.f32.mrb[90].mxu0  ;;  %v2041_v21 = vadd.f32 %v2040_v8, %v2017_v32 }
 0x1a8   :  { %v4141_v62 = vadd.f32 %v1900_v60, %v1765_v14  ;;  %v2980_v3 = vpop.f32.mrb[91].mxu1  ;;  %v3084_v26 = vpop.f32.mrb[91].mxu0  ;;  %v1986_v10 = vadd.f32 %v1985_v48, %v4137_v2 }
 0x1a9   :  { %v2981_v6 = vadd.f32 %v2980_v3, %v2979_v0  ;;  %v1770_v36 = vadd.f32 %v2978_v40, %v4069_v54  ;;  %v2018_v54 = vmul.f32 %v4133_v43, %v4133_v43 }
 0x1aa   :  { %v2020_v58 = vmul.f32 %v4141_v62, %v4141_v62  ;;  %v1987_v11 = vadd.f32 %v1986_v10, %v4141_v62 }
 0x1ab   :  { %v1773_v12 = vadd.f32 %v2981_v6, %v4072_v61  ;;  %v2019_v61 = vmul.f32 %v4137_v2, %v4137_v2  ;;  %v2042_v41 = vadd.f32 %v2041_v21, %v2018_v54 }
 0x1ad   :  { %v2982_v55 = vpop.f32.mrb[92].mxu1  ;;  %v1905_v20 = vpop.f32.mrb[92].mxu0  ;;  %v2043_v46 = vadd.f32 %v2042_v41, %v2019_v61 }
 0x1ae   :  { %v4154_v59 = vadd.f32 %v1905_v20, %v1770_v36  ;;  %v2983_v27 = vpop.f32.mrb[93].mxu1  ;;  %v3087_v42 = vpop.f32.mrb[93].mxu0 }
 0x1af   :  { %v2984_v29 = vadd.f32 %v2983_v27, %v2982_v55  ;;  %v2985_v30 = vpop.f32.mrb[94].mxu1  ;;  %v1908_v52 = vpop.f32.mrb[94].mxu0  ;;  %v2044_v3 = vadd.f32 %v2043_v46, %v2020_v58 }
 0x1b0   :  { %v4159_v56 = vadd.f32 %v1908_v52, %v1773_v12  ;;  %v2986_v24 = vpop.f32.mrb[95].mxu1  ;;  %v3088_v37 = vpop.f32.mrb[95].mxu0  ;;  %v2021_v57 = vmul.f32 %v4154_v59, %v4154_v59 }
 0x1b1   :  { %v2987_v38 = vadd.f32 %v2986_v24, %v2985_v30  ;;  %v1778_v9 = vadd.f32 %v2984_v29, %v4075_v16 }
 0x1b2   :  { %v2045_v32 = vadd.f32 %v2044_v3, %v2021_v57  ;;  %v2022_v12 = vmul.f32 %v4159_v56, %v4159_v56 }
 0x1b3   :  { %v1781_v45 = vadd.f32 %v2987_v38, %v4078_v22  ;;  %v1988_v22 = vadd.f32 %v1987_v11, %v4154_v59 }
 0x1b4   :  { %v2046_v54 = vadd.f32 %v2045_v32, %v2022_v12 }
 0x1b5   :  { %v2988_v14 = vpop.f32.mrb[96].mxu1  ;;  %v1913_v50 = vpop.f32.mrb[96].mxu0  ;;  %v1989_v18 = vadd.f32 %v1988_v22, %v4159_v56 }
 0x1b6   :  { %v4169_v53 = vadd.f32 %v1913_v50, %v1778_v9  ;;  %v2989_v40 = vpop.f32.mrb[97].mxu1  ;;  %v3091_v16 = vpop.f32.mrb[97].mxu0 }
 0x1b7   :  { %v2990_v0 = vadd.f32 %v2989_v40, %v2988_v14  ;;  %v2991_v60 = vpop.f32.mrb[98].mxu1  ;;  %v1916_v23 = vpop.f32.mrb[98].mxu0 }
 0x1b8   :  { %v4172_v26 = vadd.f32 %v1916_v23, %v1781_v45  ;;  %v2992_v6 = vpop.f32.mrb[99].mxu1  ;;  %v3092_v36 = vpop.f32.mrb[99].mxu0  ;;  %v2023_v55 = vmul.f32 %v4169_v53, %v4169_v53  ;;  %v1990_v27 = vadd.f32 %v1989_v18, %v4169_v53 }
 0x1b9   :  { %v2993_v39 = vadd.f32 %v2992_v6, %v2991_v60  ;;  %v1786_v13 = vadd.f32 %v2990_v0, %v4081_v31 }
 0x1ba   :  { %v2047_v61 = vadd.f32 %v2046_v54, %v2023_v55  ;;  %v1991_v10 = vadd.f32 %v1990_v27, %v4172_v26 }
 0x1bb   :  { %v1789_v8 = vadd.f32 %v2993_v39, %v4084_v44  ;;  %v2024_v44 = vmul.f32 %v4172_v26, %v4172_v26 }
 0x1bd   :  { %v2994_v20 = vpop.f32.mrb[100].mxu1  ;;  %v1921_v21 = vpop.f32.mrb[100].mxu0  ;;  %v2048_v58 = vadd.f32 %v2047_v61, %v2024_v44 }
 0x1be   :  { %v4182_v42 = vadd.f32 %v1921_v21, %v1786_v13  ;;  %v2995_v29 = vpop.f32.mrb[101].mxu1  ;;  %v3095_v31 = vpop.f32.mrb[101].mxu0 }
 0x1bf   :  { %v2996_v30 = vadd.f32 %v2995_v29, %v2994_v20  ;;  %v2997_v52 = vpop.f32.mrb[102].mxu1  ;;  %v1924_v48 = vpop.f32.mrb[102].mxu0 }
 0x1c0   :  { %v4186_v24 = vadd.f32 %v1924_v48, %v1789_v8  ;;  %v2998_v37 = vpop.f32.mrb[103].mxu1  ;;  %v3096_v38 = vpop.f32.mrb[103].mxu0  ;;  %v2025_v45 = vmul.f32 %v4182_v42, %v4182_v42  ;;  %v1992_v14 = vadd.f32 %v1991_v10, %v4182_v42 }
 0x1c1   :  { %v2999_v9 = vadd.f32 %v2998_v37, %v2997_v52  ;;  %v1794_v41 = vadd.f32 %v2996_v30, %v4087_v47 }
 0x1c2   :  { %v2049_v57 = vadd.f32 %v2048_v58, %v2025_v45  ;;  %v2026_v40 = vmul.f32 %v4186_v24, %v4186_v24  ;;  %v1993_v22 = vadd.f32 %v1992_v14, %v4186_v24 }
 0x1c3   :  { %v1797_v46 = vadd.f32 %v2999_v9, %v4090_v4 }
 0x1c4   :  { %v2050_v12 = vadd.f32 %v2049_v57, %v2026_v40 }
 0x1c5   :  { %v3000_v50 = vpop.f32.mrb[104].mxu1  ;;  %v1929_v11 = vpop.f32.mrb[104].mxu0 }
 0x1c6   :  { %v4196_v16 = vadd.f32 %v1929_v11, %v1794_v41  ;;  %v3001_v0 = vpop.f32.mrb[105].mxu1  ;;  %v3099_v47 = vpop.f32.mrb[105].mxu0 }
 0x1c7   :  { %v3002_v60 = vadd.f32 %v3001_v0, %v3000_v50  ;;  %v3003_v23 = vpop.f32.mrb[106].mxu1  ;;  %v1932_v3 = vpop.f32.mrb[106].mxu0 }
 0x1c8   :  { %v2027_v4 = vmul.f32 %v4196_v16, %v4196_v16  ;;  %v4201_v6 = vadd.f32 %v1932_v3, %v1797_v46  ;;  %v3004_v36 = vpop.f32.mrb[107].mxu1  ;;  %v3100_v39 = vpop.f32.mrb[107].mxu0  ;;  %v1994_v8 = vadd.f32 %v1993_v22, %v4196_v16 }
 0x1c9   :  { %v3005_v13 = vadd.f32 %v3004_v36, %v3003_v23  ;;  %v1802_v32 = vadd.f32 %v3002_v60, %v4093_v63 }
 0x1ca   :  { %v2051_v55 = vadd.f32 %v2050_v12, %v2027_v4  ;;  %v2028_v20 = vmul.f32 %v4201_v6, %v4201_v6  ;;  %v1995_v27 = vadd.f32 %v1994_v8, %v4201_v6 }
 0x1cb   :  { %v1805_v18 = vadd.f32 %v3005_v13, %v4096_v28 }
 0x1cc   :  { %v2052_v61 = vadd.f32 %v2051_v55, %v2028_v20 }
 0x1cd   :  { %v3006_v21 = vpop.f32.mrb[108].mxu1  ;;  %v1937_v54 = vpop.f32.mrb[108].mxu0 }
 0x1ce   :  { %v4209_v29 = vadd.f32 %v1937_v54, %v1802_v32  ;;  %v3007_v31 = vpop.f32.mrb[109].mxu1  ;;  %v3103_v30 = vpop.f32.mrb[109].mxu0 }
 0x1cf   :  { %v3008_v52 = vadd.f32 %v3007_v31, %v3006_v21  ;;  %v3009_v48 = vpop.f32.mrb[110].mxu1  ;;  %v1940_v63 = vpop.f32.mrb[110].mxu0 }
 0x1d0   :  { %v1996_v44 = vadd.f32 %v1995_v27, %v4209_v29  ;;  %v2029_v28 = vmul.f32 %v4209_v29, %v4209_v29  ;;  %v4214_v37 = vadd.f32 %v1940_v63, %v1805_v18  ;;  %v3010_v38 = vpop.f32.mrb[111].mxu1  ;;  %v3104_v9 = vpop.f32.mrb[111].mxu0 }
 0x1d1   :  { %v3011_v41 = vadd.f32 %v3010_v38, %v3009_v48  ;;  %v1810_v10 = vadd.f32 %v3008_v52, %v4099_v19 }
 0x1d2   :  { %v2053_v45 = vadd.f32 %v2052_v61, %v2029_v28  ;;  %v1997_v46 = vadd.f32 %v1996_v44, %v4214_v37  ;;  %v2030_v58 = vmul.f32 %v4214_v37, %v4214_v37 }
 0x1d3   :  { %v1813_v14 = vadd.f32 %v3011_v41, %v4102_v49 }
 0x1d4   :  { %v2054_v50 = vadd.f32 %v2053_v45, %v2030_v58 }
 0x1d5   :  { %v3012_v11 = vpop.f32.mrb[112].mxu1  ;;  %v1945_v57 = vpop.f32.mrb[112].mxu0 }
 0x1d6   :  { %v4221_v40 = vadd.f32 %v1945_v57, %v1810_v10  ;;  %v3013_v0 = vpop.f32.mrb[113].mxu1  ;;  %v3107_v47 = vpop.f32.mrb[113].mxu0 }
 0x1d7   :  { %v3014_v60 = vadd.f32 %v3013_v0, %v3012_v11  ;;  %v3015_v23 = vpop.f32.mrb[114].mxu1  ;;  %v1948_v3 = vpop.f32.mrb[114].mxu0 }
 0x1d8   :  { %v1998_v19 = vadd.f32 %v1997_v46, %v4221_v40  ;;  %v2031_v22 = vmul.f32 %v4221_v40, %v4221_v40  ;;  %v4226_v4 = vadd.f32 %v1948_v3, %v1813_v14  ;;  %v3016_v36 = vpop.f32.mrb[115].mxu1  ;;  %v3108_v39 = vpop.f32.mrb[115].mxu0 }
 0x1d9   :  { %v3017_v49 = vadd.f32 %v3016_v36, %v3015_v23  ;;  %v1818_v13 = vadd.f32 %v3014_v60, %v4105_v34 }
 0x1da   :  { %v2055_v32 = vadd.f32 %v2054_v50, %v2031_v22  ;;  %v1999_v12 = vadd.f32 %v1998_v19, %v4226_v4  ;;  %v2032_v8 = vmul.f32 %v4226_v4, %v4226_v4 }
 0x1db   :  { %v1821_v18 = vadd.f32 %v3017_v49, %v4108_v7 }
 0x1dc   :  { %v2056_v55 = vadd.f32 %v2055_v32, %v2032_v8 }
 0x1dd   :  { %v3018_v20 = vpop.f32.mrb[116].mxu1  ;;  %v1953_v21 = vpop.f32.mrb[116].mxu0 }
 0x1de   :  { %v4233_v54 = vadd.f32 %v1953_v21, %v1818_v13  ;;  %v3019_v27 = vpop.f32.mrb[117].mxu1  ;;  %v3111_v31 = vpop.f32.mrb[117].mxu0 }
 0x1df   :  { %v3020_v30 = vadd.f32 %v3019_v27, %v3018_v20  ;;  %v3021_v52 = vpop.f32.mrb[118].mxu1  ;;  %v1956_v48 = vpop.f32.mrb[118].mxu0 }
 0x1e0   :  { %v2000_v34 = vadd.f32 %v1999_v12, %v4233_v54  ;;  %v2033_v63 = vmul.f32 %v4233_v54, %v4233_v54  ;;  %v4238_v61 = vadd.f32 %v1956_v48, %v1821_v18  ;;  %v3022_v44 = vpop.f32.mrb[119].mxu1  ;;  %v3112_v28 = vpop.f32.mrb[119].mxu0 }
 0x1e1   :  { %v3023_v7 = vadd.f32 %v3022_v44, %v3021_v52  ;;  %v1826_v38 = vadd.f32 %v3020_v30, %v4111_v1 }
 0x1e2   :  { %v2057_v9 = vadd.f32 %v2056_v55, %v2033_v63  ;;  %v2001_v41 = vadd.f32 %v2000_v34, %v4238_v61  ;;  %v2034_v10 = vmul.f32 %v4238_v61, %v4238_v61 }
 0x1e3   :  { %v1829_v45 = vadd.f32 %v3023_v7, %v4114_v33 }
 0x1e4   :  { %v2058_v46 = vadd.f32 %v2057_v9, %v2034_v10 }
 0x1e5   :  { %v3024_v58 = vpop.f32.mrb[120].mxu1  ;;  %v1961_v14 = vpop.f32.mrb[120].mxu0 }
 0x1e6   :  { %v4245_v50 = vadd.f32 %v1961_v14, %v1826_v38  ;;  %v3025_v11 = vpop.f32.mrb[121].mxu1  ;;  %v3115_v57 = vpop.f32.mrb[121].mxu0 }
 0x1e7   :  { %v3026_v0 = vadd.f32 %v3025_v11, %v3024_v58  ;;  %v3027_v47 = vpop.f32.mrb[122].mxu1  ;;  %v1964_v60 = vpop.f32.mrb[122].mxu0 }
 0x1e8   :  { %v2002_v1 = vadd.f32 %v2001_v41, %v4245_v50  ;;  %v2035_v23 = vmul.f32 %v4245_v50, %v4245_v50  ;;  %v4250_v3 = vadd.f32 %v1964_v60, %v1829_v45  ;;  %v3028_v19 = vpop.f32.mrb[123].mxu1  ;;  %v3116_v22 = vpop.f32.mrb[123].mxu0 }
 0x1e9   :  { %v3029_v33 = vadd.f32 %v3028_v19, %v3027_v47  ;;  %v1834_v36 = vadd.f32 %v3026_v0, %v4117_v17 }
 0x1ea   :  { %v2059_v39 = vadd.f32 %v2058_v46, %v2035_v23  ;;  %v2003_v49 = vadd.f32 %v2002_v1, %v4250_v3  ;;  %v2036_v13 = vmul.f32 %v4250_v3, %v4250_v3 }
 0x1eb   :  { %v1837_v32 = vadd.f32 %v3029_v33, %v4119_v51 }
 0x1ec   :  { %v2060_v12 = vadd.f32 %v2059_v39, %v2036_v13 }
 0x1ed   :  { %v3030_v8 = vpop.f32.mrb[124].mxu1  ;;  %v1969_v18 = vpop.f32.mrb[124].mxu0 }
 0x1ee   :  { %v4257_v55 = vadd.f32 %v1969_v18, %v1834_v36  ;;  %v3031_v20 = vpop.f32.mrb[125].mxu1  ;;  %v3119_v21 = vpop.f32.mrb[125].mxu0 }
 0x1ef   :  { %v3032_v27 = vadd.f32 %v3031_v20, %v3030_v8  ;;  %v1972_v31 = vpop.f32.mrb[126].mxu0  ;;  %v3033_v30 = vpop.f32.mrb[126].mxu1 }
 0x1f0   :  { %v2004_v17 = vadd.f32 %v2003_v49, %v4257_v55  ;;  %v2037_v52 = vmul.f32 %v4257_v55, %v4257_v55  ;;  %v4262_v48 = vadd.f32 %v1972_v31, %v1837_v32  ;;  %v3120_v34 = vpop.f32.mrb[127].mxu0  ;;  %v3034_v63 = vpop.f32.mrb[127].mxu1  ;;  %v2078_v30 = vld [vmem:[%s4502_s2] sm:$0x1] }
 0x1f1   :  { %v1842_v51 = vadd.f32 %v3032_v27, %v4121_v5  ;;  %v2084_v27 = vlaneseq  ;;  %v2080_v63 = vld [vmem:[%s4503_s3] sm:$0x1] }
 0x1f2   :  { %v2061_v44 = vadd.f32 %v2060_v12, %v2037_v52  ;;  %v2005_v28 = vadd.f32 %v2004_v17, %v4262_v48  ;;  %v2038_v7 = vmul.f32 %v4262_v48, %v4262_v48 }
 0x1f3   :  { %v2085_v31 = vshrl.u32 %v2084_v27, 7 }
 0x1f4   :  { %v2062_v38 = vadd.f32 %v2061_v44, %v2038_v7 }
 0x1f5   :  { %v1977_v9 = vpop.f32.mrb[128].mxu0  ;;  %v2086_v17 = vsub.s32 0, %v2085_v31 }
 0x1f6   :  { %v1978_v41 = vadd.f32 %v1977_v9, %v1842_v51  ;;  %v3123_v10 = vpop.f32.mrb[129].mxu0 }
 0x1f7   :  { %v1980_v45 = vpop.f32.mrb[130].mxu0 }
 0x1f8   :  { %v2007_v46 = vsel %vm2006_vm1, %v1978_v41, 0.0  ;;  %v2039_v58 = vmul.f32 %v1978_v41, %v1978_v41  ;;  %v3124_v14 = vpop.f32.mrb[131].mxu0 }
 0x1f9   :  { %v2008_v11 = vadd.f32 %v2007_v46, %v2005_v28 }
 0x1fa   :  { %v2063_v57 = vsel %vm2006_vm1, %v2039_v58, 0.0 }
 0x1fb   :  { %v2009_v0 = vrot.slane %v2008_v11, 4  ;;  %v2064_v47 = vadd.f32 %v2063_v57, %v2062_v38 }
 0x1fd   :  { %v2010_v5 = vadd.f32 %v2009_v0, %v2008_v11  ;;  %v2065_v60 = vrot.slane %v2064_v47, 4 }
 0x1ff   :  { %v2011_v1 = vrot.slane %v2010_v5, 2  ;;  %v2066_v23 = vadd.f32 %v2065_v60, %v2064_v47 }
 0x201   :  { %v2012_v19 = vadd.f32 %v2011_v1, %v2010_v5  ;;  %v2067_v22 = vrot.slane %v2066_v23, 2 }
 0x203   :  { %v2013_v33 = vrot.slane %v2012_v19, 1  ;;  %v2068_v36 = vadd.f32 %v2067_v22, %v2066_v23 }
 0x205   :  { %v2014_v39 = vadd.f32 %v2013_v33, %v2012_v19  ;;  %v2069_v49 = vrot.slane %v2068_v36, 1 }
 0x207   :  { %v2070_v13 = vadd.f32 %v2069_v49, %v2068_v36  ;;  %v2071_v32 = vmul.f32 0.0051020407, %v2014_v39 }
 0x209   :  { %v2072_v12 = vmul.f32 0.0051020407, %v2070_v13  ;;  %v2073_v8 = vmul.f32 %v2071_v32, %v2071_v32 }
 0x20b   :  { %v2074_v18 = vsub.f32 %v2072_v12, %v2073_v8 }
 0x20d   :  { %v2075_v20 = vmax.f32 %v2074_v18, 0.0 }
 0x20f   :  { %v2076_v21 = vadd.f32 1e-05, %v2075_v20 }
 0x211   :  { %3380 = vrsqrt.f32 %v2076_v21 }
 0x21b   :  { %v3381_v52 = vpop.eup %3380 }
 0x21c   :  { %v2079_v34 = vmul.f32 %v3381_v52, %v2078_v30 }
 0x21e   :  { %v2081_v51 = vmul.f32 %v2079_v34, %v2071_v32  ;;  %v2087_v44 = vrot.slane %v2079_v34, %v2086_v17 }
 0x220   :  { %v2082_v28 = vsub.f32 %v2080_v63, %v2081_v51  ;;  %v2089_v7 = vmul.f32 %v2087_v44, %v4125_v15  ;;  %v2090_v38 = vmul.f32 %v2087_v44, %v4127_v25  ;;  %v2091_v9 = vmul.f32 %v2087_v44, %v4131_v35 }
 0x221   :  { %v2092_v10 = vmul.f32 %v2087_v44, %v4133_v43  ;;  %v2093_v45 = vmul.f32 %v2087_v44, %v4137_v2  ;;  %v2094_v46 = vmul.f32 %v2087_v44, %v4141_v62  ;;  %v2095_v58 = vmul.f32 %v2087_v44, %v4154_v59 }
 0x222   :  { %v2096_v14 = vmul.f32 %v2087_v44, %v4159_v56  ;;  %v2097_v11 = vmul.f32 %v2087_v44, %v4169_v53  ;;  %v2103_v57 = vmul.f32 %v2087_v44, %v4209_v29  ;;  %v2104_v15 = vmul.f32 %v2087_v44, %v4214_v37 }
 0x223   :  { %v2105_v25 = vmul.f32 %v2087_v44, %v4221_v40  ;;  %v2106_v35 = vmul.f32 %v2087_v44, %v4226_v4  ;;  %v2107_v43 = vmul.f32 %v2087_v44, %v4233_v54  ;;  %v2108_v2 = vmul.f32 %v2087_v44, %v4238_v61 }
 0x224   :  { %v2109_v62 = vmul.f32 %v2087_v44, %v4245_v50  ;;  %v2110_v59 = vmul.f32 %v2087_v44, %v4250_v3  ;;  %v2111_v56 = vmul.f32 %v2087_v44, %v4257_v55  ;;  %v2098_v53 = vmul.f32 %v2087_v44, %v4172_v26 }
 0x225   :  { %v2112_v29 = vmul.f32 %v2087_v44, %v4262_v48  ;;  %v2113_v0 = vmul.f32 %v2087_v44, %v1978_v41  ;;  %v2118_v37 = vrot.slane %v2082_v28, %v2086_v17  ;;  %v2099_v40 = vmul.f32 %v2087_v44, %v4182_v42 }
 0x226   :  { %v2100_v4 = vmul.f32 %v2087_v44, %v4186_v24  ;;  %v2101_v54 = vmul.f32 %v2087_v44, %v4196_v16  ;;  %v2102_v61 = vmul.f32 %v2087_v44, %v4201_v6 }
 0x227   :  { %v2120_v47 = vadd.f32 %v2118_v37, %v2089_v7  ;;  %v2121_v50 = vadd.f32 %v2118_v37, %v2090_v38  ;;  %v4298_v5 = vadd.f32 %v2118_v37, %v2091_v9  ;;  %v4300_v3 = vadd.f32 %v2118_v37, %v2092_v10 }
 0x228   :  { %v4302_v55 = vadd.f32 %v2118_v37, %v2093_v45  ;;  %v4304_v26 = vadd.f32 %v2118_v37, %v2094_v46  ;;  %v4306_v48 = vadd.f32 %v2118_v37, %v2095_v58  ;;  %v4308_v41 = vadd.f32 %v2118_v37, %v2096_v14 }
 0x229   :  { %v4310_v42 = vadd.f32 %v2118_v37, %v2097_v11  ;;  %v4312_v24 = vadd.f32 %v2118_v37, %v2098_v53  ;;  %v4314_v16 = vadd.f32 %v2118_v37, %v2099_v40  ;;  %v4316_v6 = vadd.f32 %v2118_v37, %v2100_v4 }
 0x22a   :  { %v4318_v60 = vadd.f32 %v2118_v37, %v2101_v54  ;;  %v4320_v1 = vadd.f32 %v2118_v37, %v2102_v61  ;;  %v4322_v23 = vadd.f32 %v2118_v37, %v2103_v57  ;;  %v4324_v19 = vadd.f32 %v2118_v37, %v2104_v15 }
 0x22b   :  { %v4326_v22 = vadd.f32 %v2118_v37, %v2105_v25  ;;  %v4328_v33 = vadd.f32 %v2118_v37, %v2106_v35  ;;  %v4330_v36 = vadd.f32 %v2118_v37, %v2107_v43  ;;  %v4332_v39 = vadd.f32 %v2118_v37, %v2108_v2 }
 0x22c   :  { %v4334_v49 = vadd.f32 %v2118_v37, %v2109_v62  ;;  %v4336_v13 = vadd.f32 %v2118_v37, %v2110_v59  ;;  %v4338_v32 = vadd.f32 %v2118_v37, %v2111_v56  ;;  %v4340_v12 = vadd.f32 %v2118_v37, %v2112_v29 }
 0x22d   :  { %v4342_v8 = vadd.f32 %v2118_v37, %v2113_v0  ;;  %vm2145_vm2 = vcmp.ge.f32.partialorder %v2120_v47, 0.0  ;;  %vm2146_vm3 = vcmp.ge.f32.partialorder %v2121_v50, 0.0  ;;  %vm2147_vm4 = vcmp.ge.f32.partialorder %v4298_v5, 0.0 }
 0x22e   :  { %vm2148_vm5 = vcmp.ge.f32.partialorder %v4300_v3, 0.0  ;;  %vm2149_vm6 = vcmp.ge.f32.partialorder %v4302_v55, 0.0  ;;  %vm2150_vm7 = vcmp.ge.f32.partialorder %v4304_v26, 0.0  ;;  %vm2155_vm12 = vcmp.ge.f32.partialorder %v4314_v16, 0.0 }
 0x22f   :  { %vm2160_vm1 = vcmp.ge.f32.partialorder %v4324_v19, 0.0  ;;  %vm2161_vm8 = vcmp.ge.f32.partialorder %v4326_v22, 0.0  ;;  %vm2162_vm9 = vcmp.ge.f32.partialorder %v4328_v33, 0.0  ;;  %vm2164_vm11 = vcmp.ge.f32.partialorder %v4332_v39, 0.0 }
 0x230   :  { %v2170_v18 = vmul.f32 0.01, %v2120_v47  ;;  %v2171_v20 = vmul.f32 0.01, %v2121_v50  ;;  %vm2165_vm13 = vcmp.ge.f32.partialorder %v4334_v49, 0.0  ;;  %vm2166_vm14 = vcmp.ge.f32.partialorder %v4336_v13, 0.0 }
 0x231   :  { %vm2167_vm15 = vcmp.ge.f32.partialorder %v4338_v32, 0.0  ;;  %vm2168_vm0 = vcmp.ge.f32.partialorder %v4340_v12, 0.0  ;;  %v2172_v21 = vmul.f32 0.01, %v4298_v5  ;;  %v2173_v27 = vmul.f32 0.01, %v4300_v3 }
 0x232   :  { %v2174_v31 = vmul.f32 0.01, %v4302_v55  ;;  %vm2169_vm10 = vcmp.ge.f32.partialorder %v4342_v8, 0.0  ;;  %v2175_v30 = vmul.f32 0.01, %v4304_v26  ;;  %v2195_v34 = vsel %vm2145_vm2, %v2120_v47, %v2170_v18 }
 0x233   :  { %v2176_v17 = vmul.f32 0.01, %v4306_v48  ;;  %v2177_v52 = vmul.f32 0.01, %v4308_v41  ;;  %v2178_v63 = vmul.f32 0.01, %v4310_v42  ;;  %v2196_v28 = vsel %vm2146_vm3, %v2121_v50, %v2171_v20 }
 0x234   :  { %v2179_v51 = vmul.f32 0.01, %v4312_v24  ;;  %v2180_v44 = vmul.f32 0.01, %v4314_v16  ;;  %v2181_v7 = vmul.f32 0.01, %v4316_v6  ;;  %v2197_v10 = vsel %vm2147_vm4, %v4298_v5, %v2172_v21 }
 0x235   :  { %v2182_v38 = vmul.f32 0.01, %v4318_v60  ;;  %v2183_v9 = vmul.f32 0.01, %v4320_v1  ;;  %v2184_v45 = vmul.f32 0.01, %v4322_v23  ;;  %v2198_v14 = vsel %vm2148_vm5, %v4300_v3, %v2173_v27 }
 0x236   :  { %v2185_v46 = vmul.f32 0.01, %v4324_v19  ;;  %v2186_v58 = vmul.f32 0.01, %v4326_v22  ;;  %v2187_v11 = vmul.f32 0.01, %v4328_v33  ;;  %v2199_v25 = vsel %vm2149_vm6, %v4302_v55, %v2174_v31 }
 0x237   :  { %v2188_v57 = vmul.f32 0.01, %v4330_v36  ;;  %v2189_v15 = vmul.f32 0.01, %v4332_v39  ;;  %v2190_v35 = vmul.f32 0.01, %v4334_v49  ;;  %v2200_v62 = vsel %vm2150_vm7, %v4304_v26, %v2175_v30 }
 0x238   :  { %v2191_v43 = vmul.f32 0.01, %v4336_v13  ;;  %v2192_v2 = vmul.f32 0.01, %v4338_v32  ;;  %v2193_v59 = vmul.f32 0.01, %v4340_v12  ;;  %v2205_v40 = vsel %vm2155_vm12, %v4314_v16, %v2180_v44 }
 0x239   :  { %v2194_v56 = vmul.f32 0.01, %v4342_v8  ;;  %vm4505_vm2 = vcmp.ge.f32.partialorder %v4306_v48, 0.0  ;;  %vm4506_vm3 = vcmp.ge.f32.partialorder %v4308_v41, 0.0  ;;  %vm4507_vm4 = vcmp.ge.f32.partialorder %v4310_v42, 0.0 }
 0x23a   :  { %v2201_v53 = vsel %vm4505_vm2, %v4306_v48, %v2176_v17  ;;  %v2202_v29 = vsel %vm4506_vm3, %v4308_v41, %v2177_v52  ;;  %v2203_v0 = vsel %vm4507_vm4, %v4310_v42, %v2178_v63  ;;  %vm4508_vm5 = vcmp.ge.f32.partialorder %v4312_v24, 0.0 }
 0x23b   :  { %v2204_v37 = vsel %vm4508_vm5, %v4312_v24, %v2179_v51  ;;  %vm4509_vm6 = vcmp.ge.f32.partialorder %v4316_v6, 0.0  ;;  %vm4510_vm7 = vcmp.ge.f32.partialorder %v4318_v60, 0.0  ;;  %vm4511_vm2 = vcmp.ge.f32.partialorder %v4320_v1, 0.0 }
 0x23c   :  { %v2206_v4 = vsel %vm4509_vm6, %v4316_v6, %v2181_v7  ;;  %v2207_v54 = vsel %vm4510_vm7, %v4318_v60, %v2182_v38  ;;  %v2208_v61 = vsel %vm4511_vm2, %v4320_v1, %v2183_v9  ;;  %vm4512_vm3 = vcmp.ge.f32.partialorder %v4322_v23, 0.0 }
 0x23d   :  { %v2209_v47 = vsel %vm4512_vm3, %v4322_v23, %v2184_v45  ;;  %v2210_v50 = vsel %vm2160_vm1, %v4324_v19, %v2185_v46  ;;  %v2211_v5 = vsel %vm2161_vm8, %v4326_v22, %v2186_v58  ;;  %v2212_v3 = vsel %vm2162_vm9, %v4328_v33, %v2187_v11 }
 0x23e   :  { %vm4513_vm12 = vcmp.ge.f32.partialorder %v4330_v36, 0.0  ;;  %v2214_v26 = vsel %vm2164_vm11, %v4332_v39, %v2189_v15  ;;  %v2215_v48 = vsel %vm2165_vm13, %v4334_v49, %v2190_v35  ;;  %v2216_v41 = vsel %vm2166_vm14, %v4336_v13, %v2191_v43 }
 0x23f   :  { %v2213_v55 = vsel %vm4513_vm12, %v4330_v36, %v2188_v57  ;;  %v2217_v42 = vsel %vm2167_vm15, %v4338_v32, %v2192_v2  ;;  %v2218_v24 = vsel %vm2168_vm0, %v4340_v12, %v2193_v59  ;;  %v2219_v16 = vsel %vm2169_vm10, %v4342_v8, %v2194_v56 }
 0x240   :  { %v2592_v6 = vpack.c.bf16 %v2196_v28, %v2195_v34  ;;  %v2597_v60 = vpack.c.bf16 %v2198_v14, %v2197_v10  ;;  %v2602_v1 = vpack.c.bf16 %v2200_v62, %v2199_v25  ;;  %v2588_v23 = vpack.c.bf16 %v2219_v16, %v2219_v16 }
 0x241   :  { %v2607_v19 = vpack.c.bf16 %v2202_v29, %v2201_v53  ;;  %v2612_v22 = vpack.c.bf16 %v2204_v37, %v2203_v0  ;;  %v2617_v33 = vpack.c.bf16 %v2206_v4, %v2205_v40  ;;  %v2622_v36 = vpack.c.bf16 %v2208_v61, %v2207_v54 }
 0x242   :  { %2593 = vst [vmem:[%s4504_s4] sm:$0xff] %v2592_v6   ;;  %2649 = vst [vmem:[%s4504_s4 + $0x8] sm:$0xff] %v2597_v60   ;;  %v2627_v39 = vpack.c.bf16 %v2210_v50, %v2209_v47  ;;  %v2632_v49 = vpack.c.bf16 %v2212_v3, %v2211_v5  ;;  %v2637_v13 = vpack.c.bf16 %v2214_v26, %v2213_v55 }
 0x243   :  { %2650 = vst [vmem:[%s4504_s4 + $0x10] sm:$0xff] %v2602_v1   ;;  %2651 = vst [vmem:[%s4504_s4 + $0x18] sm:$0xff] %v2607_v19   ;;  %v2642_v32 = vpack.c.bf16 %v2216_v41, %v2215_v48  ;;  %v2647_v12 = vpack.c.bf16 %v2218_v24, %v2217_v42 }
 0x244   :  { %2652 = vst [vmem:[%s4504_s4 + $0x20] sm:$0xff] %v2612_v22   ;;  %2653 = vst [vmem:[%s4504_s4 + $0x28] sm:$0xff] %v2617_v33  }
 0x245   :  { %2345 = vst [vmem:[%s4504_s4 + $0x60] sm:$0x3] %v2588_v23  ;;  %2654 = vst [vmem:[%s4504_s4 + $0x30] sm:$0xff] %v2622_v36  }
 0x246   :  { %2655 = vst [vmem:[%s4504_s4 + $0x38] sm:$0xff] %v2627_v39   ;;  %2656 = vst [vmem:[%s4504_s4 + $0x40] sm:$0xff] %v2632_v49  }
 0x247   :  { %2657 = vst [vmem:[%s4504_s4 + $0x48] sm:$0xff] %v2637_v13   ;;  %2658 = vst [vmem:[%s4504_s4 + $0x50] sm:$0xff] %v2642_v32  }
 0x248   :  { %2659 = vst [vmem:[%s4504_s4 + $0x58] sm:$0xff] %v2647_v12  }

// kernel: _lambda_.6
= control target key start
LH: loop header
LB: loop body
LE: loop exit
PB: predicated region body
PF: predicated region fallthrough
CT: control target
= control target key end

     0   :  { %vm1553_vm0 = vmmov 0   ;;  %vm1026_vm1 = vcmask 1043456   ;;  %s1907_s1 = inlined_call_operand.vmem [shape: bf16[1152,128], index: 1, kind: input, shape index: {}]   ;;  %s1908_s0 = inlined_call_operand.vmem [shape: bf16[36,1152], index: 0, kind: input, shape index: {}]   ;;  %s1909_s2 = inlined_call_operand.vmem [shape: f32[1,128], index: 2, kind: input, shape index: {}]   ;;  %s1910_s3 = inlined_call_operand.vmem [shape: f32[1,128], index: 3, kind: input, shape index: {}]   ;;  %s1911_s4 = inlined_call_operand.vmem [shape: bf16[36,128], index: 4, kind: output, shape index: {}]  }
   0x1   :  { %v1443_v0 = vld [vmem:[%s1907_s1 + $0x40] sm:$0xff]   ;;  %v1447_v4 = vld [vmem:[%s1907_s1 + $0x48] sm:$0xff]   ;;  %v1451_v8 = vld [vmem:[%s1907_s1 + $0x50] sm:$0xff]  }
   0x2   :  { %v1444_v1 = vld [vmem:[%s1907_s1 + $0xc0] sm:$0xff]   ;;  %1250 = vmatprep.subr.bf16.mxu0 %v1443_v0  ;;  %v1448_v5 = vld [vmem:[%s1907_s1 + $0xc8] sm:$0xff]   ;;  %v1452_v9 = vld [vmem:[%s1907_s1 + $0xd0] sm:$0xff]  }
   0x3   :  { %v1445_v2 = vld [vmem:[%s1907_s1] sm:$0xff]   ;;  %1284 = vmatprep.subr.bf16.mxu1 %v1444_v1  ;;  %v1449_v6 = vld [vmem:[%s1907_s1 + $0x8] sm:$0xff]   ;;  %v1453_v10 = vld [vmem:[%s1907_s1 + $0x10] sm:$0xff]  }
   0x4   :  { %v1446_v3 = vld [vmem:[%s1907_s1 + $0x80] sm:$0xff]   ;;  %1251 = vmatpush3.bf16.msra.mxu0 %v1445_v2  ;;  %v1450_v7 = vld [vmem:[%s1907_s1 + $0x88] sm:$0xff]   ;;  %v1454_v11 = vld [vmem:[%s1907_s1 + $0x90] sm:$0xff]  }
   0x5   :  { %1285 = vmatpush3.bf16.msra.mxu1 %v1446_v3  ;;  %1252 = vmatprep.subr.bf16.mxu0 %v1447_v4  ;;  %v1455_v12 = vld [vmem:[%s1907_s1 + $0x58] sm:$0xff]   ;;  %v1459_v16 = vld [vmem:[%s1907_s1 + $0x60] sm:$0xff]   ;;  %v1463_v20 = vld [vmem:[%s1907_s1 + $0x68] sm:$0xff]  }
   0x6   :  { %1286 = vmatprep.subr.bf16.mxu1 %v1448_v5  ;;  %v1456_v13 = vld [vmem:[%s1907_s1 + $0xd8] sm:$0xff]   ;;  %v1460_v17 = vld [vmem:[%s1907_s1 + $0xe0] sm:$0xff]   ;;  %v1464_v21 = vld [vmem:[%s1907_s1 + $0xe8] sm:$0xff]  }
   0x7   :  { %v1457_v14 = vld [vmem:[%s1907_s1 + $0x18] sm:$0xff]   ;;  %v1461_v18 = vld [vmem:[%s1907_s1 + $0x20] sm:$0xff]   ;;  %v1465_v22 = vld [vmem:[%s1907_s1 + $0x28] sm:$0xff]  }
   0x8   :  { %1253 = vmatpush3.bf16.msra.mxu0 %v1449_v6  ;;  %v1458_v15 = vld [vmem:[%s1907_s1 + $0x98] sm:$0xff]   ;;  %v1462_v19 = vld [vmem:[%s1907_s1 + $0xa0] sm:$0xff]   ;;  %v1466_v23 = vld [vmem:[%s1907_s1 + $0xa8] sm:$0xff]  }
   0x9   :  { %1287 = vmatpush3.bf16.msra.mxu1 %v1450_v7  ;;  %1254 = vmatprep.subr.bf16.mxu0 %v1451_v8  ;;  %v1467_v24 = vld [vmem:[%s1907_s1 + $0x70] sm:$0xff]   ;;  %v1471_v28 = vld [vmem:[%s1907_s1 + $0x78] sm:$0xff]   ;;  %v1475_v32 = vld [vmem:[%s1908_s0] ss:$36 sps:$4 sm:$0xff]  }
   0xa   :  { %1288 = vmatprep.subr.bf16.mxu1 %v1452_v9  ;;  %v1468_v25 = vld [vmem:[%s1907_s1 + $0xf0] sm:$0xff]   ;;  %v1472_v29 = vld [vmem:[%s1907_s1 + $0xf8] sm:$0xff]   ;;  %v1477_v33 = vld [vmem:[%s1908_s0 + $0x4] ss:$36 sps:$4 sm:$0xff]  }
   0xb   :  { %v1469_v26 = vld [vmem:[%s1907_s1 + $0x30] sm:$0xff]   ;;  %v1473_v30 = vld [vmem:[%s1907_s1 + $0x38] sm:$0xff]   ;;  %v1478_v34 = vld [vmem:[%s1908_s0 + $0x8] ss:$36 sps:$4 sm:$0xff]   ;;  %775 = vmatprep.mubr.bf16.mxu0 %v1477_v33 }
   0xc   :  { %1255 = vmatpush3.bf16.msra.mxu0 %v1453_v10  ;;  %v1470_v27 = vld [vmem:[%s1907_s1 + $0xb0] sm:$0xff]   ;;  %v1474_v31 = vld [vmem:[%s1907_s1 + $0xb8] sm:$0xff]   ;;  %v1481_v36 = vld [vmem:[%s1907_s1 + $0x140] sm:$0xff]  }
   0xd   :  { %1289 = vmatpush3.bf16.msra.mxu1 %v1454_v11  ;;  %1256 = vmatprep.subr.bf16.mxu0 %v1455_v12  ;;  %v1480_v35 = vld [vmem:[%s1908_s0 + $0xc] ss:$36 sps:$4 sm:$0xff]   ;;  %v1482_v37 = vld [vmem:[%s1907_s1 + $0x1c0] sm:$0xff]   ;;  %v1493_v48 = vld [vmem:[%s1907_s1 + $0x158] sm:$0xff]  }
   0xe   :  { %1290 = vmatprep.subr.bf16.mxu1 %v1456_v13  ;;  %831 = vmatprep.mubr.bf16.mxu1 %v1480_v35  ;;  %v1483_v38 = vld [vmem:[%s1907_s1 + $0x100] sm:$0xff]   ;;  %v1485_v40 = vld [vmem:[%s1907_s1 + $0x148] sm:$0xff]   ;;  %v1489_v44 = vld [vmem:[%s1907_s1 + $0x150] sm:$0xff]  }
   0xf   :  { %v1484_v39 = vld [vmem:[%s1907_s1 + $0x180] sm:$0xff]   ;;  %v1486_v41 = vld [vmem:[%s1907_s1 + $0x1c8] sm:$0xff]   ;;  %v1490_v45 = vld [vmem:[%s1907_s1 + $0x1d0] sm:$0xff]  }
  0x10   :  { %1257 = vmatpush3.bf16.msra.mxu0 %v1457_v14  ;;  %v1487_v42 = vld [vmem:[%s1907_s1 + $0x108] sm:$0xff]   ;;  %v1491_v46 = vld [vmem:[%s1907_s1 + $0x110] sm:$0xff]   ;;  %v1494_v49 = vld [vmem:[%s1907_s1 + $0x1d8] sm:$0xff]  }
  0x11   :  { %1291 = vmatpush3.bf16.msra.mxu1 %v1458_v15  ;;  %1258 = vmatprep.subr.bf16.mxu0 %v1459_v16  ;;  %v1488_v43 = vld [vmem:[%s1907_s1 + $0x188] sm:$0xff]   ;;  %v1492_v47 = vld [vmem:[%s1907_s1 + $0x190] sm:$0xff]   ;;  %v1499_v52 = vld [vmem:[%s1907_s1 + $0x118] sm:$0xff]   ;;  %v1552_v16 = vmov 0.0  }
  0x12   :  { %1292 = vmatprep.subr.bf16.mxu1 %v1460_v17  ;;  %v1495_v50 = vld [vmem:[%s1908_s0 + $0x4c] ss:$36 sps:$4 sm:$0xff]   ;;  %v1497_v51 = vld [vmem:[%s1908_s0 + $0x54] ss:$36 sps:$4 sm:$0xff]   ;;  %v1503_v56 = vld [vmem:[%s1907_s1 + $0x160] sm:$0xff]  }
  0x13   :  { %v1500_v53 = vld [vmem:[%s1907_s1 + $0x198] sm:$0xff]   ;;  %v1501_v54 = vld [vmem:[%s1908_s0 + $0x48] ss:$36 sps:$4 sm:$0xff]   ;;  %v1502_v55 = vld [vmem:[%s1908_s0 + $0x50] ss:$36 sps:$4 sm:$0xff]  }
  0x14   :  { %1259 = vmatpush3.bf16.msra.mxu0 %v1461_v18  ;;  %v1504_v57 = vld [vmem:[%s1907_s1 + $0x1e0] sm:$0xff]   ;;  %v1507_v60 = vld [vmem:[%s1907_s1 + $0x168] sm:$0xff]   ;;  %v39_v62 = vld [vmem:[%s1908_s0 + $0x98] sm:$0x33] }
  0x15   :  { %1293 = vmatpush3.bf16.msra.mxu1 %v1462_v19  ;;  %1260 = vmatprep.subr.bf16.mxu0 %v1463_v20  ;;  %v1505_v58 = vld [vmem:[%s1907_s1 + $0x120] sm:$0xff]   ;;  %v1508_v61 = vld [vmem:[%s1907_s1 + $0x1e8] sm:$0xff]   ;;  %v1151_v63 = vcombine.high %v39_v62, %v39_v62  ;;  %v1150_v1 = vcombine.low %v39_v62, %v39_v62  ;;  %v38_v3 = vld [vmem:[%s1908_s0 + $0x90] sm:$0x33] }
  0x16   :  { %1294 = vmatprep.subr.bf16.mxu1 %v1464_v21  ;;  %v1506_v59 = vld [vmem:[%s1907_s1 + $0x1a0] sm:$0xff]   ;;  %v1510_v0 = vld [vmem:[%s1907_s1 + $0x128] sm:$0xff]   ;;  %v1149_v4 = vcombine.high %v38_v3, %v38_v3  ;;  %v1148_v5 = vcombine.low %v38_v3, %v38_v3  ;;  %v1515_v6 = vld [vmem:[%s1907_s1 + $0x170] sm:$0xff]  }
  0x17   :  { %v1511_v2 = vld [vmem:[%s1907_s1 + $0x1a8] sm:$0xff]   ;;  %v1516_v7 = vld [vmem:[%s1907_s1 + $0x1f0] sm:$0xff]   ;;  %v1519_v10 = vld [vmem:[%s1907_s1 + $0x178] sm:$0xff]  }
  0x18   :  { %1261 = vmatpush3.bf16.msra.mxu0 %v1465_v22  ;;  %v1517_v8 = vld [vmem:[%s1907_s1 + $0x130] sm:$0xff]   ;;  %v1520_v11 = vld [vmem:[%s1907_s1 + $0x1f8] sm:$0xff]   ;;  %v1529_v19 = vld [vmem:[%s1907_s1 + $0x200] sm:$0xff]  }
  0x19   :  { %1295 = vmatpush3.bf16.msra.mxu1 %v1466_v23  ;;  %1262 = vmatprep.subr.bf16.mxu0 %v1467_v24  ;;  %v1518_v9 = vld [vmem:[%s1907_s1 + $0x1b0] sm:$0xff]   ;;  %v1521_v12 = vld [vmem:[%s1907_s1 + $0x138] sm:$0xff]   ;;  %v1530_v20 = vld [vmem:[%s1907_s1 + $0x208] sm:$0xff]  }
  0x1a   :  { %1296 = vmatprep.subr.bf16.mxu1 %v1468_v25  ;;  %v1522_v13 = vld [vmem:[%s1907_s1 + $0x1b8] sm:$0xff]   ;;  %v1523_v14 = vld [vmem:[%s1908_s0 + $0x10] ss:$36 sps:$4 sm:$0xff]   ;;  %v1534_v22 = vld [vmem:[%s1908_s0 + $0x64] ss:$36 sps:$4 sm:$0xff]  }
  0x1b   :  { %v1525_v15 = vld [vmem:[%s1908_s0 + $0x14] ss:$36 sps:$4 sm:$0xff]   ;;  %v1528_v18 = vld [vmem:[%s1908_s0 + $0x1c] ss:$36 sps:$4 sm:$0xff]  }
  0x1c   :  { %1263 = vmatpush3.bf16.msra.mxu0 %v1469_v26  ;;  %v1526_v17 = vld [vmem:[%s1908_s0 + $0x18] ss:$36 sps:$4 sm:$0xff]   ;;  %v1536_v24 = vld [vmem:[%s1907_s1 + $0x210] sm:$0xff]   ;;  %v1537_v25 = vld [vmem:[%s1908_s0 + $0x60] ss:$36 sps:$4 sm:$0xff]  }
  0x1d   :  { %1297 = vmatpush3.bf16.msra.mxu1 %v1470_v27  ;;  %1264 = vmatprep.subr.bf16.mxu0 %v1471_v28  ;;  %v1531_v21 = vld [vmem:[%s1908_s0 + $0x5c] ss:$36 sps:$4 sm:$0xff]   ;;  %v41_v27 = vld [vmem:[%s1908_s0 + $0xa8] sm:$0x33]  ;;  %v1545_v35 = vld [vmem:[%s1907_s1 + $0x230] sm:$0xff]  }
  0x1e   :  { %1298 = vmatprep.subr.bf16.mxu1 %v1472_v29  ;;  %v1533_v23 = vld [vmem:[%s1908_s0 + $0x58] ss:$36 sps:$4 sm:$0xff]   ;;  %v40_v26 = vld [vmem:[%s1908_s0 + $0xa0] sm:$0x33]  ;;  %v1155_v29 = vcombine.high %v41_v27, %v41_v27  ;;  %v1154_v33 = vcombine.low %v41_v27, %v41_v27 }
  0x1f   :  { %v1153_v28 = vcombine.high %v40_v26, %v40_v26 }
  0x20   :  { %1265 = vmatpush3.bf16.msra.mxu0 %v1473_v30  ;;  %v1538_v30 = vld [vmem:[%s1907_s1 + $0x218] sm:$0xff]  }
  0x21   :  { %1299 = vmatpush3.bf16.msra.mxu1 %v1474_v31  ;;  %1318 = vmatprep.subr.bf16.mxu0 %v1481_v36  ;;  %v1152_v31 = vcombine.low %v40_v26, %v40_v26  ;;  %v1546_v36 = vld [vmem:[%s1907_s1 + $0x238] sm:$0xff]  }
  0x22   :  { %1352 = vmatprep.subr.bf16.mxu1 %v1482_v37  ;;  %v1547_v37 = vld [vmem:[%s1908_s0 + $0x20] ss:$36 sps:$4 sm:$0xff]  }
  0x23   :  { %776 = vmatmul.mubr.bf16.vlgmr.msra.gmra.mrb[0].mxu0 %v1475_v32  ;;  %v1542_v32 = vld [vmem:[%s1907_s1 + $0x220] sm:$0xff]  }
  0x24   :  { %832 = vmatmul.mubr.bf16.vlgmr.msra.gmra.mrb[0].mxu1 %v1478_v34  ;;  %1319 = vmatpush3.bf16.msra.mxu0 %v1483_v38  ;;  %v1544_v34 = vld [vmem:[%s1907_s1 + $0x228] sm:$0xff]  }
  0x25   :  { %1353 = vmatpush3.bf16.msra.mxu1 %v1484_v39  ;;  %1320 = vmatprep.subr.bf16.mxu0 %v1485_v40  ;;  %v1548_v38 = vld [vmem:[%s1908_s0 + $0x68] ss:$36 sps:$4 sm:$0xff]   ;;  %v1549_v39 = vld [vmem:[%s1908_s0 + $0xb0] ss:$0 sps:$4 sm:$0x33]  }
  0x26   :  { %1354 = vmatprep.subr.bf16.mxu1 %v1486_v41  ;;  %783 = vmatprep.mubr.bf16.mxu0 %v1495_v50 }
  0x27   :  { %839 = vmatprep.mubr.bf16.mxu1 %v1497_v51 }
  0x28   :  { %1321 = vmatpush3.bf16.msra.mxu0 %v1487_v42 }
  0x29   :  { %1355 = vmatpush3.bf16.msra.mxu1 %v1488_v43  ;;  %1322 = vmatprep.subr.bf16.mxu0 %v1489_v44 }
  0x2a   :  { %1356 = vmatprep.subr.bf16.mxu1 %v1490_v45 }
  0x2b   :  { %784 = vmatmul.mubr.bf16.gmra.mrb[4].mxu0 %v1501_v54 }
  0x2c   :  { %1323 = vmatpush3.bf16.msra.mxu0 %v1491_v46  ;;  %840 = vmatmul.mubr.bf16.gmra.mrb[4].mxu1 %v1502_v55 }
  0x2d   :  { %1357 = vmatpush3.bf16.msra.mxu1 %v1492_v47  ;;  %1324 = vmatprep.subr.bf16.mxu0 %v1493_v48 }
  0x2e   :  { %1358 = vmatprep.subr.bf16.mxu1 %v1494_v49  ;;  %847 = vmatprep.mubr.bf16.mxu1 %v1151_v63 }
  0x2f   :  { %791 = vmatprep.mubr.bf16.mxu0 %v1149_v4 }
  0x30   :  { %1325 = vmatpush3.bf16.msra.mxu0 %v1499_v52 }
  0x31   :  { %1359 = vmatpush3.bf16.msra.mxu1 %v1500_v53  ;;  %1326 = vmatprep.subr.bf16.mxu0 %v1503_v56 }
  0x32   :  { %1360 = vmatprep.subr.bf16.mxu1 %v1504_v57 }
  0x33   :  { %792 = vmatmul.mubr.bf16.gmra.mrb[8].mxu0 %v1148_v5 }
  0x34   :  { %1327 = vmatpush3.bf16.msra.mxu0 %v1505_v58  ;;  %848 = vmatmul.mubr.bf16.gmra.mrb[8].mxu1 %v1150_v1 }
  0x35   :  { %1361 = vmatpush3.bf16.msra.mxu1 %v1506_v59  ;;  %1328 = vmatprep.subr.bf16.mxu0 %v1507_v60 }
  0x36   :  { %1362 = vmatprep.subr.bf16.mxu1 %v1508_v61  ;;  %887 = vmatprep.mubr.bf16.mxu0 %v1525_v15 }
  0x37   :  { %943 = vmatprep.mubr.bf16.mxu1 %v1528_v18 }
  0x38   :  { %1329 = vmatpush3.bf16.msra.mxu0 %v1510_v0 }
  0x39   :  { %1363 = vmatpush3.bf16.msra.mxu1 %v1511_v2  ;;  %1330 = vmatprep.subr.bf16.mxu0 %v1515_v6 }
  0x3a   :  { %1364 = vmatprep.subr.bf16.mxu1 %v1516_v7 }
  0x3c   :  { %1331 = vmatpush3.bf16.msra.mxu0 %v1517_v8 }
  0x3d   :  { %1365 = vmatpush3.bf16.msra.mxu1 %v1518_v9  ;;  %1332 = vmatprep.subr.bf16.mxu0 %v1519_v10 }
  0x3e   :  { %1366 = vmatprep.subr.bf16.mxu1 %v1520_v11 }
  0x40   :  { %1333 = vmatpush3.bf16.msra.mxu0 %v1521_v12 }
  0x41   :  { %1367 = vmatpush3.bf16.msra.mxu1 %v1522_v13  ;;  %1397 = vmatprep.subr.bf16.mxu0 %v1552_v16 }
  0x42   :  { %1425 = vmatprep.subr.bf16.mxu1 %v1552_v16 }
  0x43   :  { %888 = vmatmul.mubr.bf16.vlgmr.msra.gmra.mrb[12].mxu0 %v1523_v14 }
  0x44   :  { %944 = vmatmul.mubr.bf16.vlgmr.msra.gmra.mrb[12].mxu1 %v1526_v17  ;;  %1398 = vmatpush3.bf16.msra.mxu0 %v1529_v19 }
  0x45   :  { %1433 = vmatpush3.bf16.msra.mxu1 %v1529_v19  ;;  %1399 = vmatprep.subr.bf16.mxu0 %v1552_v16 }
  0x46   :  { %1426 = vmatprep.subr.bf16.mxu1 %v1552_v16  ;;  %895 = vmatprep.mubr.bf16.mxu0 %v1531_v21 }
  0x47   :  { %951 = vmatprep.mubr.bf16.mxu1 %v1534_v22 }
  0x48   :  { %1400 = vmatpush3.bf16.msra.mxu0 %v1530_v20 }
  0x49   :  { %1434 = vmatpush3.bf16.msra.mxu1 %v1530_v20  ;;  %1401 = vmatprep.subr.bf16.mxu0 %v1552_v16 }
  0x4a   :  { %1427 = vmatprep.subr.bf16.mxu1 %v1552_v16 }
  0x4b   :  { %896 = vmatmul.mubr.bf16.gmra.mrb[16].mxu0 %v1533_v23 }
  0x4c   :  { %1402 = vmatpush3.bf16.msra.mxu0 %v1536_v24  ;;  %952 = vmatmul.mubr.bf16.gmra.mrb[16].mxu1 %v1537_v25 }
  0x4d   :  { %1435 = vmatpush3.bf16.msra.mxu1 %v1536_v24  ;;  %1403 = vmatprep.subr.bf16.mxu0 %v1552_v16 }
  0x4e   :  { %1428 = vmatprep.subr.bf16.mxu1 %v1552_v16  ;;  %903 = vmatprep.mubr.bf16.mxu0 %v1153_v28 }
  0x4f   :  { %959 = vmatprep.mubr.bf16.mxu1 %v1155_v29 }
  0x50   :  { %1404 = vmatpush3.bf16.msra.mxu0 %v1538_v30 }
  0x51   :  { %1436 = vmatpush3.bf16.msra.mxu1 %v1538_v30  ;;  %1405 = vmatprep.subr.bf16.mxu0 %v1552_v16 }
  0x52   :  { %1429 = vmatprep.subr.bf16.mxu1 %v1552_v16 }
  0x53   :  { %904 = vmatmul.mubr.bf16.gmra.mrb[20].mxu0 %v1152_v31 }
  0x54   :  { %1406 = vmatpush3.bf16.msra.mxu0 %v1542_v32  ;;  %960 = vmatmul.mubr.bf16.gmra.mrb[20].mxu1 %v1154_v33 }
  0x55   :  { %1437 = vmatpush3.bf16.msra.mxu1 %v1542_v32  ;;  %1407 = vmatprep.subr.bf16.mxu0 %v1552_v16 }
  0x56   :  { %1430 = vmatprep.subr.bf16.mxu1 %v1552_v16  ;;  %1413 = vmatprep.mubr.msk.bf16.mxu0 %vm1553_vm0, %v1552_v16 }
  0x57   :  { %1417 = vmatprep.mubr.msk.bf16.mxu1 %vm1553_vm0, %v1552_v16 }
  0x58   :  { %1408 = vmatpush3.bf16.msra.mxu0 %v1544_v34 }
  0x59   :  { %1438 = vmatpush3.bf16.msra.mxu1 %v1544_v34  ;;  %1409 = vmatprep.subr.bf16.mxu0 %v1552_v16 }
  0x5a   :  { %1431 = vmatprep.subr.bf16.mxu1 %v1552_v16 }
  0x5c   :  { %1410 = vmatpush3.bf16.msra.mxu0 %v1545_v35 }
  0x5d   :  { %1439 = vmatpush3.bf16.msra.mxu1 %v1545_v35  ;;  %1411 = vmatprep.subr.bf16.mxu0 %v1552_v16 }
  0x5e   :  { %1432 = vmatprep.subr.bf16.mxu1 %v1552_v16 }
  0x60   :  { %1412 = vmatpush3.bf16.msra.mxu0 %v1546_v36 }
  0x61   :  { %1440 = vmatpush3.bf16.msra.mxu1 %v1546_v36 }
  0x63   :  { %1414 = vmatmul.mubr.bf16.vlgmr.msra.gmra.mrb[24].mxu0 %v1547_v37 }
  0x64   :  { %1418 = vmatmul.mubr.bf16.vlgmr.msra.gmra.mrb[24].mxu1 %v1548_v38 }
  0x65   :  { %1421 = vmatprep.mubr.msk.bf16.mxu1 %vm1553_vm0, %v1552_v16 }
  0x6c   :  { %1422 = vmatmul.mubr.bf16.gmra.mrb[28].mxu1 %v1549_v39 }
  0xf6   :  { %v1266_v40 = vpop.f32.mrb[0].mxu0 }
  0xf7   :  { %v1300_v41 = vpop.f32.mrb[0].mxu1  ;;  %v1267_v42 = vpop.f32.mrb[1].mxu0 }
  0xf8   :  { %v1268_v43 = vadd.f32 %v1267_v42, %v1266_v40  ;;  %v1301_v44 = vpop.f32.mrb[1].mxu1  ;;  %v1269_v45 = vpop.f32.mrb[2].mxu0 }
  0xf9   :  { %v1302_v46 = vadd.f32 %v1301_v44, %v1300_v41  ;;  %v1303_v47 = vpop.f32.mrb[2].mxu1  ;;  %v1270_v48 = vpop.f32.mrb[3].mxu0 }
  0xfa   :  { %v1271_v49 = vadd.f32 %v1270_v48, %v1269_v45  ;;  %v1304_v50 = vpop.f32.mrb[3].mxu1 }
  0xfb   :  { %v834_v51 = vadd.f32 %v1302_v46, %v1268_v43  ;;  %v1305_v52 = vadd.f32 %v1304_v50, %v1303_v47 }
  0xfd   :  { %v837_v53 = vadd.f32 %v1305_v52, %v1271_v49 }
  0xfe   :  { %v1272_v54 = vpop.f32.mrb[4].mxu0 }
  0xff   :  { %v1306_v55 = vpop.f32.mrb[4].mxu1  ;;  %v1273_v56 = vpop.f32.mrb[5].mxu0 }
 0x100   :  { %v1274_v57 = vadd.f32 %v1273_v56, %v1272_v54  ;;  %v1307_v58 = vpop.f32.mrb[5].mxu1  ;;  %v1275_v59 = vpop.f32.mrb[6].mxu0 }
 0x101   :  { %v1308_v60 = vadd.f32 %v1307_v58, %v1306_v55  ;;  %v1309_v61 = vpop.f32.mrb[6].mxu1  ;;  %v1276_v62 = vpop.f32.mrb[7].mxu0 }
 0x102   :  { %v1277_v63 = vadd.f32 %v1276_v62, %v1275_v59  ;;  %v1310_v0 = vpop.f32.mrb[7].mxu1 }
 0x103   :  { %v842_v1 = vadd.f32 %v1308_v60, %v1274_v57  ;;  %v1311_v2 = vadd.f32 %v1310_v0, %v1309_v61 }
 0x105   :  { %v845_v3 = vadd.f32 %v1311_v2, %v1277_v63 }
 0x106   :  { %v1278_v5 = vpop.f32.mrb[8].mxu0 }
 0x107   :  { %v1312_v4 = vpop.f32.mrb[8].mxu1  ;;  %v1279_v8 = vpop.f32.mrb[9].mxu0 }
 0x108   :  { %v1313_v6 = vpop.f32.mrb[9].mxu1  ;;  %v1280_v10 = vadd.f32 %v1279_v8, %v1278_v5  ;;  %v1281_v11 = vpop.f32.mrb[10].mxu0 }
 0x109   :  { %v1314_v7 = vadd.f32 %v1313_v6, %v1312_v4  ;;  %v1315_v9 = vpop.f32.mrb[10].mxu1  ;;  %v1282_v13 = vpop.f32.mrb[11].mxu0 }
 0x10a   :  { %v1316_v12 = vpop.f32.mrb[11].mxu1 }
 0x10b   :  { %v850_v14 = vadd.f32 %v1314_v7, %v1280_v10 }
 0x116   :  { %v1334_v15 = vpop.f32.mrb[12].mxu0 }
 0x117   :  { %v1368_v16 = vpop.f32.mrb[12].mxu1  ;;  %v1335_v17 = vpop.f32.mrb[13].mxu0 }
 0x118   :  { %v1336_v18 = vadd.f32 %v1335_v17, %v1334_v15  ;;  %v1369_v19 = vpop.f32.mrb[13].mxu1  ;;  %v1337_v20 = vpop.f32.mrb[14].mxu0 }
 0x119   :  { %v1370_v21 = vadd.f32 %v1369_v19, %v1368_v16  ;;  %v1371_v22 = vpop.f32.mrb[14].mxu1  ;;  %v1338_v23 = vpop.f32.mrb[15].mxu0 }
 0x11a   :  { %v890_v24 = vadd.f32 %v1336_v18, %v834_v51  ;;  %v1339_v25 = vadd.f32 %v1338_v23, %v1337_v20  ;;  %v1372_v26 = vpop.f32.mrb[15].mxu1 }
 0x11b   :  { %v1373_v27 = vadd.f32 %v1372_v26, %v1371_v22 }
 0x11c   :  { %v893_v28 = vadd.f32 %v1339_v25, %v837_v53  ;;  %v946_v29 = vadd.f32 %v1370_v21, %v890_v24 }
 0x11e   :  { %v1340_v30 = vpop.f32.mrb[16].mxu0  ;;  %v949_v31 = vadd.f32 %v1373_v27, %v893_v28 }
 0x11f   :  { %v1341_v32 = vpop.f32.mrb[17].mxu0  ;;  %v1374_v33 = vpop.f32.mrb[16].mxu1 }
 0x120   :  { %v1342_v34 = vadd.f32 %v1341_v32, %v1340_v30  ;;  %v1343_v35 = vpop.f32.mrb[18].mxu0  ;;  %v1375_v36 = vpop.f32.mrb[17].mxu1 }
 0x121   :  { %v1344_v37 = vpop.f32.mrb[19].mxu0  ;;  %v1376_v38 = vadd.f32 %v1375_v36, %v1374_v33  ;;  %v1377_v39 = vpop.f32.mrb[18].mxu1 }
 0x122   :  { %v898_v40 = vadd.f32 %v1342_v34, %v842_v1  ;;  %v1345_v41 = vadd.f32 %v1344_v37, %v1343_v35  ;;  %v1378_v42 = vpop.f32.mrb[19].mxu1 }
 0x123   :  { %v1379_v43 = vadd.f32 %v1378_v42, %v1377_v39 }
 0x124   :  { %v901_v44 = vadd.f32 %v1345_v41, %v845_v3  ;;  %v954_v45 = vadd.f32 %v1376_v38, %v898_v40 }
 0x126   :  { %v1346_v46 = vpop.f32.mrb[20].mxu0  ;;  %v957_v47 = vadd.f32 %v1379_v43, %v901_v44 }
 0x127   :  { %v1347_v48 = vpop.f32.mrb[21].mxu0  ;;  %v1380_v49 = vpop.f32.mrb[20].mxu1 }
 0x128   :  { %v1348_v50 = vadd.f32 %v1347_v48, %v1346_v46  ;;  %v1381_v51 = vpop.f32.mrb[21].mxu1  ;;  %v1349_v52 = vpop.f32.mrb[22].mxu0 }
 0x129   :  { %v1382_v53 = vadd.f32 %v1381_v51, %v1380_v49  ;;  %v1383_v54 = vpop.f32.mrb[22].mxu1  ;;  %v1350_v55 = vpop.f32.mrb[23].mxu0  ;;  %v1060_v51 = vld [vmem:[%s1910_s3] sm:$0x1] }
 0x12a   :  { %v906_v56 = vadd.f32 %v1348_v50, %v850_v14  ;;  %v1384_v57 = vpop.f32.mrb[23].mxu1 }
 0x12c   :  { %v962_v58 = vadd.f32 %v1382_v53, %v906_v56 }
 0x136   :  { %v1001_v59 = vpop.f32.mrb[24].mxu0 }
 0x137   :  { %v1886_v60 = vadd.f32 %v1001_v59, %v946_v29  ;;  %v1009_v61 = vpop.f32.mrb[24].mxu1  ;;  %v1415_v62 = vpop.f32.mrb[25].mxu0 }
 0x138   :  { %v1010_v63 = vadd.f32 %v1009_v61, %v954_v45  ;;  %v1419_v0 = vpop.f32.mrb[25].mxu1  ;;  %v1004_v1 = vpop.f32.mrb[26].mxu0  ;;  %v1064_v45 = vlaneseq }
 0x139   :  { %v1005_v2 = vadd.f32 %v1004_v1, %v949_v31  ;;  %v1012_v3 = vpop.f32.mrb[26].mxu1  ;;  %v1416_v4 = vpop.f32.mrb[27].mxu0  ;;  %v1035_v7 = vmul.f32 %v1886_v60, %v1886_v60 }
 0x13a   :  { %v1013_v5 = vadd.f32 %v1012_v3, %v957_v47  ;;  %v1420_v6 = vpop.f32.mrb[27].mxu1  ;;  %v1037_v10 = vmul.f32 %v1010_v63, %v1010_v63  ;;  %v1065_v46 = vshrl.u32 %v1064_v45, 7  ;;  %v1058_v47 = vld [vmem:[%s1909_s2] sm:$0x1] }
 0x13b   :  { %v1023_v8 = vadd.f32 %v1005_v2, %v1886_v60  ;;  %v1036_v9 = vmul.f32 %v1005_v2, %v1005_v2 }
 0x13c   :  { %v1038_v14 = vmul.f32 %v1013_v5, %v1013_v5  ;;  %v1066_v48 = vsub.s32 0, %v1065_v46 }
 0x13d   :  { %v1040_v11 = vadd.f32 %v1036_v9, %v1035_v7  ;;  %v1024_v12 = vadd.f32 %v1023_v8, %v1010_v63 }
 0x13f   :  { %v1025_v13 = vadd.f32 %v1024_v12, %v1013_v5  ;;  %v1041_v15 = vadd.f32 %v1040_v11, %v1037_v10  ;;  %v1017_v16 = vpop.f32.mrb[28].mxu1 }
 0x140   :  { %v1018_v17 = vadd.f32 %v1017_v16, %v962_v58  ;;  %v1423_v18 = vpop.f32.mrb[29].mxu1 }
 0x141   :  { %v1042_v19 = vadd.f32 %v1041_v15, %v1038_v14  ;;  %v1020_v20 = vpop.f32.mrb[30].mxu1 }
 0x142   :  { %v1027_v21 = vsel %vm1026_vm1, %v1018_v17, 0.0  ;;  %v1039_v22 = vmul.f32 %v1018_v17, %v1018_v17  ;;  %v1424_v23 = vpop.f32.mrb[31].mxu1 }
 0x143   :  { %v1028_v24 = vadd.f32 %v1027_v21, %v1025_v13 }
 0x144   :  { %v1043_v25 = vsel %vm1026_vm1, %v1039_v22, 0.0 }
 0x145   :  { %v1029_v26 = vrot.slane %v1028_v24, 4  ;;  %v1044_v27 = vadd.f32 %v1043_v25, %v1042_v19 }
 0x147   :  { %v1030_v28 = vadd.f32 %v1029_v26, %v1028_v24  ;;  %v1045_v29 = vrot.slane %v1044_v27, 4 }
 0x149   :  { %v1031_v30 = vrot.slane %v1030_v28, 2  ;;  %v1046_v31 = vadd.f32 %v1045_v29, %v1044_v27 }
 0x14b   :  { %v1032_v32 = vadd.f32 %v1031_v30, %v1030_v28  ;;  %v1047_v33 = vrot.slane %v1046_v31, 2 }
 0x14d   :  { %v1033_v34 = vrot.slane %v1032_v32, 1  ;;  %v1048_v35 = vadd.f32 %v1047_v33, %v1046_v31 }
 0x14f   :  { %v1034_v36 = vadd.f32 %v1033_v34, %v1032_v32  ;;  %v1049_v37 = vrot.slane %v1048_v35, 1 }
 0x151   :  { %v1050_v38 = vadd.f32 %v1049_v37, %v1048_v35  ;;  %v1051_v39 = vmul.f32 0.027777778, %v1034_v36 }
 0x153   :  { %v1052_v40 = vmul.f32 0.027777778, %v1050_v38  ;;  %v1053_v41 = vmul.f32 %v1051_v39, %v1051_v39 }
 0x155   :  { %v1054_v42 = vsub.f32 %v1052_v40, %v1053_v41 }
 0x157   :  { %v1055_v43 = vmax.f32 %v1054_v42, 0.0 }
 0x159   :  { %v1056_v44 = vadd.f32 1e-05, %v1055_v43 }
 0x15b   :  { %1550 = vrsqrt.f32 %v1056_v44 }
 0x165   :  { %v1551_v49 = vpop.eup %1550 }
 0x166   :  { %v1059_v50 = vmul.f32 %v1551_v49, %v1058_v47 }
 0x168   :  { %v1061_v52 = vmul.f32 %v1059_v50, %v1051_v39  ;;  %v1067_v53 = vrot.slane %v1059_v50, %v1066_v48 }
 0x16a   :  { %v1062_v54 = vsub.f32 %v1060_v51, %v1061_v52  ;;  %v1069_v55 = vmul.f32 %v1067_v53, %v1886_v60  ;;  %v1070_v56 = vmul.f32 %v1067_v53, %v1005_v2  ;;  %v1071_v57 = vmul.f32 %v1067_v53, %v1010_v63 }
 0x16b   :  { %v1072_v58 = vmul.f32 %v1067_v53, %v1013_v5  ;;  %v1073_v59 = vmul.f32 %v1067_v53, %v1018_v17 }
 0x16c   :  { %v1078_v61 = vrot.slane %v1062_v54, %v1066_v48 }
 0x16e   :  { %v1080_v62 = vadd.f32 %v1078_v61, %v1069_v55  ;;  %v1081_v0 = vadd.f32 %v1078_v61, %v1070_v56  ;;  %v1082_v1 = vadd.f32 %v1078_v61, %v1071_v57  ;;  %v1083_v3 = vadd.f32 %v1078_v61, %v1072_v58 }
 0x16f   :  { %v1084_v4 = vadd.f32 %v1078_v61, %v1073_v59 }
 0x170   :  { %vm1085_vm2 = vcmp.ge.f32.partialorder %v1080_v62, 0.0  ;;  %vm1086_vm3 = vcmp.ge.f32.partialorder %v1081_v0, 0.0  ;;  %vm1087_vm4 = vcmp.ge.f32.partialorder %v1082_v1, 0.0  ;;  %vm1088_vm5 = vcmp.ge.f32.partialorder %v1083_v3, 0.0 }
 0x171   :  { %vm1089_vm6 = vcmp.ge.f32.partialorder %v1084_v4, 0.0  ;;  %v1090_v6 = vmul.f32 0.01, %v1080_v62  ;;  %v1091_v7 = vmul.f32 0.01, %v1081_v0 }
 0x172   :  { %v1092_v8 = vmul.f32 0.01, %v1082_v1  ;;  %v1093_v9 = vmul.f32 0.01, %v1083_v3  ;;  %v1094_v60 = vmul.f32 0.01, %v1084_v4 }
 0x173   :  { %v1095_v2 = vsel %vm1085_vm2, %v1080_v62, %v1090_v6  ;;  %v1096_v63 = vsel %vm1086_vm3, %v1081_v0, %v1091_v7 }
 0x174   :  { %v1097_v5 = vsel %vm1087_vm4, %v1082_v1, %v1092_v8  ;;  %v1098_v10 = vsel %vm1088_vm5, %v1083_v3, %v1093_v9  ;;  %v1099_v11 = vsel %vm1089_vm6, %v1084_v4, %v1094_v60  ;;  %v1242_v12 = vpack.c.bf16 %v1096_v63, %v1095_v2 }
 0x175   :  { %v1238_v13 = vpack.c.bf16 %v1099_v11, %v1099_v11  ;;  %v1247_v14 = vpack.c.bf16 %v1098_v10, %v1097_v5 }
 0x176   :  { %1243 = vst [vmem:[%s1911_s4] sm:$0xff] %v1242_v12  }
 0x177   :  { %1249 = vst [vmem:[%s1911_s4 + $0x8] sm:$0xff] %v1247_v14   ;;  %1125 = vst [vmem:[%s1911_s4 + $0x10] sm:$0x3] %v1238_v13 }

// kernel: _lambda_.7
= control target key start
LH: loop header
LB: loop body
LE: loop exit
PB: predicated region body
PF: predicated region fallthrough
CT: control target
= control target key end

     0   :  { %v1169_v22 = vmov 1983009808   ;;  %v172_v24 = vlaneseq  ;;  %vm1171_vm0 = vmmov 0   ;;  %vm850_vm1 = vcmask 1043456   ;;  %s1441_s1 = inlined_call_operand.vmem [shape: bf16[1152,128], index: 1, kind: input, shape index: {}]   ;;  %s1442_s0 = inlined_call_operand.vmem [shape: bf16[4,1152], index: 0, kind: input, shape index: {}]   ;;  %s1443_s2 = inlined_call_operand.vmem [shape: f32[1,128], index: 2, kind: input, shape index: {}]   ;;  %s1444_s3 = inlined_call_operand.vmem [shape: f32[1,128], index: 3, kind: input, shape index: {}]   ;;  %s1445_s4 = inlined_call_operand.vmem [shape: f32[4,128], index: 4, kind: output, shape index: {}]  }
   0x1   :  { %v1093_v0 = vld [vmem:[%s1441_s1 + $0x40] sm:$0xff]   ;;  %v1097_v4 = vld [vmem:[%s1441_s1 + $0x48] sm:$0xff]   ;;  %v1101_v8 = vld [vmem:[%s1441_s1 + $0x50] sm:$0xff]   ;;  %v170_v23 = vunpack.c.l.s4 %v1169_v22 }
   0x2   :  { %v1094_v1 = vld [vmem:[%s1441_s1 + $0xc0] sm:$0xff]   ;;  %973 = vmatprep.subr.bf16.mxu0 %v1093_v0  ;;  %v1098_v5 = vld [vmem:[%s1441_s1 + $0xc8] sm:$0xff]   ;;  %v1102_v9 = vld [vmem:[%s1441_s1 + $0xd0] sm:$0xff]   ;;  %v1275_v30 = vshrl.u32 %v172_v24, 7 }
   0x3   :  { %v1095_v2 = vld [vmem:[%s1441_s1] sm:$0xff]   ;;  %995 = vmatprep.subr.bf16.mxu1 %v1094_v1  ;;  %v1099_v6 = vld [vmem:[%s1441_s1 + $0x8] sm:$0xff]   ;;  %v1103_v10 = vld [vmem:[%s1441_s1 + $0x10] sm:$0xff]   ;;  %v171_v29 = vunpack.c.0.s8 %v170_v23 }
   0x4   :  { %v1096_v3 = vld [vmem:[%s1441_s1 + $0x80] sm:$0xff]   ;;  %974 = vmatpush3.bf16.msra.mxu0 %v1095_v2  ;;  %v1100_v7 = vld [vmem:[%s1441_s1 + $0x88] sm:$0xff]   ;;  %v1104_v11 = vld [vmem:[%s1441_s1 + $0x90] sm:$0xff]  }
   0x5   :  { %996 = vmatpush3.bf16.msra.mxu1 %v1096_v3  ;;  %975 = vmatprep.subr.bf16.mxu0 %v1097_v4  ;;  %v1105_v12 = vld [vmem:[%s1441_s1 + $0x58] sm:$0xff]   ;;  %v1109_v16 = vld [vmem:[%s1441_s1 + $0x60] sm:$0xff]   ;;  %v1113_v20 = vld [vmem:[%s1441_s1 + $0x68] sm:$0xff]   ;;  %v1290_v35 = vsub.s32 %v171_v29, %v1275_v30 }
   0x6   :  { %997 = vmatprep.subr.bf16.mxu1 %v1098_v5  ;;  %v1106_v13 = vld [vmem:[%s1441_s1 + $0xd8] sm:$0xff]   ;;  %v1110_v17 = vld [vmem:[%s1441_s1 + $0xe0] sm:$0xff]   ;;  %v1114_v21 = vld [vmem:[%s1441_s1 + $0xe8] sm:$0xff]  }
   0x7   :  { %v1107_v14 = vld [vmem:[%s1441_s1 + $0x18] sm:$0xff]   ;;  %v1111_v18 = vld [vmem:[%s1441_s1 + $0x20] sm:$0xff]   ;;  %v1115_v25 = vld [vmem:[%s1441_s1 + $0x28] sm:$0xff]  }
   0x8   :  { %976 = vmatpush3.bf16.msra.mxu0 %v1099_v6  ;;  %v1108_v15 = vld [vmem:[%s1441_s1 + $0x98] sm:$0xff]   ;;  %v1112_v19 = vld [vmem:[%s1441_s1 + $0xa0] sm:$0xff]   ;;  %v1116_v26 = vld [vmem:[%s1441_s1 + $0xa8] sm:$0xff]  }
   0x9   :  { %998 = vmatpush3.bf16.msra.mxu1 %v1100_v7  ;;  %977 = vmatprep.subr.bf16.mxu0 %v1101_v8  ;;  %v1117_v27 = vld [vmem:[%s1441_s1 + $0x70] sm:$0xff]   ;;  %v1121_v33 = vld [vmem:[%s1441_s1 + $0x78] sm:$0xff]   ;;  %v18_v38 = vld [vmem:[%s1442_s0] sm:$0xff] }
   0xa   :  { %999 = vmatprep.subr.bf16.mxu1 %v1102_v9  ;;  %v1118_v28 = vld [vmem:[%s1441_s1 + $0xf0] sm:$0xff]   ;;  %v1122_v34 = vld [vmem:[%s1441_s1 + $0xf8] sm:$0xff]   ;;  %v175_v39 = vrot.slane %v18_v38, %v1290_v35  ;;  %v168_v40 = vcombine.high %v18_v38, %v18_v38  ;;  %v1126_v41 = vld [vmem:[%s1441_s1 + $0x140] sm:$0xff]  }
   0xb   :  { %v1119_v31 = vld [vmem:[%s1441_s1 + $0x30] sm:$0xff]   ;;  %v1123_v36 = vld [vmem:[%s1441_s1 + $0x38] sm:$0xff]   ;;  %v1127_v42 = vld [vmem:[%s1441_s1 + $0x100] sm:$0xff]  }
   0xc   :  { %978 = vmatpush3.bf16.msra.mxu0 %v1103_v10  ;;  %v1120_v32 = vld [vmem:[%s1441_s1 + $0xb0] sm:$0xff]   ;;  %v1124_v37 = vld [vmem:[%s1441_s1 + $0xb8] sm:$0xff]   ;;  %v183_v43 = vcombine.high %v175_v39, %v175_v39  ;;  %v182_v44 = vrot.slane %v168_v40, %v1290_v35  ;;  %v1128_v45 = vld [vmem:[%s1441_s1 + $0x1c0] sm:$0xff]  }
   0xd   :  { %1000 = vmatpush3.bf16.msra.mxu1 %v1104_v11  ;;  %979 = vmatprep.subr.bf16.mxu0 %v1105_v12  ;;  %v1129_v46 = vld [vmem:[%s1441_s1 + $0x180] sm:$0xff]   ;;  %v1130_v48 = vld [vmem:[%s1441_s1 + $0x148] sm:$0xff]   ;;  %v1134_v52 = vld [vmem:[%s1441_s1 + $0x150] sm:$0xff]  }
   0xe   :  { %1001 = vmatprep.subr.bf16.mxu1 %v1106_v13  ;;  %682 = vmatprep.mubr.bf16.mxu0 %v183_v43  ;;  %v184_v47 = vcombine.high %v182_v44, %v182_v44  ;;  %v1131_v49 = vld [vmem:[%s1441_s1 + $0x108] sm:$0xff]   ;;  %v1135_v53 = vld [vmem:[%s1441_s1 + $0x110] sm:$0xff]   ;;  %v1138_v56 = vld [vmem:[%s1441_s1 + $0x158] sm:$0xff]  }
   0xf   :  { %v1132_v50 = vld [vmem:[%s1441_s1 + $0x1c8] sm:$0xff]   ;;  %v1136_v54 = vld [vmem:[%s1441_s1 + $0x1d0] sm:$0xff]   ;;  %v1139_v57 = vld [vmem:[%s1441_s1 + $0x118] sm:$0xff]  }
  0x10   :  { %980 = vmatpush3.bf16.msra.mxu0 %v1107_v14  ;;  %722 = vmatprep.mubr.bf16.mxu1 %v184_v47  ;;  %v1133_v51 = vld [vmem:[%s1441_s1 + $0x188] sm:$0xff]   ;;  %v1137_v55 = vld [vmem:[%s1441_s1 + $0x190] sm:$0xff]   ;;  %v1140_v58 = vld [vmem:[%s1441_s1 + $0x1d8] sm:$0xff]  }
  0x11   :  { %1002 = vmatpush3.bf16.msra.mxu1 %v1108_v15  ;;  %981 = vmatprep.subr.bf16.mxu0 %v1109_v16  ;;  %v1141_v59 = vld [vmem:[%s1441_s1 + $0x198] sm:$0xff]   ;;  %v1142_v60 = vld [vmem:[%s1441_s1 + $0x160] sm:$0xff]   ;;  %v1146_v0 = vld [vmem:[%s1441_s1 + $0x168] sm:$0xff]  }
  0x12   :  { %1003 = vmatprep.subr.bf16.mxu1 %v1110_v17  ;;  %v1143_v61 = vld [vmem:[%s1441_s1 + $0x120] sm:$0xff]   ;;  %v1147_v1 = vld [vmem:[%s1441_s1 + $0x128] sm:$0xff]   ;;  %v1150_v4 = vld [vmem:[%s1441_s1 + $0x170] sm:$0xff]  }
  0x13   :  { %v1144_v62 = vld [vmem:[%s1441_s1 + $0x1e0] sm:$0xff]   ;;  %v1148_v2 = vld [vmem:[%s1441_s1 + $0x1e8] sm:$0xff]   ;;  %v1151_v5 = vld [vmem:[%s1441_s1 + $0x130] sm:$0xff]  }
  0x14   :  { %982 = vmatpush3.bf16.msra.mxu0 %v1111_v18  ;;  %v1145_v63 = vld [vmem:[%s1441_s1 + $0x1a0] sm:$0xff]   ;;  %v1149_v3 = vld [vmem:[%s1441_s1 + $0x1a8] sm:$0xff]   ;;  %v1152_v6 = vld [vmem:[%s1441_s1 + $0x1f0] sm:$0xff]   ;;  %v1170_v18 = vmov 0.0  }
  0x15   :  { %1004 = vmatpush3.bf16.msra.mxu1 %v1112_v19  ;;  %983 = vmatprep.subr.bf16.mxu0 %v1113_v20  ;;  %v1153_v7 = vld [vmem:[%s1441_s1 + $0x1b0] sm:$0xff]   ;;  %v1154_v8 = vld [vmem:[%s1441_s1 + $0x178] sm:$0xff]   ;;  %v19_v11 = vld [vmem:[%s1442_s0 + $0x8] sm:$0xff] }
  0x16   :  { %1005 = vmatprep.subr.bf16.mxu1 %v1114_v21  ;;  %v1155_v9 = vld [vmem:[%s1441_s1 + $0x138] sm:$0xff]   ;;  %v192_v12 = vrot.slane %v19_v11, %v1290_v35  ;;  %v185_v13 = vcombine.high %v19_v11, %v19_v11  ;;  %v1159_v17 = vld [vmem:[%s1441_s1 + $0x200] sm:$0xff]   ;;  %v1160_v20 = vld [vmem:[%s1441_s1 + $0x208] sm:$0xff]  }
  0x17   :  { %v1156_v10 = vld [vmem:[%s1441_s1 + $0x1f8] sm:$0xff]   ;;  %v1161_v21 = vld [vmem:[%s1441_s1 + $0x210] sm:$0xff]   ;;  %v1163_v23 = vld [vmem:[%s1441_s1 + $0x220] sm:$0xff]  }
  0x18   :  { %984 = vmatpush3.bf16.msra.mxu0 %v1115_v25  ;;  %v1157_v14 = vld [vmem:[%s1441_s1 + $0x1b8] sm:$0xff]   ;;  %v200_v15 = vcombine.high %v192_v12, %v192_v12  ;;  %v199_v16 = vrot.slane %v185_v13, %v1290_v35  ;;  %v1164_v24 = vld [vmem:[%s1441_s1 + $0x228] sm:$0xff]   ;;  %v1165_v25 = vld [vmem:[%s1441_s1 + $0x230] sm:$0xff]  }
  0x19   :  { %1006 = vmatpush3.bf16.msra.mxu1 %v1116_v26  ;;  %985 = vmatprep.subr.bf16.mxu0 %v1117_v27  ;;  %v1162_v22 = vld [vmem:[%s1441_s1 + $0x218] sm:$0xff]   ;;  %v900_v27 = vld.sshfl [vmem:[%s1442_s0 + $0x10] sm:$0x3 pattern:$0x76325410] }
  0x1a   :  { %1007 = vmatprep.subr.bf16.mxu1 %v1118_v28  ;;  %v201_v19 = vcombine.high %v199_v16, %v199_v16  ;;  %v1166_v26 = vld [vmem:[%s1441_s1 + $0x238] sm:$0xff]  }
  0x1c   :  { %986 = vmatpush3.bf16.msra.mxu0 %v1119_v31 }
  0x1d   :  { %1008 = vmatpush3.bf16.msra.mxu1 %v1120_v32  ;;  %987 = vmatprep.subr.bf16.mxu0 %v1121_v33 }
  0x1e   :  { %1009 = vmatprep.subr.bf16.mxu1 %v1122_v34 }
  0x20   :  { %988 = vmatpush3.bf16.msra.mxu0 %v1123_v36 }
  0x21   :  { %1010 = vmatpush3.bf16.msra.mxu1 %v1124_v37  ;;  %1017 = vmatprep.subr.bf16.mxu0 %v1126_v41 }
  0x22   :  { %1039 = vmatprep.subr.bf16.mxu1 %v1128_v45 }
  0x23   :  { %683 = vmatmul.mubr.bf16.vlgmr.msra.gmra.mrb[0].mxu0 %v175_v39 }
  0x24   :  { %1018 = vmatpush3.bf16.msra.mxu0 %v1127_v42  ;;  %723 = vmatmul.mubr.bf16.vlgmr.msra.gmra.mrb[0].mxu1 %v182_v44 }
  0x25   :  { %1019 = vmatprep.subr.bf16.mxu0 %v1130_v48  ;;  %1040 = vmatpush3.bf16.msra.mxu1 %v1129_v46 }
  0x26   :  { %1041 = vmatprep.subr.bf16.mxu1 %v1132_v50  ;;  %762 = vmatprep.mubr.bf16.mxu0 %v200_v15  ;;  %v881_v15 = vsub.s32 0, %v1275_v30 }
  0x27   :  { %802 = vmatprep.mubr.bf16.mxu1 %v201_v19 }
  0x28   :  { %1020 = vmatpush3.bf16.msra.mxu0 %v1131_v49 }
  0x29   :  { %1021 = vmatprep.subr.bf16.mxu0 %v1134_v52  ;;  %1042 = vmatpush3.bf16.msra.mxu1 %v1133_v51 }
  0x2a   :  { %1043 = vmatprep.subr.bf16.mxu1 %v1136_v54 }
  0x2c   :  { %1022 = vmatpush3.bf16.msra.mxu0 %v1135_v53 }
  0x2d   :  { %1023 = vmatprep.subr.bf16.mxu0 %v1138_v56  ;;  %1044 = vmatpush3.bf16.msra.mxu1 %v1137_v55 }
  0x2e   :  { %1045 = vmatprep.subr.bf16.mxu1 %v1140_v58 }
  0x30   :  { %1024 = vmatpush3.bf16.msra.mxu0 %v1139_v57 }
  0x31   :  { %1025 = vmatprep.subr.bf16.mxu0 %v1142_v60  ;;  %1046 = vmatpush3.bf16.msra.mxu1 %v1141_v59 }
  0x32   :  { %1047 = vmatprep.subr.bf16.mxu1 %v1144_v62 }
  0x34   :  { %1026 = vmatpush3.bf16.msra.mxu0 %v1143_v61 }
  0x35   :  { %1027 = vmatprep.subr.bf16.mxu0 %v1146_v0  ;;  %1048 = vmatpush3.bf16.msra.mxu1 %v1145_v63 }
  0x36   :  { %1049 = vmatprep.subr.bf16.mxu1 %v1148_v2 }
  0x38   :  { %1028 = vmatpush3.bf16.msra.mxu0 %v1147_v1 }
  0x39   :  { %1029 = vmatprep.subr.bf16.mxu0 %v1150_v4  ;;  %1050 = vmatpush3.bf16.msra.mxu1 %v1149_v3 }
  0x3a   :  { %1051 = vmatprep.subr.bf16.mxu1 %v1152_v6 }
  0x3c   :  { %1030 = vmatpush3.bf16.msra.mxu0 %v1151_v5 }
  0x3d   :  { %1031 = vmatprep.subr.bf16.mxu0 %v1154_v8  ;;  %1052 = vmatpush3.bf16.msra.mxu1 %v1153_v7 }
  0x3e   :  { %1053 = vmatprep.subr.bf16.mxu1 %v1156_v10 }
  0x40   :  { %1032 = vmatpush3.bf16.msra.mxu0 %v1155_v9 }
  0x41   :  { %1070 = vmatprep.subr.bf16.mxu0 %v1170_v18  ;;  %1054 = vmatpush3.bf16.msra.mxu1 %v1157_v14  ;;  %v873_v14 = vld [vmem:[%s1443_s2] sm:$0x1] }
  0x43   :  { %763 = vmatmul.mubr.bf16.vlgmr.msra.gmra.mrb[4].mxu0 %v192_v12 }
  0x44   :  { %1071 = vmatpush3.bf16.msra.mxu0 %v1159_v17  ;;  %1086 = vmatprep.mubr.msk.bf16.mxu0 %vm1171_vm0, %v1170_v18 }
  0x45   :  { %803 = vmatmul.mubr.bf16.vlgmr.msra.gmra.mrb[4].mxu1 %v199_v16  ;;  %1072 = vmatprep.subr.bf16.mxu0 %v1170_v18 }
  0x48   :  { %1073 = vmatpush3.bf16.msra.mxu0 %v1160_v20 }
  0x49   :  { %1074 = vmatprep.subr.bf16.mxu0 %v1170_v18 }
  0x4c   :  { %1075 = vmatpush3.bf16.msra.mxu0 %v1161_v21 }
  0x4d   :  { %1076 = vmatprep.subr.bf16.mxu0 %v1170_v18 }
  0x50   :  { %1077 = vmatpush3.bf16.msra.mxu0 %v1162_v22 }
  0x51   :  { %1078 = vmatprep.subr.bf16.mxu0 %v1170_v18 }
  0x54   :  { %1079 = vmatpush3.bf16.msra.mxu0 %v1163_v23 }
  0x55   :  { %1080 = vmatprep.subr.bf16.mxu0 %v1170_v18 }
  0x58   :  { %1081 = vmatpush3.bf16.msra.mxu0 %v1164_v24 }
  0x59   :  { %1082 = vmatprep.subr.bf16.mxu0 %v1170_v18 }
  0x5c   :  { %1083 = vmatpush3.bf16.msra.mxu0 %v1165_v25 }
  0x5d   :  { %1084 = vmatprep.subr.bf16.mxu0 %v1170_v18  ;;  %v875_v18 = vld [vmem:[%s1444_s3] sm:$0x1] }
  0x60   :  { %1085 = vmatpush3.bf16.msra.mxu0 %v1166_v26 }
  0x63   :  { %1087 = vmatmul.mubr.bf16.vlgmr.msra.gmra.mrb[8].mxu0 %v900_v27 }
  0xf6   :  { %v989_v28 = vpop.f32.mrb[0].mxu0 }
  0xf7   :  { %v990_v29 = vpop.f32.mrb[1].mxu0  ;;  %v1011_v31 = vpop.f32.mrb[0].mxu1 }
  0xf8   :  { %v991_v32 = vadd.f32 %v990_v29, %v989_v28  ;;  %v992_v33 = vpop.f32.mrb[2].mxu0  ;;  %v1012_v34 = vpop.f32.mrb[1].mxu1 }
  0xf9   :  { %v993_v35 = vpop.f32.mrb[3].mxu0  ;;  %v1013_v36 = vadd.f32 %v1012_v34, %v1011_v31  ;;  %v1014_v37 = vpop.f32.mrb[2].mxu1 }
  0xfa   :  { %v1015_v38 = vpop.f32.mrb[3].mxu1 }
  0xfb   :  { %v725_v39 = vadd.f32 %v1013_v36, %v991_v32 }
 0x116   :  { %v1033_v40 = vpop.f32.mrb[4].mxu0 }
 0x117   :  { %v1034_v41 = vpop.f32.mrb[5].mxu0 }
 0x118   :  { %v1035_v42 = vadd.f32 %v1034_v41, %v1033_v40  ;;  %v1036_v43 = vpop.f32.mrb[6].mxu0  ;;  %v1055_v44 = vpop.f32.mrb[4].mxu1 }
 0x119   :  { %v1037_v45 = vpop.f32.mrb[7].mxu0  ;;  %v1056_v46 = vpop.f32.mrb[5].mxu1 }
 0x11a   :  { %v765_v47 = vadd.f32 %v1035_v42, %v725_v39  ;;  %v1057_v48 = vadd.f32 %v1056_v46, %v1055_v44  ;;  %v1058_v49 = vpop.f32.mrb[6].mxu1 }
 0x11b   :  { %v1059_v50 = vpop.f32.mrb[7].mxu1 }
 0x11c   :  { %v805_v51 = vadd.f32 %v1057_v48, %v765_v47 }
 0x136   :  { %v844_v52 = vpop.f32.mrb[8].mxu0 }
 0x137   :  { %v845_v53 = vadd.f32 %v844_v52, %v805_v51  ;;  %v1088_v54 = vpop.f32.mrb[9].mxu0 }
 0x138   :  { %v847_v55 = vpop.f32.mrb[10].mxu0 }
 0x139   :  { %v851_v56 = vsel %vm850_vm1, %v845_v53, 0.0  ;;  %v858_v57 = vmul.f32 %v845_v53, %v845_v53  ;;  %v1089_v58 = vpop.f32.mrb[11].mxu0 }
 0x13a   :  { %v852_v59 = vrot.slane %v851_v56, 4 }
 0x13b   :  { %v859_v60 = vsel %vm850_vm1, %v858_v57, 0.0 }
 0x13c   :  { %v853_v61 = vadd.f32 %v852_v59, %v851_v56  ;;  %v860_v62 = vrot.slane %v859_v60, 4 }
 0x13e   :  { %v854_v63 = vrot.slane %v853_v61, 2  ;;  %v861_v0 = vadd.f32 %v860_v62, %v859_v60 }
 0x140   :  { %v855_v1 = vadd.f32 %v854_v63, %v853_v61  ;;  %v862_v2 = vrot.slane %v861_v0, 2 }
 0x142   :  { %v856_v3 = vrot.slane %v855_v1, 1  ;;  %v863_v4 = vadd.f32 %v862_v2, %v861_v0 }
 0x144   :  { %v857_v5 = vadd.f32 %v856_v3, %v855_v1  ;;  %v864_v6 = vrot.slane %v863_v4, 1 }
 0x146   :  { %v865_v7 = vadd.f32 %v864_v6, %v863_v4  ;;  %v866_v8 = vmul.f32 0.25, %v857_v5 }
 0x148   :  { %v867_v9 = vmul.f32 0.25, %v865_v7  ;;  %v868_v10 = vmul.f32 %v866_v8, %v866_v8 }
 0x14a   :  { %v869_v11 = vsub.f32 %v867_v9, %v868_v10 }
 0x14c   :  { %v870_v12 = vmax.f32 %v869_v11, 0.0 }
 0x14e   :  { %v871_v13 = vadd.f32 1e-05, %v870_v12 }
 0x150   :  { %1167 = vrsqrt.f32 %v871_v13 }
 0x15a   :  { %v1168_v16 = vpop.eup %1167 }
 0x15b   :  { %v874_v17 = vmul.f32 %v1168_v16, %v873_v14 }
 0x15d   :  { %v876_v19 = vmul.f32 %v874_v17, %v866_v8  ;;  %v882_v20 = vrot.slane %v874_v17, %v881_v15 }
 0x15f   :  { %v877_v21 = vsub.f32 %v875_v18, %v876_v19  ;;  %v884_v22 = vmul.f32 %v882_v20, %v845_v53 }
 0x161   :  { %v889_v23 = vrot.slane %v877_v21, %v881_v15 }
 0x163   :  { %v891_v24 = vadd.f32 %v889_v23, %v884_v22 }
 0x165   :  { %vm892_vm2 = vcmp.ge.f32.partialorder %v891_v24, 0.0  ;;  %v893_v25 = vmul.f32 0.01, %v891_v24 }
 0x167   :  { %v894_v26 = vsel %vm892_vm2, %v891_v24, %v893_v25 }
 0x168   :  { %895 = vst [vmem:[%s1445_s4] sm:$0xf] %v894_v26 }

</bundles_post_ra>
